<compile_context>
chip_gen: v5e
topology: v5e:2x2
jax: 0.10.0
libtpu: 0.0.40
codegen_flags: <defaults>
</compile_context>

<pallas_src>
import numpy as np
import jax
import jax.numpy as jnp
from jax import lax
from jax.experimental import pallas as pl
from jax.experimental.pallas import tpu as pltpu

NEG_SLOPE = 0.01            # nn.LeakyReLU() default
CHANNELS = [2, 4, 8, 16]


# --------------------------------------------------------------------------- #
# Static plan.  Every activation lives in a "padded / dilated flat" buffer of
# per-batch size Sg = Hg * Wg (row-major), stored as (C, N*Sg).  A stride-1
# valid 3x3 conv anchored at flat position p reads positions p + kh*Wg + kw, so
# the kernel only needs static lane slices + matmuls (no reshape/gather/pad).
# --------------------------------------------------------------------------- #
def _make_plan(N, H, W, channels):
    layers = []
    cin, h, w = 1, H, W
    for c in channels:                                   # encoder: Conv2d k3 s2 p1
        layers.append(dict(kind="enc", cin=cin, cout=c, hin=h, win=w))
        cin, h, w = c, h // 2, w // 2
    dec_out = channels[::-1][1:] + [1]
    for ci, co in zip(channels[::-1], dec_out):          # decoder: ConvT k3 s2 p1 op1
        layers.append(dict(kind="dec", cin=ci, cout=co, hin=h, win=w))
        h, w = 2 * h, 2 * w

    for lay in layers:
        if lay["kind"] == "enc":
            Hg, Wg = lay["hin"] + 2, lay["win"] + 2          # zero-padded grid
            Hv, Wv = lay["hin"], lay["win"]                  # valid stride-1 outputs
        else:
            Hg, Wg = 2 * lay["hin"] + 2, 2 * lay["win"] + 2  # zero-dilated + padded grid
            Hv, Wv = 2 * lay["hin"], 2 * lay["win"]
        Sg = Hg * Wg
        lay.update(Hg=Hg, Wg=Wg, Hv=Hv, Wv=Wv, Sg=Sg,
                   B=N * Sg,                       # flat buffer length
                   L0=N * Sg - (2 * Wg + 2))       # common length of the 9 tap slices
    return layers


def _sel(rows, cols, entries):
    S = np.zeros((rows, cols), np.float32)
    for r, c in entries:
        S[r, c] = 1.0
    return S


def _make_sels(N, H, W, layers):
    """n_layers+1 0/1 selection matrices: input scatter, 7 boundaries, output pack."""
    sels = []
    # 1) raw input pixel (n, i, j) -> layer-0 zero-padded flat grid at (i+1, j+1)
    l0 = layers[0]
    ent = [(n * H * W + i * W + j,
            n * l0["Sg"] + (i + 1) * l0["Wg"] + (j + 1))
           for n in range(N) for i in range(H) for j in range(W)]
    sels.append(_sel(N * H * W, l0["B"], ent))

    # 2) layer-l valid conv anchors -> layer-(l+1) padded / dilated flat grid
    for l in range(len(layers) - 1):
        src, dst = layers[l], layers[l + 1]
        step = 2 if src["kind"] == "enc" else 1           # encoder convs have stride 2
        ent = []
        for n in range(N):
            for i, ho in enumerate(range(0, src["Hv"], step)):
                for j, wo in enumerate(range(0, src["Wv"], step)):
                    p = n * src["Sg"] + ho * src["Wg"] + wo
                    if dst["kind"] == "enc":
                        r, c = i + 1, j + 1               # pad-1 interior
                    else:
                        r, c = 2 * i + 1, 2 * j + 1       # dilate-by-2 + pad-1
                    ent.append((p, n * dst["Sg"] + r * dst["Wg"] + c))
        sels.append(_sel(src["L0"], dst["B"], ent))

    # 3) last-layer valid anchors -> dense (n, i, j)-ordered output buffer
    lz = layers[-1]
    ent = [(n * lz["Sg"] + i * lz["Wg"] + j,
            n * lz["Hv"] * lz["Wv"] + i * lz["Wv"] + j)
           for n in range(N) for i in range(lz["Hv"]) for j in range(lz["Wv"])]
    sels.append(_sel(lz["L0"], N * lz["Hv"] * lz["Wv"], ent))
    return sels


# --------------------------------------------------------------------------- #
# Fused Pallas kernel: input scatter + 8 x (9 tap GEMMs + bias + LeakyReLU)
# + 7 boundary re-layout GEMMs + output pack.  Everything stays in VMEM.
# --------------------------------------------------------------------------- #
def _make_fused_kernel(layers):
    n_layers = len(layers)
    n_sels = n_layers + 1

    def kernel(*refs):
        x_ref = refs[0]
        w_refs = refs[1:1 + n_layers]                        # (9, Cout, Cin) per layer
        b_refs = refs[1 + n_layers:1 + 2 * n_layers]         # (Cout, 1) per layer
        s_refs = refs[1 + 2 * n_layers:1 + 2 * n_layers + n_sels]
        o_ref = refs[-1]

        def sel(i):                                          # 0/1 bf16 -> f32 (lossless)
            return s_refs[i][...].astype(jnp.float32)

        # Scatter dense input pixels into the layer-0 zero-padded flat buffer.
        x = jnp.dot(x_ref[...], sel(0), preferred_element_type=jnp.float32)

        for l, lay in enumerate(layers):
            Wg, L0, cin = lay["Wg"], lay["L0"], lay["cin"]
            acc = b_refs[l][...]                             # (Cout, 1), broadcasts below
            # 3x3 conv == 9 lane-shifted slices, each a tiny (Cout,Cin)x(Cin,L0) GEMM.
            for kh in range(3):
                for kw in range(3):
                    off = kh * Wg + kw
                    xs = x[:, off:off + L0]                  # (Cin, L0)
                    tap = w_refs[l][kh * 3 + kw]             # (Cout, Cin)
                    if cin == 1:
                        acc = acc + tap * xs                 # broadcast mul, no K=1 MXU op
                    else:
                        acc = acc + jnp.dot(tap, xs,
                                            preferred_element_type=jnp.float32)
            y = jnp.where(acc >= 0, acc, NEG_SLOPE * acc)    # LeakyReLU
            # Encoder stride-2 subsample / decoder zero-dilation + re-pad / final
            # dense-output packing, each expressed as one 0/1 selection matmul.
            x = jnp.dot(y, sel(l + 1), preferred_element_type=jnp.float32)

        o_ref[...] = x                                       # (1, N*Hout*Wout), lane-dense

    return kernel


# --------------------------------------------------------------------------- #
# JAX wrapper (PyTorch NCHW in/out).
# --------------------------------------------------------------------------- #
def autoencoder_forward(params, x):
    N, cin0, H, W = x.shape
    assert cin0 == 1, "Autoencoder takes single-channel input"
    layers = _make_plan(N, H, W, CHANNELS)
    sels = _make_sels(N, H, W, layers)
    last = layers[-1]

    # Per-layer tap weights (9, Cout, Cin) and biases (Cout, 1).
    wmats, biases = [], []
    for (wt, bias), lay in zip(params["enc"] + params["dec"], layers):
        if lay["kind"] == "enc":
            wc = wt                                               # (Cout, Cin, 3, 3)
        else:
            # ConvTranspose2d == direct conv with channel-transposed + spatially
            # flipped kernel over the zero-dilated, re-padded input.
            wc = jnp.flip(wt.transpose(1, 0, 2, 3), axis=(2, 3))  # (Cout, Cin, 3, 3)
        wmats.append(wc.transpose(2, 3, 0, 1).reshape(9, lay["cout"], lay["cin"]))
        biases.append(bias.reshape(lay["cout"], 1))

    # C == 1, so NCHW flattens straight to a (1, N*H*W) lane-dense buffer.
    x_flat = x.reshape(1, N * H * W).astype(jnp.float32)
    sel_args = [jnp.asarray(S, jnp.bfloat16) for S in sels]       # 0/1 -> exact in bf16

    n_in = 1 + 2 * len(layers) + len(sel_args)
    out_flat = pl.pallas_call(
        _make_fused_kernel(layers),
        out_shape=jax.ShapeDtypeStruct((1, N * last["Hv"] * last["Wv"]), jnp.float32),
        in_specs=[pl.BlockSpec(memory_space=pltpu.MemorySpace.VMEM)] * n_in,
        out_specs=pl.BlockSpec(memory_space=pltpu.MemorySpace.VMEM),
    )(x_flat, *wmats, *biases, *sel_args)

    # Output channel count is 1 -> plain reshape back to NCHW.
    return out_flat.reshape(N, 1, last["Hv"], last["Wv"])


# --------------------------------------------------------------------------- #
# Parameters (kaiming_normal_ weights, zero biases, PyTorch layouts).
# --------------------------------------------------------------------------- #
def init_params(key, channels):
    params = {"enc": [], "dec": []}
    cin = 1
    for c in channels:
        key, k1 = jax.random.split(key)
        std = (2.0 / (cin * 9)) ** 0.5                  # Conv2d fan_in = Cin*9
        w = jax.random.normal(k1, (c, cin, 3, 3), jnp.float32) * std
        params["enc"].append((w, jnp.zeros((c,), jnp.float32)))
        cin = c
    dec_in = channels[::-1]                             # [16, 8, 4, 2]
    dec_out = channels[::-1][1:] + [1]                  # [ 8, 4, 2, 1]
    for ci, co in zip(dec_in, dec_out):
        key, k1 = jax.random.split(key)
        std = (2.0 / (co * 9)) ** 0.5                   # ConvT fan_in = Cout*9
        w = jax.random.normal(k1, (ci, co, 3, 3), jnp.float32) * std
        params["dec"].append((w, jnp.zeros((co,), jnp.float32)))
    return params


# Pure-XLA reference (only used for the correctness check in __main__).
def _reference_forward(params, x):
    act = lambda v: jnp.where(v >= 0, v, NEG_SLOPE * v)
    dn = ("NCHW", "OIHW", "NCHW")
    for w, b in params["enc"]:
        x = lax.conv_general_dilated(x, w, (2, 2), ((1, 1), (1, 1)),
                                     dimension_numbers=dn,
                                     precision=lax.Precision.HIGHEST)
        x = act(x + b[None, :, None, None])
    for w, b in params["dec"]:
        wf = jnp.flip(w.transpose(1, 0, 2, 3), axis=(2, 3))
        x = lax.conv_general_dilated(x, wf, (1, 1), ((1, 2), (1, 2)),
                                     lhs_dilation=(2, 2),
                                     dimension_numbers=dn,
                                     precision=lax.Precision.HIGHEST)
        x = act(x + b[None, :, None, None])
    return x


if __name__ == "__main__":
    key = jax.random.PRNGKey(0)
    pkey, xkey = jax.random.split(key)
    params = init_params(pkey, CHANNELS)
    x = jax.random.normal(xkey, (2, 1, 16, 16), jnp.float32)   # NCHW, like PyTorch

    fwd = jax.jit(autoencoder_forward)
    y = fwd(params, x)
    jax.block_until_ready(y)

    assert y.shape == (2, 1, 16, 16), y.shape
    assert y.dtype == jnp.float32

    # Correctness check against a pure-XLA conv reference.
    y_ref = jax.jit(_reference_forward)(params, x)
    jax.block_until_ready(y_ref)
    err = float(jnp.max(jnp.abs(y - y_ref)))
    scale = float(jnp.max(jnp.abs(y_ref))) + 1e-6
    assert err <= 0.05 * scale + 1e-5, f"mismatch vs conv reference: {err} (scale={scale})"

    print("KERNEL_OK")
</pallas_src>

<mosaic_0001>
module attributes {stable_mosaic.version = 11 : i64} {
  func.func @kernel(%arg0: memref<1x512xf32, #tpu.memory_space<vmem>>, %arg1: memref<9x2x1xf32, #tpu.memory_space<vmem>>, %arg2: memref<9x4x2xf32, #tpu.memory_space<vmem>>, %arg3: memref<9x8x4xf32, #tpu.memory_space<vmem>>, %arg4: memref<9x16x8xf32, #tpu.memory_space<vmem>>, %arg5: memref<9x8x16xf32, #tpu.memory_space<vmem>>, %arg6: memref<9x4x8xf32, #tpu.memory_space<vmem>>, %arg7: memref<9x2x4xf32, #tpu.memory_space<vmem>>, %arg8: memref<9x1x2xf32, #tpu.memory_space<vmem>>, %arg9: memref<2x1xf32, #tpu.memory_space<vmem>>, %arg10: memref<4x1xf32, #tpu.memory_space<vmem>>, %arg11: memref<8x1xf32, #tpu.memory_space<vmem>>, %arg12: memref<16x1xf32, #tpu.memory_space<vmem>>, %arg13: memref<8x1xf32, #tpu.memory_space<vmem>>, %arg14: memref<4x1xf32, #tpu.memory_space<vmem>>, %arg15: memref<2x1xf32, #tpu.memory_space<vmem>>, %arg16: memref<1x1xf32, #tpu.memory_space<vmem>>, %arg17: memref<512x648xbf16, #tpu.memory_space<vmem>>, %arg18: memref<610x200xbf16, #tpu.memory_space<vmem>>, %arg19: memref<178x72xbf16, #tpu.memory_space<vmem>>, %arg20: memref<58x32xbf16, #tpu.memory_space<vmem>>, %arg21: memref<22x32xbf16, #tpu.memory_space<vmem>>, %arg22: memref<22x72xbf16, #tpu.memory_space<vmem>>, %arg23: memref<58x200xbf16, #tpu.memory_space<vmem>>, %arg24: memref<178x648xbf16, #tpu.memory_space<vmem>>, %arg25: memref<610x512xbf16, #tpu.memory_space<vmem>>, %arg26: memref<1x512xf32, #tpu.memory_space<vmem>>) attributes {dimension_semantics = [], scalar_prefetch = 0 : i64, scratch_operands = 0 : i64, tpu.core_type = #tpu.core_type<tc>} {
    %c0 = arith.constant 0 : index
    %c0_0 = arith.constant 0 : index
    %0 = vector.load %arg0[%c0, %c0_0] : memref<1x512xf32, #tpu.memory_space<vmem>>, vector<1x512xf32>
    %c0_1 = arith.constant 0 : index
    %c0_2 = arith.constant 0 : index
    %1 = vector.load %arg17[%c0_1, %c0_2] : memref<512x648xbf16, #tpu.memory_space<vmem>>, vector<512x648xbf16>
    %2 = arith.extf %1 : vector<512x648xbf16> to vector<512x648xf32>
    %cst = arith.constant dense<0.000000e+00> : vector<1x648xf32>
    %3 = tpu.matmul %0, %2, %cst {dimension_numbers = #tpu.dot_dimension_numbers<[1], [0], [0], [1], [0, 0, 1, 1], [], []>} : vector<1x512xf32>, vector<512x648xf32>, vector<1x648xf32> -> vector<1x648xf32>
    %c0_3 = arith.constant 0 : index
    %c0_4 = arith.constant 0 : index
    %4 = vector.load %arg9[%c0_3, %c0_4] : memref<2x1xf32, #tpu.memory_space<vmem>>, vector<2x1xf32>
    %5 = vector.extract_strided_slice %3 {offsets = [0, 0], sizes = [1, 610], strides = [1, 1]} : vector<1x648xf32> to vector<1x610xf32>
    %c0_5 = arith.constant 0 : index
    %c0_6 = arith.constant 0 : index
    %c0_7 = arith.constant 0 : index
    %6 = vector.load %arg1[%c0_5, %c0_6, %c0_7] : memref<9x2x1xf32, #tpu.memory_space<vmem>>, vector<1x2x1xf32>
    %7 = vector.shape_cast %6 : vector<1x2x1xf32> to vector<2x1xf32>
    %8 = vector.broadcast %7 : vector<2x1xf32> to vector<2x610xf32>
    %9 = vector.broadcast %5 : vector<1x610xf32> to vector<2x610xf32>
    %10 = arith.mulf %8, %9 : vector<2x610xf32>
    %11 = vector.broadcast %4 : vector<2x1xf32> to vector<2x610xf32>
    %12 = arith.addf %11, %10 : vector<2x610xf32>
    %13 = vector.extract_strided_slice %3 {offsets = [0, 1], sizes = [1, 610], strides = [1, 1]} : vector<1x648xf32> to vector<1x610xf32>
    %c1 = arith.constant 1 : index
    %c0_8 = arith.constant 0 : index
    %c0_9 = arith.constant 0 : index
    %14 = vector.load %arg1[%c1, %c0_8, %c0_9] : memref<9x2x1xf32, #tpu.memory_space<vmem>>, vector<1x2x1xf32>
    %15 = vector.shape_cast %14 : vector<1x2x1xf32> to vector<2x1xf32>
    %16 = vector.broadcast %15 : vector<2x1xf32> to vector<2x610xf32>
    %17 = vector.broadcast %13 : vector<1x610xf32> to vector<2x610xf32>
    %18 = arith.mulf %16, %17 : vector<2x610xf32>
    %19 = arith.addf %12, %18 : vector<2x610xf32>
    %20 = vector.extract_strided_slice %3 {offsets = [0, 2], sizes = [1, 610], strides = [1, 1]} : vector<1x648xf32> to vector<1x610xf32>
    %c2 = arith.constant 2 : index
    %c0_10 = arith.constant 0 : index
    %c0_11 = arith.constant 0 : index
    %21 = vector.load %arg1[%c2, %c0_10, %c0_11] : memref<9x2x1xf32, #tpu.memory_space<vmem>>, vector<1x2x1xf32>
    %22 = vector.shape_cast %21 : vector<1x2x1xf32> to vector<2x1xf32>
    %23 = vector.broadcast %22 : vector<2x1xf32> to vector<2x610xf32>
    %24 = vector.broadcast %20 : vector<1x610xf32> to vector<2x610xf32>
    %25 = arith.mulf %23, %24 : vector<2x610xf32>
    %26 = arith.addf %19, %25 : vector<2x610xf32>
    %27 = vector.extract_strided_slice %3 {offsets = [0, 18], sizes = [1, 610], strides = [1, 1]} : vector<1x648xf32> to vector<1x610xf32>
    %c3 = arith.constant 3 : index
    %c0_12 = arith.constant 0 : index
    %c0_13 = arith.constant 0 : index
    %28 = vector.load %arg1[%c3, %c0_12, %c0_13] : memref<9x2x1xf32, #tpu.memory_space<vmem>>, vector<1x2x1xf32>
    %29 = vector.shape_cast %28 : vector<1x2x1xf32> to vector<2x1xf32>
    %30 = vector.broadcast %29 : vector<2x1xf32> to vector<2x610xf32>
    %31 = vector.broadcast %27 : vector<1x610xf32> to vector<2x610xf32>
    %32 = arith.mulf %30, %31 : vector<2x610xf32>
    %33 = arith.addf %26, %32 : vector<2x610xf32>
    %34 = vector.extract_strided_slice %3 {offsets = [0, 19], sizes = [1, 610], strides = [1, 1]} : vector<1x648xf32> to vector<1x610xf32>
    %c4 = arith.constant 4 : index
    %c0_14 = arith.constant 0 : index
    %c0_15 = arith.constant 0 : index
    %35 = vector.load %arg1[%c4, %c0_14, %c0_15] : memref<9x2x1xf32, #tpu.memory_space<vmem>>, vector<1x2x1xf32>
    %36 = vector.shape_cast %35 : vector<1x2x1xf32> to vector<2x1xf32>
    %37 = vector.broadcast %36 : vector<2x1xf32> to vector<2x610xf32>
    %38 = vector.broadcast %34 : vector<1x610xf32> to vector<2x610xf32>
    %39 = arith.mulf %37, %38 : vector<2x610xf32>
    %40 = arith.addf %33, %39 : vector<2x610xf32>
    %41 = vector.extract_strided_slice %3 {offsets = [0, 20], sizes = [1, 610], strides = [1, 1]} : vector<1x648xf32> to vector<1x610xf32>
    %c5 = arith.constant 5 : index
    %c0_16 = arith.constant 0 : index
    %c0_17 = arith.constant 0 : index
    %42 = vector.load %arg1[%c5, %c0_16, %c0_17] : memref<9x2x1xf32, #tpu.memory_space<vmem>>, vector<1x2x1xf32>
    %43 = vector.shape_cast %42 : vector<1x2x1xf32> to vector<2x1xf32>
    %44 = vector.broadcast %43 : vector<2x1xf32> to vector<2x610xf32>
    %45 = vector.broadcast %41 : vector<1x610xf32> to vector<2x610xf32>
    %46 = arith.mulf %44, %45 : vector<2x610xf32>
    %47 = arith.addf %40, %46 : vector<2x610xf32>
    %48 = vector.extract_strided_slice %3 {offsets = [0, 36], sizes = [1, 610], strides = [1, 1]} : vector<1x648xf32> to vector<1x610xf32>
    %c6 = arith.constant 6 : index
    %c0_18 = arith.constant 0 : index
    %c0_19 = arith.constant 0 : index
    %49 = vector.load %arg1[%c6, %c0_18, %c0_19] : memref<9x2x1xf32, #tpu.memory_space<vmem>>, vector<1x2x1xf32>
    %50 = vector.shape_cast %49 : vector<1x2x1xf32> to vector<2x1xf32>
    %51 = vector.broadcast %50 : vector<2x1xf32> to vector<2x610xf32>
    %52 = vector.broadcast %48 : vector<1x610xf32> to vector<2x610xf32>
    %53 = arith.mulf %51, %52 : vector<2x610xf32>
    %54 = arith.addf %47, %53 : vector<2x610xf32>
    %55 = vector.extract_strided_slice %3 {offsets = [0, 37], sizes = [1, 610], strides = [1, 1]} : vector<1x648xf32> to vector<1x610xf32>
    %c7 = arith.constant 7 : index
    %c0_20 = arith.constant 0 : index
    %c0_21 = arith.constant 0 : index
    %56 = vector.load %arg1[%c7, %c0_20, %c0_21] : memref<9x2x1xf32, #tpu.memory_space<vmem>>, vector<1x2x1xf32>
    %57 = vector.shape_cast %56 : vector<1x2x1xf32> to vector<2x1xf32>
    %58 = vector.broadcast %57 : vector<2x1xf32> to vector<2x610xf32>
    %59 = vector.broadcast %55 : vector<1x610xf32> to vector<2x610xf32>
    %60 = arith.mulf %58, %59 : vector<2x610xf32>
    %61 = arith.addf %54, %60 : vector<2x610xf32>
    %62 = vector.extract_strided_slice %3 {offsets = [0, 38], sizes = [1, 610], strides = [1, 1]} : vector<1x648xf32> to vector<1x610xf32>
    %c8 = arith.constant 8 : index
    %c0_22 = arith.constant 0 : index
    %c0_23 = arith.constant 0 : index
    %63 = vector.load %arg1[%c8, %c0_22, %c0_23] : memref<9x2x1xf32, #tpu.memory_space<vmem>>, vector<1x2x1xf32>
    %64 = vector.shape_cast %63 : vector<1x2x1xf32> to vector<2x1xf32>
    %65 = vector.broadcast %64 : vector<2x1xf32> to vector<2x610xf32>
    %66 = vector.broadcast %62 : vector<1x610xf32> to vector<2x610xf32>
    %67 = arith.mulf %65, %66 : vector<2x610xf32>
    %68 = arith.addf %61, %67 : vector<2x610xf32>
    %cst_24 = arith.constant 0.000000e+00 : f32
    %69 = vector.broadcast %cst_24 : f32 to vector<2x610xf32>
    %70 = arith.cmpf oge, %68, %69 : vector<2x610xf32>
    %cst_25 = arith.constant 0.00999999977 : f32
    %71 = vector.broadcast %cst_25 : f32 to vector<2x610xf32>
    %72 = arith.mulf %71, %68 : vector<2x610xf32>
    %73 = arith.select %70, %68, %72 : vector<2x610xi1>, vector<2x610xf32>
    %c0_26 = arith.constant 0 : index
    %c0_27 = arith.constant 0 : index
    %74 = vector.load %arg18[%c0_26, %c0_27] : memref<610x200xbf16, #tpu.memory_space<vmem>>, vector<610x200xbf16>
    %75 = arith.extf %74 : vector<610x200xbf16> to vector<610x200xf32>
    %cst_28 = arith.constant dense<0.000000e+00> : vector<2x200xf32>
    %76 = tpu.matmul %73, %75, %cst_28 {dimension_numbers = #tpu.dot_dimension_numbers<[1], [0], [0], [1], [0, 0, 1, 1], [], []>} : vector<2x610xf32>, vector<610x200xf32>, vector<2x200xf32> -> vector<2x200xf32>
    %c0_29 = arith.constant 0 : index
    %c0_30 = arith.constant 0 : index
    %77 = vector.load %arg10[%c0_29, %c0_30] : memref<4x1xf32, #tpu.memory_space<vmem>>, vector<4x1xf32>
    %78 = vector.extract_strided_slice %76 {offsets = [0, 0], sizes = [2, 178], strides = [1, 1]} : vector<2x200xf32> to vector<2x178xf32>
    %c0_31 = arith.constant 0 : index
    %c0_32 = arith.constant 0 : index
    %c0_33 = arith.constant 0 : index
    %79 = vector.load %arg2[%c0_31, %c0_32, %c0_33] : memref<9x4x2xf32, #tpu.memory_space<vmem>>, vector<1x4x2xf32>
    %80 = vector.shape_cast %79 : vector<1x4x2xf32> to vector<4x2xf32>
    %cst_34 = arith.constant dense<0.000000e+00> : vector<4x178xf32>
    %81 = tpu.matmul %80, %78, %cst_34 {dimension_numbers = #tpu.dot_dimension_numbers<[1], [0], [0], [1], [0, 0, 1, 1], [], []>} : vector<4x2xf32>, vector<2x178xf32>, vector<4x178xf32> -> vector<4x178xf32>
    %82 = vector.broadcast %77 : vector<4x1xf32> to vector<4x178xf32>
    %83 = arith.addf %82, %81 : vector<4x178xf32>
    %84 = vector.extract_strided_slice %76 {offsets = [0, 1], sizes = [2, 178], strides = [1, 1]} : vector<2x200xf32> to vector<2x178xf32>
    %c1_35 = arith.constant 1 : index
    %c0_36 = arith.constant 0 : index
    %c0_37 = arith.constant 0 : index
    %85 = vector.load %arg2[%c1_35, %c0_36, %c0_37] : memref<9x4x2xf32, #tpu.memory_space<vmem>>, vector<1x4x2xf32>
    %86 = vector.shape_cast %85 : vector<1x4x2xf32> to vector<4x2xf32>
    %cst_38 = arith.constant dense<0.000000e+00> : vector<4x178xf32>
    %87 = tpu.matmul %86, %84, %cst_38 {dimension_numbers = #tpu.dot_dimension_numbers<[1], [0], [0], [1], [0, 0, 1, 1], [], []>} : vector<4x2xf32>, vector<2x178xf32>, vector<4x178xf32> -> vector<4x178xf32>
    %88 = arith.addf %83, %87 : vector<4x178xf32>
    %89 = vector.extract_strided_slice %76 {offsets = [0, 2], sizes = [2, 178], strides = [1, 1]} : vector<2x200xf32> to vector<2x178xf32>
    %c2_39 = arith.constant 2 : index
    %c0_40 = arith.constant 0 : index
    %c0_41 = arith.constant 0 : index
    %90 = vector.load %arg2[%c2_39, %c0_40, %c0_41] : memref<9x4x2xf32, #tpu.memory_space<vmem>>, vector<1x4x2xf32>
    %91 = vector.shape_cast %90 : vector<1x4x2xf32> to vector<4x2xf32>
    %cst_42 = arith.constant dense<0.000000e+00> : vector<4x178xf32>
    %92 = tpu.matmul %91, %89, %cst_42 {dimension_numbers = #tpu.dot_dimension_numbers<[1], [0], [0], [1], [0, 0, 1, 1], [], []>} : vector<4x2xf32>, vector<2x178xf32>, vector<4x178xf32> -> vector<4x178xf32>
    %93 = arith.addf %88, %92 : vector<4x178xf32>
    %94 = vector.extract_strided_slice %76 {offsets = [0, 10], sizes = [2, 178], strides = [1, 1]} : vector<2x200xf32> to vector<2x178xf32>
    %c3_43 = arith.constant 3 : index
    %c0_44 = arith.constant 0 : index
    %c0_45 = arith.constant 0 : index
    %95 = vector.load %arg2[%c3_43, %c0_44, %c0_45] : memref<9x4x2xf32, #tpu.memory_space<vmem>>, vector<1x4x2xf32>
    %96 = vector.shape_cast %95 : vector<1x4x2xf32> to vector<4x2xf32>
    %cst_46 = arith.constant dense<0.000000e+00> : vector<4x178xf32>
    %97 = tpu.matmul %96, %94, %cst_46 {dimension_numbers = #tpu.dot_dimension_numbers<[1], [0], [0], [1], [0, 0, 1, 1], [], []>} : vector<4x2xf32>, vector<2x178xf32>, vector<4x178xf32> -> vector<4x178xf32>
    %98 = arith.addf %93, %97 : vector<4x178xf32>
    %99 = vector.extract_strided_slice %76 {offsets = [0, 11], sizes = [2, 178], strides = [1, 1]} : vector<2x200xf32> to vector<2x178xf32>
    %c4_47 = arith.constant 4 : index
    %c0_48 = arith.constant 0 : index
    %c0_49 = arith.constant 0 : index
    %100 = vector.load %arg2[%c4_47, %c0_48, %c0_49] : memref<9x4x2xf32, #tpu.memory_space<vmem>>, vector<1x4x2xf32>
    %101 = vector.shape_cast %100 : vector<1x4x2xf32> to vector<4x2xf32>
    %cst_50 = arith.constant dense<0.000000e+00> : vector<4x178xf32>
    %102 = tpu.matmul %101, %99, %cst_50 {dimension_numbers = #tpu.dot_dimension_numbers<[1], [0], [0], [1], [0, 0, 1, 1], [], []>} : vector<4x2xf32>, vector<2x178xf32>, vector<4x178xf32> -> vector<4x178xf32>
    %103 = arith.addf %98, %102 : vector<4x178xf32>
    %104 = vector.extract_strided_slice %76 {offsets = [0, 12], sizes = [2, 178], strides = [1, 1]} : vector<2x200xf32> to vector<2x178xf32>
    %c5_51 = arith.constant 5 : index
    %c0_52 = arith.constant 0 : index
    %c0_53 = arith.constant 0 : index
    %105 = vector.load %arg2[%c5_51, %c0_52, %c0_53] : memref<9x4x2xf32, #tpu.memory_space<vmem>>, vector<1x4x2xf32>
    %106 = vector.shape_cast %105 : vector<1x4x2xf32> to vector<4x2xf32>
    %cst_54 = arith.constant dense<0.000000e+00> : vector<4x178xf32>
    %107 = tpu.matmul %106, %104, %cst_54 {dimension_numbers = #tpu.dot_dimension_numbers<[1], [0], [0], [1], [0, 0, 1, 1], [], []>} : vector<4x2xf32>, vector<2x178xf32>, vector<4x178xf32> -> vector<4x178xf32>
    %108 = arith.addf %103, %107 : vector<4x178xf32>
    %109 = vector.extract_strided_slice %76 {offsets = [0, 20], sizes = [2, 178], strides = [1, 1]} : vector<2x200xf32> to vector<2x178xf32>
    %c6_55 = arith.constant 6 : index
    %c0_56 = arith.constant 0 : index
    %c0_57 = arith.constant 0 : index
    %110 = vector.load %arg2[%c6_55, %c0_56, %c0_57] : memref<9x4x2xf32, #tpu.memory_space<vmem>>, vector<1x4x2xf32>
    %111 = vector.shape_cast %110 : vector<1x4x2xf32> to vector<4x2xf32>
    %cst_58 = arith.constant dense<0.000000e+00> : vector<4x178xf32>
    %112 = tpu.matmul %111, %109, %cst_58 {dimension_numbers = #tpu.dot_dimension_numbers<[1], [0], [0], [1], [0, 0, 1, 1], [], []>} : vector<4x2xf32>, vector<2x178xf32>, vector<4x178xf32> -> vector<4x178xf32>
    %113 = arith.addf %108, %112 : vector<4x178xf32>
    %114 = vector.extract_strided_slice %76 {offsets = [0, 21], sizes = [2, 178], strides = [1, 1]} : vector<2x200xf32> to vector<2x178xf32>
    %c7_59 = arith.constant 7 : index
    %c0_60 = arith.constant 0 : index
    %c0_61 = arith.constant 0 : index
    %115 = vector.load %arg2[%c7_59, %c0_60, %c0_61] : memref<9x4x2xf32, #tpu.memory_space<vmem>>, vector<1x4x2xf32>
    %116 = vector.shape_cast %115 : vector<1x4x2xf32> to vector<4x2xf32>
    %cst_62 = arith.constant dense<0.000000e+00> : vector<4x178xf32>
    %117 = tpu.matmul %116, %114, %cst_62 {dimension_numbers = #tpu.dot_dimension_numbers<[1], [0], [0], [1], [0, 0, 1, 1], [], []>} : vector<4x2xf32>, vector<2x178xf32>, vector<4x178xf32> -> vector<4x178xf32>
    %118 = arith.addf %113, %117 : vector<4x178xf32>
    %119 = vector.extract_strided_slice %76 {offsets = [0, 22], sizes = [2, 178], strides = [1, 1]} : vector<2x200xf32> to vector<2x178xf32>
    %c8_63 = arith.constant 8 : index
    %c0_64 = arith.constant 0 : index
    %c0_65 = arith.constant 0 : index
    %120 = vector.load %arg2[%c8_63, %c0_64, %c0_65] : memref<9x4x2xf32, #tpu.memory_space<vmem>>, vector<1x4x2xf32>
    %121 = vector.shape_cast %120 : vector<1x4x2xf32> to vector<4x2xf32>
    %cst_66 = arith.constant dense<0.000000e+00> : vector<4x178xf32>
    %122 = tpu.matmul %121, %119, %cst_66 {dimension_numbers = #tpu.dot_dimension_numbers<[1], [0], [0], [1], [0, 0, 1, 1], [], []>} : vector<4x2xf32>, vector<2x178xf32>, vector<4x178xf32> -> vector<4x178xf32>
    %123 = arith.addf %118, %122 : vector<4x178xf32>
    %cst_67 = arith.constant 0.000000e+00 : f32
    %124 = vector.broadcast %cst_67 : f32 to vector<4x178xf32>
    %125 = arith.cmpf oge, %123, %124 : vector<4x178xf32>
    %cst_68 = arith.constant 0.00999999977 : f32
    %126 = vector.broadcast %cst_68 : f32 to vector<4x178xf32>
    %127 = arith.mulf %126, %123 : vector<4x178xf32>
    %128 = arith.select %125, %123, %127 : vector<4x178xi1>, vector<4x178xf32>
    %c0_69 = arith.constant 0 : index
    %c0_70 = arith.constant 0 : index
    %129 = vector.load %arg19[%c0_69, %c0_70] : memref<178x72xbf16, #tpu.memory_space<vmem>>, vector<178x72xbf16>
    %130 = arith.extf %129 : vector<178x72xbf16> to vector<178x72xf32>
    %cst_71 = arith.constant dense<0.000000e+00> : vector<4x72xf32>
    %131 = tpu.matmul %128, %130, %cst_71 {dimension_numbers = #tpu.dot_dimension_numbers<[1], [0], [0], [1], [0, 0, 1, 1], [], []>} : vector<4x178xf32>, vector<178x72xf32>, vector<4x72xf32> -> vector<4x72xf32>
    %c0_72 = arith.constant 0 : index
    %c0_73 = arith.constant 0 : index
    %132 = vector.load %arg11[%c0_72, %c0_73] : memref<8x1xf32, #tpu.memory_space<vmem>>, vector<8x1xf32>
    %133 = vector.extract_strided_slice %131 {offsets = [0, 0], sizes = [4, 58], strides = [1, 1]} : vector<4x72xf32> to vector<4x58xf32>
    %c0_74 = arith.constant 0 : index
    %c0_75 = arith.constant 0 : index
    %c0_76 = arith.constant 0 : index
    %134 = vector.load %arg3[%c0_74, %c0_75, %c0_76] : memref<9x8x4xf32, #tpu.memory_space<vmem>>, vector<1x8x4xf32>
    %135 = vector.shape_cast %134 : vector<1x8x4xf32> to vector<8x4xf32>
    %cst_77 = arith.constant dense<0.000000e+00> : vector<8x58xf32>
    %136 = tpu.matmul %135, %133, %cst_77 {dimension_numbers = #tpu.dot_dimension_numbers<[1], [0], [0], [1], [0, 0, 1, 1], [], []>} : vector<8x4xf32>, vector<4x58xf32>, vector<8x58xf32> -> vector<8x58xf32>
    %137 = vector.broadcast %132 : vector<8x1xf32> to vector<8x58xf32>
    %138 = arith.addf %137, %136 : vector<8x58xf32>
    %139 = vector.extract_strided_slice %131 {offsets = [0, 1], sizes = [4, 58], strides = [1, 1]} : vector<4x72xf32> to vector<4x58xf32>
    %c1_78 = arith.constant 1 : index
    %c0_79 = arith.constant 0 : index
    %c0_80 = arith.constant 0 : index
    %140 = vector.load %arg3[%c1_78, %c0_79, %c0_80] : memref<9x8x4xf32, #tpu.memory_space<vmem>>, vector<1x8x4xf32>
    %141 = vector.shape_cast %140 : vector<1x8x4xf32> to vector<8x4xf32>
    %cst_81 = arith.constant dense<0.000000e+00> : vector<8x58xf32>
    %142 = tpu.matmul %141, %139, %cst_81 {dimension_numbers = #tpu.dot_dimension_numbers<[1], [0], [0], [1], [0, 0, 1, 1], [], []>} : vector<8x4xf32>, vector<4x58xf32>, vector<8x58xf32> -> vector<8x58xf32>
    %143 = arith.addf %138, %142 : vector<8x58xf32>
    %144 = vector.extract_strided_slice %131 {offsets = [0, 2], sizes = [4, 58], strides = [1, 1]} : vector<4x72xf32> to vector<4x58xf32>
    %c2_82 = arith.constant 2 : index
    %c0_83 = arith.constant 0 : index
    %c0_84 = arith.constant 0 : index
    %145 = vector.load %arg3[%c2_82, %c0_83, %c0_84] : memref<9x8x4xf32, #tpu.memory_space<vmem>>, vector<1x8x4xf32>
    %146 = vector.shape_cast %145 : vector<1x8x4xf32> to vector<8x4xf32>
    %cst_85 = arith.constant dense<0.000000e+00> : vector<8x58xf32>
    %147 = tpu.matmul %146, %144, %cst_85 {dimension_numbers = #tpu.dot_dimension_numbers<[1], [0], [0], [1], [0, 0, 1, 1], [], []>} : vector<8x4xf32>, vector<4x58xf32>, vector<8x58xf32> -> vector<8x58xf32>
    %148 = arith.addf %143, %147 : vector<8x58xf32>
    %149 = vector.extract_strided_slice %131 {offsets = [0, 6], sizes = [4, 58], strides = [1, 1]} : vector<4x72xf32> to vector<4x58xf32>
    %c3_86 = arith.constant 3 : index
    %c0_87 = arith.constant 0 : index
    %c0_88 = arith.constant 0 : index
    %150 = vector.load %arg3[%c3_86, %c0_87, %c0_88] : memref<9x8x4xf32, #tpu.memory_space<vmem>>, vector<1x8x4xf32>
    %151 = vector.shape_cast %150 : vector<1x8x4xf32> to vector<8x4xf32>
    %cst_89 = arith.constant dense<0.000000e+00> : vector<8x58xf32>
    %152 = tpu.matmul %151, %149, %cst_89 {dimension_numbers = #tpu.dot_dimension_numbers<[1], [0], [0], [1], [0, 0, 1, 1], [], []>} : vector<8x4xf32>, vector<4x58xf32>, vector<8x58xf32> -> vector<8x58xf32>
    %153 = arith.addf %148, %152 : vector<8x58xf32>
    %154 = vector.extract_strided_slice %131 {offsets = [0, 7], sizes = [4, 58], strides = [1, 1]} : vector<4x72xf32> to vector<4x58xf32>
    %c4_90 = arith.constant 4 : index
    %c0_91 = arith.constant 0 : index
    %c0_92 = arith.constant 0 : index
    %155 = vector.load %arg3[%c4_90, %c0_91, %c0_92] : memref<9x8x4xf32, #tpu.memory_space<vmem>>, vector<1x8x4xf32>
    %156 = vector.shape_cast %155 : vector<1x8x4xf32> to vector<8x4xf32>
    %cst_93 = arith.constant dense<0.000000e+00> : vector<8x58xf32>
    %157 = tpu.matmul %156, %154, %cst_93 {dimension_numbers = #tpu.dot_dimension_numbers<[1], [0], [0], [1], [0, 0, 1, 1], [], []>} : vector<8x4xf32>, vector<4x58xf32>, vector<8x58xf32> -> vector<8x58xf32>
    %158 = arith.addf %153, %157 : vector<8x58xf32>
    %159 = vector.extract_strided_slice %131 {offsets = [0, 8], sizes = [4, 58], strides = [1, 1]} : vector<4x72xf32> to vector<4x58xf32>
    %c5_94 = arith.constant 5 : index
    %c0_95 = arith.constant 0 : index
    %c0_96 = arith.constant 0 : index
    %160 = vector.load %arg3[%c5_94, %c0_95, %c0_96] : memref<9x8x4xf32, #tpu.memory_space<vmem>>, vector<1x8x4xf32>
    %161 = vector.shape_cast %160 : vector<1x8x4xf32> to vector<8x4xf32>
    %cst_97 = arith.constant dense<0.000000e+00> : vector<8x58xf32>
    %162 = tpu.matmul %161, %159, %cst_97 {dimension_numbers = #tpu.dot_dimension_numbers<[1], [0], [0], [1], [0, 0, 1, 1], [], []>} : vector<8x4xf32>, vector<4x58xf32>, vector<8x58xf32> -> vector<8x58xf32>
    %163 = arith.addf %158, %162 : vector<8x58xf32>
    %164 = vector.extract_strided_slice %131 {offsets = [0, 12], sizes = [4, 58], strides = [1, 1]} : vector<4x72xf32> to vector<4x58xf32>
    %c6_98 = arith.constant 6 : index
    %c0_99 = arith.constant 0 : index
    %c0_100 = arith.constant 0 : index
    %165 = vector.load %arg3[%c6_98, %c0_99, %c0_100] : memref<9x8x4xf32, #tpu.memory_space<vmem>>, vector<1x8x4xf32>
    %166 = vector.shape_cast %165 : vector<1x8x4xf32> to vector<8x4xf32>
    %cst_101 = arith.constant dense<0.000000e+00> : vector<8x58xf32>
    %167 = tpu.matmul %166, %164, %cst_101 {dimension_numbers = #tpu.dot_dimension_numbers<[1], [0], [0], [1], [0, 0, 1, 1], [], []>} : vector<8x4xf32>, vector<4x58xf32>, vector<8x58xf32> -> vector<8x58xf32>
    %168 = arith.addf %163, %167 : vector<8x58xf32>
    %169 = vector.extract_strided_slice %131 {offsets = [0, 13], sizes = [4, 58], strides = [1, 1]} : vector<4x72xf32> to vector<4x58xf32>
    %c7_102 = arith.constant 7 : index
    %c0_103 = arith.constant 0 : index
    %c0_104 = arith.constant 0 : index
    %170 = vector.load %arg3[%c7_102, %c0_103, %c0_104] : memref<9x8x4xf32, #tpu.memory_space<vmem>>, vector<1x8x4xf32>
    %171 = vector.shape_cast %170 : vector<1x8x4xf32> to vector<8x4xf32>
    %cst_105 = arith.constant dense<0.000000e+00> : vector<8x58xf32>
    %172 = tpu.matmul %171, %169, %cst_105 {dimension_numbers = #tpu.dot_dimension_numbers<[1], [0], [0], [1], [0, 0, 1, 1], [], []>} : vector<8x4xf32>, vector<4x58xf32>, vector<8x58xf32> -> vector<8x58xf32>
    %173 = arith.addf %168, %172 : vector<8x58xf32>
    %174 = vector.extract_strided_slice %131 {offsets = [0, 14], sizes = [4, 58], strides = [1, 1]} : vector<4x72xf32> to vector<4x58xf32>
    %c8_106 = arith.constant 8 : index
    %c0_107 = arith.constant 0 : index
    %c0_108 = arith.constant 0 : index
    %175 = vector.load %arg3[%c8_106, %c0_107, %c0_108] : memref<9x8x4xf32, #tpu.memory_space<vmem>>, vector<1x8x4xf32>
    %176 = vector.shape_cast %175 : vector<1x8x4xf32> to vector<8x4xf32>
    %cst_109 = arith.constant dense<0.000000e+00> : vector<8x58xf32>
    %177 = tpu.matmul %176, %174, %cst_109 {dimension_numbers = #tpu.dot_dimension_numbers<[1], [0], [0], [1], [0, 0, 1, 1], [], []>} : vector<8x4xf32>, vector<4x58xf32>, vector<8x58xf32> -> vector<8x58xf32>
    %178 = arith.addf %173, %177 : vector<8x58xf32>
    %cst_110 = arith.constant 0.000000e+00 : f32
    %179 = vector.broadcast %cst_110 : f32 to vector<8x58xf32>
    %180 = arith.cmpf oge, %178, %179 : vector<8x58xf32>
    %cst_111 = arith.constant 0.00999999977 : f32
    %181 = vector.broadcast %cst_111 : f32 to vector<8x58xf32>
    %182 = arith.mulf %181, %178 : vector<8x58xf32>
    %183 = arith.select %180, %178, %182 : vector<8x58xi1>, vector<8x58xf32>
    %c0_112 = arith.constant 0 : index
    %c0_113 = arith.constant 0 : index
    %184 = vector.load %arg20[%c0_112, %c0_113] : memref<58x32xbf16, #tpu.memory_space<vmem>>, vector<58x32xbf16>
    %185 = arith.extf %184 : vector<58x32xbf16> to vector<58x32xf32>
    %cst_114 = arith.constant dense<0.000000e+00> : vector<8x32xf32>
    %186 = tpu.matmul %183, %185, %cst_114 {dimension_numbers = #tpu.dot_dimension_numbers<[1], [0], [0], [1], [0, 0, 1, 1], [], []>} : vector<8x58xf32>, vector<58x32xf32>, vector<8x32xf32> -> vector<8x32xf32>
    %c0_115 = arith.constant 0 : index
    %c0_116 = arith.constant 0 : index
    %187 = vector.load %arg12[%c0_115, %c0_116] : memref<16x1xf32, #tpu.memory_space<vmem>>, vector<16x1xf32>
    %188 = vector.extract_strided_slice %186 {offsets = [0, 0], sizes = [8, 22], strides = [1, 1]} : vector<8x32xf32> to vector<8x22xf32>
    %c0_117 = arith.constant 0 : index
    %c0_118 = arith.constant 0 : index
    %c0_119 = arith.constant 0 : index
    %189 = vector.load %arg4[%c0_117, %c0_118, %c0_119] : memref<9x16x8xf32, #tpu.memory_space<vmem>>, vector<1x16x8xf32>
    %190 = vector.shape_cast %189 : vector<1x16x8xf32> to vector<16x8xf32>
    %cst_120 = arith.constant dense<0.000000e+00> : vector<16x22xf32>
    %191 = tpu.matmul %190, %188, %cst_120 {dimension_numbers = #tpu.dot_dimension_numbers<[1], [0], [0], [1], [0, 0, 1, 1], [], []>} : vector<16x8xf32>, vector<8x22xf32>, vector<16x22xf32> -> vector<16x22xf32>
    %192 = vector.broadcast %187 : vector<16x1xf32> to vector<16x22xf32>
    %193 = arith.addf %192, %191 : vector<16x22xf32>
    %194 = vector.extract_strided_slice %186 {offsets = [0, 1], sizes = [8, 22], strides = [1, 1]} : vector<8x32xf32> to vector<8x22xf32>
    %c1_121 = arith.constant 1 : index
    %c0_122 = arith.constant 0 : index
    %c0_123 = arith.constant 0 : index
    %195 = vector.load %arg4[%c1_121, %c0_122, %c0_123] : memref<9x16x8xf32, #tpu.memory_space<vmem>>, vector<1x16x8xf32>
    %196 = vector.shape_cast %195 : vector<1x16x8xf32> to vector<16x8xf32>
    %cst_124 = arith.constant dense<0.000000e+00> : vector<16x22xf32>
    %197 = tpu.matmul %196, %194, %cst_124 {dimension_numbers = #tpu.dot_dimension_numbers<[1], [0], [0], [1], [0, 0, 1, 1], [], []>} : vector<16x8xf32>, vector<8x22xf32>, vector<16x22xf32> -> vector<16x22xf32>
    %198 = arith.addf %193, %197 : vector<16x22xf32>
    %199 = vector.extract_strided_slice %186 {offsets = [0, 2], sizes = [8, 22], strides = [1, 1]} : vector<8x32xf32> to vector<8x22xf32>
    %c2_125 = arith.constant 2 : index
    %c0_126 = arith.constant 0 : index
    %c0_127 = arith.constant 0 : index
    %200 = vector.load %arg4[%c2_125, %c0_126, %c0_127] : memref<9x16x8xf32, #tpu.memory_space<vmem>>, vector<1x16x8xf32>
    %201 = vector.shape_cast %200 : vector<1x16x8xf32> to vector<16x8xf32>
    %cst_128 = arith.constant dense<0.000000e+00> : vector<16x22xf32>
    %202 = tpu.matmul %201, %199, %cst_128 {dimension_numbers = #tpu.dot_dimension_numbers<[1], [0], [0], [1], [0, 0, 1, 1], [], []>} : vector<16x8xf32>, vector<8x22xf32>, vector<16x22xf32> -> vector<16x22xf32>
    %203 = arith.addf %198, %202 : vector<16x22xf32>
    %204 = vector.extract_strided_slice %186 {offsets = [0, 4], sizes = [8, 22], strides = [1, 1]} : vector<8x32xf32> to vector<8x22xf32>
    %c3_129 = arith.constant 3 : index
    %c0_130 = arith.constant 0 : index
    %c0_131 = arith.constant 0 : index
    %205 = vector.load %arg4[%c3_129, %c0_130, %c0_131] : memref<9x16x8xf32, #tpu.memory_space<vmem>>, vector<1x16x8xf32>
    %206 = vector.shape_cast %205 : vector<1x16x8xf32> to vector<16x8xf32>
    %cst_132 = arith.constant dense<0.000000e+00> : vector<16x22xf32>
    %207 = tpu.matmul %206, %204, %cst_132 {dimension_numbers = #tpu.dot_dimension_numbers<[1], [0], [0], [1], [0, 0, 1, 1], [], []>} : vector<16x8xf32>, vector<8x22xf32>, vector<16x22xf32> -> vector<16x22xf32>
    %208 = arith.addf %203, %207 : vector<16x22xf32>
    %209 = vector.extract_strided_slice %186 {offsets = [0, 5], sizes = [8, 22], strides = [1, 1]} : vector<8x32xf32> to vector<8x22xf32>
    %c4_133 = arith.constant 4 : index
    %c0_134 = arith.constant 0 : index
    %c0_135 = arith.constant 0 : index
    %210 = vector.load %arg4[%c4_133, %c0_134, %c0_135] : memref<9x16x8xf32, #tpu.memory_space<vmem>>, vector<1x16x8xf32>
    %211 = vector.shape_cast %210 : vector<1x16x8xf32> to vector<16x8xf32>
    %cst_136 = arith.constant dense<0.000000e+00> : vector<16x22xf32>
    %212 = tpu.matmul %211, %209, %cst_136 {dimension_numbers = #tpu.dot_dimension_numbers<[1], [0], [0], [1], [0, 0, 1, 1], [], []>} : vector<16x8xf32>, vector<8x22xf32>, vector<16x22xf32> -> vector<16x22xf32>
    %213 = arith.addf %208, %212 : vector<16x22xf32>
    %214 = vector.extract_strided_slice %186 {offsets = [0, 6], sizes = [8, 22], strides = [1, 1]} : vector<8x32xf32> to vector<8x22xf32>
    %c5_137 = arith.constant 5 : index
    %c0_138 = arith.constant 0 : index
    %c0_139 = arith.constant 0 : index
    %215 = vector.load %arg4[%c5_137, %c0_138, %c0_139] : memref<9x16x8xf32, #tpu.memory_space<vmem>>, vector<1x16x8xf32>
    %216 = vector.shape_cast %215 : vector<1x16x8xf32> to vector<16x8xf32>
    %cst_140 = arith.constant dense<0.000000e+00> : vector<16x22xf32>
    %217 = tpu.matmul %216, %214, %cst_140 {dimension_numbers = #tpu.dot_dimension_numbers<[1], [0], [0], [1], [0, 0, 1, 1], [], []>} : vector<16x8xf32>, vector<8x22xf32>, vector<16x22xf32> -> vector<16x22xf32>
    %218 = arith.addf %213, %217 : vector<16x22xf32>
    %219 = vector.extract_strided_slice %186 {offsets = [0, 8], sizes = [8, 22], strides = [1, 1]} : vector<8x32xf32> to vector<8x22xf32>
    %c6_141 = arith.constant 6 : index
    %c0_142 = arith.constant 0 : index
    %c0_143 = arith.constant 0 : index
    %220 = vector.load %arg4[%c6_141, %c0_142, %c0_143] : memref<9x16x8xf32, #tpu.memory_space<vmem>>, vector<1x16x8xf32>
    %221 = vector.shape_cast %220 : vector<1x16x8xf32> to vector<16x8xf32>
    %cst_144 = arith.constant dense<0.000000e+00> : vector<16x22xf32>
    %222 = tpu.matmul %221, %219, %cst_144 {dimension_numbers = #tpu.dot_dimension_numbers<[1], [0], [0], [1], [0, 0, 1, 1], [], []>} : vector<16x8xf32>, vector<8x22xf32>, vector<16x22xf32> -> vector<16x22xf32>
    %223 = arith.addf %218, %222 : vector<16x22xf32>
    %224 = vector.extract_strided_slice %186 {offsets = [0, 9], sizes = [8, 22], strides = [1, 1]} : vector<8x32xf32> to vector<8x22xf32>
    %c7_145 = arith.constant 7 : index
    %c0_146 = arith.constant 0 : index
    %c0_147 = arith.constant 0 : index
    %225 = vector.load %arg4[%c7_145, %c0_146, %c0_147] : memref<9x16x8xf32, #tpu.memory_space<vmem>>, vector<1x16x8xf32>
    %226 = vector.shape_cast %225 : vector<1x16x8xf32> to vector<16x8xf32>
    %cst_148 = arith.constant dense<0.000000e+00> : vector<16x22xf32>
    %227 = tpu.matmul %226, %224, %cst_148 {dimension_numbers = #tpu.dot_dimension_numbers<[1], [0], [0], [1], [0, 0, 1, 1], [], []>} : vector<16x8xf32>, vector<8x22xf32>, vector<16x22xf32> -> vector<16x22xf32>
    %228 = arith.addf %223, %227 : vector<16x22xf32>
    %229 = vector.extract_strided_slice %186 {offsets = [0, 10], sizes = [8, 22], strides = [1, 1]} : vector<8x32xf32> to vector<8x22xf32>
    %c8_149 = arith.constant 8 : index
    %c0_150 = arith.constant 0 : index
    %c0_151 = arith.constant 0 : index
    %230 = vector.load %arg4[%c8_149, %c0_150, %c0_151] : memref<9x16x8xf32, #tpu.memory_space<vmem>>, vector<1x16x8xf32>
    %231 = vector.shape_cast %230 : vector<1x16x8xf32> to vector<16x8xf32>
    %cst_152 = arith.constant dense<0.000000e+00> : vector<16x22xf32>
    %232 = tpu.matmul %231, %229, %cst_152 {dimension_numbers = #tpu.dot_dimension_numbers<[1], [0], [0], [1], [0, 0, 1, 1], [], []>} : vector<16x8xf32>, vector<8x22xf32>, vector<16x22xf32> -> vector<16x22xf32>
    %233 = arith.addf %228, %232 : vector<16x22xf32>
    %cst_153 = arith.constant 0.000000e+00 : f32
    %234 = vector.broadcast %cst_153 : f32 to vector<16x22xf32>
    %235 = arith.cmpf oge, %233, %234 : vector<16x22xf32>
    %cst_154 = arith.constant 0.00999999977 : f32
    %236 = vector.broadcast %cst_154 : f32 to vector<16x22xf32>
    %237 = arith.mulf %236, %233 : vector<16x22xf32>
    %238 = arith.select %235, %233, %237 : vector<16x22xi1>, vector<16x22xf32>
    %c0_155 = arith.constant 0 : index
    %c0_156 = arith.constant 0 : index
    %239 = vector.load %arg21[%c0_155, %c0_156] : memref<22x32xbf16, #tpu.memory_space<vmem>>, vector<22x32xbf16>
    %240 = arith.extf %239 : vector<22x32xbf16> to vector<22x32xf32>
    %cst_157 = arith.constant dense<0.000000e+00> : vector<16x32xf32>
    %241 = tpu.matmul %238, %240, %cst_157 {dimension_numbers = #tpu.dot_dimension_numbers<[1], [0], [0], [1], [0, 0, 1, 1], [], []>} : vector<16x22xf32>, vector<22x32xf32>, vector<16x32xf32> -> vector<16x32xf32>
    %c0_158 = arith.constant 0 : index
    %c0_159 = arith.constant 0 : index
    %242 = vector.load %arg13[%c0_158, %c0_159] : memref<8x1xf32, #tpu.memory_space<vmem>>, vector<8x1xf32>
    %243 = vector.extract_strided_slice %241 {offsets = [0, 0], sizes = [16, 22], strides = [1, 1]} : vector<16x32xf32> to vector<16x22xf32>
    %c0_160 = arith.constant 0 : index
    %c0_161 = arith.constant 0 : index
    %c0_162 = arith.constant 0 : index
    %244 = vector.load %arg5[%c0_160, %c0_161, %c0_162] : memref<9x8x16xf32, #tpu.memory_space<vmem>>, vector<1x8x16xf32>
    %245 = vector.shape_cast %244 : vector<1x8x16xf32> to vector<8x16xf32>
    %cst_163 = arith.constant dense<0.000000e+00> : vector<8x22xf32>
    %246 = tpu.matmul %245, %243, %cst_163 {dimension_numbers = #tpu.dot_dimension_numbers<[1], [0], [0], [1], [0, 0, 1, 1], [], []>} : vector<8x16xf32>, vector<16x22xf32>, vector<8x22xf32> -> vector<8x22xf32>
    %247 = vector.broadcast %242 : vector<8x1xf32> to vector<8x22xf32>
    %248 = arith.addf %247, %246 : vector<8x22xf32>
    %249 = vector.extract_strided_slice %241 {offsets = [0, 1], sizes = [16, 22], strides = [1, 1]} : vector<16x32xf32> to vector<16x22xf32>
    %c1_164 = arith.constant 1 : index
    %c0_165 = arith.constant 0 : index
    %c0_166 = arith.constant 0 : index
    %250 = vector.load %arg5[%c1_164, %c0_165, %c0_166] : memref<9x8x16xf32, #tpu.memory_space<vmem>>, vector<1x8x16xf32>
    %251 = vector.shape_cast %250 : vector<1x8x16xf32> to vector<8x16xf32>
    %cst_167 = arith.constant dense<0.000000e+00> : vector<8x22xf32>
    %252 = tpu.matmul %251, %249, %cst_167 {dimension_numbers = #tpu.dot_dimension_numbers<[1], [0], [0], [1], [0, 0, 1, 1], [], []>} : vector<8x16xf32>, vector<16x22xf32>, vector<8x22xf32> -> vector<8x22xf32>
    %253 = arith.addf %248, %252 : vector<8x22xf32>
    %254 = vector.extract_strided_slice %241 {offsets = [0, 2], sizes = [16, 22], strides = [1, 1]} : vector<16x32xf32> to vector<16x22xf32>
    %c2_168 = arith.constant 2 : index
    %c0_169 = arith.constant 0 : index
    %c0_170 = arith.constant 0 : index
    %255 = vector.load %arg5[%c2_168, %c0_169, %c0_170] : memref<9x8x16xf32, #tpu.memory_space<vmem>>, vector<1x8x16xf32>
    %256 = vector.shape_cast %255 : vector<1x8x16xf32> to vector<8x16xf32>
    %cst_171 = arith.constant dense<0.000000e+00> : vector<8x22xf32>
    %257 = tpu.matmul %256, %254, %cst_171 {dimension_numbers = #tpu.dot_dimension_numbers<[1], [0], [0], [1], [0, 0, 1, 1], [], []>} : vector<8x16xf32>, vector<16x22xf32>, vector<8x22xf32> -> vector<8x22xf32>
    %258 = arith.addf %253, %257 : vector<8x22xf32>
    %259 = vector.extract_strided_slice %241 {offsets = [0, 4], sizes = [16, 22], strides = [1, 1]} : vector<16x32xf32> to vector<16x22xf32>
    %c3_172 = arith.constant 3 : index
    %c0_173 = arith.constant 0 : index
    %c0_174 = arith.constant 0 : index
    %260 = vector.load %arg5[%c3_172, %c0_173, %c0_174] : memref<9x8x16xf32, #tpu.memory_space<vmem>>, vector<1x8x16xf32>
    %261 = vector.shape_cast %260 : vector<1x8x16xf32> to vector<8x16xf32>
    %cst_175 = arith.constant dense<0.000000e+00> : vector<8x22xf32>
    %262 = tpu.matmul %261, %259, %cst_175 {dimension_numbers = #tpu.dot_dimension_numbers<[1], [0], [0], [1], [0, 0, 1, 1], [], []>} : vector<8x16xf32>, vector<16x22xf32>, vector<8x22xf32> -> vector<8x22xf32>
    %263 = arith.addf %258, %262 : vector<8x22xf32>
    %264 = vector.extract_strided_slice %241 {offsets = [0, 5], sizes = [16, 22], strides = [1, 1]} : vector<16x32xf32> to vector<16x22xf32>
    %c4_176 = arith.constant 4 : index
    %c0_177 = arith.constant 0 : index
    %c0_178 = arith.constant 0 : index
    %265 = vector.load %arg5[%c4_176, %c0_177, %c0_178] : memref<9x8x16xf32, #tpu.memory_space<vmem>>, vector<1x8x16xf32>
    %266 = vector.shape_cast %265 : vector<1x8x16xf32> to vector<8x16xf32>
    %cst_179 = arith.constant dense<0.000000e+00> : vector<8x22xf32>
    %267 = tpu.matmul %266, %264, %cst_179 {dimension_numbers = #tpu.dot_dimension_numbers<[1], [0], [0], [1], [0, 0, 1, 1], [], []>} : vector<8x16xf32>, vector<16x22xf32>, vector<8x22xf32> -> vector<8x22xf32>
    %268 = arith.addf %263, %267 : vector<8x22xf32>
    %269 = vector.extract_strided_slice %241 {offsets = [0, 6], sizes = [16, 22], strides = [1, 1]} : vector<16x32xf32> to vector<16x22xf32>
    %c5_180 = arith.constant 5 : index
    %c0_181 = arith.constant 0 : index
    %c0_182 = arith.constant 0 : index
    %270 = vector.load %arg5[%c5_180, %c0_181, %c0_182] : memref<9x8x16xf32, #tpu.memory_space<vmem>>, vector<1x8x16xf32>
    %271 = vector.shape_cast %270 : vector<1x8x16xf32> to vector<8x16xf32>
    %cst_183 = arith.constant dense<0.000000e+00> : vector<8x22xf32>
    %272 = tpu.matmul %271, %269, %cst_183 {dimension_numbers = #tpu.dot_dimension_numbers<[1], [0], [0], [1], [0, 0, 1, 1], [], []>} : vector<8x16xf32>, vector<16x22xf32>, vector<8x22xf32> -> vector<8x22xf32>
    %273 = arith.addf %268, %272 : vector<8x22xf32>
    %274 = vector.extract_strided_slice %241 {offsets = [0, 8], sizes = [16, 22], strides = [1, 1]} : vector<16x32xf32> to vector<16x22xf32>
    %c6_184 = arith.constant 6 : index
    %c0_185 = arith.constant 0 : index
    %c0_186 = arith.constant 0 : index
    %275 = vector.load %arg5[%c6_184, %c0_185, %c0_186] : memref<9x8x16xf32, #tpu.memory_space<vmem>>, vector<1x8x16xf32>
    %276 = vector.shape_cast %275 : vector<1x8x16xf32> to vector<8x16xf32>
    %cst_187 = arith.constant dense<0.000000e+00> : vector<8x22xf32>
    %277 = tpu.matmul %276, %274, %cst_187 {dimension_numbers = #tpu.dot_dimension_numbers<[1], [0], [0], [1], [0, 0, 1, 1], [], []>} : vector<8x16xf32>, vector<16x22xf32>, vector<8x22xf32> -> vector<8x22xf32>
    %278 = arith.addf %273, %277 : vector<8x22xf32>
    %279 = vector.extract_strided_slice %241 {offsets = [0, 9], sizes = [16, 22], strides = [1, 1]} : vector<16x32xf32> to vector<16x22xf32>
    %c7_188 = arith.constant 7 : index
    %c0_189 = arith.constant 0 : index
    %c0_190 = arith.constant 0 : index
    %280 = vector.load %arg5[%c7_188, %c0_189, %c0_190] : memref<9x8x16xf32, #tpu.memory_space<vmem>>, vector<1x8x16xf32>
    %281 = vector.shape_cast %280 : vector<1x8x16xf32> to vector<8x16xf32>
    %cst_191 = arith.constant dense<0.000000e+00> : vector<8x22xf32>
    %282 = tpu.matmul %281, %279, %cst_191 {dimension_numbers = #tpu.dot_dimension_numbers<[1], [0], [0], [1], [0, 0, 1, 1], [], []>} : vector<8x16xf32>, vector<16x22xf32>, vector<8x22xf32> -> vector<8x22xf32>
    %283 = arith.addf %278, %282 : vector<8x22xf32>
    %284 = vector.extract_strided_slice %241 {offsets = [0, 10], sizes = [16, 22], strides = [1, 1]} : vector<16x32xf32> to vector<16x22xf32>
    %c8_192 = arith.constant 8 : index
    %c0_193 = arith.constant 0 : index
    %c0_194 = arith.constant 0 : index
    %285 = vector.load %arg5[%c8_192, %c0_193, %c0_194] : memref<9x8x16xf32, #tpu.memory_space<vmem>>, vector<1x8x16xf32>
    %286 = vector.shape_cast %285 : vector<1x8x16xf32> to vector<8x16xf32>
    %cst_195 = arith.constant dense<0.000000e+00> : vector<8x22xf32>
    %287 = tpu.matmul %286, %284, %cst_195 {dimension_numbers = #tpu.dot_dimension_numbers<[1], [0], [0], [1], [0, 0, 1, 1], [], []>} : vector<8x16xf32>, vector<16x22xf32>, vector<8x22xf32> -> vector<8x22xf32>
    %288 = arith.addf %283, %287 : vector<8x22xf32>
    %cst_196 = arith.constant 0.000000e+00 : f32
    %289 = vector.broadcast %cst_196 : f32 to vector<8x22xf32>
    %290 = arith.cmpf oge, %288, %289 : vector<8x22xf32>
    %cst_197 = arith.constant 0.00999999977 : f32
    %291 = vector.broadcast %cst_197 : f32 to vector<8x22xf32>
    %292 = arith.mulf %291, %288 : vector<8x22xf32>
    %293 = arith.select %290, %288, %292 : vector<8x22xi1>, vector<8x22xf32>
    %c0_198 = arith.constant 0 : index
    %c0_199 = arith.constant 0 : index
    %294 = vector.load %arg22[%c0_198, %c0_199] : memref<22x72xbf16, #tpu.memory_space<vmem>>, vector<22x72xbf16>
    %295 = arith.extf %294 : vector<22x72xbf16> to vector<22x72xf32>
    %cst_200 = arith.constant dense<0.000000e+00> : vector<8x72xf32>
    %296 = tpu.matmul %293, %295, %cst_200 {dimension_numbers = #tpu.dot_dimension_numbers<[1], [0], [0], [1], [0, 0, 1, 1], [], []>} : vector<8x22xf32>, vector<22x72xf32>, vector<8x72xf32> -> vector<8x72xf32>
    %c0_201 = arith.constant 0 : index
    %c0_202 = arith.constant 0 : index
    %297 = vector.load %arg14[%c0_201, %c0_202] : memref<4x1xf32, #tpu.memory_space<vmem>>, vector<4x1xf32>
    %298 = vector.extract_strided_slice %296 {offsets = [0, 0], sizes = [8, 58], strides = [1, 1]} : vector<8x72xf32> to vector<8x58xf32>
    %c0_203 = arith.constant 0 : index
    %c0_204 = arith.constant 0 : index
    %c0_205 = arith.constant 0 : index
    %299 = vector.load %arg6[%c0_203, %c0_204, %c0_205] : memref<9x4x8xf32, #tpu.memory_space<vmem>>, vector<1x4x8xf32>
    %300 = vector.shape_cast %299 : vector<1x4x8xf32> to vector<4x8xf32>
    %cst_206 = arith.constant dense<0.000000e+00> : vector<4x58xf32>
    %301 = tpu.matmul %300, %298, %cst_206 {dimension_numbers = #tpu.dot_dimension_numbers<[1], [0], [0], [1], [0, 0, 1, 1], [], []>} : vector<4x8xf32>, vector<8x58xf32>, vector<4x58xf32> -> vector<4x58xf32>
    %302 = vector.broadcast %297 : vector<4x1xf32> to vector<4x58xf32>
    %303 = arith.addf %302, %301 : vector<4x58xf32>
    %304 = vector.extract_strided_slice %296 {offsets = [0, 1], sizes = [8, 58], strides = [1, 1]} : vector<8x72xf32> to vector<8x58xf32>
    %c1_207 = arith.constant 1 : index
    %c0_208 = arith.constant 0 : index
    %c0_209 = arith.constant 0 : index
    %305 = vector.load %arg6[%c1_207, %c0_208, %c0_209] : memref<9x4x8xf32, #tpu.memory_space<vmem>>, vector<1x4x8xf32>
    %306 = vector.shape_cast %305 : vector<1x4x8xf32> to vector<4x8xf32>
    %cst_210 = arith.constant dense<0.000000e+00> : vector<4x58xf32>
    %307 = tpu.matmul %306, %304, %cst_210 {dimension_numbers = #tpu.dot_dimension_numbers<[1], [0], [0], [1], [0, 0, 1, 1], [], []>} : vector<4x8xf32>, vector<8x58xf32>, vector<4x58xf32> -> vector<4x58xf32>
    %308 = arith.addf %303, %307 : vector<4x58xf32>
    %309 = vector.extract_strided_slice %296 {offsets = [0, 2], sizes = [8, 58], strides = [1, 1]} : vector<8x72xf32> to vector<8x58xf32>
    %c2_211 = arith.constant 2 : index
    %c0_212 = arith.constant 0 : index
    %c0_213 = arith.constant 0 : index
    %310 = vector.load %arg6[%c2_211, %c0_212, %c0_213] : memref<9x4x8xf32, #tpu.memory_space<vmem>>, vector<1x4x8xf32>
    %311 = vector.shape_cast %310 : vector<1x4x8xf32> to vector<4x8xf32>
    %cst_214 = arith.constant dense<0.000000e+00> : vector<4x58xf32>
    %312 = tpu.matmul %311, %309, %cst_214 {dimension_numbers = #tpu.dot_dimension_numbers<[1], [0], [0], [1], [0, 0, 1, 1], [], []>} : vector<4x8xf32>, vector<8x58xf32>, vector<4x58xf32> -> vector<4x58xf32>
    %313 = arith.addf %308, %312 : vector<4x58xf32>
    %314 = vector.extract_strided_slice %296 {offsets = [0, 6], sizes = [8, 58], strides = [1, 1]} : vector<8x72xf32> to vector<8x58xf32>
    %c3_215 = arith.constant 3 : index
    %c0_216 = arith.constant 0 : index
    %c0_217 = arith.constant 0 : index
    %315 = vector.load %arg6[%c3_215, %c0_216, %c0_217] : memref<9x4x8xf32, #tpu.memory_space<vmem>>, vector<1x4x8xf32>
    %316 = vector.shape_cast %315 : vector<1x4x8xf32> to vector<4x8xf32>
    %cst_218 = arith.constant dense<0.000000e+00> : vector<4x58xf32>
    %317 = tpu.matmul %316, %314, %cst_218 {dimension_numbers = #tpu.dot_dimension_numbers<[1], [0], [0], [1], [0, 0, 1, 1], [], []>} : vector<4x8xf32>, vector<8x58xf32>, vector<4x58xf32> -> vector<4x58xf32>
    %318 = arith.addf %313, %317 : vector<4x58xf32>
    %319 = vector.extract_strided_slice %296 {offsets = [0, 7], sizes = [8, 58], strides = [1, 1]} : vector<8x72xf32> to vector<8x58xf32>
    %c4_219 = arith.constant 4 : index
    %c0_220 = arith.constant 0 : index
    %c0_221 = arith.constant 0 : index
    %320 = vector.load %arg6[%c4_219, %c0_220, %c0_221] : memref<9x4x8xf32, #tpu.memory_space<vmem>>, vector<1x4x8xf32>
    %321 = vector.shape_cast %320 : vector<1x4x8xf32> to vector<4x8xf32>
    %cst_222 = arith.constant dense<0.000000e+00> : vector<4x58xf32>
    %322 = tpu.matmul %321, %319, %cst_222 {dimension_numbers = #tpu.dot_dimension_numbers<[1], [0], [0], [1], [0, 0, 1, 1], [], []>} : vector<4x8xf32>, vector<8x58xf32>, vector<4x58xf32> -> vector<4x58xf32>
    %323 = arith.addf %318, %322 : vector<4x58xf32>
    %324 = vector.extract_strided_slice %296 {offsets = [0, 8], sizes = [8, 58], strides = [1, 1]} : vector<8x72xf32> to vector<8x58xf32>
    %c5_223 = arith.constant 5 : index
    %c0_224 = arith.constant 0 : index
    %c0_225 = arith.constant 0 : index
    %325 = vector.load %arg6[%c5_223, %c0_224, %c0_225] : memref<9x4x8xf32, #tpu.memory_space<vmem>>, vector<1x4x8xf32>
    %326 = vector.shape_cast %325 : vector<1x4x8xf32> to vector<4x8xf32>
    %cst_226 = arith.constant dense<0.000000e+00> : vector<4x58xf32>
    %327 = tpu.matmul %326, %324, %cst_226 {dimension_numbers = #tpu.dot_dimension_numbers<[1], [0], [0], [1], [0, 0, 1, 1], [], []>} : vector<4x8xf32>, vector<8x58xf32>, vector<4x58xf32> -> vector<4x58xf32>
    %328 = arith.addf %323, %327 : vector<4x58xf32>
    %329 = vector.extract_strided_slice %296 {offsets = [0, 12], sizes = [8, 58], strides = [1, 1]} : vector<8x72xf32> to vector<8x58xf32>
    %c6_227 = arith.constant 6 : index
    %c0_228 = arith.constant 0 : index
    %c0_229 = arith.constant 0 : index
    %330 = vector.load %arg6[%c6_227, %c0_228, %c0_229] : memref<9x4x8xf32, #tpu.memory_space<vmem>>, vector<1x4x8xf32>
    %331 = vector.shape_cast %330 : vector<1x4x8xf32> to vector<4x8xf32>
    %cst_230 = arith.constant dense<0.000000e+00> : vector<4x58xf32>
    %332 = tpu.matmul %331, %329, %cst_230 {dimension_numbers = #tpu.dot_dimension_numbers<[1], [0], [0], [1], [0, 0, 1, 1], [], []>} : vector<4x8xf32>, vector<8x58xf32>, vector<4x58xf32> -> vector<4x58xf32>
    %333 = arith.addf %328, %332 : vector<4x58xf32>
    %334 = vector.extract_strided_slice %296 {offsets = [0, 13], sizes = [8, 58], strides = [1, 1]} : vector<8x72xf32> to vector<8x58xf32>
    %c7_231 = arith.constant 7 : index
    %c0_232 = arith.constant 0 : index
    %c0_233 = arith.constant 0 : index
    %335 = vector.load %arg6[%c7_231, %c0_232, %c0_233] : memref<9x4x8xf32, #tpu.memory_space<vmem>>, vector<1x4x8xf32>
    %336 = vector.shape_cast %335 : vector<1x4x8xf32> to vector<4x8xf32>
    %cst_234 = arith.constant dense<0.000000e+00> : vector<4x58xf32>
    %337 = tpu.matmul %336, %334, %cst_234 {dimension_numbers = #tpu.dot_dimension_numbers<[1], [0], [0], [1], [0, 0, 1, 1], [], []>} : vector<4x8xf32>, vector<8x58xf32>, vector<4x58xf32> -> vector<4x58xf32>
    %338 = arith.addf %333, %337 : vector<4x58xf32>
    %339 = vector.extract_strided_slice %296 {offsets = [0, 14], sizes = [8, 58], strides = [1, 1]} : vector<8x72xf32> to vector<8x58xf32>
    %c8_235 = arith.constant 8 : index
    %c0_236 = arith.constant 0 : index
    %c0_237 = arith.constant 0 : index
    %340 = vector.load %arg6[%c8_235, %c0_236, %c0_237] : memref<9x4x8xf32, #tpu.memory_space<vmem>>, vector<1x4x8xf32>
    %341 = vector.shape_cast %340 : vector<1x4x8xf32> to vector<4x8xf32>
    %cst_238 = arith.constant dense<0.000000e+00> : vector<4x58xf32>
    %342 = tpu.matmul %341, %339, %cst_238 {dimension_numbers = #tpu.dot_dimension_numbers<[1], [0], [0], [1], [0, 0, 1, 1], [], []>} : vector<4x8xf32>, vector<8x58xf32>, vector<4x58xf32> -> vector<4x58xf32>
    %343 = arith.addf %338, %342 : vector<4x58xf32>
    %cst_239 = arith.constant 0.000000e+00 : f32
    %344 = vector.broadcast %cst_239 : f32 to vector<4x58xf32>
    %345 = arith.cmpf oge, %343, %344 : vector<4x58xf32>
    %cst_240 = arith.constant 0.00999999977 : f32
    %346 = vector.broadcast %cst_240 : f32 to vector<4x58xf32>
    %347 = arith.mulf %346, %343 : vector<4x58xf32>
    %348 = arith.select %345, %343, %347 : vector<4x58xi1>, vector<4x58xf32>
    %c0_241 = arith.constant 0 : index
    %c0_242 = arith.constant 0 : index
    %349 = vector.load %arg23[%c0_241, %c0_242] : memref<58x200xbf16, #tpu.memory_space<vmem>>, vector<58x200xbf16>
    %350 = arith.extf %349 : vector<58x200xbf16> to vector<58x200xf32>
    %cst_243 = arith.constant dense<0.000000e+00> : vector<4x200xf32>
    %351 = tpu.matmul %348, %350, %cst_243 {dimension_numbers = #tpu.dot_dimension_numbers<[1], [0], [0], [1], [0, 0, 1, 1], [], []>} : vector<4x58xf32>, vector<58x200xf32>, vector<4x200xf32> -> vector<4x200xf32>
    %c0_244 = arith.constant 0 : index
    %c0_245 = arith.constant 0 : index
    %352 = vector.load %arg15[%c0_244, %c0_245] : memref<2x1xf32, #tpu.memory_space<vmem>>, vector<2x1xf32>
    %353 = vector.extract_strided_slice %351 {offsets = [0, 0], sizes = [4, 178], strides = [1, 1]} : vector<4x200xf32> to vector<4x178xf32>
    %c0_246 = arith.constant 0 : index
    %c0_247 = arith.constant 0 : index
    %c0_248 = arith.constant 0 : index
    %354 = vector.load %arg7[%c0_246, %c0_247, %c0_248] : memref<9x2x4xf32, #tpu.memory_space<vmem>>, vector<1x2x4xf32>
    %355 = vector.shape_cast %354 : vector<1x2x4xf32> to vector<2x4xf32>
    %cst_249 = arith.constant dense<0.000000e+00> : vector<2x178xf32>
    %356 = tpu.matmul %355, %353, %cst_249 {dimension_numbers = #tpu.dot_dimension_numbers<[1], [0], [0], [1], [0, 0, 1, 1], [], []>} : vector<2x4xf32>, vector<4x178xf32>, vector<2x178xf32> -> vector<2x178xf32>
    %357 = vector.broadcast %352 : vector<2x1xf32> to vector<2x178xf32>
    %358 = arith.addf %357, %356 : vector<2x178xf32>
    %359 = vector.extract_strided_slice %351 {offsets = [0, 1], sizes = [4, 178], strides = [1, 1]} : vector<4x200xf32> to vector<4x178xf32>
    %c1_250 = arith.constant 1 : index
    %c0_251 = arith.constant 0 : index
    %c0_252 = arith.constant 0 : index
    %360 = vector.load %arg7[%c1_250, %c0_251, %c0_252] : memref<9x2x4xf32, #tpu.memory_space<vmem>>, vector<1x2x4xf32>
    %361 = vector.shape_cast %360 : vector<1x2x4xf32> to vector<2x4xf32>
    %cst_253 = arith.constant dense<0.000000e+00> : vector<2x178xf32>
    %362 = tpu.matmul %361, %359, %cst_253 {dimension_numbers = #tpu.dot_dimension_numbers<[1], [0], [0], [1], [0, 0, 1, 1], [], []>} : vector<2x4xf32>, vector<4x178xf32>, vector<2x178xf32> -> vector<2x178xf32>
    %363 = arith.addf %358, %362 : vector<2x178xf32>
    %364 = vector.extract_strided_slice %351 {offsets = [0, 2], sizes = [4, 178], strides = [1, 1]} : vector<4x200xf32> to vector<4x178xf32>
    %c2_254 = arith.constant 2 : index
    %c0_255 = arith.constant 0 : index
    %c0_256 = arith.constant 0 : index
    %365 = vector.load %arg7[%c2_254, %c0_255, %c0_256] : memref<9x2x4xf32, #tpu.memory_space<vmem>>, vector<1x2x4xf32>
    %366 = vector.shape_cast %365 : vector<1x2x4xf32> to vector<2x4xf32>
    %cst_257 = arith.constant dense<0.000000e+00> : vector<2x178xf32>
    %367 = tpu.matmul %366, %364, %cst_257 {dimension_numbers = #tpu.dot_dimension_numbers<[1], [0], [0], [1], [0, 0, 1, 1], [], []>} : vector<2x4xf32>, vector<4x178xf32>, vector<2x178xf32> -> vector<2x178xf32>
    %368 = arith.addf %363, %367 : vector<2x178xf32>
    %369 = vector.extract_strided_slice %351 {offsets = [0, 10], sizes = [4, 178], strides = [1, 1]} : vector<4x200xf32> to vector<4x178xf32>
    %c3_258 = arith.constant 3 : index
    %c0_259 = arith.constant 0 : index
    %c0_260 = arith.constant 0 : index
    %370 = vector.load %arg7[%c3_258, %c0_259, %c0_260] : memref<9x2x4xf32, #tpu.memory_space<vmem>>, vector<1x2x4xf32>
    %371 = vector.shape_cast %370 : vector<1x2x4xf32> to vector<2x4xf32>
    %cst_261 = arith.constant dense<0.000000e+00> : vector<2x178xf32>
    %372 = tpu.matmul %371, %369, %cst_261 {dimension_numbers = #tpu.dot_dimension_numbers<[1], [0], [0], [1], [0, 0, 1, 1], [], []>} : vector<2x4xf32>, vector<4x178xf32>, vector<2x178xf32> -> vector<2x178xf32>
    %373 = arith.addf %368, %372 : vector<2x178xf32>
    %374 = vector.extract_strided_slice %351 {offsets = [0, 11], sizes = [4, 178], strides = [1, 1]} : vector<4x200xf32> to vector<4x178xf32>
    %c4_262 = arith.constant 4 : index
    %c0_263 = arith.constant 0 : index
    %c0_264 = arith.constant 0 : index
    %375 = vector.load %arg7[%c4_262, %c0_263, %c0_264] : memref<9x2x4xf32, #tpu.memory_space<vmem>>, vector<1x2x4xf32>
    %376 = vector.shape_cast %375 : vector<1x2x4xf32> to vector<2x4xf32>
    %cst_265 = arith.constant dense<0.000000e+00> : vector<2x178xf32>
    %377 = tpu.matmul %376, %374, %cst_265 {dimension_numbers = #tpu.dot_dimension_numbers<[1], [0], [0], [1], [0, 0, 1, 1], [], []>} : vector<2x4xf32>, vector<4x178xf32>, vector<2x178xf32> -> vector<2x178xf32>
    %378 = arith.addf %373, %377 : vector<2x178xf32>
    %379 = vector.extract_strided_slice %351 {offsets = [0, 12], sizes = [4, 178], strides = [1, 1]} : vector<4x200xf32> to vector<4x178xf32>
    %c5_266 = arith.constant 5 : index
    %c0_267 = arith.constant 0 : index
    %c0_268 = arith.constant 0 : index
    %380 = vector.load %arg7[%c5_266, %c0_267, %c0_268] : memref<9x2x4xf32, #tpu.memory_space<vmem>>, vector<1x2x4xf32>
    %381 = vector.shape_cast %380 : vector<1x2x4xf32> to vector<2x4xf32>
    %cst_269 = arith.constant dense<0.000000e+00> : vector<2x178xf32>
    %382 = tpu.matmul %381, %379, %cst_269 {dimension_numbers = #tpu.dot_dimension_numbers<[1], [0], [0], [1], [0, 0, 1, 1], [], []>} : vector<2x4xf32>, vector<4x178xf32>, vector<2x178xf32> -> vector<2x178xf32>
    %383 = arith.addf %378, %382 : vector<2x178xf32>
    %384 = vector.extract_strided_slice %351 {offsets = [0, 20], sizes = [4, 178], strides = [1, 1]} : vector<4x200xf32> to vector<4x178xf32>
    %c6_270 = arith.constant 6 : index
    %c0_271 = arith.constant 0 : index
    %c0_272 = arith.constant 0 : index
    %385 = vector.load %arg7[%c6_270, %c0_271, %c0_272] : memref<9x2x4xf32, #tpu.memory_space<vmem>>, vector<1x2x4xf32>
    %386 = vector.shape_cast %385 : vector<1x2x4xf32> to vector<2x4xf32>
    %cst_273 = arith.constant dense<0.000000e+00> : vector<2x178xf32>
    %387 = tpu.matmul %386, %384, %cst_273 {dimension_numbers = #tpu.dot_dimension_numbers<[1], [0], [0], [1], [0, 0, 1, 1], [], []>} : vector<2x4xf32>, vector<4x178xf32>, vector<2x178xf32> -> vector<2x178xf32>
    %388 = arith.addf %383, %387 : vector<2x178xf32>
    %389 = vector.extract_strided_slice %351 {offsets = [0, 21], sizes = [4, 178], strides = [1, 1]} : vector<4x200xf32> to vector<4x178xf32>
    %c7_274 = arith.constant 7 : index
    %c0_275 = arith.constant 0 : index
    %c0_276 = arith.constant 0 : index
    %390 = vector.load %arg7[%c7_274, %c0_275, %c0_276] : memref<9x2x4xf32, #tpu.memory_space<vmem>>, vector<1x2x4xf32>
    %391 = vector.shape_cast %390 : vector<1x2x4xf32> to vector<2x4xf32>
    %cst_277 = arith.constant dense<0.000000e+00> : vector<2x178xf32>
    %392 = tpu.matmul %391, %389, %cst_277 {dimension_numbers = #tpu.dot_dimension_numbers<[1], [0], [0], [1], [0, 0, 1, 1], [], []>} : vector<2x4xf32>, vector<4x178xf32>, vector<2x178xf32> -> vector<2x178xf32>
    %393 = arith.addf %388, %392 : vector<2x178xf32>
    %394 = vector.extract_strided_slice %351 {offsets = [0, 22], sizes = [4, 178], strides = [1, 1]} : vector<4x200xf32> to vector<4x178xf32>
    %c8_278 = arith.constant 8 : index
    %c0_279 = arith.constant 0 : index
    %c0_280 = arith.constant 0 : index
    %395 = vector.load %arg7[%c8_278, %c0_279, %c0_280] : memref<9x2x4xf32, #tpu.memory_space<vmem>>, vector<1x2x4xf32>
    %396 = vector.shape_cast %395 : vector<1x2x4xf32> to vector<2x4xf32>
    %cst_281 = arith.constant dense<0.000000e+00> : vector<2x178xf32>
    %397 = tpu.matmul %396, %394, %cst_281 {dimension_numbers = #tpu.dot_dimension_numbers<[1], [0], [0], [1], [0, 0, 1, 1], [], []>} : vector<2x4xf32>, vector<4x178xf32>, vector<2x178xf32> -> vector<2x178xf32>
    %398 = arith.addf %393, %397 : vector<2x178xf32>
    %cst_282 = arith.constant 0.000000e+00 : f32
    %399 = vector.broadcast %cst_282 : f32 to vector<2x178xf32>
    %400 = arith.cmpf oge, %398, %399 : vector<2x178xf32>
    %cst_283 = arith.constant 0.00999999977 : f32
    %401 = vector.broadcast %cst_283 : f32 to vector<2x178xf32>
    %402 = arith.mulf %401, %398 : vector<2x178xf32>
    %403 = arith.select %400, %398, %402 : vector<2x178xi1>, vector<2x178xf32>
    %c0_284 = arith.constant 0 : index
    %c0_285 = arith.constant 0 : index
    %404 = vector.load %arg24[%c0_284, %c0_285] : memref<178x648xbf16, #tpu.memory_space<vmem>>, vector<178x648xbf16>
    %405 = arith.extf %404 : vector<178x648xbf16> to vector<178x648xf32>
    %cst_286 = arith.constant dense<0.000000e+00> : vector<2x648xf32>
    %406 = tpu.matmul %403, %405, %cst_286 {dimension_numbers = #tpu.dot_dimension_numbers<[1], [0], [0], [1], [0, 0, 1, 1], [], []>} : vector<2x178xf32>, vector<178x648xf32>, vector<2x648xf32> -> vector<2x648xf32>
    %c0_287 = arith.constant 0 : index
    %c0_288 = arith.constant 0 : index
    %407 = vector.load %arg16[%c0_287, %c0_288] : memref<1x1xf32, #tpu.memory_space<vmem>>, vector<1x1xf32>
    %408 = vector.extract_strided_slice %406 {offsets = [0, 0], sizes = [2, 610], strides = [1, 1]} : vector<2x648xf32> to vector<2x610xf32>
    %c0_289 = arith.constant 0 : index
    %c0_290 = arith.constant 0 : index
    %c0_291 = arith.constant 0 : index
    %409 = vector.load %arg8[%c0_289, %c0_290, %c0_291] : memref<9x1x2xf32, #tpu.memory_space<vmem>>, vector<1x1x2xf32>
    %410 = vector.shape_cast %409 : vector<1x1x2xf32> to vector<1x2xf32>
    %cst_292 = arith.constant dense<0.000000e+00> : vector<1x610xf32>
    %411 = tpu.matmul %410, %408, %cst_292 {dimension_numbers = #tpu.dot_dimension_numbers<[1], [0], [0], [1], [0, 0, 1, 1], [], []>} : vector<1x2xf32>, vector<2x610xf32>, vector<1x610xf32> -> vector<1x610xf32>
    %412 = vector.broadcast %407 : vector<1x1xf32> to vector<1x610xf32>
    %413 = arith.addf %412, %411 : vector<1x610xf32>
    %414 = vector.extract_strided_slice %406 {offsets = [0, 1], sizes = [2, 610], strides = [1, 1]} : vector<2x648xf32> to vector<2x610xf32>
    %c1_293 = arith.constant 1 : index
    %c0_294 = arith.constant 0 : index
    %c0_295 = arith.constant 0 : index
    %415 = vector.load %arg8[%c1_293, %c0_294, %c0_295] : memref<9x1x2xf32, #tpu.memory_space<vmem>>, vector<1x1x2xf32>
    %416 = vector.shape_cast %415 : vector<1x1x2xf32> to vector<1x2xf32>
    %cst_296 = arith.constant dense<0.000000e+00> : vector<1x610xf32>
    %417 = tpu.matmul %416, %414, %cst_296 {dimension_numbers = #tpu.dot_dimension_numbers<[1], [0], [0], [1], [0, 0, 1, 1], [], []>} : vector<1x2xf32>, vector<2x610xf32>, vector<1x610xf32> -> vector<1x610xf32>
    %418 = arith.addf %413, %417 : vector<1x610xf32>
    %419 = vector.extract_strided_slice %406 {offsets = [0, 2], sizes = [2, 610], strides = [1, 1]} : vector<2x648xf32> to vector<2x610xf32>
    %c2_297 = arith.constant 2 : index
    %c0_298 = arith.constant 0 : index
    %c0_299 = arith.constant 0 : index
    %420 = vector.load %arg8[%c2_297, %c0_298, %c0_299] : memref<9x1x2xf32, #tpu.memory_space<vmem>>, vector<1x1x2xf32>
    %421 = vector.shape_cast %420 : vector<1x1x2xf32> to vector<1x2xf32>
    %cst_300 = arith.constant dense<0.000000e+00> : vector<1x610xf32>
    %422 = tpu.matmul %421, %419, %cst_300 {dimension_numbers = #tpu.dot_dimension_numbers<[1], [0], [0], [1], [0, 0, 1, 1], [], []>} : vector<1x2xf32>, vector<2x610xf32>, vector<1x610xf32> -> vector<1x610xf32>
    %423 = arith.addf %418, %422 : vector<1x610xf32>
    %424 = vector.extract_strided_slice %406 {offsets = [0, 18], sizes = [2, 610], strides = [1, 1]} : vector<2x648xf32> to vector<2x610xf32>
    %c3_301 = arith.constant 3 : index
    %c0_302 = arith.constant 0 : index
    %c0_303 = arith.constant 0 : index
    %425 = vector.load %arg8[%c3_301, %c0_302, %c0_303] : memref<9x1x2xf32, #tpu.memory_space<vmem>>, vector<1x1x2xf32>
    %426 = vector.shape_cast %425 : vector<1x1x2xf32> to vector<1x2xf32>
    %cst_304 = arith.constant dense<0.000000e+00> : vector<1x610xf32>
    %427 = tpu.matmul %426, %424, %cst_304 {dimension_numbers = #tpu.dot_dimension_numbers<[1], [0], [0], [1], [0, 0, 1, 1], [], []>} : vector<1x2xf32>, vector<2x610xf32>, vector<1x610xf32> -> vector<1x610xf32>
    %428 = arith.addf %423, %427 : vector<1x610xf32>
    %429 = vector.extract_strided_slice %406 {offsets = [0, 19], sizes = [2, 610], strides = [1, 1]} : vector<2x648xf32> to vector<2x610xf32>
    %c4_305 = arith.constant 4 : index
    %c0_306 = arith.constant 0 : index
    %c0_307 = arith.constant 0 : index
    %430 = vector.load %arg8[%c4_305, %c0_306, %c0_307] : memref<9x1x2xf32, #tpu.memory_space<vmem>>, vector<1x1x2xf32>
    %431 = vector.shape_cast %430 : vector<1x1x2xf32> to vector<1x2xf32>
    %cst_308 = arith.constant dense<0.000000e+00> : vector<1x610xf32>
    %432 = tpu.matmul %431, %429, %cst_308 {dimension_numbers = #tpu.dot_dimension_numbers<[1], [0], [0], [1], [0, 0, 1, 1], [], []>} : vector<1x2xf32>, vector<2x610xf32>, vector<1x610xf32> -> vector<1x610xf32>
    %433 = arith.addf %428, %432 : vector<1x610xf32>
    %434 = vector.extract_strided_slice %406 {offsets = [0, 20], sizes = [2, 610], strides = [1, 1]} : vector<2x648xf32> to vector<2x610xf32>
    %c5_309 = arith.constant 5 : index
    %c0_310 = arith.constant 0 : index
    %c0_311 = arith.constant 0 : index
    %435 = vector.load %arg8[%c5_309, %c0_310, %c0_311] : memref<9x1x2xf32, #tpu.memory_space<vmem>>, vector<1x1x2xf32>
    %436 = vector.shape_cast %435 : vector<1x1x2xf32> to vector<1x2xf32>
    %cst_312 = arith.constant dense<0.000000e+00> : vector<1x610xf32>
    %437 = tpu.matmul %436, %434, %cst_312 {dimension_numbers = #tpu.dot_dimension_numbers<[1], [0], [0], [1], [0, 0, 1, 1], [], []>} : vector<1x2xf32>, vector<2x610xf32>, vector<1x610xf32> -> vector<1x610xf32>
    %438 = arith.addf %433, %437 : vector<1x610xf32>
    %439 = vector.extract_strided_slice %406 {offsets = [0, 36], sizes = [2, 610], strides = [1, 1]} : vector<2x648xf32> to vector<2x610xf32>
    %c6_313 = arith.constant 6 : index
    %c0_314 = arith.constant 0 : index
    %c0_315 = arith.constant 0 : index
    %440 = vector.load %arg8[%c6_313, %c0_314, %c0_315] : memref<9x1x2xf32, #tpu.memory_space<vmem>>, vector<1x1x2xf32>
    %441 = vector.shape_cast %440 : vector<1x1x2xf32> to vector<1x2xf32>
    %cst_316 = arith.constant dense<0.000000e+00> : vector<1x610xf32>
    %442 = tpu.matmul %441, %439, %cst_316 {dimension_numbers = #tpu.dot_dimension_numbers<[1], [0], [0], [1], [0, 0, 1, 1], [], []>} : vector<1x2xf32>, vector<2x610xf32>, vector<1x610xf32> -> vector<1x610xf32>
    %443 = arith.addf %438, %442 : vector<1x610xf32>
    %444 = vector.extract_strided_slice %406 {offsets = [0, 37], sizes = [2, 610], strides = [1, 1]} : vector<2x648xf32> to vector<2x610xf32>
    %c7_317 = arith.constant 7 : index
    %c0_318 = arith.constant 0 : index
    %c0_319 = arith.constant 0 : index
    %445 = vector.load %arg8[%c7_317, %c0_318, %c0_319] : memref<9x1x2xf32, #tpu.memory_space<vmem>>, vector<1x1x2xf32>
    %446 = vector.shape_cast %445 : vector<1x1x2xf32> to vector<1x2xf32>
    %cst_320 = arith.constant dense<0.000000e+00> : vector<1x610xf32>
    %447 = tpu.matmul %446, %444, %cst_320 {dimension_numbers = #tpu.dot_dimension_numbers<[1], [0], [0], [1], [0, 0, 1, 1], [], []>} : vector<1x2xf32>, vector<2x610xf32>, vector<1x610xf32> -> vector<1x610xf32>
    %448 = arith.addf %443, %447 : vector<1x610xf32>
    %449 = vector.extract_strided_slice %406 {offsets = [0, 38], sizes = [2, 610], strides = [1, 1]} : vector<2x648xf32> to vector<2x610xf32>
    %c8_321 = arith.constant 8 : index
    %c0_322 = arith.constant 0 : index
    %c0_323 = arith.constant 0 : index
    %450 = vector.load %arg8[%c8_321, %c0_322, %c0_323] : memref<9x1x2xf32, #tpu.memory_space<vmem>>, vector<1x1x2xf32>
    %451 = vector.shape_cast %450 : vector<1x1x2xf32> to vector<1x2xf32>
    %cst_324 = arith.constant dense<0.000000e+00> : vector<1x610xf32>
    %452 = tpu.matmul %451, %449, %cst_324 {dimension_numbers = #tpu.dot_dimension_numbers<[1], [0], [0], [1], [0, 0, 1, 1], [], []>} : vector<1x2xf32>, vector<2x610xf32>, vector<1x610xf32> -> vector<1x610xf32>
    %453 = arith.addf %448, %452 : vector<1x610xf32>
    %cst_325 = arith.constant 0.000000e+00 : f32
    %454 = vector.broadcast %cst_325 : f32 to vector<1x610xf32>
    %455 = arith.cmpf oge, %453, %454 : vector<1x610xf32>
    %cst_326 = arith.constant 0.00999999977 : f32
    %456 = vector.broadcast %cst_326 : f32 to vector<1x610xf32>
    %457 = arith.mulf %456, %453 : vector<1x610xf32>
    %458 = arith.select %455, %453, %457 : vector<1x610xi1>, vector<1x610xf32>
    %c0_327 = arith.constant 0 : index
    %c0_328 = arith.constant 0 : index
    %459 = vector.load %arg25[%c0_327, %c0_328] : memref<610x512xbf16, #tpu.memory_space<vmem>>, vector<610x512xbf16>
    %460 = arith.extf %459 : vector<610x512xbf16> to vector<610x512xf32>
    %cst_329 = arith.constant dense<0.000000e+00> : vector<1x512xf32>
    %461 = tpu.matmul %458, %460, %cst_329 {dimension_numbers = #tpu.dot_dimension_numbers<[1], [0], [0], [1], [0, 0, 1, 1], [], []>} : vector<1x610xf32>, vector<610x512xf32>, vector<1x512xf32> -> vector<1x512xf32>
    %c0_330 = arith.constant 0 : index
    %c0_331 = arith.constant 0 : index
    %462 = vector.load %arg26[%c0_330, %c0_331] : memref<1x512xf32, #tpu.memory_space<vmem>>, vector<1x512xf32>
    tpu.vector_store %arg26[%c0_330, %c0_331], %461 {strides = array<i32>} : memref<1x512xf32, #tpu.memory_space<vmem>>, vector<1x512xf32>,
    return
  }
}

</mosaic_0001>

<bundles_post_ra>
// kernel: autoencoder_forward.1
= control target key start
LH: loop header
LB: loop body
LE: loop exit
PB: predicated region body
PF: predicated region fallthrough
CT: control target
= control target key end

     0   :  { %s11091_s0 = inlined_call_operand.vmem [shape: f32[1,512], index: 0, kind: input, shape index: {}]   ;;  %s11092_s1 = inlined_call_operand.vmem [shape: f32[9,2,1], index: 1, kind: input, shape index: {}]   ;;  %s11093_s2 = inlined_call_operand.vmem [shape: f32[9,4,2], index: 2, kind: input, shape index: {}]   ;;  %s11094_s3 = inlined_call_operand.vmem [shape: f32[9,8,4], index: 3, kind: input, shape index: {}]   ;;  %s11095_s4 = inlined_call_operand.vmem [shape: f32[9,16,8], index: 4, kind: input, shape index: {}]   ;;  %s11096_s5 = inlined_call_operand.vmem [shape: f32[9,8,16], index: 5, kind: input, shape index: {}]   ;;  %s11097_s6 = inlined_call_operand.vmem [shape: f32[9,4,8], index: 6, kind: input, shape index: {}]   ;;  %s11098_s7 = inlined_call_operand.vmem [shape: f32[9,2,4], index: 7, kind: input, shape index: {}]   ;;  %s11099_s8 = inlined_call_operand.vmem [shape: f32[9,1,2], index: 8, kind: input, shape index: {}]   ;;  %s11100_s9 = inlined_call_operand.vmem [shape: f32[2,1], index: 9, kind: input, shape index: {}]   ;;  %s11101_s10 = inlined_call_operand.vmem [shape: f32[4,1], index: 10, kind: input, shape index: {}]   ;;  %s11102_s11 = inlined_call_operand.vmem [shape: f32[8,1], index: 11, kind: input, shape index: {}]   ;;  %s11103_s12 = inlined_call_operand.vmem [shape: f32[16,1], index: 12, kind: input, shape index: {}]   ;;  %s11104_s13 = inlined_call_operand.vmem [shape: f32[8,1], index: 13, kind: input, shape index: {}]   ;;  %s11105_s14 = inlined_call_operand.vmem [shape: f32[4,1], index: 14, kind: input, shape index: {}]   ;;  %s11106_s15 = inlined_call_operand.vmem [shape: f32[2,1], index: 15, kind: input, shape index: {}]   ;;  %s11107_s16 = inlined_call_operand.<no memory space> [shape: f32[1,1], index: 16, kind: input, shape index: {}]   ;;  %s11108_s17 = inlined_call_operand.hbm [shape: bf16[512,648], index: 17, kind: input, shape index: {}]   ;;  %s11109_s18 = inlined_call_operand.hbm [shape: bf16[610,200], index: 18, kind: input, shape index: {}]   ;;  %s11110_s19 = inlined_call_operand.vmem [shape: bf16[178,72], index: 19, kind: input, shape index: {}]   ;;  %s11111_s20 = inlined_call_operand.vmem [shape: bf16[58,32], index: 20, kind: input, shape index: {}]   ;;  %s11112_s21 = inlined_call_operand.vmem [shape: bf16[22,32], index: 21, kind: input, shape index: {}]   ;;  %s11113_s22 = inlined_call_operand.vmem [shape: bf16[22,72], index: 22, kind: input, shape index: {}]   ;;  %s11114_s23 = inlined_call_operand.vmem [shape: bf16[58,200], index: 23, kind: input, shape index: {}]   ;;  %s11115_s24 = inlined_call_operand.hbm [shape: bf16[178,648], index: 24, kind: input, shape index: {}]   ;;  %s11116_s25 = inlined_call_operand.hbm [shape: bf16[610,512], index: 25, kind: input, shape index: {}]   ;;  %s11117_s26 = inlined_call_operand.vmem [shape: f32[1,512], index: 26, kind: output, shape index: {}]  }
   0x1   :  { %11248 = sst [smem:[#allocation40_spill]] %s11091_s0  ;;  %v31_v0 = vstv %s11107_s16 }
   0x2   :  { %11249 = sst [smem:[#allocation41_spill]] %s11092_s1  ;;  %32 = vst [vmem:[#allocation2] sm:$0x1] %v31_v0 }
   0x3   :  { %11250 = sst [smem:[#allocation42_spill]] %s11093_s2 }
   0x4   :  { %11251 = sst [smem:[#allocation43_spill]] %s11094_s3 }
   0x5   :  { %11252 = sst [smem:[#allocation44_spill]] %s11095_s4 }
   0x6   :  { %11253 = sst [smem:[#allocation45_spill]] %s11096_s5 }
   0x7   :  { %11254 = sst [smem:[#allocation46_spill]] %s11097_s6 }
   0x8   :  { %11255 = sst [smem:[#allocation47_spill]] %s11098_s7 }
   0x9   :  { %11256 = sst [smem:[#allocation48_spill]] %s11099_s8 }
   0xa   :  { %11257 = sst [smem:[#allocation49_spill]] %s11100_s9 }
   0xb   :  { %11258 = sst [smem:[#allocation50_spill]] %s11101_s10 }
   0xc   :  { %33 = vsyncpa [#allocation4], 0 }
   0xd   :  { %34 = vsyncpa [#allocation6], 0  ;;  %s87_s8 = sshll.u32 %s11109_s18, 4  ;;  %s88_s8 = int_to_ptr.hbm [resolvable:$true] %s87_s8 }
   0xe   :  { %35 = vsyncpa [#allocation9], 0  ;;  %s7725_s4 = smov [#allocation5]   ;;  %s74_s30 = sshll.u32 %s11108_s17, 4  ;;  %s75_s30 = int_to_ptr.hbm [resolvable:$true] %s74_s30 }
   0xf   :  { %s89_s29 = sshll.u32 %s7725_s4, 4  ;;  %s7726_s2 = smov 128   ;;  %s90_s29 = int_to_ptr.vmem [resolvable:$true] %s89_s29 }
  0x10   :  { %s7727_s5 = smov 8   ;;  %s7728_s16 = smov [#allocation3]  }
  0x11   :  { %95 = dma.hbm_to_vmem [thread:$0]  %s88_s8, 9856, %s90_s29, [#allocation6], %s7726_s2, %s7726_s2, %s7727_s5  }
  0x12   :  { %s76_s10 = sshll.u32 %s7728_s16, 4  ;;  %s7729_s6 = smov 384   ;;  %s77_s10 = int_to_ptr.vmem [resolvable:$true] %s76_s10 }
  0x13   :  { %s7730_s1 = smov 24   ;;  %s110_s3 = sshll.u32 %s11115_s24, 4  ;;  %s111_s3 = int_to_ptr.hbm [resolvable:$true] %s110_s3 }
  0x14   :  { %82 = dma.hbm_to_vmem [thread:$0]  %s75_s30, 24576, %s77_s10, [#allocation4], %s7729_s6, %s7729_s6, %s7730_s1  }
  0x15   :  { %s7731_s7 = smov [#allocation7]   ;;  %s123_s0 = sshll.u32 %s11116_s25, 4  ;;  %s124_s0 = int_to_ptr.hbm [resolvable:$true] %s123_s0 }
  0x16   :  { %s112_s28 = sshll.u32 %s7731_s7, 4  ;;  %s7732_s8 = smov [#allocation8]   ;;  %s113_s28 = int_to_ptr.vmem [resolvable:$true] %s112_s28 }
  0x17   :  { %118 = dma.hbm_to_vmem [thread:$0]  %s111_s3, 8832, %s113_s28, [#allocation6], %s7729_s6, %s7729_s6, %s7730_s1  }
  0x18   :  { %s125_s29 = sshll.u32 %s7732_s8, 4  ;;  %s7733_s9 = smov 256   ;;  %s126_s29 = int_to_ptr.vmem [resolvable:$true] %s125_s29 }
  0x19   :  { %s7734_s2 = smov 16  }
  0x1a   :  { %131 = dma.hbm_to_vmem [thread:$0]  %s124_s0, 19712, %s126_s29, [#allocation9], %s7733_s9, %s7733_s9, %s7734_s2  }
  0x1b   :  { %7719 = dma.done.wait [#allocation4], 24576  }
  0x1c   :  { %7720 = vsyncadd [#allocation4], 4294942720 }
  0x1d   :  { %7721 = dma.done.wait [#allocation6], 18688  }
  0x1e   :  { %7722 = vsyncadd [#allocation6], 4294948608 }
  0x1f   :  { %7723 = dma.done.wait [#allocation9], 19712  }
  0x20   :  { %7724 = vsyncadd [#allocation9], 4294947584  ;;  %v7907_v1 = vld [vmem:[#allocation3 + $0x468] sm:$0xff]  ;;  %v7909_v2 = vld [vmem:[#allocation3 + $0x450] sm:$0xff]  ;;  %s11274_s30 = sld [smem:[#allocation40_spill]]  ;;  %s11201_s6 = smov 109  }
  0x21   :  { %v7911_v3 = vld [vmem:[#allocation3 + $0x5e8] sm:$0xff]  ;;  %v623_v4 = vunpack.c.l.bf16 %v7907_v1  ;;  %v617_v5 = vunpack.c.l.bf16 %v7909_v2  ;;  %v7920_v9 = vld [vmem:[#allocation3 + $0x438] sm:$0xff]  ;;  %v7924_v12 = vld [vmem:[#allocation3 + $0x5d0] sm:$0xff]  ;;  %s11276_s10 = sld [smem:[#allocation41_spill]]  ;;  %s11204_s1 = smov 110   ;;  %vm1268_vm0 = vcmask 1039360  }
  0x22   :  { %v719_v6 = vunpack.c.l.bf16 %v7911_v3  ;;  %v7916_v7 = vld [vmem:[#allocation3 + $0x168] sm:$0xff]  ;;  %v7926_v13 = vld [vmem:[#allocation3 + $0x150] sm:$0xff]  ;;  %v611_v15 = vunpack.c.l.bf16 %v7920_v9  ;;  %v713_v16 = vunpack.c.l.bf16 %v7924_v12  ;;  %v7934_v19 = vld [vmem:[#allocation3 + $0x420] sm:$0xff]  ;;  %s11304_s9 = sld [smem:[#allocation49_spill]]  ;;  %s7739_s18 = smov 108   ;;  %vm1310_vm1 = vcmask 1031168  }
  0x23   :  { %v7918_v8 = vld [vmem:[#allocation3 + $0x2e8] sm:$0xff]  ;;  %v431_v10 = vunpack.c.l.bf16 %v7916_v7  ;;  %v7928_v14 = vld [vmem:[#allocation3 + $0x2d0] sm:$0xff]  ;;  %774 = vmatpush.msra.mxu2 %v623_v4  ;;  %v425_v17 = vunpack.c.l.bf16 %v7926_v13  ;;  %v7936_v20 = vld [vmem:[#allocation3 + $0x5b8] sm:$0xff]  ;;  %v605_v27 = vunpack.c.l.bf16 %v7934_v19  ;;  %s7740_s27 = smov 126   ;;  %s11190_s3 = smov 90   ;;  %vm11203_vm2 = vcmask 900096  }
  0x24   :  { %v527_v11 = vunpack.c.l.bf16 %v7918_v8  ;;  %794 = vmatpush.msra.mxu3 %v719_v6  ;;  %v521_v18 = vunpack.c.l.bf16 %v7928_v14  ;;  %v7938_v21 = vld [vmem:[#allocation3 + $0x138] sm:$0xff]  ;;  %v707_v22 = vunpack.c.l.bf16 %v7936_v20  ;;  %v7944_v25 = vld [vmem:[#allocation3 + $0x408] sm:$0xff]  ;;  %v7946_v26 = vld [vmem:[#allocation3 + $0x5a0] sm:$0xff]  ;;  %s11199_s7 = smov 92   ;;  %s11197_s28 = smov 91   ;;  %vm11196_vm3 = vcmask 891904  }
  0x25   :  { %734 = vmatpush.msra.mxu0 %v431_v10  ;;  %v419_v23 = vunpack.c.l.bf16 %v7938_v21  ;;  %v7942_v24 = vld [vmem:[#allocation3 + $0x2b8] sm:$0xff]  ;;  %775 = vmatpush.msra.mxu2 %v617_v5  ;;  %v701_v29 = vunpack.c.l.bf16 %v7946_v26  ;;  %v7951_v30 = vld [vmem:[#allocation3 + $0x120] sm:$0xff]  ;;  %v7955_v32 = vld [vmem:[#allocation3 + $0x3f0] sm:$0xff]  ;;  %v599_v38 = vunpack.c.l.bf16 %v7944_v25  ;;  %vm1436_vm4 = vcmask 883712   ;;  %s11387_s0 = sld [smem:[#allocation42_spill]]  ;;  %s7744_s8 = smov 118  }
  0x26   :  { %754 = vmatpush.msra.mxu1 %v527_v11  ;;  %795 = vmatpush.msra.mxu3 %v713_v16  ;;  %v515_v28 = vunpack.c.l.bf16 %v7942_v24  ;;  %v7953_v31 = vld [vmem:[#allocation3 + $0x2a0] sm:$0xff]  ;;  %v413_v33 = vunpack.c.l.bf16 %v7951_v30  ;;  %v7959_v35 = vld [vmem:[#allocation3 + $0x588] sm:$0xff]  ;;  %v7967_v40 = vld [vmem:[#allocation3 + $0x570] sm:$0xff]  ;;  %v593_v47 = vunpack.c.l.bf16 %v7955_v32  ;;  %vm11195_vm5 = vcmask 752640   ;;  %s7745_s29 = smov 116   ;;  %s11208_s2 = smov 106  }
  0x27   :  { %735 = vmatpush.msra.mxu0 %v425_v17  ;;  %v509_v34 = vunpack.c.l.bf16 %v7953_v31  ;;  %v7961_v36 = vld [vmem:[#allocation3 + $0x108] sm:$0xff]  ;;  %776 = vmatpush.msra.mxu2 %v611_v15  ;;  %v695_v39 = vunpack.c.l.bf16 %v7959_v35  ;;  %v7969_v41 = vld [vmem:[#allocation3 + $0xf0] sm:$0xff]  ;;  %v7973_v44 = vld [vmem:[#allocation3 + $0x3d8] sm:$0xff]  ;;  %v689_v48 = vunpack.c.l.bf16 %v7967_v40  ;;  %vm11194_vm6 = vcmask 744448   ;;  %s11206_s24 = smov 107   ;;  %s11388_s5 = sld [smem:[#allocation50_spill]] }
  0x28   :  { %755 = vmatpush.msra.mxu1 %v521_v18  ;;  %v7963_v37 = vld [vmem:[#allocation3 + $0x288] sm:$0xff]  ;;  %796 = vmatpush.msra.mxu3 %v707_v22  ;;  %v407_v42 = vunpack.c.l.bf16 %v7961_v36  ;;  %v7975_v45 = vld [vmem:[#allocation3 + $0x270] sm:$0xff]  ;;  %v7977_v46 = vld [vmem:[#allocation3 + $0x558] sm:$0xff]  ;;  %v401_v51 = vunpack.c.l.bf16 %v7969_v41  ;;  %v587_v55 = vunpack.c.l.bf16 %v7973_v44  ;;  %vm11193_vm7 = vcmask 736256   ;;  %s11389_s16 = sld [smem:[#allocation43_spill]]  ;;  %s7750_s4 = smov 115  }
  0x29   :  { %736 = vmatpush.msra.mxu0 %v419_v23  ;;  %v503_v43 = vunpack.c.l.bf16 %v7963_v37  ;;  %777 = vmatpush.msra.mxu2 %v605_v27  ;;  %v7981_v49 = vld [vmem:[#allocation3 + $0xd8] sm:$0xff]  ;;  %v497_v52 = vunpack.c.l.bf16 %v7975_v45  ;;  %v7987_v53 = vld [vmem:[#allocation3 + $0x3c0] sm:$0xff]  ;;  %v683_v56 = vunpack.c.l.bf16 %v7977_v46  ;;  %v7999_v61 = vld [vmem:[#allocation3 + $0x3a8] sm:$0xff]  ;;  %vm1843_vm9 = vcmask 1041408   ;;  %s7752_s17 = smov 122   ;;  %s11390_s25 = sld [smem:[#allocation44_spill]] }
  0x2a   :  { %756 = vmatpush.msra.mxu1 %v515_v28  ;;  %797 = vmatpush.msra.mxu3 %v701_v29  ;;  %v7983_v50 = vld [vmem:[#allocation3 + $0x258] sm:$0xff]  ;;  %v7989_v54 = vld [vmem:[#allocation3 + $0x540] sm:$0xff]  ;;  %v395_v59 = vunpack.c.l.bf16 %v7981_v49  ;;  %v8001_v62 = vld [vmem:[#allocation3 + $0x528] sm:$0xff]  ;;  %v581_v63 = vunpack.c.l.bf16 %v7987_v53  ;;  %v575_v16 = vunpack.c.l.bf16 %v7999_v61  ;;  %vm11192_vm14 = vcmask 801792  }
  0x2b   :  { %737 = vmatpush.msra.mxu0 %v413_v33  ;;  %778 = vmatpush.msra.mxu2 %v599_v38  ;;  %v7993_v57 = vld [vmem:[#allocation3 + $0xc0] sm:$0xff]  ;;  %v491_v60 = vunpack.c.l.bf16 %v7983_v50  ;;  %v677_v0 = vunpack.c.l.bf16 %v7989_v54  ;;  %v8005_v4 = vld [vmem:[#allocation3 + $0xa8] sm:$0xff]  ;;  %v8011_v11 = vld [vmem:[#allocation3 + $0x390] sm:$0xff]  ;;  %v671_v17 = vunpack.c.l.bf16 %v8001_v62  ;;  %vm11210_vm15 = vcmask 15360  }
  0x2c   :  { %757 = vmatpush.msra.mxu1 %v509_v34  ;;  %798 = vmatpush.msra.mxu3 %v695_v39  ;;  %v7995_v58 = vld [vmem:[#allocation3 + $0x240] sm:$0xff]  ;;  %v8007_v5 = vld [vmem:[#allocation3 + $0x228] sm:$0xff]  ;;  %v389_v6 = vunpack.c.l.bf16 %v7993_v57  ;;  %v8013_v15 = vld [vmem:[#allocation3 + $0x510] sm:$0xff]  ;;  %v383_v23 = vunpack.c.l.bf16 %v8005_v4  ;;  %v569_v33 = vunpack.c.l.bf16 %v8011_v11 }
  0x2d   :  { %738 = vmatpush.msra.mxu0 %v407_v42  ;;  %779 = vmatpush.msra.mxu2 %v593_v47  ;;  %v485_v10 = vunpack.c.l.bf16 %v7995_v58  ;;  %v8017_v18 = vld [vmem:[#allocation3 + $0x90] sm:$0xff]  ;;  %v479_v27 = vunpack.c.l.bf16 %v8007_v5  ;;  %v8023_v28 = vld [vmem:[#allocation3 + $0x378] sm:$0xff]  ;;  %v665_v34 = vunpack.c.l.bf16 %v8013_v15  ;;  %v8035_v47 = vld [vmem:[#allocation3 + $0x360] sm:$0xff] }
  0x2e   :  { %758 = vmatpush.msra.mxu1 %v503_v43  ;;  %799 = vmatpush.msra.mxu3 %v689_v48  ;;  %v8019_v22 = vld [vmem:[#allocation3 + $0x210] sm:$0xff]  ;;  %v8025_v29 = vld [vmem:[#allocation3 + $0x4f8] sm:$0xff]  ;;  %v377_v42 = vunpack.c.l.bf16 %v8017_v18  ;;  %v8037_v48 = vld [vmem:[#allocation3 + $0x4e0] sm:$0xff] }
  0x2f   :  { %739 = vmatpush.msra.mxu0 %v401_v51  ;;  %780 = vmatpush.msra.mxu2 %v587_v55  ;;  %11259 = vst [vmem:[#allocation13_spill] sm:$0xff] %v8025_v29  ;;  %v8029_v38 = vld [vmem:[#allocation3 + $0x78] sm:$0xff]  ;;  %v473_v43 = vunpack.c.l.bf16 %v8019_v22  ;;  %v563_v51 = vunpack.c.l.bf16 %v8023_v28  ;;  %v8041_v55 = vld [vmem:[#allocation3 + $0x60] sm:$0xff] }
  0x30   :  { %759 = vmatpush.msra.mxu1 %v497_v52  ;;  %800 = vmatpush.msra.mxu3 %v683_v56  ;;  %11260 = vst [vmem:[#allocation14_spill] sm:$0xff] %v8029_v38  ;;  %v8031_v39 = vld [vmem:[#allocation3 + $0x1f8] sm:$0xff]  ;;  %v659_v52 = vunpack.c.l.bf16 %v8025_v29  ;;  %v8043_v56 = vld [vmem:[#allocation3 + $0x1e0] sm:$0xff]  ;;  %v8067_v29 = vld [vmem:[#allocation3 + $0x1b0] sm:$0xff] }
  0x31   :  { %740 = vmatpush.msra.mxu0 %v395_v59  ;;  %781 = vmatpush.msra.mxu2 %v581_v63  ;;  %11261 = vst [vmem:[#allocation15_spill] sm:$0xff] %v8031_v39  ;;  %v371_v59 = vunpack.c.l.bf16 %v8029_v38  ;;  %v8047_v63 = vld [vmem:[#allocation3 + $0x348] sm:$0xff]  ;;  %v8061_v38 = vld [vmem:[#allocation3 + $0x4b0] sm:$0xff] }
  0x32   :  { %760 = vmatpush.msra.mxu1 %v491_v60  ;;  %801 = vmatpush.msra.mxu3 %v677_v0  ;;  %11262 = vst [vmem:[#allocation16_spill] sm:$0xff] %v8037_v48  ;;  %v467_v60 = vunpack.c.l.bf16 %v8031_v39  ;;  %v8049_v0 = vld [vmem:[#allocation3 + $0x4c8] sm:$0xff]  ;;  %v8059_v39 = vld [vmem:[#allocation3 + $0x330] sm:$0xff] }
  0x33   :  { %741 = vmatpush.msra.mxu0 %v389_v6  ;;  %782 = vmatpush.msra.mxu2 %v575_v16  ;;  %11263 = vst [vmem:[#allocation17_spill] sm:$0xff] %v8041_v55  ;;  %v557_v6 = vunpack.c.l.bf16 %v8035_v47  ;;  %v8053_v16 = vld [vmem:[#allocation3 + $0x48] sm:$0xff] }
  0x34   :  { %761 = vmatpush.msra.mxu1 %v485_v10  ;;  %802 = vmatpush.msra.mxu3 %v671_v17  ;;  %11264 = vst [vmem:[#allocation18_spill] sm:$0xff] %v8043_v56  ;;  %v653_v10 = vunpack.c.l.bf16 %v8037_v48  ;;  %v8055_v17 = vld [vmem:[#allocation3 + $0x1c8] sm:$0xff]  ;;  %v8065_v48 = vld [vmem:[#allocation3 + $0x30] sm:$0xff] }
  0x35   :  { %742 = vmatpush.msra.mxu0 %v383_v23  ;;  %11265 = vst [vmem:[#allocation19_spill] sm:$0xff] %v8047_v63  ;;  %783 = vmatpush.msra.mxu2 %v569_v33  ;;  %v365_v23 = vunpack.c.l.bf16 %v8041_v55  ;;  %v551_v33 = vunpack.c.l.bf16 %v8047_v63  ;;  %v8073_v55 = vld [vmem:[#allocation3 + $0x498] sm:$0xff] }
  0x36   :  { %762 = vmatpush.msra.mxu1 %v479_v27  ;;  %11266 = vst [vmem:[#allocation20_spill] sm:$0xff] %v8049_v0  ;;  %803 = vmatpush.msra.mxu3 %v665_v34  ;;  %v461_v27 = vunpack.c.l.bf16 %v8043_v56  ;;  %v647_v34 = vunpack.c.l.bf16 %v8049_v0  ;;  %v8071_v56 = vld [vmem:[#allocation3 + $0x318] sm:$0xff] }
  0x37   :  { %11267 = vst [vmem:[#allocation21_spill] sm:$0xff] %v8053_v16  ;;  %743 = vmatpush.msra.mxu0 %v377_v42  ;;  %784 = vmatpush.msra.mxu2 %v563_v51  ;;  %v359_v42 = vunpack.c.l.bf16 %v8053_v16  ;;  %v545_v51 = vunpack.c.l.bf16 %v8059_v39  ;;  %v8077_v0 = vld [vmem:[#allocation3 + $0x18] sm:$0xff]  ;;  %v8085_v16 = vld [vmem:[#allocation3 + $0x480] sm:$0xff] }
  0x38   :  { %11268 = vst [vmem:[#allocation22_spill] sm:$0xff] %v8055_v17  ;;  %763 = vmatpush.msra.mxu1 %v473_v43  ;;  %804 = vmatpush.msra.mxu3 %v659_v52  ;;  %v455_v43 = vunpack.c.l.bf16 %v8055_v17  ;;  %v641_v52 = vunpack.c.l.bf16 %v8061_v38  ;;  %v8079_v63 = vld [vmem:[#allocation3 + $0x198] sm:$0xff]  ;;  %v8083_v17 = vld [vmem:[#allocation3 + $0x300] sm:$0xff] }
  0x39   :  { %11269 = vst [vmem:[#allocation23_spill] sm:$0xff] %v8061_v38  ;;  %744 = vmatpush.msra.mxu0 %v371_v59  ;;  %785 = vmatpush.msra.mxu2 %v557_v6  ;;  %v353_v59 = vunpack.c.l.bf16 %v8065_v48  ;;  %v539_v6 = vunpack.c.l.bf16 %v8071_v56  ;;  %v148_v38 = vld [vmem:[%s11274_s30] sm:$0xf]  ;;  %s11391_s30 = sld [smem:[#allocation45_spill]] }
  0x3a   :  { %11270 = vst [vmem:[#allocation24_spill] sm:$0xff] %v8065_v48  ;;  %764 = vmatpush.msra.mxu1 %v467_v60  ;;  %805 = vmatpush.msra.mxu3 %v653_v10  ;;  %v449_v60 = vunpack.c.l.bf16 %v8067_v29  ;;  %v635_v10 = vunpack.c.l.bf16 %v8073_v55  ;;  %v8098_v48 = vld [vmem:[#allocation3 + $0x180] sm:$0xff] }
  0x3b   :  { %11271 = vst [vmem:[#allocation25_spill] sm:$0xff] %v8067_v29  ;;  %745 = vmatpush.msra.mxu0 %v365_v23  ;;  %786 = vmatpush.msra.mxu2 %v551_v33  ;;  %v347_v23 = vunpack.c.l.bf16 %v8077_v0  ;;  %v533_v29 = vunpack.c.l.bf16 %v8083_v17  ;;  %v629_v33 = vunpack.c.l.bf16 %v8085_v16 }
  0x3c   :  { %11272 = vst [vmem:[#allocation26_spill] sm:$0xff] %v8073_v55  ;;  %765 = vmatpush.msra.mxu1 %v461_v27  ;;  %806 = vmatpush.msra.mxu3 %v647_v34  ;;  %v443_v27 = vunpack.c.l.bf16 %v8079_v63  ;;  %v8096_v34 = vld [vmem:[#allocation3] sm:$0xff]  ;;  %v8100_v55 = vperm.slane %v148_v38, 2 }
  0x3d   :  { %11273 = vst [vmem:[#allocation27_spill] sm:$0xff] %v8085_v16  ;;  %746 = vmatpush.msra.mxu0 %v359_v42  ;;  %787 = vmatpush.msra.mxu2 %v545_v51  ;;  %v8102_v42 = vperm.slane %v148_v38, 3  ;;  %v720_v51 = vunpack.c.h.bf16 %v7911_v3  ;;  %v437_v16 = vunpack.c.l.bf16 %v8098_v48  ;;  %v528_v3 = vunpack.c.h.bf16 %v7918_v8 }
  0x3e   :  { %766 = vmatpush.msra.mxu1 %v455_v43  ;;  %807 = vmatpush.msra.mxu3 %v641_v52  ;;  %v624_v43 = vunpack.c.h.bf16 %v7907_v1  ;;  %v341_v52 = vunpack.c.l.bf16 %v8096_v34  ;;  %v432_v1 = vunpack.c.h.bf16 %v7916_v7  ;;  %v708_v7 = vunpack.c.h.bf16 %v7936_v20 }
  0x3f   :  { %747 = vmatpush.msra.mxu0 %v353_v59  ;;  %788 = vmatpush.msra.mxu2 %v539_v6  ;;  %v618_v59 = vunpack.c.h.bf16 %v7909_v2  ;;  %v8113_v6 = vperm.slane %v148_v38, 1  ;;  %v714_v2 = vunpack.c.h.bf16 %v7924_v12  ;;  %v420_v8 = vunpack.c.h.bf16 %v7938_v21 }
  0x40   :  { %767 = vmatpush.msra.mxu1 %v449_v60  ;;  %808 = vmatpush.msra.mxu3 %v635_v10  ;;  %v8109_v60 = vperm.slane %v148_v38, 0  ;;  %v612_v10 = vunpack.c.h.bf16 %v7920_v9  ;;  %v522_v38 = vunpack.c.h.bf16 %v7928_v14  ;;  %v516_v9 = vunpack.c.h.bf16 %v7942_v24 }
  0x41   :  { %748 = vmatpush.msra.mxu0 %v347_v23  ;;  %789 = vmatpush.msra.mxu2 %v533_v29  ;;  %v426_v29 = vunpack.c.h.bf16 %v7926_v13  ;;  %v606_v23 = vunpack.c.h.bf16 %v7934_v19  ;;  %v600_v12 = vunpack.c.h.bf16 %v7944_v25  ;;  %v702_v13 = vunpack.c.h.bf16 %v7946_v26 }
  0x42   :  { %768 = vmatpush.msra.mxu1 %v443_v27  ;;  %809 = vmatpush.msra.mxu3 %v629_v33  ;;  %v414_v14 = vunpack.c.h.bf16 %v7951_v30  ;;  %v510_v19 = vunpack.c.h.bf16 %v7953_v31  ;;  %v594_v20 = vunpack.c.h.bf16 %v7955_v32  ;;  %v696_v21 = vunpack.c.h.bf16 %v7959_v35  ;;  %v11279_v33 = vld [vmem:[#allocation19_spill] sm:$0xff] }
  0x43   :  { %790 = vmatmul.f32.vlgmr.msra.gmra.mxu2 %v8100_v55  ;;  %810 = vmatmul.f32.vlgmr.msra.gmra.mxu3 %v8102_v42  ;;  %v408_v24 = vunpack.c.h.bf16 %v7961_v36  ;;  %v504_v25 = vunpack.c.h.bf16 %v7963_v37  ;;  %v588_v26 = vunpack.c.h.bf16 %v7973_v44  ;;  %v690_v30 = vunpack.c.h.bf16 %v7967_v40 }
  0x44   :  { %854 = vmatpush.msrb.mxu2 %v624_v43  ;;  %874 = vmatpush.msrb.mxu3 %v720_v51  ;;  %v402_v31 = vunpack.c.h.bf16 %v7969_v41  ;;  %v498_v32 = vunpack.c.h.bf16 %v7975_v45  ;;  %v582_v35 = vunpack.c.h.bf16 %v7987_v53  ;;  %v684_v36 = vunpack.c.h.bf16 %v7977_v46  ;;  %v11280_v51 = vld [vmem:[#allocation16_spill] sm:$0xff] }
  0x45   :  { %749 = vmatpush.msra.mxu0 %v341_v52  ;;  %769 = vmatpush.msra.mxu1 %v437_v16  ;;  %v396_v37 = vunpack.c.h.bf16 %v7981_v49  ;;  %v492_v44 = vunpack.c.h.bf16 %v7983_v50  ;;  %v576_v40 = vunpack.c.h.bf16 %v7999_v61  ;;  %v678_v41 = vunpack.c.h.bf16 %v7989_v54  ;;  %v11277_v16 = vld [vmem:[#allocation14_spill] sm:$0xff] }
  0x46   :  { %855 = vmatpush.msrb.mxu2 %v618_v59  ;;  %750 = vmatmul.f32.vlgmr.msra.gmra.mxu0 %v8109_v60  ;;  %v390_v45 = vunpack.c.h.bf16 %v7993_v57  ;;  %v486_v53 = vunpack.c.h.bf16 %v7995_v58  ;;  %v570_v46 = vunpack.c.h.bf16 %v8011_v11  ;;  %v672_v49 = vunpack.c.h.bf16 %v8001_v62  ;;  %v11275_v11 = vld [vmem:[#allocation13_spill] sm:$0xff] }
  0x47   :  { %770 = vmatmul.f32.vlgmr.msra.gmra.mxu1 %v8113_v6  ;;  %814 = vmatpush.msrb.mxu0 %v432_v1  ;;  %v384_v50 = vunpack.c.h.bf16 %v8005_v4  ;;  %v480_v61 = vunpack.c.h.bf16 %v8007_v5  ;;  %v564_v54 = vunpack.c.h.bf16 %v8023_v28  ;;  %v666_v57 = vunpack.c.h.bf16 %v8013_v15  ;;  %v7149_v15 = vld [vmem:[%s11276_s10 + $0x6] sm:$0x3] }
  0x48   :  { %834 = vmatpush.msrb.mxu1 %v528_v3  ;;  %856 = vmatpush.msrb.mxu2 %v612_v10  ;;  %v378_v58 = vunpack.c.h.bf16 %v8017_v18  ;;  %v474_v62 = vunpack.c.h.bf16 %v8019_v22  ;;  %v558_v4 = vunpack.c.h.bf16 %v8035_v47  ;;  %v660_v5 = vunpack.c.h.bf16 %v11275_v11  ;;  %v7147_v22 = vld [vmem:[%s11276_s10 + $0x2] sm:$0x3]  ;;  %v11278_v47 = vld [vmem:[#allocation15_spill] sm:$0xff]  ;;  %v11282_v3 = vld [vmem:[#allocation18_spill] sm:$0xff] }
  0x49   :  { %875 = vmatpush.msrb.mxu3 %v714_v2  ;;  %815 = vmatpush.msrb.mxu0 %v426_v29  ;;  %v11141_v28 = vmov 0   ;;  %v372_v18 = vunpack.c.h.bf16 %v11277_v16  ;;  %v468_v27 = vunpack.c.h.bf16 %v11278_v47  ;;  %v552_v43 = vunpack.c.h.bf16 %v11279_v33  ;;  %v11281_v59 = vld [vmem:[#allocation17_spill] sm:$0xff]  ;;  %v11283_v29 = vld [vmem:[#allocation20_spill] sm:$0xff]  ;;  %v8226_v16 = vld [vmem:[#allocation3 + $0x410] sm:$0xff] }
  0x4a   :  { %835 = vmatpush.msrb.mxu1 %v522_v38  ;;  %857 = vmatpush.msrb.mxu2 %v606_v23  ;;  %v654_v52 = vunpack.c.h.bf16 %v11280_v51  ;;  %v366_v1 = vunpack.c.h.bf16 %v11281_v59  ;;  %v462_v10 = vunpack.c.h.bf16 %v11282_v3  ;;  %v546_v2 = vunpack.c.h.bf16 %v8059_v39  ;;  %v11284_v23 = vld [vmem:[#allocation21_spill] sm:$0xff]  ;;  %v8238_v51 = vld [vmem:[#allocation3 + $0x2a8] sm:$0xff]  ;;  %v8244_v3 = vld [vmem:[#allocation3 + $0x590] sm:$0xff] }
  0x4b   :  { %876 = vmatpush.msrb.mxu3 %v708_v7  ;;  %816 = vmatpush.msrb.mxu0 %v420_v8  ;;  %v648_v38 = vunpack.c.h.bf16 %v11283_v29  ;;  %v360_v7 = vunpack.c.h.bf16 %v11284_v23  ;;  %v11285_v8 = vld [vmem:[#allocation22_spill] sm:$0xff]  ;;  %v11288_v39 = vld [vmem:[#allocation25_spill] sm:$0xff]  ;;  %v601_v59 = vunpack.c.l.bf16 %v8226_v16  ;;  %v8249_v29 = vld [vmem:[#allocation3 + $0x290] sm:$0xff] }
  0x4c   :  { %836 = vmatpush.msrb.mxu1 %v516_v9  ;;  %858 = vmatpush.msrb.mxu2 %v600_v12  ;;  %v456_v9 = vunpack.c.h.bf16 %v11285_v8  ;;  %v540_v12 = vunpack.c.h.bf16 %v8071_v56  ;;  %v7150_v56 = vld [vmem:[%s11276_s10 + $0x8] sm:$0x3]  ;;  %v7148_v23 = vld [vmem:[%s11276_s10 + $0x4] sm:$0x3] }
  0x4d   :  { %877 = vmatpush.msrb.mxu3 %v702_v13  ;;  %817 = vmatpush.msrb.mxu0 %v414_v14  ;;  %v11286_v13 = vld [vmem:[#allocation23_spill] sm:$0xff]  ;;  %v8222_v11 = vld [vmem:[#allocation3 + $0x2c0] sm:$0xff] }
  0x4e   :  { %837 = vmatpush.msrb.mxu1 %v510_v19  ;;  %859 = vmatpush.msrb.mxu2 %v594_v20  ;;  %v642_v14 = vunpack.c.h.bf16 %v11286_v13  ;;  %v11287_v19 = vld [vmem:[#allocation24_spill] sm:$0xff]  ;;  %v697_v13 = vunpack.c.l.bf16 %v8244_v3 }
  0x4f   :  { %878 = vmatpush.msrb.mxu3 %v696_v21  ;;  %818 = vmatpush.msrb.mxu0 %v408_v24  ;;  %v354_v20 = vunpack.c.h.bf16 %v11287_v19  ;;  %v450_v21 = vunpack.c.h.bf16 %v11288_v39  ;;  %v534_v24 = vunpack.c.h.bf16 %v8083_v17  ;;  %v8264_v19 = vld [vmem:[#allocation3 + $0x278] sm:$0xff]  ;;  %v505_v39 = vunpack.c.l.bf16 %v8249_v29 }
  0x50   :  { %838 = vmatpush.msrb.mxu1 %v504_v25  ;;  %860 = vmatpush.msrb.mxu2 %v588_v26  ;;  %v8180_v25 = vld [vmem:[#allocation3 + $0x470] sm:$0xff]  ;;  %v11289_v26 = vld [vmem:[#allocation26_spill] sm:$0xff] }
  0x51   :  { %879 = vmatpush.msrb.mxu3 %v690_v30  ;;  %819 = vmatpush.msrb.mxu0 %v402_v31  ;;  %v636_v30 = vunpack.c.h.bf16 %v11289_v26  ;;  %v348_v31 = vunpack.c.h.bf16 %v8077_v0  ;;  %v625_v17 = vunpack.c.l.bf16 %v8180_v25 }
  0x52   :  { %839 = vmatpush.msrb.mxu1 %v498_v32  ;;  %861 = vmatpush.msrb.mxu2 %v582_v35  ;;  %v8187_v32 = vld [vmem:[#allocation3 + $0x458] sm:$0xff]  ;;  %v444_v35 = vunpack.c.h.bf16 %v8079_v63 }
  0x53   :  { %880 = vmatpush.msrb.mxu3 %v684_v36  ;;  %820 = vmatpush.msrb.mxu0 %v396_v37  ;;  %v8191_v36 = vld [vmem:[#allocation3 + $0x5f0] sm:$0xff]  ;;  %v619_v0 = vunpack.c.l.bf16 %v8187_v32 }
  0x54   :  { %840 = vmatpush.msrb.mxu1 %v492_v44  ;;  %862 = vmatpush.msrb.mxu2 %v576_v40  ;;  %v11290_v37 = vld [vmem:[#allocation27_spill] sm:$0xff]  ;;  %v342_v40 = vunpack.c.h.bf16 %v8096_v34  ;;  %v721_v63 = vunpack.c.l.bf16 %v8191_v36  ;;  %v8207_v34 = vld [vmem:[#allocation3 + $0x158] sm:$0xff] }
  0x55   :  { %881 = vmatpush.msrb.mxu3 %v678_v41  ;;  %821 = vmatpush.msrb.mxu0 %v390_v45  ;;  %v630_v44 = vunpack.c.h.bf16 %v11290_v37  ;;  %v8196_v41 = vld [vmem:[#allocation3 + $0x170] sm:$0xff] }
  0x56   :  { %841 = vmatpush.msrb.mxu1 %v486_v53  ;;  %863 = vmatpush.msrb.mxu2 %v570_v46  ;;  %v8198_v45 = vld [vmem:[#allocation3 + $0x2f0] sm:$0xff]  ;;  %v438_v53 = vunpack.c.h.bf16 %v8098_v48  ;;  %v8203_v46 = vld [vmem:[#allocation3 + $0x440] sm:$0xff] }
  0x57   :  { %882 = vmatpush.msrb.mxu3 %v672_v49  ;;  %822 = vmatpush.msrb.mxu0 %v384_v50  ;;  %v8205_v49 = vld [vmem:[#allocation3 + $0x5d8] sm:$0xff]  ;;  %v613_v48 = vunpack.c.l.bf16 %v8203_v46  ;;  %v8280_v37 = vld [vmem:[#allocation3 + $0x3b0] sm:$0xff] }
  0x58   :  { %842 = vmatpush.msrb.mxu1 %v480_v61  ;;  %864 = vmatpush.msrb.mxu2 %v564_v54  ;;  %v8209_v50 = vld [vmem:[#allocation3 + $0x2d8] sm:$0xff]  ;;  %v433_v61 = vunpack.c.l.bf16 %v8196_v41  ;;  %v529_v54 = vunpack.c.l.bf16 %v8198_v45 }
  0x59   :  { %883 = vmatpush.msrb.mxu3 %v666_v57  ;;  %7581 = vset.pattern.permute.xlu1 %v11141_v28  ;;  %v8213_v57 = vld [vmem:[#allocation3 + $0x428] sm:$0xff] }
  0x5a   :  { %7580 = vset.pattern.permute.xlu0 %v11141_v28  ;;  %823 = vmatpush.msrb.mxu0 %v378_v58  ;;  %v8215_v58 = vld [vmem:[#allocation3 + $0x5c0] sm:$0xff]  ;;  %v8340_v28 = vld [vmem:[#allocation3 + $0x68] sm:$0xff] }
  0x5b   :  { %843 = vmatpush.msrb.mxu1 %v474_v62  ;;  %865 = vmatpush.msrb.mxu2 %v558_v4  ;;  %v715_v62 = vunpack.c.l.bf16 %v8205_v49  ;;  %v8220_v4 = vld [vmem:[#allocation3 + $0x140] sm:$0xff]  ;;  %v709_v47 = vunpack.c.l.bf16 %v8215_v58  ;;  %11299 = vst [vmem:[#allocation21_spill] sm:$0xff] %v8340_v28 }
  0x5c   :  { %884 = vmatpush.msrb.mxu3 %v660_v5  ;;  %1329 = vperm.xlu1 %7581, %v7149_v15   ;;  %v427_v5 = vunpack.c.l.bf16 %v8207_v34  ;;  %v523_v15 = vunpack.c.l.bf16 %v8209_v50  ;;  %v421_v33 = vunpack.c.l.bf16 %v8220_v4 }
  0x5d   :  { %1245 = vperm.xlu0 %7580, %v7147_v22   ;;  %824 = vmatpush.msrb.mxu0 %v372_v18  ;;  %v8228_v18 = vld [vmem:[#allocation3 + $0x5a8] sm:$0xff]  ;;  %v607_v22 = vunpack.c.l.bf16 %v8213_v57 }
  0x5e   :  { %844 = vmatpush.msrb.mxu1 %v468_v27  ;;  %866 = vmatpush.msrb.mxu2 %v552_v43  ;;  %v8234_v27 = vld [vmem:[#allocation3 + $0x128] sm:$0xff]  ;;  %v517_v43 = vunpack.c.l.bf16 %v8222_v11 }
  0x5f   :  { %885 = vmatpush.msrb.mxu3 %v654_v52  ;;  %825 = vmatpush.msrb.mxu0 %v366_v1  ;;  %v8240_v52 = vld [vmem:[#allocation3 + $0x3f8] sm:$0xff]  ;;  %v703_v1 = vunpack.c.l.bf16 %v8228_v18 }
  0x60   :  { %845 = vmatpush.msrb.mxu1 %v462_v10  ;;  %867 = vmatpush.msrb.mxu2 %v546_v2  ;;  %v8246_v10 = vld [vmem:[#allocation3 + $0x110] sm:$0xff]  ;;  %v415_v2 = vunpack.c.l.bf16 %v8234_v27  ;;  %v595_v8 = vunpack.c.l.bf16 %v8240_v52 }
  0x61   :  { %886 = vmatpush.msrb.mxu3 %v648_v38  ;;  %826 = vmatpush.msrb.mxu0 %v360_v7  ;;  %v8251_v38 = vld [vmem:[#allocation3 + $0x3e0] sm:$0xff]  ;;  %v511_v7 = vunpack.c.l.bf16 %v8238_v51 }
  0x62   :  { %846 = vmatpush.msrb.mxu1 %v456_v9  ;;  %868 = vmatpush.msrb.mxu2 %v540_v12  ;;  %v8258_v9 = vld [vmem:[#allocation3 + $0x578] sm:$0xff] }
  0x63   :  { %887 = vmatpush.msrb.mxu3 %v642_v14  ;;  %827 = vmatpush.msrb.mxu0 %v354_v20  ;;  %v8260_v12 = vld [vmem:[#allocation3 + $0xf8] sm:$0xff]  ;;  %v409_v14 = vunpack.c.l.bf16 %v8246_v10  ;;  %v8266_v20 = vld [vmem:[#allocation3 + $0x3c8] sm:$0xff]  ;;  %v691_v26 = vunpack.c.l.bf16 %v8258_v9 }
  0x64   :  { %847 = vmatpush.msrb.mxu1 %v450_v21  ;;  %869 = vmatpush.msrb.mxu2 %v534_v24  ;;  %v589_v21 = vunpack.c.l.bf16 %v8251_v38  ;;  %v8270_v24 = vld [vmem:[#allocation3 + $0x560] sm:$0xff] }
  0x65   :  { %888 = vmatpush.msrb.mxu3 %v636_v30  ;;  %1371 = vperm.xlu1 %7581, %v7150_v56   ;;  %v403_v30 = vunpack.c.l.bf16 %v8260_v12  ;;  %v8274_v56 = vld [vmem:[#allocation3 + $0xe0] sm:$0xff] }
  0x66   :  { %870 = vmatmul.f32.vlgmr.msrb.gmra.mxu2 %v8100_v55  ;;  %828 = vmatpush.msrb.mxu0 %v348_v31  ;;  %v8276_v31 = vld [vmem:[#allocation3 + $0x260] sm:$0xff] }
  0x67   :  { %934 = vmatpush.msra.mxu2 %v625_v17  ;;  %848 = vmatpush.msrb.mxu1 %v444_v35  ;;  %v499_v17 = vunpack.c.l.bf16 %v8264_v19  ;;  %v583_v35 = vunpack.c.l.bf16 %v8266_v20 }
  0x68   :  { %889 = vmatpush.msrb.mxu3 %v630_v44  ;;  %829 = vmatpush.msrb.mxu0 %v342_v40  ;;  %v8282_v44 = vld [vmem:[#allocation3 + $0x548] sm:$0xff]  ;;  %v685_v40 = vunpack.c.l.bf16 %v8270_v24 }
  0x69   :  { %890 = vmatmul.f32.vlgmr.msrb.gmra.mxu3 %v8102_v42  ;;  %935 = vmatpush.msra.mxu2 %v619_v0  ;;  %v8285_v0 = vld [vmem:[#allocation3 + $0xc8] sm:$0xff] }
  0x6a   :  { %954 = vmatpush.msra.mxu3 %v721_v63  ;;  %849 = vmatpush.msrb.mxu1 %v438_v53  ;;  %v7154_v63 = vld [vmem:[%s11276_s10 + $0x10] sm:$0x3]  ;;  %v397_v53 = vunpack.c.l.bf16 %v8274_v56 }
  0x6b   :  { %830 = vmatmul.f32.vlgmr.msrb.gmra.mxu0 %v8109_v60  ;;  %850 = vmatmul.f32.vlgmr.msrb.gmra.mxu1 %v8113_v6 }
  0x6c   :  { %894 = vmatpush.msra.mxu0 %v433_v61  ;;  %914 = vmatpush.msra.mxu1 %v529_v54  ;;  %v493_v61 = vunpack.c.l.bf16 %v8276_v31  ;;  %v8292_v54 = vld [vmem:[#allocation3 + $0x248] sm:$0xff] }
  0x6d   :  { %936 = vmatpush.msra.mxu2 %v613_v48  ;;  %955 = vmatpush.msra.mxu3 %v715_v62  ;;  %v8294_v48 = vld [vmem:[#allocation3 + $0x398] sm:$0xff]  ;;  %v577_v62 = vunpack.c.l.bf16 %v8280_v37 }
  0x6e   :  { %895 = vmatpush.msra.mxu0 %v427_v5  ;;  %915 = vmatpush.msra.mxu1 %v523_v15  ;;  %v679_v5 = vunpack.c.l.bf16 %v8282_v44  ;;  %v8298_v15 = vld [vmem:[#allocation3 + $0x530] sm:$0xff] }
  0x6f   :  { %937 = vmatpush.msra.mxu2 %v607_v22  ;;  %956 = vmatpush.msra.mxu3 %v709_v47  ;;  %v8300_v22 = vld [vmem:[#allocation3 + $0xb0] sm:$0xff]  ;;  %v391_v47 = vunpack.c.l.bf16 %v8285_v0 }
  0x70   :  { %896 = vmatpush.msra.mxu0 %v421_v33  ;;  %916 = vmatpush.msra.mxu1 %v517_v43  ;;  %v8303_v33 = vld [vmem:[#allocation3 + $0x230] sm:$0xff]  ;;  %v8305_v43 = vld [vmem:[#allocation3 + $0x380] sm:$0xff] }
  0x71   :  { %938 = vmatpush.msra.mxu2 %v601_v59  ;;  %957 = vmatpush.msra.mxu3 %v703_v1  ;;  %v7153_v59 = vld [vmem:[%s11276_s10 + $0xe] sm:$0x3]  ;;  %v487_v1 = vunpack.c.l.bf16 %v8292_v54 }
  0x72   :  { %1287 = vperm.xlu0 %7580, %v7148_v23   ;;  %897 = vmatpush.msra.mxu0 %v415_v2  ;;  %v571_v2 = vunpack.c.l.bf16 %v8294_v48  ;;  %v8312_v23 = vld [vmem:[#allocation3 + $0x518] sm:$0xff] }
  0x73   :  { %917 = vmatpush.msra.mxu1 %v511_v7  ;;  %939 = vmatpush.msra.mxu2 %v595_v8  ;;  %v8314_v7 = vld [vmem:[#allocation3 + $0x98] sm:$0xff]  ;;  %v673_v8 = vunpack.c.l.bf16 %v8298_v15 }
  0x74   :  { %958 = vmatpush.msra.mxu3 %v697_v13  ;;  %898 = vmatpush.msra.mxu0 %v409_v14  ;;  %11291 = vst [vmem:[#allocation13_spill] sm:$0xff] %v8314_v7  ;;  %v385_v13 = vunpack.c.l.bf16 %v8300_v22  ;;  %v8318_v14 = vld [vmem:[#allocation3 + $0x218] sm:$0xff] }
  0x75   :  { %918 = vmatpush.msra.mxu1 %v505_v39  ;;  %940 = vmatpush.msra.mxu2 %v589_v21  ;;  %11292 = vst [vmem:[#allocation14_spill] sm:$0xff] %v8318_v14  ;;  %v8320_v39 = vld [vmem:[#allocation3 + $0x368] sm:$0xff]  ;;  %v481_v21 = vunpack.c.l.bf16 %v8303_v33 }
  0x76   :  { %959 = vmatpush.msra.mxu3 %v691_v26  ;;  %899 = vmatpush.msra.mxu0 %v403_v30  ;;  %11293 = vst [vmem:[#allocation15_spill] sm:$0xff] %v8320_v39  ;;  %v565_v26 = vunpack.c.l.bf16 %v8305_v43  ;;  %v8324_v30 = vld [vmem:[#allocation3 + $0x500] sm:$0xff] }
  0x77   :  { %919 = vmatpush.msra.mxu1 %v499_v17  ;;  %941 = vmatpush.msra.mxu2 %v583_v35  ;;  %11294 = vst [vmem:[#allocation19_spill] sm:$0xff] %v8324_v30  ;;  %v8326_v17 = vld [vmem:[#allocation3 + $0x80] sm:$0xff]  ;;  %v667_v35 = vunpack.c.l.bf16 %v8312_v23 }
  0x78   :  { %960 = vmatpush.msra.mxu3 %v685_v40  ;;  %1550 = vperm.xlu1 %7581, %v7154_v63   ;;  %11295 = vst [vmem:[#allocation16_spill] sm:$0xff] %v8326_v17  ;;  %v379_v40 = vunpack.c.l.bf16 %v8314_v7  ;;  %v8330_v63 = vld [vmem:[#allocation3 + $0x200] sm:$0xff]  ;;  %v8342_v7 = vld [vmem:[#allocation3 + $0x1e8] sm:$0xff] }
  0x79   :  { %900 = vmatpush.msra.mxu0 %v397_v53  ;;  %920 = vmatpush.msra.mxu1 %v493_v61  ;;  %11296 = vst [vmem:[#allocation17_spill] sm:$0xff] %v8330_v63  ;;  %v8332_v53 = vld [vmem:[#allocation3 + $0x350] sm:$0xff]  ;;  %v475_v61 = vunpack.c.l.bf16 %v8318_v14  ;;  %v8346_v14 = vld [vmem:[#allocation3 + $0x338] sm:$0xff] }
  0x7a   :  { %942 = vmatpush.msra.mxu2 %v577_v62  ;;  %961 = vmatpush.msra.mxu3 %v679_v5  ;;  %11297 = vst [vmem:[#allocation18_spill] sm:$0xff] %v8332_v53  ;;  %v559_v62 = vunpack.c.l.bf16 %v8320_v39  ;;  %v8336_v5 = vld [vmem:[#allocation3 + $0x4e8] sm:$0xff]  ;;  %v8348_v39 = vld [vmem:[#allocation3 + $0x4d0] sm:$0xff] }
  0x7b   :  { %1503 = vperm.xlu0 %7580, %v7153_v59   ;;  %901 = vmatpush.msra.mxu0 %v391_v47  ;;  %11298 = vst [vmem:[#allocation20_spill] sm:$0xff] %v8336_v5  ;;  %v661_v47 = vunpack.c.l.bf16 %v8324_v30  ;;  %v373_v59 = vunpack.c.l.bf16 %v8326_v17  ;;  %v8353_v17 = vld [vmem:[#allocation3 + $0x1d0] sm:$0xff]  ;;  %v8370_v30 = vld [vmem:[#allocation3 + $0x1b8] sm:$0xff] }
  0x7c   :  { %921 = vmatpush.msra.mxu1 %v487_v1  ;;  %943 = vmatpush.msra.mxu2 %v571_v2  ;;  %11300 = vst [vmem:[#allocation22_spill] sm:$0xff] %v8342_v7  ;;  %v469_v1 = vunpack.c.l.bf16 %v8330_v63  ;;  %v553_v2 = vunpack.c.l.bf16 %v8332_v53  ;;  %v463_v53 = vunpack.c.l.bf16 %v8342_v7  ;;  %v8360_v63 = vld [vmem:[#allocation3 + $0x320] sm:$0xff]  ;;  %v8372_v7 = vld [vmem:[#allocation3 + $0x308] sm:$0xff] }
  0x7d   :  { %962 = vmatpush.msra.mxu3 %v673_v8  ;;  %902 = vmatpush.msra.mxu0 %v385_v13  ;;  %11301 = vst [vmem:[#allocation23_spill] sm:$0xff] %v8346_v14  ;;  %v655_v8 = vunpack.c.l.bf16 %v8336_v5  ;;  %v8351_v13 = vld [vmem:[#allocation3 + $0x50] sm:$0xff]  ;;  %v649_v5 = vunpack.c.l.bf16 %v8348_v39 }
  0x7e   :  { %922 = vmatpush.msra.mxu1 %v481_v21  ;;  %944 = vmatpush.msra.mxu2 %v565_v26  ;;  %11302 = vst [vmem:[#allocation24_spill] sm:$0xff] %v8351_v13  ;;  %v1214_v21 = vld [vmem:[%s11304_s9] sm:$0x3]  ;;  %v367_v26 = vunpack.c.l.bf16 %v8340_v28  ;;  %v457_v28 = vunpack.c.l.bf16 %v8353_v17  ;;  %s7746_s9 = smov 117  }
  0x7f   :  { %963 = vmatpush.msra.mxu3 %v667_v35  ;;  %903 = vmatpush.msra.mxu0 %v379_v40  ;;  %11303 = vst [vmem:[#allocation25_spill] sm:$0xff] %v8353_v17  ;;  %v8362_v35 = vld [vmem:[#allocation3 + $0x4b8] sm:$0xff]  ;;  %v547_v40 = vunpack.c.l.bf16 %v8346_v14  ;;  %v8376_v14 = vld [vmem:[#allocation3 + $0x4a0] sm:$0xff]  ;;  %v451_v17 = vunpack.c.l.bf16 %v8370_v30 }
  0x80   :  { %923 = vmatpush.msra.mxu1 %v475_v61  ;;  %945 = vmatpush.msra.mxu2 %v559_v62  ;;  %11305 = vst [vmem:[#allocation26_spill] sm:$0xff] %v8362_v35  ;;  %v8366_v61 = vld [vmem:[#allocation3 + $0x38] sm:$0xff]  ;;  %v361_v62 = vunpack.c.l.bf16 %v8351_v13  ;;  %v535_v13 = vunpack.c.l.bf16 %v8372_v7 }
  0x81   :  { %964 = vmatpush.msra.mxu3 %v661_v47  ;;  %904 = vmatpush.msra.mxu0 %v373_v59  ;;  %11306 = vst [vmem:[#allocation27_spill] sm:$0xff] %v8372_v7  ;;  %v541_v47 = vunpack.c.l.bf16 %v8360_v63  ;;  %v643_v59 = vunpack.c.l.bf16 %v8362_v35  ;;  %v8386_v35 = vld [vmem:[#allocation3 + $0x488] sm:$0xff]  ;;  %v620_v7 = vunpack.c.h.bf16 %v8187_v32  ;;  %v614_v32 = vunpack.c.h.bf16 %v8203_v46 }
  0x82   :  { %924 = vmatpush.msra.mxu1 %v469_v1  ;;  %946 = vmatpush.msra.mxu2 %v553_v2  ;;  %11307 = vst [vmem:[#allocation28_spill] sm:$0xff] %v8376_v14  ;;  %v355_v1 = vunpack.c.l.bf16 %v8366_v61  ;;  %v8379_v2 = vld [vmem:[#allocation3 + $0x20] sm:$0xff]  ;;  %v422_v46 = vunpack.c.h.bf16 %v8220_v4  ;;  %v512_v4 = vunpack.c.h.bf16 %v8238_v51  ;;  %v404_v51 = vunpack.c.h.bf16 %v8260_v12 }
  0x83   :  { %965 = vmatpush.msra.mxu3 %v655_v8  ;;  %1233 = vperm.xlu0 %7580, %v1214_v21   ;;  %v8383_v8 = vld [vmem:[#allocation3 + $0x1a0] sm:$0xff]  ;;  %v637_v21 = vunpack.c.l.bf16 %v8376_v14  ;;  %v8397_v14 = vld [vmem:[#allocation3 + $0x188] sm:$0xff]  ;;  %v578_v12 = vunpack.c.h.bf16 %v8280_v37  ;;  %v482_v37 = vunpack.c.h.bf16 %v8303_v33  ;;  %v11313_v33 = vld [vmem:[#allocation16_spill] sm:$0xff] }
  0x84   :  { %905 = vmatpush.msra.mxu0 %v367_v26  ;;  %925 = vmatpush.msra.mxu1 %v463_v53  ;;  %v8388_v26 = vld [vmem:[#allocation3 + $0x8] sm:$0xff] }
  0x85   :  { %947 = vmatpush.msra.mxu2 %v547_v40  ;;  %966 = vmatpush.msra.mxu3 %v649_v5  ;;  %v7151_v53 = vld [vmem:[%s11276_s10 + $0xa] sm:$0x3]  ;;  %v349_v5 = vunpack.c.l.bf16 %v8379_v2  ;;  %v11308_v40 = vmov 0  }
  0x86   :  { %906 = vmatpush.msra.mxu0 %v361_v62  ;;  %926 = vmatpush.msra.mxu1 %v457_v28  ;;  %v626_v62 = vunpack.c.h.bf16 %v8180_v25  ;;  %v445_v28 = vunpack.c.l.bf16 %v8383_v8  ;;  %v439_v25 = vunpack.c.l.bf16 %v8397_v14 }
  0x87   :  { %948 = vmatpush.msra.mxu2 %v541_v47  ;;  %967 = vmatpush.msra.mxu3 %v643_v59  ;;  %v631_v47 = vunpack.c.l.bf16 %v8386_v35  ;;  %v343_v59 = vunpack.c.l.bf16 %v8388_v26 }
  0x88   :  { %7582 = vset.pattern.permute.xlu2 %v11308_v40  ;;  %907 = vmatpush.msra.mxu0 %v355_v1  ;;  %v722_v1 = vunpack.c.h.bf16 %v8191_v36  ;;  %v428_v36 = vunpack.c.h.bf16 %v8207_v34  ;;  %v518_v34 = vunpack.c.h.bf16 %v8222_v11  ;;  %v410_v11 = vunpack.c.h.bf16 %v8246_v10 }
  0x89   :  { %927 = vmatpush.msra.mxu1 %v451_v17  ;;  %949 = vmatpush.msra.mxu2 %v535_v13  ;;  %v434_v17 = vunpack.c.h.bf16 %v8196_v41  ;;  %v530_v13 = vunpack.c.h.bf16 %v8198_v45  ;;  %v608_v41 = vunpack.c.h.bf16 %v8213_v57  ;;  %v710_v45 = vunpack.c.h.bf16 %v8215_v58 }
  0x8a   :  { %968 = vmatpush.msra.mxu3 %v637_v21  ;;  %1413 = vperm.xlu2 %7582, %v7151_v53   ;;  %v716_v21 = vunpack.c.h.bf16 %v8205_v49  ;;  %v524_v53 = vunpack.c.h.bf16 %v8209_v50  ;;  %v7152_v49 = vld [vmem:[%s11276_s10 + $0xc] sm:$0x3]  ;;  %v602_v50 = vunpack.c.h.bf16 %v8226_v16  ;;  %v704_v57 = vunpack.c.h.bf16 %v8228_v18 }
  0x8b   :  { %950 = vmatmul.f32.vlgmr.msra.gmra.mxu2 %v8100_v55  ;;  %908 = vmatpush.msra.mxu0 %v349_v5  ;;  %v416_v58 = vunpack.c.h.bf16 %v8234_v27  ;;  %v698_v5 = vunpack.c.h.bf16 %v8244_v3  ;;  %v506_v16 = vunpack.c.h.bf16 %v8249_v29  ;;  %v590_v18 = vunpack.c.h.bf16 %v8251_v38  ;;  %v1215_v29 = vld [vmem:[%s11276_s10] sm:$0x3]  ;;  %s7736_s10 = smov 127  }
  0x8c   :  { %1014 = vmatpush.msrb.mxu2 %v626_v62  ;;  %928 = vmatpush.msra.mxu1 %v445_v28  ;;  %v692_v27 = vunpack.c.h.bf16 %v8258_v9  ;;  %v584_v3 = vunpack.c.h.bf16 %v8266_v20  ;;  %v686_v10 = vunpack.c.h.bf16 %v8270_v24  ;;  %v398_v38 = vunpack.c.h.bf16 %v8274_v56  ;;  %v11310_v28 = vld [vmem:[#allocation14_spill] sm:$0xff] }
  0x8d   :  { %969 = vmatpush.msra.mxu3 %v631_v47  ;;  %909 = vmatpush.msra.mxu0 %v343_v59  ;;  %v494_v9 = vunpack.c.h.bf16 %v8276_v31  ;;  %v392_v20 = vunpack.c.h.bf16 %v8285_v0  ;;  %v488_v24 = vunpack.c.h.bf16 %v8292_v54  ;;  %v572_v40 = vunpack.c.h.bf16 %v8294_v48  ;;  %v11309_v54 = vld [vmem:[#allocation13_spill] sm:$0xff]  ;;  %v11312_v59 = vld [vmem:[#allocation19_spill] sm:$0xff] }
  0x8e   :  { %970 = vmatmul.f32.vlgmr.msra.gmra.mxu3 %v8102_v42  ;;  %1015 = vmatpush.msrb.mxu2 %v620_v7  ;;  %v596_v7 = vunpack.c.h.bf16 %v8240_v52  ;;  %v500_v52 = vunpack.c.h.bf16 %v8264_v19  ;;  %v680_v19 = vunpack.c.h.bf16 %v8282_v44  ;;  %v674_v56 = vunpack.c.h.bf16 %v8298_v15  ;;  %v11311_v15 = vld [vmem:[#allocation15_spill] sm:$0xff] }
  0x8f   :  { %1034 = vmatpush.msrb.mxu3 %v722_v1  ;;  %929 = vmatpush.msra.mxu1 %v439_v25  ;;  %v386_v31 = vunpack.c.h.bf16 %v8300_v22  ;;  %v566_v44 = vunpack.c.h.bf16 %v8305_v43  ;;  %v668_v0 = vunpack.c.h.bf16 %v8312_v23  ;;  %v380_v62 = vunpack.c.h.bf16 %v11309_v54  ;;  %v11314_v25 = vld [vmem:[#allocation17_spill] sm:$0xff]  ;;  %v11315_v23 = vld [vmem:[#allocation18_spill] sm:$0xff] }
  0x90   :  { %910 = vmatmul.f32.vlgmr.msra.gmra.mxu0 %v8109_v60  ;;  %930 = vmatmul.f32.vlgmr.msra.gmra.mxu1 %v8113_v6  ;;  %v476_v48 = vunpack.c.h.bf16 %v11310_v28  ;;  %v560_v47 = vunpack.c.h.bf16 %v11311_v15  ;;  %v662_v22 = vunpack.c.h.bf16 %v11312_v59  ;;  %v374_v1 = vunpack.c.h.bf16 %v11313_v33  ;;  %v8508_v54 = vld [vmem:[#allocation3 + $0x2c8] sm:$0xff]  ;;  %v8514_v15 = vld [vmem:[#allocation3 + $0x5b0] sm:$0xff] }
  0x91   :  { %974 = vmatpush.msrb.mxu0 %v434_v17  ;;  %994 = vmatpush.msrb.mxu1 %v530_v13  ;;  %v470_v43 = vunpack.c.h.bf16 %v11314_v25  ;;  %v554_v17 = vunpack.c.h.bf16 %v11315_v23  ;;  %v11316_v13 = vld [vmem:[#allocation20_spill] sm:$0xff]  ;;  %v8522_v33 = vld [vmem:[#allocation3 + $0x2b0] sm:$0xff]  ;;  %v519_v25 = vunpack.c.l.bf16 %v8508_v54 }
  0x92   :  { %1016 = vmatpush.msrb.mxu2 %v614_v32  ;;  %1035 = vmatpush.msrb.mxu3 %v716_v21  ;;  %v656_v32 = vunpack.c.h.bf16 %v11316_v13  ;;  %v11317_v21 = vld [vmem:[#allocation21_spill] sm:$0xff]  ;;  %v8528_v23 = vld [vmem:[#allocation3 + $0x598] sm:$0xff]  ;;  %v705_v13 = vunpack.c.l.bf16 %v8514_v15 }
  0x93   :  { %975 = vmatpush.msrb.mxu0 %v428_v36  ;;  %995 = vmatpush.msrb.mxu1 %v524_v53  ;;  %v368_v36 = vunpack.c.h.bf16 %v11317_v21  ;;  %v11318_v53 = vld [vmem:[#allocation22_spill] sm:$0xff]  ;;  %v8534_v21 = vld [vmem:[#allocation3 + $0x298] sm:$0xff] }
  0x94   :  { %1017 = vmatpush.msrb.mxu2 %v608_v41  ;;  %1036 = vmatpush.msrb.mxu3 %v710_v45  ;;  %v464_v41 = vunpack.c.h.bf16 %v11318_v53  ;;  %v11319_v45 = vld [vmem:[#allocation23_spill] sm:$0xff]  ;;  %v513_v53 = vunpack.c.l.bf16 %v8522_v33 }
  0x95   :  { %1455 = vperm.xlu2 %7582, %v7152_v49   ;;  %976 = vmatpush.msrb.mxu0 %v422_v46  ;;  %v548_v46 = vunpack.c.h.bf16 %v11319_v45  ;;  %v650_v49 = vunpack.c.h.bf16 %v8348_v39  ;;  %v11323_v39 = vld [vmem:[#allocation27_spill] sm:$0xff]  ;;  %v8540_v45 = vld [vmem:[#allocation3 + $0x580] sm:$0xff] }
  0x96   :  { %996 = vmatpush.msrb.mxu1 %v518_v34  ;;  %1018 = vmatpush.msrb.mxu2 %v602_v50  ;;  %v11320_v34 = vld [vmem:[#allocation24_spill] sm:$0xff] }
  0x97   :  { %1037 = vmatpush.msrb.mxu3 %v704_v57  ;;  %977 = vmatpush.msrb.mxu0 %v416_v58  ;;  %v362_v50 = vunpack.c.h.bf16 %v11320_v34  ;;  %v11321_v57 = vld [vmem:[#allocation25_spill] sm:$0xff] }
  0x98   :  { %997 = vmatpush.msrb.mxu1 %v512_v4  ;;  %1019 = vmatpush.msrb.mxu2 %v596_v7  ;;  %v458_v58 = vunpack.c.h.bf16 %v11321_v57  ;;  %v542_v4 = vunpack.c.h.bf16 %v8360_v63  ;;  %v11322_v7 = vld [vmem:[#allocation26_spill] sm:$0xff]  ;;  %v350_v63 = vunpack.c.h.bf16 %v8379_v2  ;;  %v8544_v34 = vld [vmem:[#allocation3 + $0x100] sm:$0xff] }
  0x99   :  { %1038 = vmatpush.msrb.mxu3 %v698_v5  ;;  %978 = vmatpush.msrb.mxu0 %v410_v11  ;;  %v644_v5 = vunpack.c.h.bf16 %v11322_v7  ;;  %v356_v11 = vunpack.c.h.bf16 %v8366_v61  ;;  %v8552_v7 = vld [vmem:[#allocation3 + $0x568] sm:$0xff] }
  0x9a   :  { %998 = vmatpush.msrb.mxu1 %v506_v16  ;;  %1020 = vmatpush.msrb.mxu2 %v590_v18  ;;  %v452_v16 = vunpack.c.h.bf16 %v8370_v30  ;;  %v8468_v18 = vld [vmem:[#allocation3 + $0x478] sm:$0xff]  ;;  %v446_v30 = vunpack.c.h.bf16 %v8383_v8 }
  0x9b   :  { %1039 = vmatpush.msrb.mxu3 %v692_v27  ;;  %979 = vmatpush.msrb.mxu0 %v404_v51  ;;  %v536_v27 = vunpack.c.h.bf16 %v11323_v39  ;;  %v11324_v51 = vld [vmem:[#allocation28_spill] sm:$0xff]  ;;  %v627_v61 = vunpack.c.l.bf16 %v8468_v18  ;;  %v8558_v39 = vld [vmem:[#allocation3 + $0x268] sm:$0xff] }
  0x9c   :  { %999 = vmatpush.msrb.mxu1 %v500_v52  ;;  %1021 = vmatpush.msrb.mxu2 %v584_v3  ;;  %v638_v52 = vunpack.c.h.bf16 %v11324_v51  ;;  %v8473_v3 = vld [vmem:[#allocation3 + $0x460] sm:$0xff] }
  0x9d   :  { %1040 = vmatpush.msrb.mxu3 %v686_v10  ;;  %1218 = vperm.xlu2 %7582, %v1215_v29   ;;  %v8477_v10 = vld [vmem:[#allocation3 + $0x5f8] sm:$0xff]  ;;  %v632_v29 = vunpack.c.h.bf16 %v8386_v35  ;;  %v621_v2 = vunpack.c.l.bf16 %v8473_v3  ;;  %v8491_v35 = vld [vmem:[#allocation3 + $0x5e0] sm:$0xff] }
  0x9e   :  { %980 = vmatpush.msrb.mxu0 %v398_v38  ;;  %1000 = vmatpush.msrb.mxu1 %v494_v9  ;;  %v344_v38 = vunpack.c.h.bf16 %v8388_v26  ;;  %v8482_v9 = vld [vmem:[#allocation3 + $0x178] sm:$0xff]  ;;  %v723_v8 = vunpack.c.l.bf16 %v8477_v10  ;;  %v8493_v26 = vld [vmem:[#allocation3 + $0x160] sm:$0xff] }
  0x9f   :  { %1022 = vmatpush.msrb.mxu2 %v578_v12  ;;  %1041 = vmatpush.msrb.mxu3 %v680_v19  ;;  %v8484_v12 = vld [vmem:[#allocation3 + $0x2f8] sm:$0xff]  ;;  %v440_v19 = vunpack.c.h.bf16 %v8397_v14 }
  0xa0   :  { %981 = vmatpush.msrb.mxu0 %v392_v20  ;;  %1001 = vmatpush.msrb.mxu1 %v488_v24  ;;  %v8489_v20 = vld [vmem:[#allocation3 + $0x448] sm:$0xff]  ;;  %v8495_v24 = vld [vmem:[#allocation3 + $0x2e0] sm:$0xff] }
  0xa1   :  { %1023 = vmatpush.msrb.mxu2 %v572_v40  ;;  %1042 = vmatpush.msrb.mxu3 %v674_v56  ;;  %v435_v40 = vunpack.c.l.bf16 %v8482_v9  ;;  %v531_v56 = vunpack.c.l.bf16 %v8484_v12  ;;  %v615_v14 = vunpack.c.l.bf16 %v8489_v20  ;;  %v525_v28 = vunpack.c.l.bf16 %v8495_v24 }
  0xa2   :  { %982 = vmatpush.msrb.mxu0 %v386_v31  ;;  %1002 = vmatpush.msrb.mxu1 %v482_v37  ;;  %v8499_v31 = vld [vmem:[#allocation3 + $0x430] sm:$0xff]  ;;  %v8501_v37 = vld [vmem:[#allocation3 + $0x5c8] sm:$0xff] }
  0xa3   :  { %1024 = vmatpush.msrb.mxu2 %v566_v44  ;;  %1043 = vmatpush.msrb.mxu3 %v668_v0  ;;  %v717_v44 = vunpack.c.l.bf16 %v8491_v35  ;;  %v8506_v0 = vld [vmem:[#allocation3 + $0x148] sm:$0xff]  ;;  %v711_v59 = vunpack.c.l.bf16 %v8501_v37 }
  0xa4   :  { %983 = vmatpush.msrb.mxu0 %v380_v62  ;;  %1003 = vmatpush.msrb.mxu1 %v476_v48  ;;  %v429_v62 = vunpack.c.l.bf16 %v8493_v26  ;;  %v8512_v48 = vld [vmem:[#allocation3 + $0x418] sm:$0xff] }
  0xa5   :  { %1025 = vmatpush.msrb.mxu2 %v560_v47  ;;  %1044 = vmatpush.msrb.mxu3 %v662_v22  ;;  %v609_v47 = vunpack.c.l.bf16 %v8499_v31  ;;  %v8520_v22 = vld [vmem:[#allocation3 + $0x130] sm:$0xff] }
  0xa6   :  { %984 = vmatpush.msrb.mxu0 %v374_v1  ;;  %1004 = vmatpush.msrb.mxu1 %v470_v43  ;;  %v423_v1 = vunpack.c.l.bf16 %v8506_v0  ;;  %v8526_v43 = vld [vmem:[#allocation3 + $0x400] sm:$0xff] }
  0xa7   :  { %1026 = vmatpush.msrb.mxu2 %v554_v17  ;;  %1045 = vmatpush.msrb.mxu3 %v656_v32  ;;  %v603_v17 = vunpack.c.l.bf16 %v8512_v48  ;;  %v8532_v32 = vld [vmem:[#allocation3 + $0x118] sm:$0xff] }
  0xa8   :  { %985 = vmatpush.msrb.mxu0 %v368_v36  ;;  %1005 = vmatpush.msrb.mxu1 %v464_v41  ;;  %v417_v36 = vunpack.c.l.bf16 %v8520_v22  ;;  %v8538_v41 = vld [vmem:[#allocation3 + $0x3e8] sm:$0xff]  ;;  %v411_v57 = vunpack.c.l.bf16 %v8532_v32 }
  0xa9   :  { %1027 = vmatpush.msrb.mxu2 %v548_v46  ;;  %1046 = vmatpush.msrb.mxu3 %v650_v49  ;;  %v597_v46 = vunpack.c.l.bf16 %v8526_v43  ;;  %v699_v49 = vunpack.c.l.bf16 %v8528_v23 }
  0xaa   :  { %986 = vmatpush.msrb.mxu0 %v362_v50  ;;  %1006 = vmatpush.msrb.mxu1 %v458_v58  ;;  %v8546_v50 = vld [vmem:[#allocation3 + $0x280] sm:$0xff]  ;;  %v507_v58 = vunpack.c.l.bf16 %v8534_v21 }
  0xab   :  { %1028 = vmatpush.msrb.mxu2 %v542_v4  ;;  %1047 = vmatpush.msrb.mxu3 %v644_v5  ;;  %v8550_v4 = vld [vmem:[#allocation3 + $0x3d0] sm:$0xff]  ;;  %v591_v5 = vunpack.c.l.bf16 %v8538_v41  ;;  %v501_v51 = vunpack.c.l.bf16 %v8546_v50 }
  0xac   :  { %987 = vmatpush.msrb.mxu0 %v356_v11  ;;  %1007 = vmatpush.msrb.mxu1 %v452_v16  ;;  %v693_v11 = vunpack.c.l.bf16 %v8540_v45  ;;  %v8556_v16 = vld [vmem:[#allocation3 + $0xe8] sm:$0xff] }
  0xad   :  { %1029 = vmatpush.msrb.mxu2 %v536_v27  ;;  %1048 = vmatpush.msrb.mxu3 %v638_v52  ;;  %v405_v27 = vunpack.c.l.bf16 %v8544_v34  ;;  %v8562_v52 = vld [vmem:[#allocation3 + $0x3b8] sm:$0xff] }
  0xae   :  { %1030 = vmatmul.f32.vlgmr.msrb.gmra.mxu2 %v8100_v55  ;;  %988 = vmatpush.msrb.mxu0 %v350_v63  ;;  %v8564_v63 = vld [vmem:[#allocation3 + $0x550] sm:$0xff] }
  0xaf   :  { %1094 = vmatpush.msra.mxu2 %v627_v61  ;;  %1008 = vmatpush.msrb.mxu1 %v446_v30  ;;  %v585_v61 = vunpack.c.l.bf16 %v8550_v4  ;;  %v687_v30 = vunpack.c.l.bf16 %v8552_v7 }
  0xb0   :  { %1049 = vmatpush.msrb.mxu3 %v632_v29  ;;  %989 = vmatpush.msrb.mxu0 %v344_v38  ;;  %v8568_v29 = vld [vmem:[#allocation3 + $0xd0] sm:$0xff] }
  0xb1   :  { %1050 = vmatmul.f32.vlgmr.msrb.gmra.mxu3 %v8102_v42  ;;  %1095 = vmatpush.msra.mxu2 %v621_v2  ;;  %v8570_v38 = vld [vmem:[#allocation3 + $0x250] sm:$0xff]  ;;  %v399_v2 = vunpack.c.l.bf16 %v8556_v16 }
  0xb2   :  { %1114 = vmatpush.msra.mxu3 %v723_v8  ;;  %1009 = vmatpush.msrb.mxu1 %v440_v19  ;;  %v495_v8 = vunpack.c.l.bf16 %v8558_v39  ;;  %v8574_v19 = vld [vmem:[#allocation3 + $0x3a0] sm:$0xff] }
  0xb3   :  { %990 = vmatmul.f32.vlgmr.msrb.gmra.mxu0 %v8109_v60  ;;  %1010 = vmatmul.f32.vlgmr.msrb.gmra.mxu1 %v8113_v6 }
  0xb4   :  { %1054 = vmatpush.msra.mxu0 %v435_v40  ;;  %1074 = vmatpush.msra.mxu1 %v531_v56  ;;  %v8576_v40 = vld [vmem:[#allocation3 + $0x538] sm:$0xff]  ;;  %v579_v56 = vunpack.c.l.bf16 %v8562_v52 }
  0xb5   :  { %1096 = vmatpush.msra.mxu2 %v615_v14  ;;  %1115 = vmatpush.msra.mxu3 %v717_v44  ;;  %v681_v14 = vunpack.c.l.bf16 %v8564_v63  ;;  %v8580_v44 = vld [vmem:[#allocation3 + $0xb8] sm:$0xff] }
  0xb6   :  { %1055 = vmatpush.msra.mxu0 %v429_v62  ;;  %1075 = vmatpush.msra.mxu1 %v525_v28  ;;  %v8582_v62 = vld [vmem:[#allocation3 + $0x238] sm:$0xff]  ;;  %v393_v28 = vunpack.c.l.bf16 %v8568_v29 }
  0xb7   :  { %1097 = vmatpush.msra.mxu2 %v609_v47  ;;  %1116 = vmatpush.msra.mxu3 %v711_v59  ;;  %v489_v47 = vunpack.c.l.bf16 %v8570_v38  ;;  %v8586_v59 = vld [vmem:[#allocation3 + $0x388] sm:$0xff] }
  0xb8   :  { %1056 = vmatpush.msra.mxu0 %v423_v1  ;;  %1076 = vmatpush.msra.mxu1 %v519_v25  ;;  %v8588_v1 = vld [vmem:[#allocation3 + $0x520] sm:$0xff]  ;;  %v573_v25 = vunpack.c.l.bf16 %v8574_v19 }
  0xb9   :  { %1098 = vmatpush.msra.mxu2 %v603_v17  ;;  %1117 = vmatpush.msra.mxu3 %v705_v13  ;;  %11325 = vst [vmem:[#allocation13_spill] sm:$0xff] %v8588_v1  ;;  %v675_v17 = vunpack.c.l.bf16 %v8576_v40  ;;  %v8592_v13 = vld [vmem:[#allocation3 + $0xa0] sm:$0xff] }
  0xba   :  { %1057 = vmatpush.msra.mxu0 %v417_v36  ;;  %1077 = vmatpush.msra.mxu1 %v513_v53  ;;  %11326 = vst [vmem:[#allocation14_spill] sm:$0xff] %v8592_v13  ;;  %v8594_v36 = vld [vmem:[#allocation3 + $0x220] sm:$0xff]  ;;  %v387_v53 = vunpack.c.l.bf16 %v8580_v44 }
  0xbb   :  { %1099 = vmatpush.msra.mxu2 %v597_v46  ;;  %1118 = vmatpush.msra.mxu3 %v699_v49  ;;  %11327 = vst [vmem:[#allocation15_spill] sm:$0xff] %v8594_v36  ;;  %v483_v46 = vunpack.c.l.bf16 %v8582_v62  ;;  %v8598_v49 = vld [vmem:[#allocation3 + $0x370] sm:$0xff] }
  0xbc   :  { %1058 = vmatpush.msra.mxu0 %v411_v57  ;;  %1078 = vmatpush.msra.mxu1 %v507_v58  ;;  %11328 = vst [vmem:[#allocation19_spill] sm:$0xff] %v8598_v49  ;;  %v8600_v57 = vld [vmem:[#allocation3 + $0x508] sm:$0xff]  ;;  %v567_v58 = vunpack.c.l.bf16 %v8586_v59 }
  0xbd   :  { %1100 = vmatpush.msra.mxu2 %v591_v5  ;;  %1119 = vmatpush.msra.mxu3 %v693_v11  ;;  %11329 = vst [vmem:[#allocation16_spill] sm:$0xff] %v8600_v57  ;;  %v669_v5 = vunpack.c.l.bf16 %v8588_v1  ;;  %v8604_v11 = vld [vmem:[#allocation3 + $0x88] sm:$0xff]  ;;  %v8618_v1 = vld [vmem:[#allocation3 + $0x1f0] sm:$0xff] }
  0xbe   :  { %1059 = vmatpush.msra.mxu0 %v405_v27  ;;  %1079 = vmatpush.msra.mxu1 %v501_v51  ;;  %11330 = vst [vmem:[#allocation17_spill] sm:$0xff] %v8604_v11  ;;  %v8606_v27 = vld [vmem:[#allocation3 + $0x208] sm:$0xff]  ;;  %v381_v51 = vunpack.c.l.bf16 %v8592_v13  ;;  %v8624_v13 = vld [vmem:[#allocation3 + $0x4d8] sm:$0xff] }
  0xbf   :  { %1101 = vmatpush.msra.mxu2 %v585_v61  ;;  %1120 = vmatpush.msra.mxu3 %v687_v30  ;;  %11331 = vst [vmem:[#allocation18_spill] sm:$0xff] %v8606_v27  ;;  %v477_v61 = vunpack.c.l.bf16 %v8594_v36  ;;  %v8610_v30 = vld [vmem:[#allocation3 + $0x358] sm:$0xff]  ;;  %v8622_v36 = vld [vmem:[#allocation3 + $0x340] sm:$0xff] }
  0xc0   :  { %1060 = vmatpush.msra.mxu0 %v399_v2  ;;  %1080 = vmatpush.msra.mxu1 %v495_v8  ;;  %11332 = vst [vmem:[#allocation20_spill] sm:$0xff] %v8610_v30  ;;  %v8612_v2 = vld [vmem:[#allocation3 + $0x4f0] sm:$0xff]  ;;  %v561_v8 = vunpack.c.l.bf16 %v8598_v49  ;;  %v8630_v49 = vld [vmem:[#allocation3 + $0x1d8] sm:$0xff] }
  0xc1   :  { %1102 = vmatpush.msra.mxu2 %v579_v56  ;;  %1121 = vmatpush.msra.mxu3 %v681_v14  ;;  %11333 = vst [vmem:[#allocation21_spill] sm:$0xff] %v8612_v2  ;;  %v663_v56 = vunpack.c.l.bf16 %v8600_v57  ;;  %v8616_v14 = vld [vmem:[#allocation3 + $0x70] sm:$0xff]  ;;  %v8628_v57 = vld [vmem:[#allocation3 + $0x58] sm:$0xff] }
  0xc2   :  { %1061 = vmatpush.msra.mxu0 %v393_v28  ;;  %1081 = vmatpush.msra.mxu1 %v489_v47  ;;  %11334 = vst [vmem:[#allocation22_spill] sm:$0xff] %v8616_v14  ;;  %v375_v28 = vunpack.c.l.bf16 %v8604_v11  ;;  %v471_v47 = vunpack.c.l.bf16 %v8606_v27  ;;  %v8634_v27 = vld [vmem:[#allocation3 + $0x328] sm:$0xff]  ;;  %v8636_v11 = vld [vmem:[#allocation3 + $0x4c0] sm:$0xff] }
  0xc3   :  { %1103 = vmatpush.msra.mxu2 %v573_v25  ;;  %1122 = vmatpush.msra.mxu3 %v675_v17  ;;  %11335 = vst [vmem:[#allocation23_spill] sm:$0xff] %v8618_v1  ;;  %v555_v25 = vunpack.c.l.bf16 %v8610_v30  ;;  %v657_v17 = vunpack.c.l.bf16 %v8612_v2  ;;  %v8640_v2 = vld [vmem:[#allocation3 + $0x40] sm:$0xff] }
  0xc4   :  { %1062 = vmatpush.msra.mxu0 %v387_v53  ;;  %1082 = vmatpush.msra.mxu1 %v483_v46  ;;  %11336 = vst [vmem:[#allocation24_spill] sm:$0xff] %v8624_v13  ;;  %v369_v53 = vunpack.c.l.bf16 %v8616_v14  ;;  %v465_v46 = vunpack.c.l.bf16 %v8618_v1  ;;  %v8642_v30 = vld [vmem:[#allocation3 + $0x1c0] sm:$0xff]  ;;  %v8646_v1 = vld [vmem:[#allocation3 + $0x310] sm:$0xff]  ;;  %v8648_v14 = vld [vmem:[#allocation3 + $0x4a8] sm:$0xff] }
  0xc5   :  { %1104 = vmatpush.msra.mxu2 %v567_v58  ;;  %1123 = vmatpush.msra.mxu3 %v669_v5  ;;  %11337 = vst [vmem:[#allocation25_spill] sm:$0xff] %v8628_v57  ;;  %v549_v58 = vunpack.c.l.bf16 %v8622_v36  ;;  %v651_v5 = vunpack.c.l.bf16 %v8624_v13  ;;  %v8652_v13 = vld [vmem:[#allocation3 + $0x28] sm:$0xff] }
  0xc6   :  { %11338 = vst [vmem:[#allocation26_spill] sm:$0xff] %v8630_v49  ;;  %1063 = vmatpush.msra.mxu0 %v381_v51  ;;  %1083 = vmatpush.msra.mxu1 %v477_v61  ;;  %v363_v51 = vunpack.c.l.bf16 %v8628_v57  ;;  %v459_v61 = vunpack.c.l.bf16 %v8630_v49  ;;  %v8656_v57 = vld [vmem:[#allocation3 + $0x1a8] sm:$0xff]  ;;  %v537_v49 = vunpack.c.l.bf16 %v8646_v1 }
  0xc7   :  { %11339 = vst [vmem:[#allocation27_spill] sm:$0xff] %v8634_v27  ;;  %1105 = vmatpush.msra.mxu2 %v561_v8  ;;  %1124 = vmatpush.msra.mxu3 %v663_v56  ;;  %v543_v8 = vunpack.c.l.bf16 %v8634_v27  ;;  %v645_v56 = vunpack.c.l.bf16 %v8636_v11  ;;  %v8662_v27 = vld [vmem:[#allocation3 + $0x10] sm:$0xff] }
  0xc8   :  { %11340 = vst [vmem:[#allocation28_spill] sm:$0xff] %v8640_v2  ;;  %1064 = vmatpush.msra.mxu0 %v375_v28  ;;  %1084 = vmatpush.msra.mxu1 %v471_v47  ;;  %v357_v28 = vunpack.c.l.bf16 %v8640_v2  ;;  %v453_v47 = vunpack.c.l.bf16 %v8642_v30  ;;  %v345_v2 = vunpack.c.l.bf16 %v8662_v27 }
  0xc9   :  { %11341 = vst [vmem:[#allocation29_spill] sm:$0xff] %v8642_v30  ;;  %1106 = vmatpush.msra.mxu2 %v555_v25  ;;  %1125 = vmatpush.msra.mxu3 %v657_v17  ;;  %v639_v25 = vunpack.c.l.bf16 %v8648_v14  ;;  %v8660_v17 = vld [vmem:[#allocation3 + $0x490] sm:$0xff]  ;;  %v447_v30 = vunpack.c.l.bf16 %v8656_v57 }
  0xca   :  { %11342 = vst [vmem:[#allocation30_spill] sm:$0xff] %v8646_v1  ;;  %1065 = vmatpush.msra.mxu0 %v369_v53  ;;  %1085 = vmatpush.msra.mxu1 %v465_v46  ;;  %v351_v53 = vunpack.c.l.bf16 %v8652_v13  ;;  %v628_v46 = vunpack.c.h.bf16 %v8468_v18  ;;  %v771_v1 = vpop.f32.mrf.mxu1  ;;  %v724_v18 = vunpack.c.h.bf16 %v8477_v10  ;;  %v430_v10 = vunpack.c.h.bf16 %v8493_v26 }
  0xcb   :  { %11343 = vst [vmem:[#allocation31_spill] sm:$0xff] %v8648_v14  ;;  %1107 = vmatpush.msra.mxu2 %v549_v58  ;;  %1126 = vmatpush.msra.mxu3 %v651_v5  ;;  %v8667_v58 = vld [vmem:[#allocation3 + $0x190] sm:$0xff]  ;;  %v751_v5 = vpop.f32.mrf.mxu0  ;;  %v633_v14 = vunpack.c.l.bf16 %v8660_v17  ;;  %v604_v26 = vunpack.c.h.bf16 %v8512_v48  ;;  %v508_v48 = vunpack.c.h.bf16 %v8534_v21  ;;  %v586_v21 = vunpack.c.h.bf16 %v8550_v4 }
  0xcc   :  { %1066 = vmatpush.msra.mxu0 %v363_v51  ;;  %1086 = vmatpush.msra.mxu1 %v459_v61  ;;  %v622_v51 = vunpack.c.h.bf16 %v8473_v3  ;;  %v441_v61 = vunpack.c.l.bf16 %v8667_v58  ;;  %v616_v3 = vunpack.c.h.bf16 %v8489_v20  ;;  %v424_v20 = vunpack.c.h.bf16 %v8506_v0 }
  0xcd   :  { %1108 = vmatpush.msra.mxu2 %v543_v8  ;;  %1127 = vmatpush.msra.mxu3 %v645_v56  ;;  %v772_v8 = vadd.f32 %v771_v1, %v751_v5  ;;  %v791_v56 = vpop.f32.mrf.mxu2  ;;  %v526_v1 = vunpack.c.h.bf16 %v8495_v24  ;;  %v706_v24 = vunpack.c.h.bf16 %v8514_v15  ;;  %v700_v0 = vunpack.c.h.bf16 %v8528_v23 }
  0xce   :  { %1067 = vmatpush.msra.mxu0 %v357_v28  ;;  %1087 = vmatpush.msra.mxu1 %v453_v47  ;;  %v436_v28 = vunpack.c.h.bf16 %v8482_v9  ;;  %v718_v47 = vunpack.c.h.bf16 %v8491_v35  ;;  %v610_v9 = vunpack.c.h.bf16 %v8499_v31  ;;  %v520_v35 = vunpack.c.h.bf16 %v8508_v54 }
  0xcf   :  { %1109 = vmatpush.msra.mxu2 %v537_v49  ;;  %1128 = vmatpush.msra.mxu3 %v639_v25  ;;  %v532_v49 = vunpack.c.h.bf16 %v8484_v12  ;;  %v712_v12 = vunpack.c.h.bf16 %v8501_v37  ;;  %v418_v31 = vunpack.c.h.bf16 %v8520_v22  ;;  %v514_v37 = vunpack.c.h.bf16 %v8522_v33 }
  0xd0   :  { %1110 = vmatmul.f32.vlgmr.msra.gmra.mxu2 %v8100_v55  ;;  %1068 = vmatpush.msra.mxu0 %v351_v53  ;;  %v598_v25 = vunpack.c.h.bf16 %v8526_v43  ;;  %v412_v54 = vunpack.c.h.bf16 %v8532_v32  ;;  %v592_v15 = vunpack.c.h.bf16 %v8538_v41  ;;  %v694_v22 = vunpack.c.h.bf16 %v8540_v45  ;;  %v8698_v53 = vpop.permute.xlu1 %1329  ;;  %v8704_v32 = vpop.permute.xlu0 %1245 }
  0xd1   :  { %1174 = vmatpush.msrb.mxu2 %v628_v46  ;;  %1088 = vmatpush.msra.mxu1 %v447_v30  ;;  %v792_v30 = vadd.f32 %v791_v56, %v772_v8  ;;  %v406_v43 = vunpack.c.h.bf16 %v8544_v34  ;;  %v502_v23 = vunpack.c.h.bf16 %v8546_v50  ;;  %v688_v41 = vunpack.c.h.bf16 %v8552_v7  ;;  %v11347_v8 = vld [vmem:[#allocation19_spill] sm:$0xff] }
  0xd2   :  { %1129 = vmatpush.msra.mxu3 %v633_v14  ;;  %1069 = vmatpush.msra.mxu0 %v345_v2  ;;  %v811_v2 = vpop.f32.mrf.mxu3  ;;  %v400_v45 = vunpack.c.h.bf16 %v8556_v16  ;;  %v496_v46 = vunpack.c.h.bf16 %v8558_v39  ;;  %v580_v34 = vunpack.c.h.bf16 %v8562_v52  ;;  %v682_v50 = vunpack.c.h.bf16 %v8564_v63 }
  0xd3   :  { %1130 = vmatmul.f32.vlgmr.msra.gmra.mxu3 %v8102_v42  ;;  %1175 = vmatpush.msrb.mxu2 %v622_v51  ;;  %v812_v14 = vadd.f32 %v811_v2, %v792_v30  ;;  %v394_v4 = vunpack.c.h.bf16 %v8568_v29  ;;  %v490_v7 = vunpack.c.h.bf16 %v8570_v38  ;;  %v574_v16 = vunpack.c.h.bf16 %v8574_v19  ;;  %v11344_v29 = vld [vmem:[#allocation13_spill] sm:$0xff]  ;;  %v11353_v2 = vld [vmem:[#allocation22_spill] sm:$0xff] }
  0xd4   :  { %1194 = vmatpush.msrb.mxu3 %v724_v18  ;;  %1089 = vmatpush.msra.mxu1 %v441_v61  ;;  %v676_v39 = vunpack.c.h.bf16 %v8576_v40  ;;  %v388_v52 = vunpack.c.h.bf16 %v8580_v44  ;;  %v484_v63 = vunpack.c.h.bf16 %v8582_v62  ;;  %v568_v51 = vunpack.c.h.bf16 %v8586_v59  ;;  %v11345_v18 = vld [vmem:[#allocation14_spill] sm:$0xff]  ;;  %v11346_v40 = vld [vmem:[#allocation15_spill] sm:$0xff]  ;;  %v11348_v62 = vld [vmem:[#allocation16_spill] sm:$0xff] }
  0xd5   :  { %1070 = vmatmul.f32.vlgmr.msra.gmra.mxu0 %v8109_v60  ;;  %1090 = vmatmul.f32.vlgmr.msra.gmra.mxu1 %v8113_v6  ;;  %v8700_v33 = vperm.slane %v812_v14, 0  ;;  %v670_v38 = vunpack.c.h.bf16 %v11344_v29  ;;  %v382_v19 = vunpack.c.h.bf16 %v11345_v18  ;;  %v478_v44 = vunpack.c.h.bf16 %v11346_v40  ;;  %v11352_v30 = vld [vmem:[#allocation21_spill] sm:$0xff] }
  0xd6   :  { %1134 = vmatpush.msrb.mxu0 %v436_v28  ;;  %1154 = vmatpush.msrb.mxu1 %v532_v49  ;;  %v562_v56 = vunpack.c.h.bf16 %v11347_v8  ;;  %v664_v59 = vunpack.c.h.bf16 %v11348_v62  ;;  %v11349_v28 = vld [vmem:[#allocation17_spill] sm:$0xff]  ;;  %v346_v18 = vunpack.c.h.bf16 %v8662_v27 }
  0xd7   :  { %1176 = vmatpush.msrb.mxu2 %v616_v3  ;;  %1195 = vmatpush.msrb.mxu3 %v718_v47  ;;  %v1248_v5 = vmul.f32 %v8704_v32, %v8700_v33  ;;  %v376_v49 = vunpack.c.h.bf16 %v11349_v28  ;;  %v11350_v3 = vld [vmem:[#allocation18_spill] sm:$0xff] }
  0xd8   :  { %1135 = vmatpush.msrb.mxu0 %v430_v10  ;;  %1155 = vmatpush.msrb.mxu1 %v526_v1  ;;  %v8724_v61 = vpop.permute.xlu1 %1371  ;;  %v472_v47 = vunpack.c.h.bf16 %v11350_v3  ;;  %v11351_v10 = vld [vmem:[#allocation20_spill] sm:$0xff] }
  0xd9   :  { %1177 = vmatpush.msrb.mxu2 %v610_v9  ;;  %1196 = vmatpush.msrb.mxu3 %v712_v12  ;;  %v556_v1 = vunpack.c.h.bf16 %v11351_v10  ;;  %v658_v9 = vunpack.c.h.bf16 %v11352_v30  ;;  %v1374_v12 = vmul.f32 %v8724_v61, %v8700_v33 }
  0xda   :  { %1136 = vmatpush.msrb.mxu0 %v424_v20  ;;  %1156 = vmatpush.msrb.mxu1 %v520_v35  ;;  %v370_v20 = vunpack.c.h.bf16 %v11353_v2  ;;  %v11354_v35 = vld [vmem:[#allocation23_spill] sm:$0xff] }
  0xdb   :  { %1178 = vmatpush.msrb.mxu2 %v604_v26  ;;  %1197 = vmatpush.msrb.mxu3 %v706_v24  ;;  %v466_v26 = vunpack.c.h.bf16 %v11354_v35 }
  0xdc   :  { %1137 = vmatpush.msrb.mxu0 %v418_v31  ;;  %1157 = vmatpush.msrb.mxu1 %v514_v37  ;;  %v550_v31 = vunpack.c.h.bf16 %v8622_v36  ;;  %v11355_v37 = vld [vmem:[#allocation24_spill] sm:$0xff] }
  0xdd   :  { %1179 = vmatpush.msrb.mxu2 %v598_v25  ;;  %1198 = vmatpush.msrb.mxu3 %v700_v0  ;;  %v652_v25 = vunpack.c.h.bf16 %v11355_v37  ;;  %v11356_v0 = vld [vmem:[#allocation25_spill] sm:$0xff]  ;;  %v11359_v36 = vld [vmem:[#allocation28_spill] sm:$0xff] }
  0xde   :  { %1138 = vmatpush.msrb.mxu0 %v412_v54  ;;  %1158 = vmatpush.msrb.mxu1 %v508_v48  ;;  %v364_v54 = vunpack.c.h.bf16 %v11356_v0  ;;  %v11357_v48 = vld [vmem:[#allocation26_spill] sm:$0xff] }
  0xdf   :  { %1180 = vmatpush.msrb.mxu2 %v592_v15  ;;  %1199 = vmatpush.msrb.mxu3 %v694_v22  ;;  %v460_v15 = vunpack.c.h.bf16 %v11357_v48 }
  0xe0   :  { %1139 = vmatpush.msrb.mxu0 %v406_v43  ;;  %1159 = vmatpush.msrb.mxu1 %v502_v23  ;;  %v11358_v43 = vld [vmem:[#allocation27_spill] sm:$0xff] }
  0xe1   :  { %1181 = vmatpush.msrb.mxu2 %v586_v21  ;;  %1200 = vmatpush.msrb.mxu3 %v688_v41  ;;  %v544_v23 = vunpack.c.h.bf16 %v11358_v43  ;;  %v646_v21 = vunpack.c.h.bf16 %v8636_v11  ;;  %v352_v11 = vunpack.c.h.bf16 %v8652_v13  ;;  %v442_v13 = vunpack.c.h.bf16 %v8667_v58 }
  0xe2   :  { %1140 = vmatpush.msrb.mxu0 %v400_v45  ;;  %1160 = vmatpush.msrb.mxu1 %v496_v46  ;;  %v358_v45 = vunpack.c.h.bf16 %v11359_v36  ;;  %v11360_v46 = vld [vmem:[#allocation29_spill] sm:$0xff] }
  0xe3   :  { %1182 = vmatpush.msrb.mxu2 %v580_v34  ;;  %1201 = vmatpush.msrb.mxu3 %v682_v50  ;;  %v454_v34 = vunpack.c.h.bf16 %v11360_v46 }
  0xe4   :  { %1258 = vrot.lane.b32.xlu1 %v1248_v5, %s7736_s10  ;;  %1141 = vmatpush.msrb.mxu0 %v394_v4  ;;  %v8742_v22 = vpop.permute.xlu2 %1413  ;;  %v11361_v5 = vld [vmem:[#allocation30_spill] sm:$0xff] }
  0xe5   :  { %1161 = vmatpush.msrb.mxu1 %v490_v7  ;;  %1183 = vmatpush.msrb.mxu2 %v574_v16  ;;  %v538_v4 = vunpack.c.h.bf16 %v11361_v5  ;;  %v11362_v7 = vld [vmem:[#allocation31_spill] sm:$0xff]  ;;  %v1416_v29 = vmul.f32 %v8742_v22, %v8700_v33 }
  0xe6   :  { %1202 = vmatpush.msrb.mxu3 %v676_v39  ;;  %1142 = vmatpush.msrb.mxu0 %v388_v52  ;;  %v640_v16 = vunpack.c.h.bf16 %v11362_v7  ;;  %v1332_v39 = vmul.f32 %v8698_v53, %v8700_v33  ;;  %v448_v52 = vunpack.c.h.bf16 %v8656_v57 }
  0xe7   :  { %1162 = vmatpush.msrb.mxu1 %v484_v63  ;;  %1184 = vmatpush.msrb.mxu2 %v568_v51  ;;  %v634_v51 = vunpack.c.h.bf16 %v8660_v17 }
  0xe8   :  { %1203 = vmatpush.msrb.mxu3 %v670_v38  ;;  %1143 = vmatpush.msrb.mxu0 %v382_v19  ;;  %v831_v24 = vpop.f32.mrf.mxu0  ;;  %v851_v14 = vpop.f32.mrf.mxu1 }
  0xe9   :  { %1163 = vmatpush.msrb.mxu1 %v478_v44  ;;  %1185 = vmatpush.msrb.mxu2 %v562_v56  ;;  %v852_v41 = vadd.f32 %v851_v14, %v831_v24  ;;  %v871_v50 = vpop.f32.mrf.mxu2  ;;  %v8758_v19 = vpop.permute.xlu0 %1287 }
  0xea   :  { %1204 = vmatpush.msrb.mxu3 %v664_v59  ;;  %1144 = vmatpush.msrb.mxu0 %v376_v49  ;;  %v8763_v57 = vpop.permute.xlu1 %1550  ;;  %v1290_v17 = vmul.f32 %v8758_v19, %v8700_v33 }
  0xeb   :  { %1164 = vmatpush.msrb.mxu1 %v472_v47  ;;  %1186 = vmatpush.msrb.mxu2 %v556_v1  ;;  %v872_v63 = vadd.f32 %v871_v50, %v852_v41  ;;  %v1553_v27 = vmul.f32 %v8763_v57, %v8700_v33 }
  0xec   :  { %1205 = vmatpush.msrb.mxu3 %v658_v9  ;;  %1384 = vrot.lane.b32.xlu1 %v1374_v12, %s11201_s6  ;;  %v891_v38 = vpop.f32.mrf.mxu3 }
  0xed   :  { %1145 = vmatpush.msrb.mxu0 %v370_v20  ;;  %1165 = vmatpush.msrb.mxu1 %v466_v26  ;;  %v892_v40 = vadd.f32 %v891_v38, %v872_v63 }
  0xee   :  { %1187 = vmatpush.msrb.mxu2 %v550_v31  ;;  %1206 = vmatpush.msrb.mxu3 %v652_v25 }
  0xef   :  { %1146 = vmatpush.msrb.mxu0 %v364_v54  ;;  %1166 = vmatpush.msrb.mxu1 %v460_v15  ;;  %v8776_v58 = vperm.slane %v892_v40, 0 }
  0xf0   :  { %1188 = vmatpush.msrb.mxu2 %v544_v23  ;;  %1207 = vmatpush.msrb.mxu3 %v646_v21 }
  0xf1   :  { %1147 = vmatpush.msrb.mxu0 %v358_v45  ;;  %1167 = vmatpush.msrb.mxu1 %v454_v34  ;;  %v1554_v56 = vmul.f32 %v8763_v57, %v8776_v58  ;;  %v1375_v62 = vmul.f32 %v8724_v61, %v8776_v58  ;;  %v1291_v59 = vmul.f32 %v8758_v19, %v8776_v58 }
  0xf2   :  { %1189 = vmatpush.msrb.mxu2 %v538_v4  ;;  %1208 = vmatpush.msrb.mxu3 %v640_v16  ;;  %v1417_v10 = vmul.f32 %v8742_v22, %v8776_v58  ;;  %v8857_v16 = vld [vmem:[#allocation5 + $0x78] sm:$0xff] }
  0xf3   :  { %1190 = vmatmul.f32.vlgmr.msrb.gmra.mxu2 %v8100_v55  ;;  %1342 = vrot.lane.b32.xlu2 %v1332_v39, %s11204_s1  ;;  %v8769_v55 = vpop.permute.xlu2 %1455  ;;  %v1715_v39 = vunpack.c.l.bf16 %v8857_v16 }
  0xf4   :  { %1148 = vmatpush.msrb.mxu0 %v352_v11  ;;  %1168 = vmatpush.msrb.mxu1 %v448_v52  ;;  %v1459_v44 = vmul.f32 %v8769_v55, %v8700_v33  ;;  %v1460_v35 = vmul.f32 %v8769_v55, %v8776_v58 }
  0xf5   :  { %1209 = vmatpush.msrb.mxu3 %v634_v51  ;;  %1426 = vrot.lane.b32.xlu1 %v1416_v29, %s7739_s18  ;;  %v8863_v51 = vld [vmem:[#allocation5 + $0x70] sm:$0xff] }
  0xf6   :  { %1210 = vmatmul.f32.vlgmr.msrb.gmra.mxu3 %v8102_v42  ;;  %1149 = vmatpush.msrb.mxu0 %v346_v18  ;;  %v1333_v42 = vmul.f32 %v8698_v53, %v8776_v58  ;;  %v1713_v18 = vunpack.c.l.bf16 %v8863_v51 }
  0xf7   :  { %1169 = vmatpush.msrb.mxu1 %v442_v13  ;;  %1150 = vmatmul.f32.vlgmr.msrb.gmra.mxu0 %v8109_v60  ;;  %v1249_v60 = vmul.f32 %v8704_v32, %v8776_v58  ;;  %v8867_v13 = vld [vmem:[#allocation5 + $0x68] sm:$0xff] }
  0xf8   :  { %1170 = vmatmul.f32.vlgmr.msrb.gmra.mxu1 %v8113_v6  ;;  %1300 = vrot.lane.b32.xlu0 %v1290_v17, %s7740_s27  ;;  %v8786_v6 = vpop.permute.xlu0 %1503 }
  0xf9   :  { %v1506_v8 = vmul.f32 %v8786_v6, %v8700_v33  ;;  %v1507_v24 = vmul.f32 %v8786_v6, %v8776_v58  ;;  %1850 = vmatpush.msra.mxu0 %v1715_v39  ;;  %v8941_v39 = vld [vmem:[#allocation5] sm:$0xff] }
  0xfb   :  { %1565 = vrot.lane.b32.xlu2 %v1553_v27, %s11190_s3  ;;  %v8845_v34 = vpop.permute.xlu2 %1218  ;;  %1851 = vmatpush.msra.mxu0 %v1713_v18  ;;  %v1711_v27 = vunpack.c.l.bf16 %v8867_v13  ;;  %v8950_v18 = vld [vmem:[#allocation5 + $0xf0] sm:$0xff] }
  0xfd   :  { %1471 = vrot.lane.b32.xlu1 %v1459_v44, %s11199_s7  ;;  %1852 = vmatpush.msra.mxu0 %v1711_v27 }
 0x100   :  { %1344 = vrot.lane.b32.xlu0 %v1333_v42, %s11204_s1 }
 0x103   :  { %1260 = vrot.lane.b32.xlu2 %v1249_v60, %s7736_s10  ;;  %v8874_v60 = vld [vmem:[#allocation5 + $0x60] sm:$0xff] }
 0x105   :  { %1518 = vrot.lane.b32.xlu1 %v1506_v8, %s11197_s28 }
 0x108   :  { %1567 = vrot.lane.b32.xlu0 %v1554_v56, %s11190_s3  ;;  %v1709_v56 = vunpack.c.l.bf16 %v8874_v60 }
 0x10a   :  { %1853 = vmatpush.msra.mxu0 %v1709_v56 }
 0x10b   :  { %1386 = vrot.lane.b32.xlu2 %v1375_v62, %s11201_s6  ;;  %v8877_v62 = vld [vmem:[#allocation5 + $0x58] sm:$0xff] }
 0x10d   :  { %1302 = vrot.lane.b32.xlu1 %v1291_v59, %s7740_s27  ;;  %v911_v28 = vpop.f32.mrf.mxu0  ;;  %v931_v49 = vpop.f32.mrf.mxu1 }
 0x10e   :  { %v932_v3 = vadd.f32 %v931_v49, %v911_v28  ;;  %v951_v47 = vpop.f32.mrf.mxu2  ;;  %v1707_v49 = vunpack.c.l.bf16 %v8877_v62 }
 0x110   :  { %v952_v1 = vadd.f32 %v951_v47, %v932_v3  ;;  %v8884_v3 = vld [vmem:[#allocation5 + $0x50] sm:$0xff]  ;;  %1854 = vmatpush.msra.mxu0 %v1707_v49 }
 0x111   :  { %v971_v30 = vpop.f32.mrf.mxu3 }
 0x112   :  { %v972_v9 = vadd.f32 %v971_v30, %v952_v1  ;;  %v1705_v1 = vunpack.c.l.bf16 %v8884_v3  ;;  %v8892_v30 = vld [vmem:[#allocation5 + $0x48] sm:$0xff] }
 0x113   :  { %1428 = vrot.lane.b32.xlu2 %v1417_v10, %s7739_s18 }
 0x114   :  { %v8805_v12 = vperm.slane %v972_v9, 0  ;;  %v1703_v9 = vunpack.c.l.bf16 %v8892_v30  ;;  %1855 = vmatpush.msra.mxu0 %v1705_v1 }
 0x116   :  { %v1250_v2 = vmul.f32 %v8704_v32, %v8805_v12  ;;  %v1376_v20 = vmul.f32 %v8724_v61, %v8805_v12  ;;  %v1292_v26 = vmul.f32 %v8758_v19, %v8805_v12  ;;  %v1334_v14 = vmul.f32 %v8698_v53, %v8805_v12  ;;  %1856 = vmatpush.msra.mxu0 %v1703_v9  ;;  %v8964_v9 = vld [vmem:[#allocation5 + $0xd8] sm:$0xff] }
 0x117   :  { %v1418_v31 = vmul.f32 %v8742_v22, %v8805_v12  ;;  %v1461_v23 = vmul.f32 %v8769_v55, %v8805_v12  ;;  %v1508_v45 = vmul.f32 %v8786_v6, %v8805_v12  ;;  %v1555_v50 = vmul.f32 %v8763_v57, %v8805_v12 }
 0x118   :  { %1262 = vrot.lane.b32.xlu0 %v1250_v2, %s7736_s10  ;;  %1388 = vrot.lane.b32.xlu1 %v1376_v20, %s11201_s6 }
 0x11b   :  { %1473 = vrot.lane.b32.xlu2 %v1460_v35, %s11199_s7 }
 0x120   :  { %1304 = vrot.lane.b32.xlu0 %v1292_v26, %s7740_s27  ;;  %v8904_v26 = vld [vmem:[#allocation5 + $0x38] sm:$0xff] }
 0x123   :  { %1520 = vrot.lane.b32.xlu2 %v1507_v24, %s11197_s28 }
 0x128   :  { %1346 = vrot.lane.b32.xlu0 %v1334_v14, %s11204_s1  ;;  %v1699_v14 = vunpack.c.l.bf16 %v8904_v26 }
 0x130   :  { %v991_v37 = vpop.f32.mrf.mxu0  ;;  %v1011_v25 = vpop.f32.mrf.mxu1  ;;  %1430 = vrot.lane.b32.xlu0 %v1418_v31, %s7739_s18  ;;  %v8909_v31 = vld [vmem:[#allocation5 + $0x30] sm:$0xff] }
 0x131   :  { %v1012_v0 = vadd.f32 %v1011_v25, %v991_v37  ;;  %v1031_v54 = vpop.f32.mrf.mxu2 }
 0x133   :  { %v1032_v48 = vadd.f32 %v1031_v54, %v1012_v0  ;;  %v1697_v0 = vunpack.c.l.bf16 %v8909_v31  ;;  %v8917_v54 = vld [vmem:[#allocation5 + $0x28] sm:$0xff] }
 0x134   :  { %v1051_v15 = vpop.f32.mrf.mxu3 }
 0x135   :  { %v1052_v43 = vadd.f32 %v1051_v15, %v1032_v48  ;;  %v1695_v48 = vunpack.c.l.bf16 %v8917_v54  ;;  %v8922_v15 = vpop.permute.xlu0 %1233 }
 0x136   :  { %11365 = vst [vmem:[#allocation15_spill] sm:$0xff] %v8922_v15 }
 0x137   :  { %v8830_v21 = vperm.slane %v1052_v43, 0 }
 0x138   :  { %1475 = vrot.lane.b32.xlu0 %v1461_v23, %s11199_s7 }
 0x139   :  { %11363 = vst [vmem:[#allocation13_spill] sm:$0xff] %v8830_v21  ;;  %v1293_v41 = vmul.f32 %v8758_v19, %v8830_v21  ;;  %v1509_v36 = vmul.f32 %v8786_v6, %v8830_v21  ;;  %v1335_v46 = vmul.f32 %v8698_v53, %v8830_v21  ;;  %v1377_v5 = vmul.f32 %v8724_v61, %v8830_v21 }
 0x13a   :  { %v1251_v7 = vmul.f32 %v8704_v32, %v8830_v21  ;;  %v1419_v11 = vmul.f32 %v8742_v22, %v8830_v21  ;;  %v1462_v28 = vmul.f32 %v8769_v55, %v8830_v21  ;;  %v1556_v25 = vmul.f32 %v8763_v57, %v8830_v21 }
 0x13b   :  { %1306 = vrot.lane.b32.xlu2 %v1293_v41, %s7740_s27  ;;  %1524 = vrot.lane.b32.xlu1 %v1509_v36, %s11197_s28  ;;  %v8929_v41 = vld [vmem:[#allocation5 + $0x18] sm:$0xff] }
 0x140   :  { %1522 = vrot.lane.b32.xlu0 %v1508_v45, %s11197_s28  ;;  %v1691_v45 = vunpack.c.l.bf16 %v8929_v41 }
 0x143   :  { %1348 = vrot.lane.b32.xlu2 %v1335_v46, %s11204_s1  ;;  %v8934_v46 = vld [vmem:[#allocation5 + $0x10] sm:$0xff] }
 0x148   :  { %1569 = vrot.lane.b32.xlu0 %v1555_v50, %s11190_s3  ;;  %v8936_v50 = vld [vmem:[#allocation5 + $0x8] sm:$0xff] }
 0x14b   :  { %1390 = vrot.lane.b32.xlu2 %v1377_v5, %s11201_s6  ;;  %v1689_v5 = vunpack.c.l.bf16 %v8934_v46 }
 0x14d   :  { %v8853_v4 = vpop.permute.xlu2 %1342 }
 0x150   :  { %1264 = vrot.lane.b32.xlu0 %v1251_v7, %s7736_s10 }
 0x152   :  { %v1071_v52 = vpop.f32.mrf.mxu0  ;;  %v1091_v63 = vpop.f32.mrf.mxu1 }
 0x153   :  { %v1092_v29 = vadd.f32 %v1091_v63, %v1071_v52  ;;  %v1111_v38 = vpop.f32.mrf.mxu2  ;;  %1432 = vrot.lane.b32.xlu2 %v1419_v11, %s7739_s18  ;;  %v1687_v11 = vunpack.c.l.bf16 %v8936_v50  ;;  %v1685_v63 = vunpack.c.l.bf16 %v8941_v39 }
 0x155   :  { %v8869_v17 = vpop.permute.xlu2 %1565  ;;  %v1112_v40 = vadd.f32 %v1111_v38, %v1092_v29  ;;  %v8948_v38 = vld [vmem:[#allocation5 + $0xf8] sm:$0xff] }
 0x156   :  { %v8872_v44 = vpop.permute.xlu1 %1258  ;;  %v1131_v42 = vpop.f32.mrf.mxu3 }
 0x157   :  { %v1132_v8 = vadd.f32 %v1131_v42, %v1112_v40  ;;  %v1747_v42 = vunpack.c.l.bf16 %v8948_v38 }
 0x159   :  { %v8879_v59 = vperm.slane %v1132_v8, 0  ;;  %v1745_v8 = vunpack.c.l.bf16 %v8950_v18  ;;  %1870 = vmatpush.msra.mxu1 %v1747_v42 }
 0x15b   :  { %11364 = vst [vmem:[#allocation14_spill] sm:$0xff] %v8879_v59  ;;  %v1252_v47 = vmul.f32 %v8704_v32, %v8879_v59  ;;  %1477 = vrot.lane.b32.xlu2 %v1462_v28, %s11199_s7  ;;  %v1463_v10 = vmul.f32 %v8769_v55, %v8879_v59  ;;  %v8899_v32 = vld [vmem:[#allocation5 + $0x40] sm:$0xff]  ;;  %v1510_v24 = vmul.f32 %v8786_v6, %v8879_v59 }
 0x15c   :  { %v1701_v35 = vunpack.c.l.bf16 %v8899_v32  ;;  %v1294_v37 = vmul.f32 %v8758_v19, %v8879_v59  ;;  %v8924_v19 = vld [vmem:[#allocation5 + $0x20] sm:$0xff]  ;;  %v1336_v7 = vmul.f32 %v8698_v53, %v8879_v59  ;;  %v8952_v53 = vld [vmem:[#allocation5 + $0xe8] sm:$0xff]  ;;  %v1378_v27 = vmul.f32 %v8724_v61, %v8879_v59  ;;  %1871 = vmatpush.msra.mxu1 %v1745_v8 }
 0x15d   :  { %1266 = vrot.lane.b32.xlu1 %v1252_v47, %s7736_s10  ;;  %1479 = vrot.lane.b32.xlu0 %v1463_v10, %s11199_s7  ;;  %v8901_v20 = vpop.permute.xlu2 %1260  ;;  %v1693_v23 = vunpack.c.l.bf16 %v8924_v19  ;;  %v8960_v28 = vld [vmem:[#allocation5 + $0xe0] sm:$0xff]  ;;  %v1743_v47 = vunpack.c.l.bf16 %v8952_v53 }
 0x15e   :  { %v8897_v2 = vpop.permute.xlu1 %1384  ;;  %1857 = vmatpush.msra.mxu0 %v1701_v35  ;;  %v1741_v61 = vunpack.c.l.bf16 %v8960_v28 }
 0x15f   :  { %1872 = vmatpush.msra.mxu1 %v1743_v47 }
 0x160   :  { %1858 = vmatpush.msra.mxu0 %v1699_v14 }
 0x161   :  { %1873 = vmatpush.msra.mxu1 %v1741_v61 }
 0x162   :  { %1859 = vmatpush.msra.mxu0 %v1697_v0 }
 0x163   :  { %1526 = vrot.lane.b32.xlu2 %v1510_v24, %s11197_s28 }
 0x164   :  { %1860 = vmatpush.msra.mxu0 %v1695_v48  ;;  %v1739_v48 = vunpack.c.l.bf16 %v8964_v9 }
 0x165   :  { %1308 = vrot.lane.b32.xlu1 %v1294_v37, %s7740_s27  ;;  %1571 = vrot.lane.b32.xlu0 %v1556_v25, %s11190_s3  ;;  %v8931_v36 = vpop.permute.xlu2 %1386  ;;  %v8971_v37 = vld [vmem:[#allocation5 + $0xd0] sm:$0xff]  ;;  %v1226_v25 = vmul.f32 %v8700_v33, %v8845_v34  ;;  %v8986_v33 = vld [vmem:[#allocation5 + $0xc0] sm:$0xff] }
 0x166   :  { %1861 = vmatpush.msra.mxu0 %v1693_v23  ;;  %1874 = vmatpush.msra.mxu1 %v1739_v48  ;;  %v1557_v48 = vmul.f32 %v8763_v57, %v8879_v59 }
 0x167   :  { %v8926_v43 = vpop.permute.xlu1 %1426 }
 0x168   :  { %1862 = vmatpush.msra.mxu0 %v1691_v45  ;;  %v8976_v45 = vld [vmem:[#allocation5 + $0xc8] sm:$0xff] }
 0x16a   :  { %v1301_v52 = vpop.permute.xlu0 %1300  ;;  %1863 = vmatpush.msra.mxu0 %v1689_v5  ;;  %v1420_v5 = vmul.f32 %v8742_v22, %v8879_v59  ;;  %v1735_v22 = vunpack.c.l.bf16 %v8976_v45 }
 0x16c   :  { %1864 = vmatpush.msra.mxu0 %v1687_v11  ;;  %v1269_v11 = vsel %vm1268_vm0, %v8872_v44, %v8901_v20 }
 0x16d   :  { %1350 = vrot.lane.b32.xlu1 %v1336_v7, %s11204_s1  ;;  %v8954_v40 = vpop.permute.xlu2 %1428  ;;  %v1737_v7 = vunpack.c.l.bf16 %v8971_v37 }
 0x16e   :  { %1865 = vmatpush.msra.mxu0 %v1685_v63 }
 0x16f   :  { %v8946_v29 = vpop.permute.xlu1 %1471  ;;  %1875 = vmatpush.msra.mxu1 %v1737_v7  ;;  %v9022_v7 = vld [vmem:[#allocation5 + $0xa0] sm:$0xff] }
 0x171   :  { %1876 = vmatpush.msra.mxu1 %v1735_v22  ;;  %v9029_v22 = vld [vmem:[#allocation5 + $0x98] sm:$0xff] }
 0x172   :  { %v8969_v24 = vpop.permute.xlu0 %1344 }
 0x174   :  { %v1151_v56 = vpop.f32.mrf.mxu0 }
 0x175   :  { %v1171_v49 = vpop.f32.mrf.mxu1  ;;  %1392 = vrot.lane.b32.xlu1 %v1378_v27, %s11201_s6  ;;  %v1236_v27 = vadd.f32 %v8922_v15, %v1226_v25  ;;  %v8989_v42 = vpop.permute.xlu2 %1473  ;;  %s7755_s6 = smov 124  }
 0x176   :  { %v1172_v10 = vadd.f32 %v1171_v49, %v1151_v56  ;;  %v1191_v1 = vpop.f32.mrf.mxu2  ;;  %v8997_v56 = vld [vmem:[#allocation5 + $0xb8] sm:$0xff] }
 0x177   :  { %v8966_v35 = vpop.permute.xlu1 %1518  ;;  %v1278_v49 = vadd.f32 %v1269_v11, %v1236_v27  ;;  %v1731_v61 = vunpack.c.l.bf16 %v8997_v56  ;;  %v1437_v27 = vsel %vm1436_vm4, %v8926_v43, %v8954_v40  ;;  %v1484_v43 = vsel %vm11195_vm5, %v8946_v29, %v8989_v42 }
 0x178   :  { %v1192_v14 = vadd.f32 %v1191_v1, %v1172_v10  ;;  %v1733_v10 = vunpack.c.l.bf16 %v8986_v33 }
 0x179   :  { %v1211_v0 = vpop.f32.mrf.mxu3 }
 0x17a   :  { %v1212_v23 = vadd.f32 %v1211_v0, %v1192_v14  ;;  %v1353_v14 = vsel %vm11203_vm2, %v8853_v4, %v8969_v24  ;;  %v9012_v25 = vpop.permute.xlu0 %1567  ;;  %v9014_v0 = vld [vmem:[#allocation5 + $0xa8] sm:$0xff]  ;;  %1877 = vmatpush.msra.mxu1 %v1733_v10 }
 0x17b   :  { %v1727_v11 = vunpack.c.l.bf16 %v9014_v0 }
 0x17c   :  { %v8984_v63 = vperm.slane %v1212_v23, 0  ;;  %1878 = vmatpush.msra.mxu1 %v1731_v61  ;;  %v9044_v61 = vld [vmem:[#allocation5 + $0x90] sm:$0xff] }
 0x17d   :  { %1434 = vrot.lane.b32.xlu1 %v1420_v5, %s7739_s18  ;;  %v1395_v5 = vsel %vm11196_vm3, %v8897_v2, %v8931_v36 }
 0x17e   :  { %v1464_v8 = vmul.f32 %v8984_v63, %v8769_v55  ;;  %v1511_v44 = vmul.f32 %v8786_v6, %v8984_v63  ;;  %v9006_v55 = vld [vmem:[#allocation5 + $0xb0] sm:$0xff]  ;;  %v1558_v59 = vmul.f32 %v8763_v57, %v8984_v63  ;;  %v9069_v57 = vld [vmem:[#allocation5 + $0x158] sm:$0xff] }
 0x17f   :  { %v8999_v47 = vpop.permute.xlu1 %1302  ;;  %v1729_v23 = vunpack.c.l.bf16 %v9006_v55  ;;  %v9071_v63 = vld [vmem:[#allocation5 + $0x150] sm:$0xff] }
 0x180   :  { %v1311_v1 = vsel %vm1310_vm1, %v1301_v52, %v8999_v47  ;;  %1481 = vrot.lane.b32.xlu2 %v1464_v8, %s11199_s7  ;;  %1528 = vrot.lane.b32.xlu0 %v1511_v44, %s11197_s28  ;;  %v9031_v8 = vld [vmem:[#allocation5 + $0x178] sm:$0xff]  ;;  %v9033_v44 = vpop.permute.xlu2 %1520  ;;  %s7754_s28 = smov 123  }
 0x181   :  { %v1320_v6 = vadd.f32 %v1311_v1, %v1278_v49  ;;  %1879 = vmatpush.msra.mxu1 %v1729_v23  ;;  %v1725_v49 = vunpack.c.l.bf16 %v9022_v7  ;;  %v1779_v10 = vunpack.c.l.bf16 %v9031_v8  ;;  %v9037_v1 = vld [vmem:[#allocation5 + $0x170] sm:$0xff]  ;;  %v9048_v23 = vld [vmem:[#allocation5 + $0x160] sm:$0xff] }
 0x183   :  { %v1362_v52 = vadd.f32 %v1353_v14, %v1320_v6  ;;  %v9039_v6 = vld [vmem:[#allocation5 + $0x168] sm:$0xff]  ;;  %v1777_v14 = vunpack.c.l.bf16 %v9037_v1  ;;  %1880 = vmatpush.msra.mxu1 %v1727_v11  ;;  %1890 = vmatpush.msra.mxu2 %v1779_v10  ;;  %v1721_v11 = vunpack.c.l.bf16 %v9044_v61  ;;  %v1578_v10 = vsel %vm11193_vm7, %v8869_v17, %v9012_v25 }
 0x184   :  { %11366 = vst [vmem:[#allocation19_spill] sm:$0xff] %v9039_v6  ;;  %v1775_v29 = vunpack.c.l.bf16 %v9039_v6 }
 0x185   :  { %v1404_v4 = vadd.f32 %v1395_v5, %v1362_v52  ;;  %1573 = vrot.lane.b32.xlu1 %v1557_v48, %s11190_s3  ;;  %v1723_v48 = vunpack.c.l.bf16 %v9029_v22  ;;  %v1531_v5 = vsel %vm11194_vm6, %v8966_v35, %v9033_v44  ;;  %1881 = vmatpush.msra.mxu1 %v1725_v49  ;;  %v1773_v35 = vunpack.c.l.bf16 %v9048_v23 }
 0x186   :  { %1891 = vmatpush.msra.mxu2 %v1777_v14  ;;  %v1771_v14 = vunpack.c.l.bf16 %v9069_v57 }
 0x187   :  { %v1446_v2 = vadd.f32 %v1437_v27, %v1404_v4  ;;  %v9055_v27 = vld [vmem:[#allocation5 + $0x88] sm:$0xff]  ;;  %1882 = vmatpush.msra.mxu1 %v1723_v48  ;;  %v1769_v48 = vunpack.c.l.bf16 %v9071_v63 }
 0x188   :  { %v1719_v6 = vunpack.c.l.bf16 %v9055_v27  ;;  %1892 = vmatpush.msra.mxu2 %v1775_v29  ;;  %v9081_v29 = vld [vmem:[#allocation5 + $0x140] sm:$0xff] }
 0x189   :  { %v1494_v52 = vadd.f32 %v1484_v43, %v1446_v2  ;;  %v9064_v43 = vld [vmem:[#allocation5 + $0x80] sm:$0xff]  ;;  %1883 = vmatpush.msra.mxu1 %v1721_v11  ;;  %v1714_v11 = vunpack.c.h.bf16 %v8863_v51  ;;  %v9096_v51 = vld [vmem:[#allocation5 + $0x128] sm:$0xff] }
 0x18a   :  { %v9053_v4 = vpop.permute.xlu0 %1262  ;;  %v1717_v17 = vunpack.c.l.bf16 %v9064_v43  ;;  %1893 = vmatpush.msra.mxu2 %v1773_v35  ;;  %v9091_v35 = vld [vmem:[#allocation5 + $0x138] sm:$0xff] }
 0x18b   :  { %v1541_v2 = vadd.f32 %v1531_v5, %v1494_v52  ;;  %v9075_v52 = vld [vmem:[#allocation5 + $0x148] sm:$0xff]  ;;  %1884 = vmatpush.msra.mxu1 %v1719_v6  ;;  %v1710_v6 = vunpack.c.h.bf16 %v8874_v60  ;;  %v1706_v60 = vunpack.c.h.bf16 %v8884_v3  ;;  %v1700_v3 = vunpack.c.h.bf16 %v8904_v26 }
 0x18c   :  { %1894 = vmatpush.msra.mxu2 %v1771_v14  ;;  %v1763_v14 = vunpack.c.l.bf16 %v9091_v35  ;;  %v1696_v26 = vunpack.c.h.bf16 %v8917_v54  ;;  %v1270_v54 = vsel %vm1268_vm0, %v8901_v20, %v9053_v4 }
 0x18d   :  { %1575 = vrot.lane.b32.xlu1 %v1558_v59, %s11190_s3  ;;  %v1588_v21 = vadd.f32 %v1578_v10, %v1541_v2  ;;  %v1716_v59 = vunpack.c.h.bf16 %v8857_v16  ;;  %v1767_v10 = vunpack.c.l.bf16 %v9075_v52  ;;  %1885 = vmatpush.msra.mxu1 %v1717_v17  ;;  %v1712_v16 = vunpack.c.h.bf16 %v8867_v13  ;;  %s7749_s3 = smov 121  }
 0x18e   :  { %1895 = vmatpush.msra.mxu2 %v1769_v48  ;;  %v1708_v17 = vunpack.c.h.bf16 %v8877_v62  ;;  %v1702_v62 = vunpack.c.h.bf16 %v8899_v32  ;;  %v1698_v32 = vunpack.c.h.bf16 %v8909_v31  ;;  %v1694_v31 = vunpack.c.h.bf16 %v8924_v19 }
 0x18f   :  { %vm1593_vm8 = vcmp.ge.f32.partialorder %v1588_v21, 0.0  ;;  %v1598_v49 = vmul.f32 0.01, %v1588_v21  ;;  %1950 = vmatpush.msrb.mxu1 %v1716_v59  ;;  %v9100_v59 = vld [vmem:[#allocation5 + $0x120] sm:$0xff]  ;;  %v1746_v19 = vunpack.c.h.bf16 %v8950_v18  ;;  %v1742_v18 = vunpack.c.h.bf16 %v8960_v28  ;;  %v9167_v28 = vld [vmem:[#allocation5 + $0x1d8] sm:$0xff] }
 0x190   :  { %1896 = vmatpush.msra.mxu2 %v1767_v10  ;;  %v1704_v10 = vunpack.c.h.bf16 %v8892_v30 }
 0x191   :  { %v9079_v5 = vsel %vm1593_vm8, %v1588_v21, %v1598_v49  ;;  %v1765_v21 = vunpack.c.l.bf16 %v9081_v29  ;;  %1951 = vmatpush.msrb.mxu1 %v1714_v11  ;;  %v9093_v49 = vld [vmem:[#allocation5 + $0x130] sm:$0xff]  ;;  %v1759_v11 = vunpack.c.l.bf16 %v9096_v51  ;;  %vm2227_vm8 = vcmask 965632  }
 0x192   :  { %1866 = vmatmul.f32.vlgmr.msra.gmra.mxu0 %v9079_v5  ;;  %v9084_v2 = vpop.permute.xlu0 %1304  ;;  %11367 = vst [vmem:[#allocation16_spill] sm:$0xff] %v9093_v49  ;;  %v1761_v13 = vunpack.c.l.bf16 %v9093_v49  ;;  %v9111_v49 = vld [vmem:[#allocation5 + $0x110] sm:$0xff] }
 0x193   :  { %1952 = vmatpush.msrb.mxu1 %v1712_v16  ;;  %1897 = vmatpush.msra.mxu2 %v1765_v21  ;;  %v1757_v16 = vunpack.c.l.bf16 %v9100_v59  ;;  %v9109_v21 = vld [vmem:[#allocation5 + $0x118] sm:$0xff]  ;;  %11369 = vst [vmem:[#allocation18_spill] sm:$0xff] %v9111_v49  ;;  %v1753_v30 = vunpack.c.l.bf16 %v9111_v49  ;;  %v1227_v49 = vmul.f32 %v8776_v58, %v8845_v34  ;;  %v9142_v58 = vld [vmem:[#allocation5 + $0x1f0] sm:$0xff]  ;;  %v1312_v20 = vsel %vm1310_vm1, %v8999_v47, %v9084_v2 }
 0x194   :  { %11368 = vst [vmem:[#allocation17_spill] sm:$0xff] %v9109_v21  ;;  %v1686_v47 = vunpack.c.h.bf16 %v8941_v39 }
 0x195   :  { %1953 = vmatpush.msrb.mxu1 %v1710_v6  ;;  %1898 = vmatpush.msra.mxu2 %v1763_v14  ;;  %v1755_v6 = vunpack.c.l.bf16 %v9109_v21  ;;  %v9114_v14 = vld [vmem:[#allocation5 + $0x108] sm:$0xff] }
 0x197   :  { %1954 = vmatpush.msrb.mxu1 %v1708_v17  ;;  %1899 = vmatpush.msra.mxu2 %v1761_v13  ;;  %v9118_v17 = vld [vmem:[#allocation5 + $0x100] sm:$0xff]  ;;  %v9120_v13 = vld [vmem:[#allocation5 + $0x1f8] sm:$0xff] }
 0x198   :  { %v1811_v21 = vunpack.c.l.bf16 %v9120_v13 }
 0x199   :  { %1955 = vmatpush.msrb.mxu1 %v1706_v60  ;;  %1900 = vmatpush.msra.mxu2 %v1759_v11  ;;  %v1751_v11 = vunpack.c.l.bf16 %v9114_v14 }
 0x19a   :  { %v9102_v48 = vpop.permute.xlu0 %1346  ;;  %1910 = vmatpush.msra.mxu3 %v1811_v21 }
 0x19b   :  { %1956 = vmatpush.msrb.mxu1 %v1704_v10  ;;  %1901 = vmatpush.msra.mxu2 %v1757_v16  ;;  %v1749_v10 = vunpack.c.l.bf16 %v9118_v17  ;;  %v1748_v16 = vunpack.c.h.bf16 %v8948_v38  ;;  %v1237_v38 = vadd.f32 %v8922_v15, %v1227_v49  ;;  %v1809_v49 = vunpack.c.l.bf16 %v9142_v58 }
 0x19d   :  { %1957 = vmatpush.msrb.mxu1 %v1702_v62  ;;  %1902 = vmatpush.msra.mxu2 %v1755_v6  ;;  %v9132_v62 = vpop.permute.xlu2 %1306  ;;  %v1692_v6 = vunpack.c.h.bf16 %v8929_v41  ;;  %v1744_v41 = vunpack.c.h.bf16 %v8952_v53  ;;  %v1354_v53 = vsel %vm11203_vm2, %v8969_v24, %v9102_v48  ;;  %v1740_v24 = vunpack.c.h.bf16 %v8964_v9 }
 0x19e   :  { %1911 = vmatpush.msra.mxu3 %v1809_v49  ;;  %v1736_v49 = vunpack.c.h.bf16 %v8976_v45 }
 0x19f   :  { %1958 = vmatpush.msrb.mxu1 %v1700_v3  ;;  %1903 = vmatpush.msra.mxu2 %v1753_v30  ;;  %v1690_v3 = vunpack.c.h.bf16 %v8934_v46  ;;  %v9146_v30 = vld [vmem:[#allocation5 + $0x1e8] sm:$0xff]  ;;  %v1688_v46 = vunpack.c.h.bf16 %v8936_v50 }
 0x1a1   :  { %1959 = vmatpush.msrb.mxu1 %v1698_v32  ;;  %1904 = vmatpush.msra.mxu2 %v1751_v11  ;;  %v9149_v32 = vld [vmem:[#allocation5 + $0x1e0] sm:$0xff]  ;;  %v1807_v11 = vunpack.c.l.bf16 %v9146_v30 }
 0x1a2   :  { %v9122_v60 = vpop.permute.xlu0 %1430 }
 0x1a3   :  { %1960 = vmatpush.msrb.mxu1 %v1696_v26  ;;  %1905 = vmatpush.msra.mxu2 %v1749_v10  ;;  %v1279_v26 = vadd.f32 %v1270_v54, %v1237_v38  ;;  %v1805_v10 = vunpack.c.l.bf16 %v9149_v32  ;;  %v9170_v54 = vld [vmem:[#allocation5 + $0x1d0] sm:$0xff]  ;;  %v1738_v38 = vunpack.c.h.bf16 %v8971_v37  ;;  %v1438_v37 = vsel %vm1436_vm4, %v8954_v40, %v9122_v60 }
 0x1a4   :  { %1912 = vmatpush.msra.mxu3 %v1807_v11  ;;  %v9188_v11 = vld [vmem:[#allocation5 + $0x1c0] sm:$0xff] }
 0x1a5   :  { %1970 = vmatpush.msrb.mxu2 %v1748_v16  ;;  %1961 = vmatpush.msrb.mxu1 %v1694_v31  ;;  %v1321_v16 = vadd.f32 %v1312_v20, %v1279_v26  ;;  %v9163_v31 = vpop.permute.xlu1 %1388  ;;  %v9179_v20 = vld [vmem:[#allocation5 + $0x260] sm:$0x11]  ;;  %v1797_v40 = vunpack.c.l.bf16 %v9188_v11 }
 0x1a6   :  { %1913 = vmatpush.msra.mxu3 %v1805_v10  ;;  %v1396_v9 = vsel %vm11196_vm3, %v8931_v36, %v9163_v31  ;;  %v1837_v26 = vunpack.c.l.bf16 %v9179_v20 }
 0x1a7   :  { %1962 = vmatpush.msrb.mxu1 %v1692_v6  ;;  %1971 = vmatpush.msrb.mxu2 %v1746_v19  ;;  %v9165_v6 = vpop.permute.xlu2 %1348  ;;  %v1363_v50 = vadd.f32 %v1354_v53, %v1321_v16  ;;  %v1803_v19 = vunpack.c.l.bf16 %v9167_v28  ;;  %v1734_v16 = vunpack.c.h.bf16 %v8986_v33  ;;  %v1732_v33 = vunpack.c.h.bf16 %v8997_v56  ;;  %v9227_v56 = vld [vmem:[#allocation5 + $0x1a0] sm:$0xff] }
 0x1a8   :  { %7155 = vmatpush.msk.msrb.mxu0 %vm1843_vm9, %v1837_v26  ;;  %v9220_v26 = vld [vmem:[#allocation5 + $0x1a8] sm:$0xff]  ;;  %11370 = vst [vmem:[#allocation20_spill] sm:$0xff] %v9227_v56 }
 0x1a9   :  { %1963 = vmatpush.msrb.mxu1 %v1690_v3  ;;  %1972 = vmatpush.msrb.mxu2 %v1744_v41  ;;  %v9173_v3 = vld [vmem:[#allocation5 + $0x1c8] sm:$0xff]  ;;  %v1801_v41 = vunpack.c.l.bf16 %v9170_v54 }
 0x1aa   :  { %v9140_v21 = vpop.permute.xlu0 %1475  ;;  %1914 = vmatpush.msra.mxu3 %v1803_v19 }
 0x1ab   :  { %1964 = vmatpush.msrb.mxu1 %v1688_v46  ;;  %1973 = vmatpush.msrb.mxu2 %v1742_v18  ;;  %v1405_v46 = vadd.f32 %v1396_v9, %v1363_v50  ;;  %v1799_v18 = vunpack.c.l.bf16 %v9173_v3  ;;  %v1485_v53 = vsel %vm11195_vm5, %v8989_v42, %v9140_v21  ;;  %v9203_v50 = vld [vmem:[#allocation5 + $0x258] sm:$0xff]  ;;  %v9215_v9 = vld [vmem:[#allocation5 + $0x1b0] sm:$0xff] }
 0x1ac   :  { %1915 = vmatpush.msra.mxu3 %v1801_v41  ;;  %v1835_v41 = vunpack.c.l.bf16 %v9203_v50 }
 0x1ad   :  { %1965 = vmatpush.msrb.mxu1 %v1686_v47  ;;  %1974 = vmatpush.msrb.mxu2 %v1740_v24  ;;  %v1447_v36 = vadd.f32 %v1438_v37, %v1405_v46  ;;  %v9201_v47 = vld [vmem:[#allocation5 + $0x1b8] sm:$0xff]  ;;  %v9217_v37 = vld [vmem:[#allocation5 + $0x250] sm:$0xff] }
 0x1ae   :  { %1916 = vmatpush.msra.mxu3 %v1799_v18  ;;  %v1795_v19 = vunpack.c.l.bf16 %v9201_v47  ;;  %1934 = vmatpush.msrb.mxu0 %v1835_v41  ;;  %v1793_v18 = vunpack.c.l.bf16 %v9215_v9  ;;  %v1726_v41 = vunpack.c.h.bf16 %v9022_v7 }
 0x1af   :  { %1975 = vmatpush.msrb.mxu2 %v1738_v38  ;;  %v1495_v10 = vadd.f32 %v1485_v53, %v1447_v36  ;;  %v9205_v42 = vpop.permute.xlu2 %1390  ;;  %v1833_v53 = vunpack.c.l.bf16 %v9217_v37  ;;  %v9225_v36 = vld [vmem:[#allocation5 + $0x248] sm:$0xff] }
 0x1b0   :  { %1917 = vmatpush.msra.mxu3 %v1797_v40  ;;  %v9229_v40 = vld [vmem:[#allocation5 + $0x240] sm:$0xff] }
 0x1b1   :  { %1976 = vmatpush.msrb.mxu2 %v1736_v49  ;;  %v1730_v49 = vunpack.c.h.bf16 %v9006_v55  ;;  %v1228_v55 = vmul.f32 %v8805_v12, %v8845_v34  ;;  %1935 = vmatpush.msrb.mxu0 %v1833_v53  ;;  %v9241_v12 = vld [vmem:[#allocation5 + $0x198] sm:$0xff] }
 0x1b2   :  { %v9175_v39 = vpop.permute.xlu0 %1522  ;;  %1918 = vmatpush.msra.mxu3 %v1795_v19  ;;  %v1829_v19 = vunpack.c.l.bf16 %v9229_v40  ;;  %11372 = vst [vmem:[#allocation22_spill] sm:$0xff] %v9241_v12  ;;  %v1787_v7 = vunpack.c.l.bf16 %v9241_v12  ;;  %v9267_v12 = vld [vmem:[#allocation5 + $0x220] sm:$0xff] }
 0x1b3   :  { %v1532_v45 = vsel %vm11194_vm6, %v9033_v44, %v9175_v39  ;;  %1977 = vmatpush.msrb.mxu2 %v1734_v16  ;;  %v1238_v53 = vadd.f32 %v8922_v15, %v1228_v55 }
 0x1b4   :  { %v1542_v24 = vadd.f32 %v1532_v45, %v1495_v10  ;;  %v1831_v45 = vunpack.c.l.bf16 %v9225_v36  ;;  %v1728_v10 = vunpack.c.h.bf16 %v9014_v0  ;;  %1919 = vmatpush.msra.mxu3 %v1793_v18  ;;  %v9243_v0 = vld [vmem:[#allocation5 + $0x238] sm:$0xff]  ;;  %v9246_v18 = vld [vmem:[#allocation5 + $0x190] sm:$0xff] }
 0x1b5   :  { %1978 = vmatpush.msrb.mxu2 %v1732_v33  ;;  %v1724_v33 = vunpack.c.h.bf16 %v9029_v22  ;;  %11373 = vst [vmem:[#allocation23_spill] sm:$0xff] %v9246_v18 }
 0x1b6   :  { %1936 = vmatpush.msrb.mxu0 %v1831_v45  ;;  %v9254_v45 = vld [vmem:[#allocation5 + $0x230] sm:$0xff] }
 0x1b7   :  { %1979 = vmatpush.msrb.mxu2 %v1730_v49  ;;  %v1825_v55 = vunpack.c.l.bf16 %v9254_v45 }
 0x1b8   :  { %1937 = vmatpush.msrb.mxu0 %v1829_v19  ;;  %v9265_v19 = vld [vmem:[#allocation5 + $0x180] sm:$0xff] }
 0x1b9   :  { %1980 = vmatpush.msrb.mxu2 %v1728_v10  ;;  %v9256_v10 = vld [vmem:[#allocation5 + $0x188] sm:$0xff] }
 0x1ba   :  { %v9207_v38 = vpop.permute.xlu0 %1569 }
 0x1bb   :  { %v1579_v44 = vsel %vm11193_vm7, %v9012_v25, %v9207_v38  ;;  %v1791_v25 = vunpack.c.l.bf16 %v9220_v26  ;;  %1981 = vmatpush.msrb.mxu2 %v1726_v41 }
 0x1bc   :  { %v1589_v46 = vadd.f32 %v1579_v44, %v1542_v24  ;;  %v1789_v24 = vunpack.c.l.bf16 %v9227_v56  ;;  %v1783_v56 = vunpack.c.l.bf16 %v9256_v10 }
 0x1bd   :  { %1920 = vmatpush.msra.mxu3 %v1791_v25  ;;  %v1785_v25 = vunpack.c.l.bf16 %v9246_v18  ;;  %v9269_v18 = vpop.permute.xlu2 %1432  ;;  %1982 = vmatpush.msrb.mxu2 %v1724_v33 }
 0x1be   :  { %v1599_v16 = vmul.f32 0.01, %v1589_v46  ;;  %vm1594_vm10 = vcmp.ge.f32.partialorder %v1589_v46, 0.0 }
 0x1bf   :  { %1921 = vmatpush.msra.mxu3 %v1789_v24  ;;  %v1722_v24 = vunpack.c.h.bf16 %v9044_v61  ;;  %v1720_v61 = vunpack.c.h.bf16 %v9055_v27  ;;  %v9290_v27 = vld [vmem:[#allocation5 + $0x218] sm:$0xff] }
 0x1c0   :  { %v9238_v44 = vsel %vm1594_vm10, %v1589_v46, %v1599_v16  ;;  %v1827_v46 = vunpack.c.l.bf16 %v9243_v0  ;;  %v9258_v16 = vld [vmem:[#allocation5 + $0x228] sm:$0xff]  ;;  %vm2341_vm10 = vcmask 949248  }
 0x1c1   :  { %11371 = vst [vmem:[#allocation21_spill] sm:$0xff] %v9238_v44  ;;  %1886 = vmatmul.f32.vlgmr.msra.gmra.mxu1 %v9238_v44  ;;  %1922 = vmatpush.msra.mxu3 %v1787_v7  ;;  %v1823_v44 = vunpack.c.l.bf16 %v9258_v16  ;;  %v1355_v7 = vsel %vm11203_vm2, %v9102_v48, %v9165_v6  ;;  %v1778_v48 = vunpack.c.h.bf16 %v9037_v1 }
 0x1c2   :  { %v9249_v49 = vpop.permute.xlu0 %1264  ;;  %1938 = vmatpush.msrb.mxu0 %v1827_v46  ;;  %v9282_v46 = vpop.permute.xlu1 %1524  ;;  %1983 = vmatpush.msrb.mxu2 %v1722_v24  ;;  %v9301_v24 = vld [vmem:[#allocation5 + $0x200] sm:$0xff] }
 0x1c3   :  { %11374 = vst [vmem:[#allocation24_spill] sm:$0xff] %v9249_v49  ;;  %v1271_v22 = vsel %vm1268_vm0, %v9053_v4, %v9249_v49  ;;  %v1313_v4 = vsel %vm1310_vm1, %v9084_v2, %v9132_v62  ;;  %1923 = vmatpush.msra.mxu3 %v1785_v25  ;;  %v1781_v49 = vunpack.c.l.bf16 %v9265_v19  ;;  %v1780_v2 = vunpack.c.h.bf16 %v9031_v8  ;;  %v9293_v25 = vld [vmem:[#allocation5 + $0x210] sm:$0xff] }
 0x1c4   :  { %v1280_v15 = vadd.f32 %v1271_v22, %v1238_v53  ;;  %1939 = vmatpush.msrb.mxu0 %v1825_v55  ;;  %v1821_v53 = vunpack.c.l.bf16 %v9267_v12  ;;  %v1718_v22 = vunpack.c.h.bf16 %v9064_v43  ;;  %1984 = vmatpush.msrb.mxu2 %v1720_v61  ;;  %v9295_v55 = vld [vmem:[#allocation5 + $0x208] sm:$0xff]  ;;  %v1838_v8 = vunpack.c.h.bf16 %v9179_v20 }
 0x1c5   :  { %1924 = vmatpush.msra.mxu3 %v1783_v56  ;;  %v1819_v56 = vunpack.c.l.bf16 %v9290_v27  ;;  %v1815_v1 = vunpack.c.l.bf16 %v9295_v55  ;;  %v1439_v20 = vsel %vm1436_vm4, %v9122_v60, %v9269_v18  ;;  %v1772_v60 = vunpack.c.h.bf16 %v9069_v57 }
 0x1c6   :  { %v1322_v41 = vadd.f32 %v1313_v4, %v1280_v15  ;;  %1940 = vmatpush.msrb.mxu0 %v1823_v44  ;;  %v1397_v15 = vsel %vm11196_vm3, %v9163_v31, %v9205_v42  ;;  %v1817_v31 = vunpack.c.l.bf16 %v9293_v25  ;;  %1985 = vmatpush.msrb.mxu2 %v1718_v22  ;;  %v9309_v4 = vpop.permute.xlu2 %1477  ;;  %v1832_v57 = vunpack.c.h.bf16 %v9225_v36 }
 0x1c7   :  { %1925 = vmatpush.msra.mxu3 %v1781_v49  ;;  %7157 = vmatpush.msk.msra.mxu1 %vm1843_vm9, %v1838_v8  ;;  %v1774_v49 = vunpack.c.h.bf16 %v9048_v23  ;;  %v1486_v22 = vsel %vm11195_vm5, %v9140_v21, %v9309_v4  ;;  %v1836_v23 = vunpack.c.h.bf16 %v9203_v50  ;;  %v1834_v8 = vunpack.c.h.bf16 %v9217_v37 }
 0x1c8   :  { %v1364_v33 = vadd.f32 %v1355_v7, %v1322_v41  ;;  %1941 = vmatpush.msrb.mxu0 %v1821_v53  ;;  %v1813_v41 = vunpack.c.l.bf16 %v9301_v24  ;;  %v1808_v21 = vunpack.c.h.bf16 %v9146_v30  ;;  %v1830_v50 = vunpack.c.h.bf16 %v9229_v40 }
 0x1c9   :  { %1966 = vmatmul.f32.vlgmr.msrb.gmra.mxu1 %v9079_v5  ;;  %1990 = vmatpush.msrb.mxu3 %v1780_v2  ;;  %v11375_v5 = vld [vmem:[#allocation19_spill] sm:$0xff]  ;;  %v1812_v2 = vunpack.c.h.bf16 %v9120_v13  ;;  %v1766_v13 = vunpack.c.h.bf16 %v9081_v29  ;;  %v1764_v36 = vunpack.c.h.bf16 %v9091_v35  ;;  %v1828_v29 = vunpack.c.h.bf16 %v9243_v0 }
 0x1ca   :  { %v1406_v43 = vadd.f32 %v1397_v15, %v1364_v33  ;;  %v1776_v44 = vunpack.c.h.bf16 %v11375_v5  ;;  %1942 = vmatpush.msrb.mxu0 %v1819_v56  ;;  %2034 = vmatpush.msra.mxu1 %v1836_v23  ;;  %v1770_v15 = vunpack.c.h.bf16 %v9071_v63  ;;  %v1533_v63 = vsel %vm11194_vm6, %v9175_v39, %v9282_v46 }
 0x1cb   :  { %1991 = vmatpush.msrb.mxu3 %v1778_v48  ;;  %v1810_v48 = vunpack.c.h.bf16 %v9142_v58  ;;  %v1806_v58 = vunpack.c.h.bf16 %v9149_v32  ;;  %v1804_v32 = vunpack.c.h.bf16 %v9167_v28  ;;  %v1802_v35 = vunpack.c.h.bf16 %v9170_v54 }
 0x1cc   :  { %v1448_v61 = vadd.f32 %v1439_v20, %v1406_v43  ;;  %1943 = vmatpush.msrb.mxu0 %v1817_v31  ;;  %v1768_v43 = vunpack.c.h.bf16 %v9075_v52  ;;  %2035 = vmatpush.msra.mxu1 %v1834_v8  ;;  %v11376_v31 = vld [vmem:[#allocation16_spill] sm:$0xff]  ;;  %v1826_v0 = vunpack.c.h.bf16 %v9254_v45  ;;  %v1824_v28 = vunpack.c.h.bf16 %v9258_v16  ;;  %v11383_v8 = vld [vmem:[#allocation15_spill] sm:$0xff] }
 0x1cd   :  { %1992 = vmatpush.msrb.mxu3 %v1776_v44  ;;  %v1762_v5 = vunpack.c.h.bf16 %v11376_v31  ;;  %v1800_v44 = vunpack.c.h.bf16 %v9173_v3  ;;  %v1758_v20 = vunpack.c.h.bf16 %v9100_v59  ;;  %v1822_v54 = vunpack.c.h.bf16 %v9267_v12  ;;  %v11378_v59 = vld [vmem:[#allocation13_spill] sm:$0xff] }
 0x1ce   :  { %1944 = vmatpush.msrb.mxu0 %v1815_v1  ;;  %v1496_v33 = vadd.f32 %v1486_v22, %v1448_v61  ;;  %2036 = vmatpush.msra.mxu1 %v1832_v57  ;;  %v1820_v3 = vunpack.c.h.bf16 %v9290_v27  ;;  %v1796_v16 = vunpack.c.h.bf16 %v9201_v47  ;;  %v1818_v12 = vunpack.c.h.bf16 %v9293_v25  ;;  %v11385_v57 = vld [vmem:[#allocation14_spill] sm:$0xff] }
 0x1cf   :  { %v9312_v53 = vpop.permute.xlu1 %1266  ;;  %v9314_v7 = vpop.permute.xlu0 %1479  ;;  %1993 = vmatpush.msrb.mxu3 %v1774_v49  ;;  %v1798_v49 = vunpack.c.h.bf16 %v9188_v11  ;;  %v11379_v11 = vld [vmem:[#allocation18_spill] sm:$0xff]  ;;  %v1752_v23 = vunpack.c.h.bf16 %v9114_v14  ;;  %v1816_v47 = vunpack.c.h.bf16 %v9295_v55  ;;  %v1750_v27 = vunpack.c.h.bf16 %v9118_v17 }
 0x1d0   :  { %1945 = vmatpush.msrb.mxu0 %v1813_v41  ;;  %v1543_v30 = vadd.f32 %v1533_v63, %v1496_v33  ;;  %2037 = vmatpush.msra.mxu1 %v1830_v50  ;;  %v1229_v41 = vmul.f32 %v11378_v59, %v8845_v34  ;;  %v1754_v22 = vunpack.c.h.bf16 %v11379_v11  ;;  %v11380_v33 = vld [vmem:[#allocation24_spill] sm:$0xff]  ;;  %v11384_v55 = vld [vmem:[#allocation22_spill] sm:$0xff] }
 0x1d1   :  { %1994 = vmatpush.msrb.mxu3 %v1772_v60  ;;  %v1794_v60 = vunpack.c.h.bf16 %v9215_v9  ;;  %v11382_v9 = vld [vmem:[#allocation20_spill] sm:$0xff] }
 0x1d2   :  { %2010 = vmatpush.msra.mxu0 %v1812_v2  ;;  %2038 = vmatpush.msra.mxu1 %v1828_v29  ;;  %v1792_v2 = vunpack.c.h.bf16 %v9220_v26  ;;  %v1790_v25 = vunpack.c.h.bf16 %v11382_v9  ;;  %v1239_v14 = vadd.f32 %v11383_v8, %v1229_v41  ;;  %v1814_v26 = vunpack.c.h.bf16 %v9301_v24 }
 0x1d3   :  { %1995 = vmatpush.msrb.mxu3 %v1770_v15  ;;  %v1272_v15 = vsel %vm1268_vm0, %v11380_v33, %v9312_v53 }
 0x1d4   :  { %2011 = vmatpush.msra.mxu0 %v1810_v48  ;;  %2039 = vmatpush.msra.mxu1 %v1826_v0  ;;  %v11381_v48 = vld [vmem:[#allocation21_spill] sm:$0xff]  ;;  %v1281_v50 = vadd.f32 %v1272_v15, %v1239_v14 }
 0x1d5   :  { %1996 = vmatpush.msrb.mxu3 %v1768_v43 }
 0x1d6   :  { %2012 = vmatpush.msra.mxu0 %v1808_v21  ;;  %2040 = vmatpush.msra.mxu1 %v1824_v28  ;;  %v1788_v21 = vunpack.c.h.bf16 %v11384_v55 }
 0x1d7   :  { %v9334_v37 = vpop.permute.xlu1 %1308  ;;  %v9336_v52 = vpop.permute.xlu0 %1571  ;;  %1997 = vmatpush.msrb.mxu3 %v1766_v13  ;;  %v1230_v13 = vmul.f32 %v11385_v57, %v8845_v34  ;;  %v1784_v34 = vunpack.c.h.bf16 %v9256_v10 }
 0x1d8   :  { %v1580_v40 = vsel %vm11193_vm7, %v9207_v38, %v9336_v52  ;;  %2013 = vmatpush.msra.mxu0 %v1806_v58  ;;  %v1760_v38 = vunpack.c.h.bf16 %v9096_v51  ;;  %v11377_v51 = vld [vmem:[#allocation17_spill] sm:$0xff]  ;;  %2041 = vmatpush.msra.mxu1 %v1822_v54  ;;  %v1314_v17 = vsel %vm1310_vm1, %v9132_v62, %v9334_v37  ;;  %v11386_v58 = vld [vmem:[#allocation23_spill] sm:$0xff] }
 0x1d9   :  { %v1590_v39 = vadd.f32 %v1580_v40, %v1543_v30  ;;  %1998 = vmatpush.msrb.mxu3 %v1764_v36  ;;  %v1756_v45 = vunpack.c.h.bf16 %v11377_v51  ;;  %v1786_v30 = vunpack.c.h.bf16 %v11386_v58  ;;  %v1323_v24 = vadd.f32 %v1314_v17, %v1281_v50  ;;  %v1527_v40 = vpop.permute.xlu2 %1526  ;;  %v2050_v17 = vld [vmem:[%s11388_s5] sm:$0xf]  ;;  %v7163_v50 = vld [vmem:[%s11387_s0 + $0x4] sm:$0xf]  ;;  %s11392_s5 = sld [smem:[#allocation46_spill]] }
 0x1da   :  { %2014 = vmatpush.msra.mxu0 %v1804_v32  ;;  %2042 = vmatpush.msra.mxu1 %v1820_v3  ;;  %v1240_v36 = vadd.f32 %v11383_v8, %v1230_v13 }
 0x1db   :  { %v1600_v56 = vmul.f32 0.01, %v1590_v39  ;;  %vm1595_vm11 = vcmp.ge.f32.partialorder %v1590_v39, 0.0  ;;  %1999 = vmatpush.msrb.mxu3 %v1762_v5 }
 0x1dc   :  { %2015 = vmatpush.msra.mxu0 %v1802_v35  ;;  %2043 = vmatpush.msra.mxu1 %v1818_v12  ;;  %v1487_v35 = vsel %vm11195_vm5, %v9309_v4, %v9314_v7 }
 0x1dd   :  { %v9349_v1 = vsel %vm1595_vm11, %v1590_v39, %v1600_v56  ;;  %2000 = vmatpush.msrb.mxu3 %v1760_v38  ;;  %v1282_v39 = vadd.f32 %v9312_v53, %v1240_v36  ;;  %v1782_v56 = vunpack.c.h.bf16 %v9265_v19  ;;  %v1534_v53 = vsel %vm11194_vm6, %v9282_v46, %v1527_v40 }
 0x1de   :  { %1906 = vmatmul.f32.vlgmr.msra.gmra.mxu2 %v9349_v1  ;;  %2016 = vmatpush.msra.mxu0 %v1800_v44  ;;  %vm2284_vm11 = vcmask 957440  }
 0x1df   :  { %v1351_v61 = vpop.permute.xlu1 %1350  ;;  %2001 = vmatpush.msrb.mxu3 %v1758_v20  ;;  %2044 = vmatpush.msra.mxu1 %v1816_v47 }
 0x1e0   :  { %2017 = vmatpush.msra.mxu0 %v1798_v49  ;;  %v1356_v63 = vsel %vm11203_vm2, %v9165_v6, %v1351_v61  ;;  %vm2987_vm2 = vcmask 64512  }
 0x1e1   :  { %2002 = vmatpush.msrb.mxu3 %v1756_v45  ;;  %2045 = vmatpush.msra.mxu1 %v1814_v26  ;;  %v1365_v29 = vadd.f32 %v1356_v63, %v1323_v24  ;;  %v1482_v44 = vpop.permute.xlu2 %1481 }
 0x1e2   :  { %2018 = vmatpush.msra.mxu0 %v1796_v16  ;;  %v1488_v49 = vsel %vm11195_vm5, %v9314_v7, %v1482_v44  ;;  %vm2667_vm5 = vcmask 1043456  }
 0x1e3   :  { %2003 = vmatpush.msrb.mxu3 %v1754_v22 }
 0x1e4   :  { %2019 = vmatpush.msra.mxu0 %v1794_v60 }
 0x1e5   :  { %2004 = vmatpush.msrb.mxu3 %v1752_v23 }
 0x1e6   :  { %1986 = vmatmul.f32.vlgmr.msrb.gmra.mxu2 %v11381_v48  ;;  %2020 = vmatpush.msra.mxu0 %v1792_v2  ;;  %v2051_v48 = vld [vmem:[%s11387_s0] sm:$0xf] }
 0x1e7   :  { %v1393_v43 = vpop.permute.xlu1 %1392  ;;  %2005 = vmatpush.msrb.mxu3 %v1750_v27 }
 0x1e8   :  { %2021 = vmatpush.msra.mxu0 %v1790_v25  ;;  %v1398_v62 = vsel %vm11196_vm3, %v9205_v42, %v1393_v43  ;;  %v1324_v42 = vadd.f32 %v9334_v37, %v1282_v39  ;;  %vm2663_vm3 = vcmask 31744  }
 0x1e9   :  { %v1407_v32 = vadd.f32 %v1398_v62, %v1365_v29  ;;  %v7168_v62 = vld [vmem:[%s11387_s0 + $0x8] sm:$0xf] }
 0x1ea   :  { %2022 = vmatpush.msra.mxu0 %v1788_v21  ;;  %v1366_v10 = vadd.f32 %v1351_v61, %v1324_v42  ;;  %v7178_v42 = vld [vmem:[%s11387_s0 + $0x10] sm:$0xf] }
 0x1ec   :  { %2023 = vmatpush.msra.mxu0 %v1786_v30  ;;  %v1408_v38 = vadd.f32 %v1393_v43, %v1366_v10 }
 0x1ee   :  { %2024 = vmatpush.msra.mxu0 %v1784_v34 }
 0x1ef   :  { %v1435_v6 = vpop.permute.xlu1 %1434 }
 0x1f0   :  { %v1440_v31 = vsel %vm1436_vm4, %v9269_v18, %v1435_v6  ;;  %2025 = vmatpush.msra.mxu0 %v1782_v56  ;;  %v1450_v19 = vadd.f32 %v1435_v6, %v1408_v38 }
 0x1f1   :  { %v1449_v5 = vadd.f32 %v1440_v31, %v1407_v32  ;;  %v7173_v32 = vld [vmem:[%s11387_s0 + $0xc] sm:$0xf] }
 0x1f2   :  { %v1529_v54 = vpop.permute.xlu0 %1528  ;;  %v1498_v4 = vadd.f32 %v1488_v49, %v1450_v19  ;;  %v7188_v19 = vld [vmem:[%s11387_s0 + $0x18] sm:$0xf] }
 0x1f3   :  { %v1497_v0 = vadd.f32 %v1487_v35, %v1449_v5  ;;  %v1535_v45 = vsel %vm11194_vm6, %v1527_v40, %v1529_v54  ;;  %v7183_v35 = vld [vmem:[%s11387_s0 + $0x14] sm:$0xf]  ;;  %v7542_v49 = vld [vmem:[%s11110_s19 + $0x38] sm:$0xff]  }
 0x1f4   :  { %v1545_v46 = vadd.f32 %v1535_v45, %v1498_v4  ;;  %v7541_v54 = vld [vmem:[%s11110_s19 + $0x30] sm:$0xff]   ;;  %v7503_v4 = vunpack.c.h.bf16 %v7542_v49 }
 0x1f5   :  { %v1544_v28 = vadd.f32 %v1534_v53, %v1497_v0  ;;  %v7498_v45 = vunpack.c.l.bf16 %v7541_v54 }
 0x1f7   :  { %v1574_v20 = vpop.permute.xlu1 %1573 }
 0x1f8   :  { %v1581_v18 = vsel %vm11193_vm7, %v9336_v52, %v1574_v20 }
 0x1f9   :  { %v1591_v37 = vadd.f32 %v1581_v18, %v1544_v28 }
 0x1fb   :  { %v1601_v51 = vmul.f32 0.01, %v1591_v37  ;;  %vm1596_vm12 = vcmp.ge.f32.partialorder %v1591_v37, 0.0 }
 0x1fd   :  { %v1606_v61 = vsel %vm1596_vm12, %v1591_v37, %v1601_v51  ;;  %vm11212_vm12 = vcmask 867328   ;;  %v7198_v37 = vld [vmem:[%s11387_s0 + $0x20] sm:$0xf]  ;;  %v7502_v51 = vunpack.c.l.bf16 %v7542_v49 }
 0x1fe   :  { %1926 = vmatmul.f32.vlgmr.msra.gmra.mxu3 %v1606_v61 }
 0x1ff   :  { %v1576_v3 = vpop.permute.xlu1 %1575 }
 0x200   :  { %v1582_v16 = vsel %vm11193_vm7, %v1574_v20, %v1576_v3  ;;  %v7193_v20 = vld [vmem:[%s11387_s0 + $0x1c] sm:$0xf]  ;;  %vm11211_vm7 = vcmask 408576   ;;  %s7751_s0 = smov 120  }
 0x201   :  { %v1592_v59 = vadd.f32 %v1582_v16, %v1545_v46  ;;  %v7540_v46 = vld [vmem:[%s11110_s19 + $0x28] sm:$0xff]  }
 0x202   :  { %v7495_v3 = vunpack.c.h.bf16 %v7540_v46  ;;  %v7494_v16 = vunpack.c.l.bf16 %v7540_v46 }
 0x203   :  { %vm1597_vm13 = vcmp.ge.f32.partialorder %v1592_v59, 0.0  ;;  %v1602_v41 = vmul.f32 0.01, %v1592_v59 }
 0x205   :  { %v1607_v52 = vsel %vm1597_vm13, %v1592_v59, %v1602_v41  ;;  %vm11213_vm13 = vcmask 875520   ;;  %v7539_v59 = vld [vmem:[%s11110_s19 + $0x20] sm:$0xff]  }
 0x206   :  { %7156 = vmatmul.msk.f32.vlgmr.msrb.gmra.mxu0 %vm11192_vm14, %v1607_v52  ;;  %2006 = vmatmul.f32.vlgmr.msrb.gmra.mxu3 %v9349_v1  ;;  %v7491_v41 = vunpack.c.h.bf16 %v7539_v59 }
 0x207   :  { %7158 = vmatmul.msk.f32.vlgmr.msra.gmra.mxu1 %vm11192_vm14, %v1607_v52 }
 0x20e   :  { %2026 = vmatmul.f32.vlgmr.msra.gmra.mxu0 %v1606_v61  ;;  %v7499_v61 = vunpack.c.h.bf16 %v7541_v54 }
 0x20f   :  { %v1867_v7 = vpop.f32.mrf.mxu0 }
 0x23e   :  { %v1887_v11 = vpop.f32.mrf.mxu1 }
 0x23f   :  { %v1888_v60 = vadd.f32 %v1887_v11, %v1867_v7  ;;  %v7490_v11 = vunpack.c.l.bf16 %v7539_v59 }
 0x246   :  { %v1967_v33 = vpop.f32.mrf.mxu1 }
 0x261   :  { %v1907_v22 = vpop.f32.mrf.mxu2 }
 0x262   :  { %v1908_v12 = vadd.f32 %v1907_v22, %v1888_v60  ;;  %v7538_v22 = vld [vmem:[%s11110_s19 + $0x18] sm:$0xff]  }
 0x263   :  { %v7487_v60 = vunpack.c.h.bf16 %v7538_v22 }
 0x269   :  { %v1987_v15 = vpop.f32.mrf.mxu2 }
 0x26a   :  { %v1988_v1 = vadd.f32 %v1987_v15, %v1967_v33 }
 0x281   :  { %v1927_v23 = vpop.f32.mrf.mxu3 }
 0x282   :  { %v1928_v2 = vadd.f32 %v1927_v23, %v1908_v12  ;;  %v2590_v12 = vld [vmem:[%s11110_s19 + $0x58] sm:$0x1] }
 0x283   :  { %v1947_v47 = vpop.f32.mrf.mxu0  ;;  %v2613_v23 = vunpack.c.l.bf16 %v2590_v12  ;;  %v2661_v12 = vld [vmem:[%s11102_s11] sm:$0xff] }
 0x284   :  { %v1948_v27 = vadd.f32 %v1947_v47, %v1928_v2  ;;  %v2047_v43 = vpop.f32.mrf.mxu1  ;;  %v7486_v2 = vunpack.c.l.bf16 %v7538_v22  ;;  %v7545_v47 = vld [vmem:[%s11110_s19 + $0x50] sm:$0xff]  }
 0x285   :  { %v7515_v33 = vunpack.c.h.bf16 %v7545_v47 }
 0x286   :  { %2167 = vrot.lane.b32.xlu1 %v1948_v27, %s7740_s27  ;;  %2111 = vrot.lane.b32.xlu2 %v1948_v27, %s7736_s10 }
 0x287   :  { %7159 = vmatpush.msk.msra.mxu2 %vm1843_vm9, %v1948_v27 }
 0x288   :  { %7160 = vmatmul.msk.f32.vlgmr.msra.gmra.mxu2 %vm11210_vm15, %v2051_v48 }
 0x289   :  { %v2007_v9 = vpop.f32.mrf.mxu3 }
 0x28a   :  { %v2008_v25 = vadd.f32 %v2007_v9, %v1988_v1 }
 0x28b   :  { %v2027_v8 = vpop.f32.mrf.mxu0 }
 0x28c   :  { %v2028_v14 = vadd.f32 %v2027_v8, %v2008_v25  ;;  %v7544_v8 = vld [vmem:[%s11110_s19 + $0x48] sm:$0xff]  }
 0x28e   :  { %v2048_v26 = vadd.f32 %v2047_v43, %v2028_v14  ;;  %v7511_v14 = vunpack.c.h.bf16 %v7544_v8  ;;  %v7536_v43 = vld [vmem:[%s11110_s19 + $0x8] sm:$0xff]  }
 0x290   :  { %2113 = vrot.lane.b32.xlu0 %v2048_v26, %s7736_s10  ;;  %7161 = vmatpush.msk.msra.mxu3 %vm1843_vm9, %v2048_v26 }
 0x291   :  { %2225 = vrot.lane.b32.xlu1 %v2048_v26, %s7744_s8  ;;  %2169 = vrot.lane.b32.xlu2 %v2048_v26, %s7740_s27 }
 0x292   :  { %7162 = vmatmul.msk.f32.vlgmr.msra.gmra.mxu3 %vm11210_vm15, %v2051_v48  ;;  %v7514_v48 = vunpack.c.l.bf16 %v7545_v47  ;;  %v7219_v47 = vld [vmem:[%s11389_s16 + $0x28] sm:$0xff] }
 0x298   :  { %2223 = vrot.lane.b32.xlu0 %v1948_v27, %s7744_s8 }
 0x299   :  { %2337 = vrot.lane.b32.xlu1 %v1948_v27, %s7745_s29  ;;  %2280 = vrot.lane.b32.xlu2 %v1948_v27, %s7746_s9 }
 0x2a0   :  { %2394 = vrot.lane.b32.xlu0 %v1948_v27, %s7739_s18 }
 0x2a1   :  { %2396 = vrot.lane.b32.xlu1 %v2048_v26, %s7739_s18  ;;  %2339 = vrot.lane.b32.xlu2 %v2048_v26, %s7745_s29 }
 0x2a8   :  { %2282 = vrot.lane.b32.xlu0 %v2048_v26, %s7746_s9 }
 0x2a9   :  { %2507 = vrot.lane.b32.xlu1 %v1948_v27, %s11208_s2  ;;  %2450 = vrot.lane.b32.xlu2 %v1948_v27, %s11206_s24  ;;  %v7537_v27 = vld [vmem:[%s11110_s19 + $0x10] sm:$0xff]  }
 0x2aa   :  { %v7483_v15 = vunpack.c.h.bf16 %v7537_v27  ;;  %v7482_v25 = vunpack.c.l.bf16 %v7537_v27 }
 0x2b0   :  { %2452 = vrot.lane.b32.xlu0 %v2048_v26, %s11206_s24 }
 0x2b1   :  { %2509 = vrot.lane.b32.xlu2 %v2048_v26, %s11208_s2  ;;  %v7479_v26 = vunpack.c.h.bf16 %v7536_v43 }
 0x2b8   :  { %2104 = vperm.xlu0 %7580, %v2050_v17   ;;  %v7510_v17 = vunpack.c.l.bf16 %v7544_v8  ;;  %v7225_v8 = vld [vmem:[%s11389_s16 + $0x38] sm:$0xff] }
 0x2e0   :  { %v2112_v55 = vpop.permute.xlu2 %2111 }
 0x2eb   :  { %v2170_v21 = vpop.permute.xlu2 %2169 }
 0x2f3   :  { %v2281_v13 = vpop.permute.xlu2 %2280 }
 0x2f8   :  { %v2168_v57 = vpop.permute.xlu1 %2167 }
 0x2f9   :  { %v2171_v24 = vsel %vm1310_vm1, %v2168_v57, %v2170_v21 }
 0x2fb   :  { %v2340_v36 = vpop.permute.xlu2 %2339 }
 0x302   :  { %v2114_v63 = vpop.permute.xlu0 %2113 }
 0x303   :  { %v2115_v58 = vsel %vm1268_vm0, %v2112_v55, %v2114_v63  ;;  %v2226_v30 = vpop.permute.xlu1 %2225  ;;  %7166 = vmatpush.msk.msrb.mxu3 %vm1843_vm9, %v2114_v63  ;;  %v2451_v31 = vpop.permute.xlu2 %2450  ;;  %v7478_v55 = vunpack.c.l.bf16 %v7536_v43  ;;  %v7213_v43 = vld [vmem:[%s11389_s16 + $0x18] sm:$0xff] }
 0x304   :  { %7164 = vmatpush.msk.msrb.mxu2 %vm1843_vm9, %v2115_v58  ;;  %7167 = vmatmul.msk.f32.vlgmr.msrb.gmra.mxu3 %vm11210_vm15, %v7163_v50 }
 0x305   :  { %7171 = vmatpush.msk.msra.mxu3 %vm1843_vm9, %v2170_v21  ;;  %7165 = vmatmul.msk.f32.vlgmr.msrb.gmra.mxu2 %vm11210_vm15, %v7163_v50  ;;  %v7543_v21 = vld [vmem:[%s11110_s19 + $0x40] sm:$0xff]  }
 0x306   :  { %7169 = vmatpush.msk.msra.mxu2 %vm1843_vm9, %v2171_v24  ;;  %v7507_v57 = vunpack.c.h.bf16 %v7543_v21  ;;  %v7506_v50 = vunpack.c.l.bf16 %v7543_v21  ;;  %v2947_v21 = vld [vmem:[%s11111_s20 + $0x1c] sm:$0x1] }
 0x307   :  { %7176 = vmatpush.msk.msrb.mxu3 %vm1843_vm9, %v2226_v30 }
 0x30a   :  { %v2224_v29 = vpop.permute.xlu0 %2223 }
 0x30b   :  { %v2228_v34 = vsel %vm2227_vm8, %v2224_v29, %v2226_v30  ;;  %v2338_v40 = vpop.permute.xlu1 %2337  ;;  %v2510_v38 = vpop.permute.xlu2 %2509 }
 0x30c   :  { %v2342_v39 = vsel %vm2341_vm10, %v2338_v40, %v2340_v36  ;;  %7172 = vmatmul.msk.f32.vlgmr.msra.gmra.mxu3 %vm11210_vm15, %v7168_v62  ;;  %7174 = vmatpush.msk.msrb.mxu2 %vm1843_vm9, %v2228_v34  ;;  %v2079_v7 = vpop.f32.mrf.mxu2 }
 0x30d   :  { %7186 = vmatpush.msk.msra.mxu3 %vm1843_vm9, %v2340_v36  ;;  %7170 = vmatmul.msk.f32.vlgmr.msra.gmra.mxu2 %vm11210_vm15, %v7168_v62 }
 0x30e   :  { %7184 = vmatpush.msk.msra.mxu2 %vm1843_vm9, %v2342_v39 }
 0x312   :  { %v2395_v6 = vpop.permute.xlu0 %2394 }
 0x313   :  { %v2397_v56 = vpop.permute.xlu1 %2396 }
 0x314   :  { %7177 = vmatmul.msk.f32.vlgmr.msrb.gmra.mxu3 %vm11210_vm15, %v7173_v32  ;;  %v2398_v53 = vsel %vm1436_vm4, %v2395_v6, %v2397_v56 }
 0x315   :  { %7175 = vmatmul.msk.f32.vlgmr.msrb.gmra.mxu2 %vm11210_vm15, %v7173_v32  ;;  %v2099_v52 = vpop.f32.mrf.mxu3 }
 0x31a   :  { %v2283_v5 = vpop.permute.xlu0 %2282 }
 0x31b   :  { %v2285_v10 = vsel %vm2284_vm11, %v2281_v13, %v2283_v5  ;;  %7181 = vmatpush.msk.msrb.mxu1 %vm1843_vm9, %v2283_v5  ;;  %v2508_v0 = vpop.permute.xlu1 %2507  ;;  %v7473_v13 = vld [vmem:[%s11110_s19] sm:$0xff]   ;;  %s7753_s19 = smov 114  }
 0x31c   :  { %7179 = vmatpush.msk.msrb.mxu0 %vm1843_vm9, %v2285_v10  ;;  %7182 = vmatmul.msk.f32.vlgmr.msrb.gmra.mxu1 %vm11210_vm15, %v7178_v42  ;;  %v2512_v44 = vsel %vm11212_vm12, %v2508_v0, %v2510_v38  ;;  %v7475_v58 = vunpack.c.h.bf16 %v7473_v13  ;;  %v7474_v30 = vunpack.c.l.bf16 %v7473_v13  ;;  %v2946_v13 = vld [vmem:[%s11111_s20 + $0x18] sm:$0xf] }
 0x31d   :  { %7187 = vmatmul.msk.f32.vlgmr.msra.gmra.mxu3 %vm11210_vm15, %v7183_v35  ;;  %7191 = vmatpush.msk.msra.mxu1 %vm1843_vm9, %v2397_v56 }
 0x31e   :  { %7180 = vmatmul.msk.f32.vlgmr.msrb.gmra.mxu0 %vm11210_vm15, %v7178_v42  ;;  %7185 = vmatmul.msk.f32.vlgmr.msra.gmra.mxu2 %vm11210_vm15, %v7183_v35 }
 0x31f   :  { %7189 = vmatpush.msk.msra.mxu0 %vm1843_vm9, %v2398_v53  ;;  %7201 = vmatpush.msk.msrb.mxu1 %vm1843_vm9, %v2510_v38 }
 0x321   :  { %7199 = vmatpush.msk.msrb.mxu0 %vm1843_vm9, %v2512_v44 }
 0x322   :  { %v2453_v28 = vpop.permute.xlu0 %2452 }
 0x323   :  { %v2455_v18 = vsel %vm11213_vm13, %v2451_v31, %v2453_v28  ;;  %7196 = vmatpush.msk.msrb.mxu3 %vm1843_vm9, %v2453_v28  ;;  %vm3374_vm13 = vcmask 130048  }
 0x324   :  { %7192 = vmatmul.msk.f32.vlgmr.msra.gmra.mxu1 %vm11210_vm15, %v7188_v19  ;;  %7194 = vmatpush.msk.msrb.mxu2 %vm1843_vm9, %v2455_v18 }
 0x325   :  { %7197 = vmatmul.msk.f32.vlgmr.msrb.gmra.mxu3 %vm11210_vm15, %v7193_v20 }
 0x326   :  { %7190 = vmatmul.msk.f32.vlgmr.msra.gmra.mxu0 %vm11210_vm15, %v7188_v19  ;;  %7195 = vmatmul.msk.f32.vlgmr.msrb.gmra.mxu2 %vm11210_vm15, %v7193_v20 }
 0x327   :  { %2621 = vmatpush.msra.mxu2 %v7503_v4  ;;  %7203 = vmatpush.msk.msra.mxu3 %vm1843_vm9, %v2613_v23  ;;  %v7210_v23 = vld [vmem:[%s11389_s16 + $0x10] sm:$0xff] }
 0x329   :  { %2622 = vmatpush.msra.mxu2 %v7502_v51  ;;  %2651 = vmatpush.msra.mxu3 %v7515_v33  ;;  %v7228_v33 = vld [vmem:[%s11389_s16 + $0x40] sm:$0xff] }
 0x32a   :  { %v2105_v62 = vpop.permute.xlu0 %2104 }
 0x32b   :  { %2623 = vmatpush.msra.mxu2 %v7499_v61  ;;  %2652 = vmatpush.msra.mxu3 %v7514_v48  ;;  %v2108_v36 = vadd.f32 %v2105_v62, %v2099_v52  ;;  %v2107_v34 = vadd.f32 %v2105_v62, %v2079_v7  ;;  %v7216_v48 = vld [vmem:[%s11389_s16 + $0x20] sm:$0xff] }
 0x32c   :  { %7202 = vmatmul.msk.f32.vlgmr.msrb.gmra.mxu1 %vm11210_vm15, %v7198_v37 }
 0x32d   :  { %2624 = vmatpush.msra.mxu2 %v7498_v45  ;;  %2653 = vmatpush.msra.mxu3 %v7511_v14 }
 0x32e   :  { %7200 = vmatmul.msk.f32.vlgmr.msrb.gmra.mxu0 %vm11210_vm15, %v7198_v37 }
 0x32f   :  { %2625 = vmatpush.msra.mxu2 %v7495_v3  ;;  %2654 = vmatpush.msra.mxu3 %v7510_v17  ;;  %v7222_v17 = vld [vmem:[%s11389_s16 + $0x30] sm:$0xff] }
 0x331   :  { %2626 = vmatpush.msra.mxu2 %v7494_v16  ;;  %2655 = vmatpush.msra.mxu3 %v7507_v57  ;;  %v2955_v57 = vunpack.c.l.bf16 %v2947_v21  ;;  %v3334_v21 = vld [vmem:[%s11112_s21 + $0x8] sm:$0x7] }
 0x333   :  { %2627 = vmatpush.msra.mxu2 %v7491_v41  ;;  %2656 = vmatpush.msra.mxu3 %v7506_v50  ;;  %v2954_v50 = vunpack.c.l.bf16 %v2946_v13  ;;  %v3337_v13 = vunpack.c.l.bf16 %v3334_v21 }
 0x335   :  { %2628 = vmatpush.msra.mxu2 %v7490_v11 }
 0x337   :  { %2629 = vmatpush.msra.mxu2 %v7487_v60  ;;  %v2662_v60 = vld [vmem:[%s11389_s16] sm:$0xff] }
 0x339   :  { %2630 = vmatpush.msra.mxu2 %v7486_v2 }
 0x33b   :  { %2631 = vmatpush.msra.mxu2 %v7483_v15 }
 0x33d   :  { %2632 = vmatpush.msra.mxu2 %v7482_v25 }
 0x33f   :  { %2633 = vmatpush.msra.mxu2 %v7479_v26 }
 0x341   :  { %2634 = vmatpush.msra.mxu2 %v7478_v55 }
 0x343   :  { %2635 = vmatpush.msra.mxu2 %v7475_v58 }
 0x345   :  { %2636 = vmatpush.msra.mxu2 %v7474_v30 }
 0x387   :  { %v2160_v1 = vpop.f32.mrf.mxu3 }
 0x388   :  { %v2140_v9 = vpop.f32.mrf.mxu2  ;;  %v2164_v39 = vadd.f32 %v2160_v1, %v2108_v36 }
 0x389   :  { %v2163_v6 = vadd.f32 %v2140_v9, %v2107_v34  ;;  %v7207_v9 = vld [vmem:[%s11389_s16 + $0x8] sm:$0xff] }
 0x38f   :  { %v2216_v63 = vpop.f32.mrf.mxu3 }
 0x390   :  { %v2196_v24 = vpop.f32.mrf.mxu2  ;;  %v2220_v56 = vadd.f32 %v2216_v63, %v2164_v39  ;;  %v7547_v63 = vld [vmem:[%s11111_s20 + $0x10] sm:$0xff]  }
 0x391   :  { %v2219_v42 = vadd.f32 %v2196_v24, %v2163_v6  ;;  %v7527_v58 = vunpack.c.h.bf16 %v7547_v63  ;;  %v7526_v30 = vunpack.c.l.bf16 %v7547_v63  ;;  %v7546_v24 = vld [vmem:[%s11111_s20 + $0x8] sm:$0xff]  }
 0x392   :  { %v7523_v62 = vunpack.c.h.bf16 %v7546_v24  ;;  %v7522_v36 = vunpack.c.l.bf16 %v7546_v24 }
 0x397   :  { %v2273_v29 = vpop.f32.mrf.mxu3 }
 0x398   :  { %v2253_v40 = vpop.f32.mrf.mxu2  ;;  %v2277_v5 = vadd.f32 %v2273_v29, %v2220_v56  ;;  %v7517_v29 = vld [vmem:[%s11111_s20] sm:$0xff]   ;;  %s7756_s20 = smov 119  }
 0x399   :  { %v2330_v32 = vpop.f32.mrf.mxu1  ;;  %v2276_v35 = vadd.f32 %v2253_v40, %v2219_v42  ;;  %v7519_v34 = vunpack.c.h.bf16 %v7517_v29  ;;  %v7518_v40 = vunpack.c.l.bf16 %v7517_v29 }
 0x39a   :  { %v2334_v0 = vadd.f32 %v2330_v32, %v2277_v5 }
 0x39b   :  { %v2310_v31 = vpop.f32.mrf.mxu0 }
 0x39c   :  { %v2333_v44 = vadd.f32 %v2310_v31, %v2276_v35 }
 0x3a0   :  { %v2387_v10 = vpop.f32.mrf.mxu3 }
 0x3a1   :  { %v2367_v38 = vpop.f32.mrf.mxu2  ;;  %v2443_v53 = vpop.f32.mrf.mxu1  ;;  %v2391_v19 = vadd.f32 %v2387_v10, %v2334_v0 }
 0x3a2   :  { %v2390_v20 = vadd.f32 %v2367_v38, %v2333_v44 }
 0x3a3   :  { %v2423_v28 = vpop.f32.mrf.mxu0  ;;  %v2447_v18 = vadd.f32 %v2443_v53, %v2391_v19 }
 0x3a4   :  { %v2446_v37 = vadd.f32 %v2423_v28, %v2390_v20 }
 0x3a8   :  { %v2500_v49 = vpop.f32.mrf.mxu3 }
 0x3a9   :  { %v2504_v54 = vadd.f32 %v2500_v49, %v2447_v18  ;;  %v2480_v4 = vpop.f32.mrf.mxu2  ;;  %v2557_v51 = vpop.f32.mrf.mxu1 }
 0x3aa   :  { %v2503_v61 = vadd.f32 %v2480_v4, %v2446_v37 }
 0x3ab   :  { %v2561_v45 = vadd.f32 %v2557_v51, %v2504_v54  ;;  %v2537_v46 = vpop.f32.mrf.mxu0 }
 0x3ac   :  { %v2560_v3 = vadd.f32 %v2537_v46, %v2503_v61  ;;  %v2985_v61 = vld [vmem:[%s11390_s25] sm:$0xff] }
 0x3ad   :  { %vm2563_vm14 = vcmp.ge.f32.partialorder %v2561_v45, 0.0  ;;  %v2565_v16 = vmul.f32 0.01, %v2561_v45  ;;  %v2983_v46 = vld [vmem:[%s11103_s12] sm:$0xff] }
 0x3ae   :  { %v2564_v59 = vmul.f32 0.01, %v2560_v3  ;;  %vm2562_vm6 = vcmp.ge.f32.partialorder %v2560_v3, 0.0 }
 0x3af   :  { %v2567_v41 = vsel %vm2563_vm14, %v2561_v45, %v2565_v16  ;;  %vm2956_vm14 = vcmask 474112   ;;  %v2986_v45 = vld [vmem:[%s11390_s25 + $0x8] sm:$0xff] }
 0x3b0   :  { %7204 = vmatmul.msk.f32.vlgmr.msra.gmra.mxu3 %vm11211_vm7, %v2567_v41  ;;  %v2566_v52 = vsel %vm2562_vm6, %v2560_v3, %v2564_v59  ;;  %v2984_v3 = vld [vmem:[%s11103_s12 + $0x8] sm:$0xff]  ;;  %v7247_v59 = vld [vmem:[%s11390_s25 + $0x40] sm:$0xff]  ;;  %vm3338_vm7 = vcmask 179200  }
 0x3b1   :  { %2637 = vmatmul.f32.vlgmr.msra.gmra.mxu2 %v2566_v52  ;;  %v7248_v41 = vld [vmem:[%s11390_s25 + $0x48] sm:$0xff]  ;;  %v7239_v52 = vld [vmem:[%s11390_s25 + $0x20] sm:$0xff] }
 0x433   :  { %v2658_v7 = vpop.f32.mrf.mxu3 }
 0x434   :  { %v2638_v11 = vpop.f32.mrf.mxu2 }
 0x435   :  { %v2659_v22 = vadd.f32 %v2658_v7, %v2638_v11 }
 0x437   :  { %2789 = vrot.lane.b32.xlu0 %v2659_v22, %s7749_s3  ;;  %2729 = vrot.lane.b32.xlu2 %v2659_v22, %s7740_s27 }
 0x438   :  { %2699 = vrot.lane.b32.xlu1 %v2659_v22, %s7736_s10  ;;  %7205 = vmatpush.msk.msra.mxu0 %vm2667_vm5, %v2659_v22 }
 0x439   :  { %7206 = vmatmul.msk.f32.vlgmr.msra.gmra.mxu0 %vm2663_vm3, %v2662_v60 }
 0x43f   :  { %2879 = vrot.lane.b32.xlu0 %v2659_v22, %s7750_s4  ;;  %2819 = vrot.lane.b32.xlu2 %v2659_v22, %s7751_s0 }
 0x440   :  { %2759 = vrot.lane.b32.xlu1 %v2659_v22, %s7752_s17 }
 0x447   :  { %2693 = vperm.xlu0 %7580, %v2661_v12   ;;  %2909 = vrot.lane.b32.xlu2 %v2659_v22, %s7753_s19  ;;  %v7240_v12 = vld [vmem:[%s11390_s25 + $0x28] sm:$0xff] }
 0x448   :  { %2849 = vrot.lane.b32.xlu1 %v2659_v22, %s7745_s29  ;;  %v7235_v22 = vld [vmem:[%s11390_s25 + $0x10] sm:$0xff] }
 0x491   :  { %v2730_v2 = vpop.permute.xlu2 %2729 }
 0x492   :  { %7211 = vmatpush.msk.msrb.mxu0 %vm2667_vm5, %v2730_v2  ;;  %v7236_v2 = vld [vmem:[%s11390_s25 + $0x18] sm:$0xff] }
 0x493   :  { %7212 = vmatmul.msk.f32.vlgmr.msrb.gmra.mxu0 %vm2663_vm3, %v7210_v23 }
 0x499   :  { %v2820_v27 = vpop.permute.xlu2 %2819 }
 0x49a   :  { %7220 = vmatpush.msk.msra.mxu0 %vm2667_vm5, %v2820_v27  ;;  %v7243_v27 = vld [vmem:[%s11390_s25 + $0x30] sm:$0xff] }
 0x49b   :  { %7221 = vmatmul.msk.f32.vlgmr.msra.gmra.mxu0 %vm2663_vm3, %v7219_v47 }
 0x4a1   :  { %v2910_v15 = vpop.permute.xlu2 %2909 }
 0x4a2   :  { %7229 = vmatpush.msk.msrb.mxu0 %vm2667_vm5, %v2910_v15 }
 0x4a3   :  { %7230 = vmatmul.msk.f32.vlgmr.msrb.gmra.mxu0 %vm2663_vm3, %v7228_v33  ;;  %v7263_v33 = vld [vmem:[%s11390_s25 + $0x80] sm:$0xff] }
 0x4a9   :  { %v2790_v1 = vpop.permute.xlu0 %2789 }
 0x4aa   :  { %v2700_v25 = vpop.permute.xlu1 %2699  ;;  %7217 = vmatpush.msk.msrb.mxu3 %vm2667_vm5, %v2790_v1  ;;  %v7255_v1 = vld [vmem:[%s11390_s25 + $0x60] sm:$0xff] }
 0x4ab   :  { %7208 = vmatpush.msk.msra.mxu1 %vm2667_vm5, %v2700_v25  ;;  %7218 = vmatmul.msk.f32.vlgmr.msrb.gmra.mxu3 %vm2663_vm3, %v7216_v48  ;;  %v7251_v48 = vld [vmem:[%s11390_s25 + $0x50] sm:$0xff]  ;;  %v7244_v25 = vld [vmem:[%s11390_s25 + $0x38] sm:$0xff] }
 0x4ac   :  { %7209 = vmatmul.msk.f32.vlgmr.msra.gmra.mxu1 %vm2663_vm3, %v7207_v9 }
 0x4b1   :  { %v2880_v14 = vpop.permute.xlu0 %2879 }
 0x4b2   :  { %v2760_v26 = vpop.permute.xlu1 %2759  ;;  %7226 = vmatpush.msk.msra.mxu3 %vm2667_vm5, %v2880_v14  ;;  %v7252_v14 = vld [vmem:[%s11390_s25 + $0x58] sm:$0xff] }
 0x4b3   :  { %7214 = vmatpush.msk.msrb.mxu1 %vm2667_vm5, %v2760_v26  ;;  %7227 = vmatmul.msk.f32.vlgmr.msra.gmra.mxu3 %vm2663_vm3, %v7225_v8  ;;  %v7264_v8 = vld [vmem:[%s11390_s25 + $0x88] sm:$0xff]  ;;  %v7259_v26 = vld [vmem:[%s11390_s25 + $0x70] sm:$0xff] }
 0x4b4   :  { %7215 = vmatmul.msk.f32.vlgmr.msrb.gmra.mxu1 %vm2663_vm3, %v7213_v43  ;;  %v7256_v43 = vld [vmem:[%s11390_s25 + $0x68] sm:$0xff] }
 0x4b6   :  { %v2688_v39 = vpop.f32.mrf.mxu0 }
 0x4b9   :  { %v2694_v32 = vpop.permute.xlu0 %2693 }
 0x4ba   :  { %v2850_v55 = vpop.permute.xlu1 %2849  ;;  %v2696_v31 = vadd.f32 %v2694_v32, %v2688_v39 }
 0x4bb   :  { %7223 = vmatpush.msk.msra.mxu1 %vm2667_vm5, %v2850_v55 }
 0x4bc   :  { %7224 = vmatmul.msk.f32.vlgmr.msra.gmra.mxu1 %vm2663_vm3, %v7222_v17  ;;  %v7260_v17 = vld [vmem:[%s11390_s25 + $0x78] sm:$0xff] }
 0x4bd   :  { %7231 = vmatpush.msk.msrb.mxu1 %vm1843_vm9, %v2955_v57 }
 0x4bf   :  { %2972 = vmatpush.msrb.mxu1 %v2954_v50  ;;  %v7529_v50 = vld [vmem:[%s11112_s21] sm:$0xff]  }
 0x4c0   :  { %v7531_v63 = vunpack.c.h.bf16 %v7529_v50 }
 0x4c1   :  { %2973 = vmatpush.msrb.mxu1 %v7527_v58 }
 0x4c3   :  { %2974 = vmatpush.msrb.mxu1 %v7526_v30  ;;  %v7530_v30 = vunpack.c.l.bf16 %v7529_v50  ;;  %v7277_v50 = vld [vmem:[%s11391_s30 + $0x20] sm:$0xff] }
 0x4c5   :  { %2975 = vmatpush.msrb.mxu1 %v7523_v62 }
 0x4c7   :  { %2976 = vmatpush.msrb.mxu1 %v7522_v36 }
 0x4c9   :  { %2977 = vmatpush.msrb.mxu1 %v7519_v34 }
 0x4cb   :  { %2978 = vmatpush.msrb.mxu1 %v7518_v40 }
 0x510   :  { %v2753_v56 = vpop.f32.mrf.mxu0 }
 0x518   :  { %v2843_v0 = vpop.f32.mrf.mxu0 }
 0x520   :  { %v2933_v18 = vpop.f32.mrf.mxu0 }
 0x529   :  { %v2723_v6 = vpop.f32.mrf.mxu1 }
 0x52a   :  { %v2726_v42 = vadd.f32 %v2723_v6, %v2696_v31 }
 0x52c   :  { %v2756_v35 = vadd.f32 %v2753_v56, %v2726_v42 }
 0x52e   :  { %v2813_v5 = vpop.f32.mrf.mxu3 }
 0x531   :  { %v2783_v10 = vpop.f32.mrf.mxu1 }
 0x532   :  { %v2786_v38 = vadd.f32 %v2783_v10, %v2756_v35 }
 0x534   :  { %v2816_v53 = vadd.f32 %v2813_v5, %v2786_v38 }
 0x536   :  { %v2846_v44 = vadd.f32 %v2843_v0, %v2816_v53  ;;  %v2903_v28 = vpop.f32.mrf.mxu3 }
 0x539   :  { %v2873_v19 = vpop.f32.mrf.mxu1 }
 0x53a   :  { %v2876_v20 = vadd.f32 %v2873_v19, %v2846_v44 }
 0x53c   :  { %v2906_v37 = vadd.f32 %v2903_v28, %v2876_v20 }
 0x53e   :  { %v2936_v49 = vadd.f32 %v2933_v18, %v2906_v37 }
 0x540   :  { %vm2937_vm6 = vcmp.ge.f32.partialorder %v2936_v49, 0.0  ;;  %v2938_v54 = vmul.f32 0.01, %v2936_v49 }
 0x542   :  { %v2939_v4 = vsel %vm2937_vm6, %v2936_v49, %v2938_v54  ;;  %vm3345_vm6 = vcmask 1045504  }
 0x543   :  { %7232 = vmatmul.msk.f32.vlgmr.msrb.gmra.mxu1 %vm2956_vm14, %v2939_v4 }
 0x5c0   :  { %v2980_v51 = vpop.f32.mrf.mxu1 }
 0x5c1   :  { %3070 = vrot.lane.b32.xlu0 %v2980_v51, %s7740_s27  ;;  %3144 = vrot.lane.b32.xlu2 %v2980_v51, %s7754_s28 }
 0x5c2   :  { %3033 = vrot.lane.b32.xlu1 %v2980_v51, %s7736_s10  ;;  %3009 = vmatpush.msrb.mxu3 %v2980_v51 }
 0x5c3   :  { %7233 = vmatmul.msk.f32.vlgmr.msrb.gmra.mxu3 %vm2987_vm2, %v2985_v61 }
 0x5c9   :  { %3292 = vrot.lane.b32.xlu0 %v2980_v51, %s7744_s8  ;;  %3181 = vrot.lane.b32.xlu2 %v2980_v51, %s7752_s17 }
 0x5ca   :  { %3107 = vrot.lane.b32.xlu1 %v2980_v51, %s7755_s6 }
 0x5cb   :  { %7234 = vmatmul.msk.f32.gmra.mxu3 %vm2987_vm2, %v2986_v45 }
 0x5d1   :  { %3019 = vperm.xlu0 %7580, %v2983_v46   ;;  %3255 = vrot.lane.b32.xlu2 %v2980_v51, %s7756_s20 }
 0x5d2   :  { %3218 = vrot.lane.b32.xlu1 %v2980_v51, %s7751_s0 }
 0x5da   :  { %3024 = vperm.xlu1 %7581, %v2984_v3  }
 0x61b   :  { %v3145_v16 = vpop.permute.xlu2 %3144 }
 0x61c   :  { %3168 = vmatpush.msra.mxu3 %v3145_v16 }
 0x61d   :  { %7249 = vmatmul.msk.f32.vlgmr.msra.gmra.mxu3 %vm2987_vm2, %v7247_v59 }
 0x623   :  { %v3182_v7 = vpop.permute.xlu2 %3181 }
 0x625   :  { %7250 = vmatmul.msk.f32.gmra.mxu3 %vm2987_vm2, %v7248_v41 }
 0x62b   :  { %v3256_v15 = vpop.permute.xlu2 %3255 }
 0x633   :  { %v3071_v11 = vpop.permute.xlu0 %3070 }
 0x634   :  { %v3034_v60 = vpop.permute.xlu1 %3033  ;;  %3094 = vmatpush.msra.mxu0 %v3071_v11 }
 0x635   :  { %3057 = vmatpush.msrb.mxu2 %v3034_v60  ;;  %7241 = vmatmul.msk.f32.vlgmr.msra.gmra.mxu0 %vm2987_vm2, %v7239_v52 }
 0x636   :  { %7237 = vmatmul.msk.f32.vlgmr.msrb.gmra.mxu2 %vm2987_vm2, %v7235_v22 }
 0x637   :  { %3205 = vmatpush.msra.mxu2 %v3182_v7 }
 0x639   :  { %7267 = vmatpush.msk.msrb.mxu2 %vm3345_vm6, %v3337_v13  ;;  %v7271_v13 = vld [vmem:[%s11391_s30 + $0x8] sm:$0xff] }
 0x63b   :  { %v3293_v23 = vpop.permute.xlu0 %3292  ;;  %3363 = vmatpush.msrb.mxu2 %v7531_v63 }
 0x63c   :  { %v3108_v47 = vpop.permute.xlu1 %3107  ;;  %3316 = vmatpush.msrb.mxu3 %v3293_v23 }
 0x63d   :  { %3131 = vmatpush.msra.mxu1 %v3108_v47  ;;  %7242 = vmatmul.msk.f32.gmra.mxu0 %vm2987_vm2, %v7240_v12  ;;  %v3372_v47 = vld [vmem:[%s11104_s13] sm:$0xff]  ;;  %s11395_s13 = smov 107  }
 0x63e   :  { %7238 = vmatmul.msk.f32.gmra.mxu2 %vm2987_vm2, %v7236_v2  ;;  %7245 = vmatmul.msk.f32.vlgmr.msra.gmra.mxu1 %vm2987_vm2, %v7243_v27  ;;  %v3373_v2 = vld [vmem:[%s11391_s30] sm:$0xff] }
 0x63f   :  { %3279 = vmatpush.msrb.mxu1 %v3256_v15  ;;  %7265 = vmatmul.msk.f32.vlgmr.msrb.gmra.mxu3 %vm2987_vm2, %v7263_v33 }
 0x640   :  { %3364 = vmatpush.msrb.mxu2 %v7530_v30 }
 0x643   :  { %v3020_v62 = vpop.permute.xlu0 %3019 }
 0x644   :  { %v3219_v9 = vpop.permute.xlu1 %3218 }
 0x645   :  { %3242 = vmatpush.msrb.mxu0 %v3219_v9 }
 0x646   :  { %7253 = vmatmul.msk.f32.vlgmr.msra.gmra.mxu2 %vm2987_vm2, %v7251_v48  ;;  %7257 = vmatmul.msk.f32.vlgmr.msrb.gmra.mxu0 %vm2987_vm2, %v7255_v1  ;;  %v3011_v55 = vpop.f32.mrf.mxu3  ;;  %v7275_v48 = vld [vmem:[%s11391_s30 + $0x18] sm:$0xff] }
 0x647   :  { %7246 = vmatmul.msk.f32.gmra.mxu1 %vm2987_vm2, %v7244_v25  ;;  %7266 = vmatmul.msk.f32.gmra.mxu3 %vm2987_vm2, %v7264_v8  ;;  %v3027_v29 = vadd.f32 %v3020_v62, %v3011_v55  ;;  %v7273_v8 = vld [vmem:[%s11391_s30 + $0x10] sm:$0xff] }
 0x64c   :  { %v3025_v32 = vpop.permute.xlu1 %3024 }
 0x64e   :  { %7254 = vmatmul.msk.f32.gmra.mxu2 %vm2987_vm2, %v7252_v14  ;;  %7258 = vmatmul.msk.f32.gmra.mxu0 %vm2987_vm2, %v7256_v43  ;;  %v3014_v57 = vpop.f32.mrf.mxu3 }
 0x64f   :  { %7261 = vmatmul.msk.f32.vlgmr.msrb.gmra.mxu1 %vm2987_vm2, %v7259_v26  ;;  %v3028_v42 = vadd.f32 %v3025_v32, %v3014_v57  ;;  %v7285_v32 = vld [vmem:[%s11391_s30 + $0x40] sm:$0xff] }
 0x657   :  { %7262 = vmatmul.msk.f32.gmra.mxu1 %vm2987_vm2, %v7260_v17 }
 0x6a0   :  { %v3170_v24 = vpop.f32.mrf.mxu3 }
 0x6a8   :  { %v3173_v31 = vpop.f32.mrf.mxu3 }
 0x6b2   :  { %v3096_v58 = vpop.f32.mrf.mxu0 }
 0x6b9   :  { %v3059_v36 = vpop.f32.mrf.mxu2 }
 0x6ba   :  { %v3065_v34 = vadd.f32 %v3059_v36, %v3027_v29  ;;  %v3099_v39 = vpop.f32.mrf.mxu0 }
 0x6bb   :  { %v3133_v40 = vpop.f32.mrf.mxu1 }
 0x6bc   :  { %v3102_v6 = vadd.f32 %v3096_v58, %v3065_v34 }
 0x6be   :  { %v3139_v5 = vadd.f32 %v3133_v40, %v3102_v6  ;;  %v7279_v40 = vld [vmem:[%s11391_s30 + $0x28] sm:$0xff] }
 0x6c0   :  { %v3176_v38 = vadd.f32 %v3170_v24, %v3139_v5  ;;  %v3667_v5 = vld [vmem:[%s11113_s22 + $0x8] sm:$0x7] }
 0x6c1   :  { %v3062_v56 = vpop.f32.mrf.mxu2 }
 0x6c2   :  { %v3066_v35 = vadd.f32 %v3062_v56, %v3028_v42  ;;  %v3318_v28 = vpop.f32.mrf.mxu3  ;;  %v7281_v42 = vld [vmem:[%s11391_s30 + $0x30] sm:$0xff] }
 0x6c3   :  { %v3244_v0 = vpop.f32.mrf.mxu0 }
 0x6c4   :  { %v3136_v10 = vpop.f32.mrf.mxu1  ;;  %v3103_v53 = vadd.f32 %v3099_v39, %v3066_v35  ;;  %v7283_v39 = vld [vmem:[%s11391_s30 + $0x38] sm:$0xff]  ;;  %v3670_v35 = vunpack.c.l.bf16 %v3667_v5 }
 0x6c6   :  { %v3140_v20 = vadd.f32 %v3136_v10, %v3103_v53  ;;  %v7533_v10 = vld [vmem:[%s11113_s22] sm:$0xff]  }
 0x6c8   :  { %v3177_v54 = vadd.f32 %v3173_v31, %v3140_v20 }
 0x6c9   :  { %v3207_v44 = vpop.f32.mrf.mxu2 }
 0x6ca   :  { %v3213_v19 = vadd.f32 %v3207_v44, %v3176_v38  ;;  %v3321_v41 = vpop.f32.mrf.mxu3  ;;  %v7534_v38 = vunpack.c.l.bf16 %v7533_v10 }
 0x6cb   :  { %v3247_v61 = vpop.f32.mrf.mxu0 }
 0x6cc   :  { %v3250_v18 = vadd.f32 %v3244_v0, %v3213_v19  ;;  %v3281_v37 = vpop.f32.mrf.mxu1  ;;  %v7535_v0 = vunpack.c.h.bf16 %v7533_v10  ;;  %v3964_v10 = vld [vmem:[%s11114_s23] sm:$0xff] }
 0x6ce   :  { %v3287_v49 = vadd.f32 %v3281_v37, %v3250_v18 }
 0x6d0   :  { %v3324_v4 = vadd.f32 %v3318_v28, %v3287_v49 }
 0x6d1   :  { %v3210_v51 = vpop.f32.mrf.mxu2 }
 0x6d2   :  { %vm3326_vm15 = vcmp.ge.f32.partialorder %v3324_v4, 0.0  ;;  %v3328_v45 = vmul.f32 0.01, %v3324_v4  ;;  %v3214_v46 = vadd.f32 %v3210_v51, %v3177_v54 }
 0x6d4   :  { %v3251_v3 = vadd.f32 %v3247_v61, %v3214_v46  ;;  %v3284_v16 = vpop.f32.mrf.mxu1  ;;  %v3330_v59 = vsel %vm3326_vm15, %v3324_v4, %v3328_v45 }
 0x6d5   :  { %7268 = vmatmul.msk.f32.vlgmr.msrb.gmra.mxu2 %vm3338_vm7, %v3330_v59 }
 0x6d6   :  { %v3288_v52 = vadd.f32 %v3284_v16, %v3251_v3 }
 0x6d8   :  { %v3325_v7 = vadd.f32 %v3321_v41, %v3288_v52 }
 0x6da   :  { %vm3327_vm12 = vcmp.ge.f32.partialorder %v3325_v7, 0.0  ;;  %v3329_v11 = vmul.f32 0.01, %v3325_v7 }
 0x6dc   :  { %v3331_v22 = vsel %vm3327_vm12, %v3325_v7, %v3329_v11 }
 0x6dd   :  { %7269 = vmatmul.msk.f32.gmra.mxu2 %vm3338_vm7, %v3331_v22 }
 0x758   :  { %v3366_v60 = vpop.f32.mrf.mxu2 }
 0x760   :  { %v3369_v12 = vpop.f32.mrf.mxu2 }
 0x761   :  { %3392 = vmatpush.msra.mxu0 %v3369_v12  ;;  %v7593_v23 = vpack.i.bf16 %v3366_v60, %v3369_v12  ;;  %v3697_v12 = vld [vmem:[%s11105_s14] sm:$0xf] }
 0x763   :  { %7594 = vrot.lane.b32.xlu1 %v7593_v23, %s7754_s28  ;;  %7589 = vrot.lane.b32.xlu0 %v7593_v23, %s7736_s10  ;;  %s11393_s28 = sld [smem:[#allocation47_spill]] }
 0x764   :  { %7584 = vrot.lane.b32.xlu2 %v7593_v23, %s7755_s6  ;;  %3393 = vmatpush.msra.mxu0 %v3366_v60  ;;  %v3698_v60 = vld [vmem:[%s11392_s5] sm:$0xf]  ;;  %s11394_s6 = smov 106  }
 0x765   :  { %7270 = vmatmul.msk.f32.vlgmr.msra.gmra.mxu0 %vm3374_vm13, %v3373_v2 }
 0x76b   :  { %7609 = vrot.lane.b32.xlu1 %v7593_v23, %s7752_s17  ;;  %7604 = vrot.lane.b32.xlu0 %v7593_v23, %s7756_s20 }
 0x76c   :  { %7599 = vrot.lane.b32.xlu2 %v7593_v23, %s7740_s27 }
 0x773   :  { %3400 = vperm.xlu1 %7581, %v3372_v47   ;;  %7619 = vrot.lane.b32.xlu0 %v7593_v23, %s7751_s0  ;;  %v7294_v47 = vld [vmem:[%s11392_s5 + $0xc] sm:$0xf] }
 0x774   :  { %7614 = vrot.lane.b32.xlu2 %v7593_v23, %s7744_s8  ;;  %v7290_v23 = vld [vmem:[%s11392_s5 + $0x4] sm:$0xf] }
 0x7be   :  { %v7585_v27 = vpop.permute.xlu2 %7584 }
 0x7bf   :  { %v7586_v33 = vunpack.i.l.bf16 %v7585_v27  ;;  %v7587_v15 = vunpack.i.h.bf16 %v7585_v27 }
 0x7c1   :  { %3495 = vmatpush.msra.mxu3 %v7586_v33  ;;  %v7302_v33 = vld [vmem:[%s11392_s5 + $0x1c] sm:$0xf] }
 0x7c3   :  { %3496 = vmatpush.msra.mxu3 %v7587_v15 }
 0x7c4   :  { %7276 = vmatmul.msk.f32.vlgmr.msra.gmra.mxu3 %vm3374_vm13, %v7275_v48  ;;  %v7292_v48 = vld [vmem:[%s11392_s5 + $0x8] sm:$0xf] }
 0x7c6   :  { %v7600_v1 = vpop.permute.xlu2 %7599 }
 0x7c7   :  { %v7601_v9 = vunpack.i.l.bf16 %v7600_v1  ;;  %v7602_v25 = vunpack.i.h.bf16 %v7600_v1  ;;  %v7298_v1 = vld [vmem:[%s11392_s5 + $0x14] sm:$0xf] }
 0x7c9   :  { %3463 = vmatpush.msra.mxu1 %v7601_v9 }
 0x7cb   :  { %3464 = vmatpush.msra.mxu1 %v7602_v25 }
 0x7cc   :  { %7274 = vmatmul.msk.f32.vlgmr.msra.gmra.mxu1 %vm3374_vm13, %v7273_v8  ;;  %v7300_v8 = vld [vmem:[%s11392_s5 + $0x18] sm:$0xf] }
 0x7ce   :  { %v7615_v55 = vpop.permute.xlu2 %7614 }
 0x7cf   :  { %v7616_v63 = vunpack.i.l.bf16 %v7615_v55  ;;  %v7617_v58 = vunpack.i.h.bf16 %v7615_v55 }
 0x7d5   :  { %v7595_v14 = vpop.permute.xlu1 %7594  ;;  %v7590_v43 = vpop.permute.xlu0 %7589 }
 0x7d6   :  { %v7596_v26 = vunpack.i.l.bf16 %v7595_v14  ;;  %v7591_v17 = vunpack.i.l.bf16 %v7590_v43  ;;  %v7597_v21 = vunpack.i.h.bf16 %v7595_v14  ;;  %v7592_v57 = vunpack.i.h.bf16 %v7590_v43  ;;  %v7296_v14 = vld [vmem:[%s11392_s5 + $0x10] sm:$0xf] }
 0x7d8   :  { %3431 = vmatpush.msrb.mxu0 %v7591_v17  ;;  %3527 = vmatpush.msra.mxu2 %v7596_v26  ;;  %v7304_v17 = vld [vmem:[%s11392_s5 + $0x20] sm:$0xf] }
 0x7da   :  { %3432 = vmatpush.msrb.mxu0 %v7592_v57  ;;  %3528 = vmatpush.msra.mxu2 %v7597_v21  ;;  %v3971_v21 = vld [vmem:[%s11114_s23 + $0x38] sm:$0x11] }
 0x7db   :  { %7272 = vmatmul.msk.f32.vlgmr.msrb.gmra.mxu0 %vm3374_vm13, %v7271_v13  ;;  %7278 = vmatmul.msk.f32.vlgmr.msra.gmra.mxu2 %vm3374_vm13, %v7277_v50  ;;  %v3986_v57 = vunpack.c.l.bf16 %v3971_v21  ;;  %v3987_v13 = vunpack.c.h.bf16 %v3971_v21  ;;  %v3970_v50 = vld [vmem:[%s11114_s23 + $0x30] sm:$0xff]  ;;  %v7339_v21 = vld [vmem:[%s11393_s28 + $0xc] sm:$0x3] }
 0x7dc   :  { %3655 = vmatpush.msrb.mxu2 %v7616_v63  ;;  %v3984_v63 = vunpack.c.l.bf16 %v3970_v50 }
 0x7dd   :  { %v7610_v30 = vpop.permute.xlu1 %7609  ;;  %v7605_v24 = vpop.permute.xlu0 %7604 }
 0x7de   :  { %v7611_v62 = vunpack.i.l.bf16 %v7610_v30  ;;  %v7606_v36 = vunpack.i.l.bf16 %v7605_v24  ;;  %3656 = vmatpush.msrb.mxu2 %v7617_v58  ;;  %v7612_v29 = vunpack.i.h.bf16 %v7610_v30  ;;  %v7607_v34 = vunpack.i.h.bf16 %v7605_v24  ;;  %v3969_v30 = vld [vmem:[%s11114_s23 + $0x28] sm:$0xff] }
 0x7df   :  { %v3985_v58 = vunpack.c.h.bf16 %v3970_v50  ;;  %v3982_v24 = vunpack.c.l.bf16 %v3969_v30 }
 0x7e0   :  { %3559 = vmatpush.msra.mxu0 %v7611_v62  ;;  %3623 = vmatpush.msrb.mxu3 %v7606_v36  ;;  %v3983_v62 = vunpack.c.h.bf16 %v3969_v30  ;;  %v3968_v36 = vld [vmem:[%s11114_s23 + $0x20] sm:$0xff] }
 0x7e2   :  { %3560 = vmatpush.msra.mxu0 %v7612_v29  ;;  %3624 = vmatpush.msrb.mxu3 %v7607_v34  ;;  %v3395_v53 = vpop.f32.mrf.mxu0  ;;  %v3980_v29 = vunpack.c.l.bf16 %v3968_v36  ;;  %v3981_v34 = vunpack.c.h.bf16 %v3968_v36 }
 0x7e3   :  { %7280 = vmatmul.msk.f32.vlgmr.msra.gmra.mxu0 %vm3374_vm13, %v7279_v40  ;;  %7284 = vmatmul.msk.f32.vlgmr.msrb.gmra.mxu3 %vm3374_vm13, %v7283_v39  ;;  %v3967_v40 = vld [vmem:[%s11114_s23 + $0x18] sm:$0xff] }
 0x7e4   :  { %7286 = vmatmul.msk.f32.vlgmr.msrb.gmra.mxu2 %vm3374_vm13, %v7285_v32  ;;  %7287 = vmatpush.msk.msrb.mxu0 %vm3345_vm6, %v3670_v35  ;;  %v3978_v39 = vunpack.c.l.bf16 %v3967_v40  ;;  %v3979_v32 = vunpack.c.h.bf16 %v3967_v40  ;;  %v4591_v40 = vld [vmem:[#allocation7 + $0x150] sm:$0xff] }
 0x7e5   :  { %v7620_v6 = vpop.permute.xlu0 %7619  ;;  %v3401_v44 = vpop.permute.xlu1 %3400 }
 0x7e6   :  { %v7621_v56 = vunpack.i.l.bf16 %v7620_v6  ;;  %v7622_v31 = vunpack.i.h.bf16 %v7620_v6  ;;  %3691 = vmatpush.msrb.mxu0 %v7535_v0  ;;  %v3403_v19 = vadd.f32 %v3401_v44, %v3395_v53  ;;  %v3966_v6 = vld [vmem:[%s11114_s23 + $0x10] sm:$0xff]  ;;  %v3972_v0 = vunpack.c.l.bf16 %v3964_v10 }
 0x7e8   :  { %3591 = vmatpush.msrb.mxu1 %v7621_v56  ;;  %3692 = vmatpush.msrb.mxu0 %v7534_v38  ;;  %v3976_v56 = vunpack.c.l.bf16 %v3966_v6  ;;  %v3973_v38 = vunpack.c.h.bf16 %v3964_v10 }
 0x7ea   :  { %3592 = vmatpush.msrb.mxu1 %v7622_v31  ;;  %v3977_v31 = vunpack.c.h.bf16 %v3966_v6  ;;  %v9915_v6 = vld [vmem:[#allocation7 + $0x210] sm:$0x11] }
 0x7eb   :  { %7282 = vmatmul.msk.f32.vlgmr.msrb.gmra.mxu1 %vm3374_vm13, %v7281_v42  ;;  %v3965_v42 = vld [vmem:[%s11114_s23 + $0x8] sm:$0xff]  ;;  %s11406_s23 = sld [smem:[#allocation48_spill]] }
 0x7ec   :  { %v3974_v5 = vunpack.c.l.bf16 %v3965_v42  ;;  %v3975_v35 = vunpack.c.h.bf16 %v3965_v42  ;;  %v4588_v42 = vld [vmem:[#allocation7 + $0x138] sm:$0xff] }
 0x847   :  { %v3498_v49 = vpop.f32.mrf.mxu3 }
 0x849   :  { %v3466_v20 = vpop.f32.mrf.mxu1 }
 0x858   :  { %v3434_v28 = vpop.f32.mrf.mxu0 }
 0x859   :  { %v3437_v18 = vadd.f32 %v3434_v28, %v3403_v19 }
 0x85b   :  { %v3469_v37 = vadd.f32 %v3466_v20, %v3437_v18 }
 0x85d   :  { %v3501_v54 = vadd.f32 %v3498_v49, %v3469_v37 }
 0x85e   :  { %v3530_v4 = vpop.f32.mrf.mxu2 }
 0x85f   :  { %v3533_v51 = vadd.f32 %v3530_v4, %v3501_v54 }
 0x860   :  { %v3562_v61 = vpop.f32.mrf.mxu0 }
 0x861   :  { %v3565_v45 = vadd.f32 %v3562_v61, %v3533_v51 }
 0x866   :  { %v3626_v3 = vpop.f32.mrf.mxu3 }
 0x867   :  { %v3658_v59 = vpop.f32.mrf.mxu2 }
 0x868   :  { %v3594_v46 = vpop.f32.mrf.mxu1 }
 0x869   :  { %v3597_v16 = vadd.f32 %v3594_v46, %v3565_v45 }
 0x86b   :  { %v3629_v41 = vadd.f32 %v3626_v3, %v3597_v16 }
 0x86d   :  { %v3661_v52 = vadd.f32 %v3658_v59, %v3629_v41 }
 0x86f   :  { %vm3662_vm15 = vcmp.ge.f32.partialorder %v3661_v52, 0.0  ;;  %v3663_v7 = vmul.f32 0.01, %v3661_v52 }
 0x871   :  { %v3664_v11 = vsel %vm3662_vm15, %v3661_v52, %v3663_v7  ;;  %vm11407_vm15 = vcmask 15360  }
 0x872   :  { %7288 = vmatmul.msk.f32.vlgmr.msrb.gmra.mxu0 %vm3338_vm7, %v3664_v11  ;;  %vm11396_vm7 = vcmask 875520  }
 0x8ef   :  { %v3694_v22 = vpop.f32.mrf.mxu0 }
 0x8f0   :  { %3847 = vrot.lane.b32.xlu1 %v3694_v22, %s7751_s0  ;;  %3760 = vrot.lane.b32.xlu0 %v3694_v22, %s7740_s27 }
 0x8f1   :  { %3731 = vrot.lane.b32.xlu2 %v3694_v22, %s7736_s10  ;;  %3717 = vmatpush.msra.mxu1 %v3694_v22 }
 0x8f2   :  { %7289 = vmatmul.msk.f32.vlgmr.msra.gmra.mxu1 %vm2987_vm2, %v3698_v60 }
 0x8f8   :  { %3818 = vrot.lane.b32.xlu1 %v3694_v22, %s7749_s3  ;;  %3876 = vrot.lane.b32.xlu0 %v3694_v22, %s7745_s29 }
 0x8f9   :  { %3789 = vrot.lane.b32.xlu2 %v3694_v22, %s7752_s17 }
 0x900   :  { %3724 = vperm.xlu1 %7581, %v3697_v12   ;;  %3934 = vrot.lane.b32.xlu0 %v3694_v22, %s7753_s19  ;;  %v4038_v12 = vld [vmem:[%s11393_s28] sm:$0x3]  ;;  %s11405_s19 = smov 109  }
 0x901   :  { %3905 = vrot.lane.b32.xlu2 %v3694_v22, %s7750_s4  ;;  %s11404_s4 = smov 110  }
 0x94b   :  { %v3732_v2 = vpop.permute.xlu2 %3731 }
 0x94c   :  { %3752 = vmatpush.msra.mxu3 %v3732_v2  ;;  %v7319_v2 = vld [vmem:[%s11393_s28 + $0x4] sm:$0x3] }
 0x94d   :  { %7291 = vmatmul.msk.f32.vlgmr.msra.gmra.mxu3 %vm2987_vm2, %v7290_v23  ;;  %v4037_v23 = vld [vmem:[%s11106_s15] sm:$0x3] }
 0x953   :  { %v3790_v27 = vpop.permute.xlu2 %3789 }
 0x954   :  { %3810 = vmatpush.msra.mxu0 %v3790_v27  ;;  %v7329_v27 = vld [vmem:[%s11393_s28 + $0x8] sm:$0x3] }
 0x955   :  { %7295 = vmatmul.msk.f32.vlgmr.msra.gmra.mxu0 %vm2987_vm2, %v7294_v47 }
 0x95b   :  { %v3906_v15 = vpop.permute.xlu2 %3905 }
 0x95c   :  { %3926 = vmatpush.msrb.mxu0 %v3906_v15 }
 0x95d   :  { %7303 = vmatmul.msk.f32.vlgmr.msrb.gmra.mxu0 %vm2987_vm2, %v7302_v33 }
 0x962   :  { %v3848_v9 = vpop.permute.xlu1 %3847  ;;  %v3761_v25 = vpop.permute.xlu0 %3760 }
 0x963   :  { %3781 = vmatpush.msra.mxu2 %v3761_v25  ;;  %3868 = vmatpush.msrb.mxu3 %v3848_v9 }
 0x964   :  { %7293 = vmatmul.msk.f32.vlgmr.msra.gmra.mxu2 %vm2987_vm2, %v7292_v48  ;;  %7299 = vmatmul.msk.f32.vlgmr.msrb.gmra.mxu3 %vm2987_vm2, %v7298_v1  ;;  %v7314_v48 = vld [vmem:[%s11393_s28 + $0x2] sm:$0x3] }
 0x965   :  { %7306 = vmatpush.msk.msra.mxu3 %vm1843_vm9, %v3986_v57 }
 0x967   :  { %4006 = vmatpush.msra.mxu3 %v3984_v63 }
 0x969   :  { %4007 = vmatpush.msra.mxu3 %v3982_v24 }
 0x96a   :  { %v3819_v43 = vpop.permute.xlu1 %3818  ;;  %v3877_v26 = vpop.permute.xlu0 %3876 }
 0x96b   :  { %3839 = vmatpush.msrb.mxu1 %v3819_v43  ;;  %3897 = vmatpush.msrb.mxu2 %v3877_v26  ;;  %v7324_v26 = vld [vmem:[%s11393_s28 + $0x6] sm:$0x3] }
 0x96c   :  { %7301 = vmatmul.msk.f32.vlgmr.msrb.gmra.mxu2 %vm2987_vm2, %v7300_v8  ;;  %7297 = vmatmul.msk.f32.vlgmr.msrb.gmra.mxu1 %vm2987_vm2, %v7296_v14 }
 0x96d   :  { %7308 = vmatpush.msk.msra.mxu2 %vm1843_vm9, %v3987_v13  ;;  %4008 = vmatpush.msra.mxu3 %v3980_v29  ;;  %v7334_v13 = vld [vmem:[%s11393_s28 + $0xa] sm:$0x3] }
 0x96f   :  { %4026 = vmatpush.msra.mxu2 %v3985_v58  ;;  %4009 = vmatpush.msra.mxu3 %v3978_v39  ;;  %v3719_v44 = vpop.f32.mrf.mxu1  ;;  %v7344_v39 = vld [vmem:[%s11393_s28 + $0xe] sm:$0x3] }
 0x971   :  { %4027 = vmatpush.msra.mxu2 %v3983_v62  ;;  %4010 = vmatpush.msra.mxu3 %v3976_v56  ;;  %v7349_v62 = vld [vmem:[%s11393_s28 + $0x10] sm:$0x3] }
 0x972   :  { %v3935_v55 = vpop.permute.xlu0 %3934  ;;  %v3725_v53 = vpop.permute.xlu1 %3724 }
 0x973   :  { %3955 = vmatpush.msra.mxu1 %v3935_v55  ;;  %4028 = vmatpush.msra.mxu2 %v3981_v34  ;;  %v3727_v28 = vadd.f32 %v3725_v53, %v3719_v44  ;;  %v4594_v34 = vld [vmem:[#allocation7 + $0x168] sm:$0xff]  ;;  %v4750_v44 = vunpack.c.l.bf16 %v9915_v6 }
 0x974   :  { %7305 = vmatmul.msk.f32.vlgmr.msra.gmra.mxu1 %vm2987_vm2, %v7304_v17  ;;  %4011 = vmatpush.msra.mxu3 %v3974_v5  ;;  %v4709_v10 = vunpack.c.h.bf16 %v4594_v34 }
 0x975   :  { %4029 = vmatpush.msra.mxu2 %v3979_v32  ;;  %v4708_v32 = vunpack.c.l.bf16 %v4594_v34 }
 0x976   :  { %4012 = vmatpush.msra.mxu3 %v3972_v0  ;;  %v4702_v0 = vunpack.c.l.bf16 %v4591_v40 }
 0x977   :  { %4030 = vmatpush.msra.mxu2 %v3977_v31 }
 0x979   :  { %4031 = vmatpush.msra.mxu2 %v3975_v35 }
 0x97b   :  { %4032 = vmatpush.msra.mxu2 %v3973_v38  ;;  %v9919_v38 = vld [vmem:[#allocation7 + $0x1f8] sm:$0xff] }
 0x9d0   :  { %v3754_v19 = vpop.f32.mrf.mxu3 }
 0x9d1   :  { %v3757_v18 = vadd.f32 %v3754_v19, %v3727_v28  ;;  %v4585_v19 = vld [vmem:[#allocation7 + $0x120] sm:$0xff]  ;;  %v4703_v28 = vunpack.c.h.bf16 %v4591_v40  ;;  %v9955_v40 = vld [vmem:[#allocation7 + $0x128] sm:$0xff] }
 0x9d2   :  { %v3812_v20 = vpop.f32.mrf.mxu0 }
 0x9da   :  { %v3928_v3 = vpop.f32.mrf.mxu0 }
 0x9e7   :  { %v3783_v37 = vpop.f32.mrf.mxu2  ;;  %v3870_v51 = vpop.f32.mrf.mxu3 }
 0x9e8   :  { %v3786_v49 = vadd.f32 %v3783_v37, %v3757_v18  ;;  %v4744_v18 = vunpack.c.l.bf16 %v9919_v38  ;;  %v4582_v37 = vld [vmem:[#allocation7 + $0x108] sm:$0xff] }
 0x9e9   :  { %v3841_v54 = vpop.f32.mrf.mxu1 }
 0x9ea   :  { %v3815_v4 = vadd.f32 %v3812_v20, %v3786_v49  ;;  %v4696_v20 = vunpack.c.l.bf16 %v4588_v42  ;;  %v4697_v49 = vunpack.c.h.bf16 %v4588_v42 }
 0x9ec   :  { %v3844_v61 = vadd.f32 %v3841_v54, %v3815_v4  ;;  %v4690_v54 = vunpack.c.l.bf16 %v4585_v19  ;;  %v4691_v4 = vunpack.c.h.bf16 %v4585_v19 }
 0x9ee   :  { %v3873_v45 = vadd.f32 %v3870_v51, %v3844_v61  ;;  %v4684_v51 = vunpack.c.l.bf16 %v4582_v37  ;;  %v4685_v61 = vunpack.c.h.bf16 %v4582_v37 }
 0x9ef   :  { %v3899_v46 = vpop.f32.mrf.mxu2 }
 0x9f0   :  { %v3902_v16 = vadd.f32 %v3899_v46, %v3873_v45  ;;  %v9930_v45 = vld [vmem:[#allocation7 + $0x1e0] sm:$0xff] }
 0x9f1   :  { %v3957_v59 = vpop.f32.mrf.mxu1  ;;  %v4738_v46 = vunpack.c.l.bf16 %v9930_v45 }
 0x9f2   :  { %v3931_v41 = vadd.f32 %v3928_v3, %v3902_v16  ;;  %v4579_v3 = vld [vmem:[#allocation7 + $0xf0] sm:$0xff] }
 0x9f3   :  { %v4678_v16 = vunpack.c.l.bf16 %v4579_v3 }
 0x9f4   :  { %v3960_v52 = vadd.f32 %v3957_v59, %v3931_v41  ;;  %v4679_v59 = vunpack.c.h.bf16 %v4579_v3  ;;  %v9933_v41 = vld [vmem:[#allocation7 + $0x1c8] sm:$0xff] }
 0x9f6   :  { %vm3961_vm2 = vcmp.ge.f32.partialorder %v3960_v52, 0.0  ;;  %v3962_v7 = vmul.f32 0.01, %v3960_v52 }
 0x9f8   :  { %v3963_v11 = vsel %vm3961_vm2, %v3960_v52, %v3962_v7  ;;  %v4732_v52 = vunpack.c.l.bf16 %v9933_v41  ;;  %v4576_v7 = vld [vmem:[#allocation7 + $0xd8] sm:$0xff]  ;;  %vm11408_vm2 = vmmov %vm11407_vm15 }
 0x9f9   :  { %7307 = vmatmul.msk.f32.vlgmr.msra.gmra.mxu3 %vm2956_vm14, %v3963_v11  ;;  %7309 = vmatmul.msk.f32.vlgmr.msra.gmra.mxu2 %vm2956_vm14, %v3963_v11  ;;  %v4672_v11 = vunpack.c.l.bf16 %v4576_v7 }
 0xa7c   :  { %v4014_v22 = vpop.f32.mrf.mxu3  ;;  %v4034_v60 = vpop.f32.mrf.mxu2 }
 0xa7d   :  { %4099 = vrot.lane.b32.xlu0 %v4034_v60, %s7736_s10  ;;  %4155 = vrot.lane.b32.xlu2 %v4034_v60, %s7740_s27 }
 0xa7e   :  { %7312 = vmatpush.msk.msrb.mxu1 %vm2667_vm5, %v4034_v60  ;;  %4153 = vrot.lane.b32.xlu1 %v4014_v22, %s7740_s27 }
 0xa7f   :  { %7310 = vmatpush.msk.msra.mxu0 %vm2667_vm5, %v4014_v22  ;;  %7313 = vmatmul.msk.f32.vlgmr.msrb.gmra.mxu1 %vm2663_vm3, %v4038_v12 }
 0xa80   :  { %7311 = vmatmul.msk.f32.vlgmr.msra.gmra.mxu0 %vm2663_vm3, %v4038_v12  ;;  %v4573_v12 = vld [vmem:[#allocation7 + $0xc0] sm:$0xff] }
 0xa85   :  { %4267 = vrot.lane.b32.xlu2 %v4034_v60, %s7746_s9  ;;  %4097 = vrot.lane.b32.xlu0 %v4014_v22, %s7736_s10 }
 0xa86   :  { %4211 = vrot.lane.b32.xlu1 %v4034_v60, %s7744_s8 }
 0xa8d   :  { %4265 = vrot.lane.b32.xlu2 %v4014_v22, %s7746_s9  ;;  %4379 = vrot.lane.b32.xlu0 %v4034_v60, %s7739_s18 }
 0xa8e   :  { %4209 = vrot.lane.b32.xlu1 %v4014_v22, %s7744_s8 }
 0xa95   :  { %4323 = vrot.lane.b32.xlu2 %v4034_v60, %s7745_s29  ;;  %4377 = vrot.lane.b32.xlu0 %v4014_v22, %s7739_s18 }
 0xa96   :  { %4491 = vrot.lane.b32.xlu1 %v4034_v60, %s11394_s6 }
 0xa9d   :  { %4321 = vrot.lane.b32.xlu2 %v4014_v22, %s7745_s29  ;;  %4435 = vrot.lane.b32.xlu0 %v4034_v60, %s11395_s13  ;;  %v9936_v60 = vld [vmem:[#allocation7 + $0x1b0] sm:$0xff] }
 0xa9e   :  { %4489 = vrot.lane.b32.xlu1 %v4014_v22, %s11394_s6 }
 0xaa5   :  { %4433 = vrot.lane.b32.xlu2 %v4014_v22, %s11395_s13  ;;  %4090 = vperm.xlu0 %7580, %v4037_v23   ;;  %v4673_v22 = vunpack.c.h.bf16 %v4576_v7  ;;  %v9938_v23 = vld [vmem:[#allocation7 + $0x198] sm:$0xff]  ;;  %v9984_v7 = vld [vmem:[#allocation7 + $0xb0] sm:$0xff] }
 0xad7   :  { %v4156_v47 = vpop.permute.xlu2 %4155 }
 0xad8   :  { %7322 = vmatpush.msk.msrb.mxu2 %vm2667_vm5, %v4156_v47 }
 0xad9   :  { %7323 = vmatmul.msk.f32.vlgmr.msrb.gmra.mxu2 %vm2663_vm3, %v7319_v2 }
 0xadf   :  { %v4268_v33 = vpop.permute.xlu2 %4267 }
 0xae0   :  { %7332 = vmatpush.msk.msra.mxu2 %vm2667_vm5, %v4268_v33 }
 0xae1   :  { %7333 = vmatmul.msk.f32.vlgmr.msra.gmra.mxu2 %vm2663_vm3, %v7329_v27 }
 0xae7   :  { %v4266_v15 = vpop.permute.xlu2 %4265 }
 0xae8   :  { %v4269_v8 = vsel %vm2284_vm11, %v4266_v15, %v4268_v33  ;;  %v4720_v33 = vunpack.c.l.bf16 %v9938_v23  ;;  %v4570_v15 = vld [vmem:[#allocation7 + $0xa8] sm:$0xff] }
 0xaef   :  { %v4100_v1 = vpop.permute.xlu0 %4099  ;;  %v4324_v14 = vpop.permute.xlu2 %4323 }
 0xaf0   :  { %v4154_v9 = vpop.permute.xlu1 %4153  ;;  %7317 = vmatpush.msk.msra.mxu1 %vm2667_vm5, %v4100_v1 }
 0xaf1   :  { %v4157_v25 = vsel %vm1310_vm1, %v4154_v9, %v4156_v47  ;;  %7318 = vmatmul.msk.f32.vlgmr.msra.gmra.mxu1 %vm2663_vm3, %v7314_v48  ;;  %v4666_v47 = vunpack.c.l.bf16 %v4573_v12  ;;  %v9942_v9 = vld [vmem:[#allocation7 + $0x180] sm:$0xff] }
 0xaf2   :  { %7320 = vmatpush.msk.msrb.mxu3 %vm2667_vm5, %v4157_v25  ;;  %v4714_v25 = vunpack.c.l.bf16 %v9942_v9 }
 0xaf3   :  { %7321 = vmatmul.msk.f32.vlgmr.msrb.gmra.mxu3 %vm2663_vm3, %v7319_v2  ;;  %v4726_v2 = vunpack.c.l.bf16 %v9936_v60 }
 0xaf4   :  { %7330 = vmatpush.msk.msra.mxu3 %vm2667_vm5, %v4269_v8  ;;  %v4567_v8 = vld [vmem:[#allocation7 + $0x90] sm:$0xff] }
 0xaf7   :  { %v4098_v43 = vpop.permute.xlu0 %4097  ;;  %v4322_v50 = vpop.permute.xlu2 %4321 }
 0xaf8   :  { %v4101_v17 = vsel %vm1268_vm0, %v4098_v43, %v4100_v1  ;;  %v4212_v55 = vpop.permute.xlu1 %4211  ;;  %v4325_v30 = vsel %vm2341_vm10, %v4322_v50, %v4324_v14  ;;  %v4661_v1 = vunpack.c.h.bf16 %v4570_v15  ;;  %v4654_v43 = vunpack.c.l.bf16 %v4567_v8 }
 0xaf9   :  { %7327 = vmatpush.msk.msrb.mxu1 %vm2667_vm5, %v4212_v55  ;;  %7315 = vmatpush.msk.msrb.mxu0 %vm2667_vm5, %v4101_v17 }
 0xafa   :  { %7328 = vmatmul.msk.f32.vlgmr.msrb.gmra.mxu1 %vm2663_vm3, %v7324_v26  ;;  %7316 = vmatmul.msk.f32.vlgmr.msrb.gmra.mxu0 %vm2663_vm3, %v7314_v48  ;;  %v4660_v48 = vunpack.c.l.bf16 %v4570_v15  ;;  %v4693_v15 = vunpack.c.h.bf16 %v9955_v40 }
 0xafb   :  { %7337 = vmatpush.msk.msra.mxu1 %vm2667_vm5, %v4324_v14  ;;  %7331 = vmatmul.msk.f32.vlgmr.msra.gmra.mxu3 %vm2663_vm3, %v7329_v27  ;;  %v4667_v27 = vunpack.c.h.bf16 %v4573_v12  ;;  %v9945_v14 = vld [vmem:[#allocation7 + $0x170] sm:$0xff] }
 0xafc   :  { %v4710_v17 = vunpack.c.l.bf16 %v9945_v14 }
 0xaff   :  { %v4380_v57 = vpop.permute.xlu0 %4379  ;;  %v4434_v56 = vpop.permute.xlu2 %4433 }
 0xb00   :  { %v4210_v63 = vpop.permute.xlu1 %4209  ;;  %7342 = vmatpush.msk.msrb.mxu2 %vm2667_vm5, %v4380_v57 }
 0xb01   :  { %v4213_v58 = vsel %vm2227_vm8, %v4210_v63, %v4212_v55  ;;  %7343 = vmatmul.msk.f32.vlgmr.msrb.gmra.mxu2 %vm2663_vm3, %v7339_v21  ;;  %vm11397_vm8 = vcmask 867328   ;;  %v4564_v55 = vld [vmem:[#allocation7 + $0x78] sm:$0xff]  ;;  %v4561_v63 = vld [vmem:[#allocation7 + $0x60] sm:$0xff] }
 0xb02   :  { %7325 = vmatpush.msk.msra.mxu0 %vm2667_vm5, %v4213_v58  ;;  %7338 = vmatmul.msk.f32.vlgmr.msra.gmra.mxu1 %vm2663_vm3, %v7334_v13  ;;  %v9951_v58 = vld [vmem:[#allocation7 + $0x140] sm:$0xff] }
 0xb03   :  { %7326 = vmatmul.msk.f32.vlgmr.msra.gmra.mxu0 %vm2663_vm3, %v7324_v26  ;;  %v4655_v26 = vunpack.c.h.bf16 %v4567_v8  ;;  %v4699_v12 = vunpack.c.h.bf16 %v9951_v58 }
 0xb04   :  { %7335 = vmatpush.msk.msrb.mxu0 %vm2667_vm5, %v4325_v30  ;;  %v4751_v30 = vunpack.c.h.bf16 %v9915_v6  ;;  %v4745_v6 = vunpack.c.h.bf16 %v9919_v38 }
 0xb07   :  { %v4378_v24 = vpop.permute.xlu0 %4377 }
 0xb08   :  { %v4381_v36 = vsel %vm1436_vm4, %v4378_v24, %v4380_v57  ;;  %v4492_v29 = vpop.permute.xlu1 %4491  ;;  %v4648_v57 = vunpack.c.l.bf16 %v4564_v55  ;;  %v4558_v24 = vld [vmem:[#allocation7 + $0x48] sm:$0xff] }
 0xb09   :  { %7352 = vmatpush.msk.msra.mxu2 %vm2667_vm5, %v4492_v29  ;;  %7340 = vmatpush.msk.msrb.mxu3 %vm2667_vm5, %v4381_v36  ;;  %v4643_v36 = vunpack.c.h.bf16 %v4561_v63  ;;  %v4636_v34 = vunpack.c.l.bf16 %v4558_v24 }
 0xb0a   :  { %7341 = vmatmul.msk.f32.vlgmr.msrb.gmra.mxu3 %vm2663_vm3, %v7339_v21  ;;  %7353 = vmatmul.msk.f32.vlgmr.msra.gmra.mxu2 %vm2663_vm3, %v7349_v62  ;;  %v9948_v21 = vld [vmem:[#allocation7 + $0x158] sm:$0xff] }
 0xb0b   :  { %7336 = vmatmul.msk.f32.vlgmr.msrb.gmra.mxu0 %vm2663_vm3, %v7334_v13  ;;  %v4649_v13 = vunpack.c.h.bf16 %v4564_v55  ;;  %v4704_v50 = vunpack.c.l.bf16 %v9948_v21  ;;  %7356 = vmatpush.msk.msrb.mxu2 %vm1843_vm9, %v4751_v30 }
 0xb0d   :  { %4847 = vmatpush.msrb.mxu2 %v4745_v6  ;;  %v10037_v6 = vld [vmem:[#allocation7 + $0x38] sm:$0xff] }
 0xb0f   :  { %v4436_v31 = vpop.permute.xlu0 %4435 }
 0xb10   :  { %v4437_v5 = vsel %vm11396_vm7, %v4434_v56, %v4436_v31  ;;  %v4490_v35 = vpop.permute.xlu1 %4489  ;;  %7347 = vmatpush.msk.msrb.mxu1 %vm2667_vm5, %v4436_v31  ;;  %v4555_v56 = vld [vmem:[#allocation7 + $0x30] sm:$0xff]  ;;  %vm11409_vm7 = vmmov %vm11408_vm2 }
 0xb11   :  { %v4493_v53 = vsel %vm11397_vm8, %v4490_v35, %v4492_v29  ;;  %7345 = vmatpush.msk.msra.mxu0 %vm2667_vm5, %v4437_v5  ;;  %7348 = vmatmul.msk.f32.vlgmr.msrb.gmra.mxu1 %vm2663_vm3, %v7344_v39  ;;  %v4698_v29 = vunpack.c.l.bf16 %v9951_v58  ;;  %v9960_v31 = vld [vmem:[#allocation7 + $0x110] sm:$0xff]  ;;  %v4630_v42 = vunpack.c.l.bf16 %v4555_v56  ;;  %v4631_v5 = vunpack.c.h.bf16 %v4555_v56  ;;  %v10039_v56 = vld [vmem:[#allocation7 + $0x1b8] sm:$0xff]  ;;  %vm11410_vm8 = vmmov %vm11408_vm2 }
 0xb12   :  { %7350 = vmatpush.msk.msra.mxu3 %vm2667_vm5, %v4493_v53  ;;  %7354 = vmatpush.msk.msra.mxu1 %vm1843_vm9, %v4750_v44  ;;  %v4686_v35 = vunpack.c.l.bf16 %v9960_v31  ;;  %v9964_v53 = vld [vmem:[#allocation7 + $0xf8] sm:$0xff]  ;;  %vm11398_vm5 = vcmask 408576  }
 0xb13   :  { %4777 = vmatpush.msrb.mxu0 %v4708_v32  ;;  %7351 = vmatmul.msk.f32.vlgmr.msra.gmra.mxu3 %vm2663_vm3, %v7349_v62  ;;  %v4642_v62 = vunpack.c.l.bf16 %v4561_v63  ;;  %v4692_v32 = vunpack.c.l.bf16 %v9955_v40  ;;  %v4680_v19 = vunpack.c.l.bf16 %v9964_v53  ;;  %v10021_v63 = vld [vmem:[#allocation7 + $0x100] sm:$0xff]  ;;  %v4681_v58 = vunpack.c.h.bf16 %v9964_v53  ;;  %v10033_v40 = vld [vmem:[#allocation7 + $0xe8] sm:$0xff]  ;;  %vm11399_vm10 = vmmov %vm11398_vm5 }
 0xb14   :  { %7346 = vmatmul.msk.f32.vlgmr.msra.gmra.mxu0 %vm2663_vm3, %v7344_v39  ;;  %4817 = vmatpush.msrb.mxu3 %v4709_v10  ;;  %v4637_v39 = vunpack.c.h.bf16 %v4558_v24  ;;  %v4739_v10 = vunpack.c.h.bf16 %v9930_v45  ;;  %v4682_v30 = vunpack.c.l.bf16 %v10021_v63  ;;  %v10025_v24 = vld [vmem:[#allocation7 + $0x50] sm:$0xff]  ;;  %v10047_v53 = vld [vmem:[#allocation7 + $0x20] sm:$0xff]  ;;  %vm11400_vm12 = vmmov %vm11398_vm5 }
 0xb15   :  { %4778 = vmatpush.msrb.mxu0 %v4702_v0  ;;  %4807 = vmatpush.msra.mxu1 %v4744_v18  ;;  %v4552_v0 = vld [vmem:[#allocation7 + $0x18] sm:$0xff]  ;;  %v9968_v18 = vld [vmem:[#allocation7 + $0xe0] sm:$0xff]  ;;  %vm11401_vm13 = vmmov %vm11398_vm5 }
 0xb16   :  { %4818 = vmatpush.msrb.mxu3 %v4703_v28  ;;  %v4624_v44 = vunpack.c.l.bf16 %v4552_v0  ;;  %v4625_v38 = vunpack.c.h.bf16 %v4552_v0  ;;  %4848 = vmatpush.msrb.mxu2 %v4739_v10  ;;  %v4733_v28 = vunpack.c.h.bf16 %v9933_v41  ;;  %v9981_v41 = vld [vmem:[#allocation7 + $0x160] sm:$0xff]  ;;  %vm11402_vm14 = vmmov %vm11398_vm5 }
 0xb17   :  { %4779 = vmatpush.msrb.mxu0 %v4696_v20  ;;  %4808 = vmatpush.msra.mxu1 %v4738_v46  ;;  %v4549_v20 = vld [vmem:[#allocation7] sm:$0xff]  ;;  %v9976_v46 = vld [vmem:[#allocation7 + $0xc8] sm:$0xff]  ;;  %vm11403_vm6 = vmmov %vm11398_vm5 }
 0xb18   :  { %4819 = vmatpush.msrb.mxu3 %v4697_v49  ;;  %v4618_v37 = vunpack.c.l.bf16 %v4549_v20  ;;  %v4619_v49 = vunpack.c.h.bf16 %v4549_v20  ;;  %4849 = vmatpush.msrb.mxu2 %v4733_v28  ;;  %v4668_v3 = vunpack.c.l.bf16 %v9976_v46  ;;  %v4669_v10 = vunpack.c.h.bf16 %v9976_v46  ;;  %v10053_v28 = vld [vmem:[#allocation7 + $0xb8] sm:$0xff] }
 0xb19   :  { %4780 = vmatpush.msrb.mxu0 %v4690_v54  ;;  %4809 = vmatpush.msra.mxu1 %v4732_v52  ;;  %v4674_v54 = vunpack.c.l.bf16 %v9968_v18  ;;  %v4706_v52 = vunpack.c.l.bf16 %v9981_v41 }
 0xb1a   :  { %4820 = vmatpush.msrb.mxu3 %v4691_v4  ;;  %v9971_v4 = vld [vmem:[#allocation7 + $0x178] sm:$0xff] }
 0xb1b   :  { %4781 = vmatpush.msrb.mxu0 %v4684_v51  ;;  %4810 = vmatpush.msra.mxu1 %v4726_v2  ;;  %v4727_v51 = vunpack.c.h.bf16 %v9936_v60  ;;  %v4712_v45 = vunpack.c.l.bf16 %v9971_v4  ;;  %v4715_v60 = vunpack.c.h.bf16 %v9942_v9  ;;  %v9992_v2 = vld [vmem:[#allocation7 + $0x98] sm:$0xff]  ;;  %v10003_v9 = vld [vmem:[#allocation7 + $0x200] sm:$0xff] }
 0xb1c   :  { %4821 = vmatpush.msrb.mxu3 %v4685_v61  ;;  %v4711_v61 = vunpack.c.h.bf16 %v9945_v14  ;;  %v4657_v46 = vunpack.c.h.bf16 %v9992_v2 }
 0xb1d   :  { %4782 = vmatpush.msrb.mxu0 %v4678_v16  ;;  %4811 = vmatpush.msra.mxu1 %v4720_v33  ;;  %v4721_v16 = vunpack.c.h.bf16 %v9938_v23 }
 0xb1e   :  { %4822 = vmatpush.msrb.mxu3 %v4679_v59  ;;  %v4705_v59 = vunpack.c.h.bf16 %v9948_v21  ;;  %4850 = vmatpush.msrb.mxu2 %v4727_v51  ;;  %v10015_v21 = vld [vmem:[#allocation7 + $0x68] sm:$0xff] }
 0xb1f   :  { %4783 = vmatpush.msrb.mxu0 %v4672_v11  ;;  %4812 = vmatpush.msra.mxu1 %v4714_v25  ;;  %v4662_v11 = vunpack.c.l.bf16 %v9984_v7  ;;  %v10005_v25 = vpop.f32.mrf.mxu1 }
 0xb20   :  { %4823 = vmatpush.msrb.mxu3 %v4673_v22  ;;  %v9987_v22 = vld [vmem:[#allocation7 + $0x148] sm:$0xff]  ;;  %4851 = vmatpush.msrb.mxu2 %v4721_v16 }
 0xb21   :  { %4784 = vmatpush.msrb.mxu0 %v4666_v47  ;;  %4857 = vmatpush.msrb.mxu1 %v4710_v17  ;;  %v4700_v23 = vunpack.c.l.bf16 %v9987_v22  ;;  %v9994_v47 = vld [vmem:[#allocation7 + $0x218] sm:$0x11]  ;;  %v4687_v17 = vunpack.c.h.bf16 %v9960_v31  ;;  %v4632_v31 = vunpack.c.l.bf16 %v10037_v6 }
 0xb22   :  { %4824 = vmatpush.msrb.mxu3 %v4667_v27  ;;  %v4656_v27 = vunpack.c.l.bf16 %v9992_v2  ;;  %v4752_v33 = vunpack.c.l.bf16 %v9994_v47  ;;  %4852 = vmatpush.msrb.mxu2 %v4715_v60  ;;  %v4091_v60 = vpop.permute.xlu0 %4090 }
 0xb23   :  { %4785 = vmatpush.msrb.mxu0 %v4660_v48  ;;  %4858 = vmatpush.msrb.mxu1 %v4704_v50  ;;  %v9999_v48 = vld [vmem:[#allocation7 + $0x130] sm:$0xff] }
 0xb24   :  { %4825 = vmatpush.msrb.mxu3 %v4661_v1  ;;  %v10001_v1 = vld [vmem:[#allocation7 + $0x80] sm:$0xff]  ;;  %v4694_v8 = vunpack.c.l.bf16 %v9999_v48  ;;  %7358 = vmatpush.msk.msra.mxu2 %vm1843_vm9, %v4752_v33 }
 0xb25   :  { %4786 = vmatpush.msrb.mxu0 %v4654_v43  ;;  %4859 = vmatpush.msrb.mxu1 %v4698_v29  ;;  %v4650_v14 = vunpack.c.l.bf16 %v10001_v1  ;;  %v4746_v43 = vunpack.c.l.bf16 %v10003_v9  ;;  %v4638_v29 = vunpack.c.l.bf16 %v10025_v24 }
 0xb26   :  { %4826 = vmatpush.msrb.mxu3 %v4655_v26  ;;  %v10010_v26 = vld [vmem:[#allocation7 + $0x118] sm:$0xff] }
 0xb27   :  { %4787 = vmatpush.msrb.mxu0 %v4648_v57  ;;  %4860 = vmatpush.msrb.mxu1 %v4692_v32  ;;  %v4688_v55 = vunpack.c.l.bf16 %v10010_v26  ;;  %v10017_v57 = vld [vmem:[#allocation7 + $0x1e8] sm:$0xff]  ;;  %v4676_v32 = vunpack.c.l.bf16 %v10033_v40 }
 0xb28   :  { %4827 = vmatpush.msrb.mxu3 %v4649_v13  ;;  %v4644_v13 = vunpack.c.l.bf16 %v10015_v21  ;;  %v4740_v50 = vunpack.c.l.bf16 %v10017_v57  ;;  %4887 = vmatpush.msra.mxu2 %v4746_v43 }
 0xb29   :  { %4788 = vmatpush.msrb.mxu0 %v4642_v62  ;;  %4861 = vmatpush.msrb.mxu1 %v4686_v35  ;;  %v10027_v62 = vld [vmem:[#allocation7 + $0x1d0] sm:$0xff] }
 0xb2a   :  { %4828 = vmatpush.msrb.mxu3 %v4643_v36  ;;  %v10029_v36 = vpop.f32.mrf.mxu0  ;;  %4888 = vmatpush.msra.mxu2 %v4740_v50  ;;  %v10082_v50 = vld [vmem:[#allocation7 + $0x28] sm:$0xff] }
 0xb2b   :  { %4789 = vmatpush.msrb.mxu0 %v4636_v34  ;;  %4862 = vmatpush.msrb.mxu1 %v4680_v19  ;;  %v4734_v34 = vunpack.c.l.bf16 %v10027_v62 }
 0xb2c   :  { %4829 = vmatpush.msrb.mxu3 %v4637_v39  ;;  %v4675_v39 = vunpack.c.h.bf16 %v9968_v18  ;;  %v4663_v18 = vunpack.c.h.bf16 %v9984_v7 }
 0xb2d   :  { %4790 = vmatpush.msrb.mxu0 %v4630_v42  ;;  %4863 = vmatpush.msrb.mxu1 %v4674_v54  ;;  %v4728_v42 = vunpack.c.l.bf16 %v10039_v56  ;;  %v10057_v54 = vld [vmem:[#allocation7 + $0x188] sm:$0xff] }
 0xb2e   :  { %4830 = vmatpush.msrb.mxu3 %v4631_v5  ;;  %v10043_v5 = vld [vmem:[#allocation7 + $0xd0] sm:$0xff]  ;;  %4889 = vmatpush.msra.mxu2 %v4734_v34 }
 0xb2f   :  { %4791 = vmatpush.msrb.mxu0 %v4624_v44  ;;  %4864 = vmatpush.msrb.mxu1 %v4668_v3  ;;  %v4670_v0 = vunpack.c.l.bf16 %v10043_v5  ;;  %v10049_v44 = vld [vmem:[#allocation7 + $0x1a0] sm:$0xff] }
 0xb30   :  { %4831 = vmatpush.msrb.mxu3 %v4625_v38  ;;  %v4626_v38 = vunpack.c.l.bf16 %v10047_v53  ;;  %v4722_v19 = vunpack.c.l.bf16 %v10049_v44  ;;  %4890 = vmatpush.msra.mxu2 %v4728_v42 }
 0xb31   :  { %4792 = vmatpush.msrb.mxu0 %v4618_v37  ;;  %4865 = vmatpush.msrb.mxu1 %v4662_v11  ;;  %v4664_v37 = vunpack.c.l.bf16 %v10053_v28  ;;  %v10068_v11 = vld [vmem:[#allocation7 + $0x70] sm:$0xff] }
 0xb32   :  { %4832 = vmatpush.msrb.mxu3 %v4619_v49  ;;  %v4550_v49 = vld [vmem:[#allocation7 + $0x8] sm:$0xff]  ;;  %4891 = vmatpush.msra.mxu2 %v4722_v19  ;;  %v4646_v2 = vunpack.c.l.bf16 %v10068_v11 }
 0xb33   :  { %4897 = vmatpush.msra.mxu0 %v4711_v61  ;;  %4866 = vmatpush.msrb.mxu1 %v4656_v27  ;;  %v4620_v51 = vunpack.c.l.bf16 %v4550_v49  ;;  %v4716_v61 = vunpack.c.l.bf16 %v10057_v54  ;;  %v10072_v27 = vld [vmem:[#allocation7 + $0x58] sm:$0xff] }
 0xb34   :  { %4937 = vmatpush.msra.mxu3 %v4712_v45  ;;  %v10060_v45 = vld [vmem:[#allocation7 + $0xa0] sm:$0xff] }
 0xb35   :  { %4898 = vmatpush.msra.mxu0 %v4705_v59  ;;  %4867 = vmatpush.msrb.mxu1 %v4650_v14  ;;  %v4658_v3 = vunpack.c.l.bf16 %v10060_v45  ;;  %v10064_v59 = vld [vmem:[#allocation7 + $0x88] sm:$0xff]  ;;  %v10077_v14 = vld [vmem:[#allocation7 + $0x40] sm:$0xff] }
 0xb36   :  { %4938 = vmatpush.msra.mxu3 %v4706_v52  ;;  %4892 = vmatpush.msra.mxu2 %v4716_v61  ;;  %v4651_v52 = vunpack.c.h.bf16 %v10001_v1  ;;  %v4652_v7 = vunpack.c.l.bf16 %v10064_v59  ;;  %v4640_v1 = vunpack.c.l.bf16 %v10072_v27 }
 0xb37   :  { %4899 = vmatpush.msra.mxu0 %v4699_v12  ;;  %4868 = vmatpush.msrb.mxu1 %v4644_v13  ;;  %v4645_v12 = vunpack.c.h.bf16 %v10015_v21  ;;  %v4627_v13 = vunpack.c.h.bf16 %v10047_v53 }
 0xb38   :  { %4939 = vmatpush.msra.mxu3 %v4700_v23 }
 0xb39   :  { %4900 = vmatpush.msra.mxu0 %v4693_v15  ;;  %4869 = vmatpush.msrb.mxu1 %v4638_v29  ;;  %v4639_v15 = vunpack.c.h.bf16 %v10025_v24  ;;  %v4621_v24 = vunpack.c.h.bf16 %v4550_v49  ;;  %v10086_v29 = vld [vmem:[#allocation7 + $0x10] sm:$0xff] }
 0xb3a   :  { %4940 = vmatpush.msra.mxu3 %v4694_v8  ;;  %v4094_v8 = vadd.f32 %v4091_v60, %v10005_v25  ;;  %v4093_v25 = vadd.f32 %v4091_v60, %v10029_v36  ;;  %v4622_v34 = vunpack.c.l.bf16 %v10086_v29 }
 0xb3b   :  { %4901 = vmatpush.msra.mxu0 %v4687_v17  ;;  %4870 = vmatpush.msrb.mxu1 %v4632_v31  ;;  %v4633_v17 = vunpack.c.h.bf16 %v10037_v6 }
 0xb3c   :  { %4941 = vmatpush.msra.mxu3 %v4688_v55  ;;  %v4634_v55 = vunpack.c.l.bf16 %v10077_v14 }
 0xb3d   :  { %4902 = vmatpush.msra.mxu0 %v4681_v58  ;;  %4871 = vmatpush.msrb.mxu1 %v4626_v38 }
 0xb3e   :  { %4942 = vmatpush.msra.mxu3 %v4682_v30  ;;  %v4628_v30 = vunpack.c.l.bf16 %v10082_v50 }
 0xb3f   :  { %4903 = vmatpush.msra.mxu0 %v4675_v39  ;;  %4872 = vmatpush.msrb.mxu1 %v4620_v51 }
 0xb40   :  { %4943 = vmatpush.msra.mxu3 %v4676_v32 }
 0xb41   :  { %4904 = vmatpush.msra.mxu0 %v4669_v10 }
 0xb42   :  { %4944 = vmatpush.msra.mxu3 %v4670_v0 }
 0xb43   :  { %4905 = vmatpush.msra.mxu0 %v4663_v18 }
 0xb44   :  { %4945 = vmatpush.msra.mxu3 %v4664_v37 }
 0xb45   :  { %4906 = vmatpush.msra.mxu0 %v4657_v46  ;;  %v4617_v46 = vld [vmem:[#allocation7 + $0x220] sm:$0x11] }
 0xb46   :  { %4946 = vmatpush.msra.mxu3 %v4658_v3 }
 0xb47   :  { %4907 = vmatpush.msra.mxu0 %v4651_v52 }
 0xb48   :  { %4947 = vmatpush.msra.mxu3 %v4652_v7  ;;  %v4614_v7 = vld [vmem:[#allocation7 + $0x208] sm:$0xff] }
 0xb49   :  { %4908 = vmatpush.msra.mxu0 %v4645_v12  ;;  %v4753_v12 = vunpack.c.h.bf16 %v9994_v47  ;;  %v4741_v47 = vunpack.c.h.bf16 %v10017_v57  ;;  %v4599_v57 = vld [vmem:[#allocation7 + $0x190] sm:$0xff] }
 0xb4a   :  { %4948 = vmatpush.msra.mxu3 %v4646_v2  ;;  %v4611_v2 = vld [vmem:[#allocation7 + $0x1f0] sm:$0xff] }
 0xb4b   :  { %4909 = vmatpush.msra.mxu0 %v4639_v15 }
 0xb4c   :  { %4949 = vmatpush.msra.mxu3 %v4640_v1  ;;  %v4747_v1 = vunpack.c.h.bf16 %v10003_v9 }
 0xb4d   :  { %4910 = vmatpush.msra.mxu0 %v4633_v17  ;;  %v4608_v17 = vld [vmem:[#allocation7 + $0x1d8] sm:$0xff] }
 0xb4e   :  { %4950 = vmatpush.msra.mxu3 %v4634_v55 }
 0xb4f   :  { %4911 = vmatpush.msra.mxu0 %v4627_v13  ;;  %v4605_v13 = vld [vmem:[#allocation7 + $0x1c0] sm:$0xff] }
 0xb50   :  { %4951 = vmatpush.msra.mxu3 %v4628_v30  ;;  %v4736_v30 = vunpack.c.l.bf16 %v4608_v17 }
 0xb51   :  { %4912 = vmatpush.msra.mxu0 %v4621_v24 }
 0xb52   :  { %4952 = vmatpush.msra.mxu3 %v4622_v34  ;;  %v4729_v34 = vunpack.c.h.bf16 %v10039_v56  ;;  %v4718_v56 = vunpack.c.l.bf16 %v4599_v57 }
 0xb5c   :  { %v4202_v20 = vpop.f32.mrf.mxu2 }
 0xb64   :  { %v4314_v43 = vpop.f32.mrf.mxu2 }
 0xb6e   :  { %v4146_v35 = vpop.f32.mrf.mxu1 }
 0xb6f   :  { %v4150_v21 = vadd.f32 %v4146_v35, %v4094_v8  ;;  %v4748_v8 = vunpack.c.l.bf16 %v4614_v7 }
 0xb71   :  { %v4206_v39 = vadd.f32 %v4202_v20, %v4150_v21  ;;  %v4742_v21 = vunpack.c.l.bf16 %v4611_v2 }
 0xb76   :  { %v4182_v23 = vpop.f32.mrf.mxu3 }
 0xb77   :  { %v4126_v16 = vpop.f32.mrf.mxu0  ;;  %v4258_v33 = vpop.f32.mrf.mxu1 }
 0xb78   :  { %v4149_v32 = vadd.f32 %v4126_v16, %v4093_v25  ;;  %v4262_v6 = vadd.f32 %v4258_v33, %v4206_v39  ;;  %v4602_v25 = vld [vmem:[#allocation7 + $0x1a8] sm:$0xff]  ;;  %v4730_v39 = vunpack.c.l.bf16 %v4605_v13 }
 0xb7a   :  { %v4205_v10 = vadd.f32 %v4182_v23, %v4149_v32  ;;  %v4318_v36 = vadd.f32 %v4314_v43, %v4262_v6  ;;  %v4754_v23 = vunpack.c.l.bf16 %v4617_v46  ;;  %v4723_v32 = vunpack.c.h.bf16 %v10049_v44 }
 0xb7b   :  { %v4724_v6 = vunpack.c.l.bf16 %v4602_v25  ;;  %v4707_v44 = vunpack.c.h.bf16 %v9981_v41  ;;  %v4737_v41 = vunpack.c.h.bf16 %v4608_v17  ;;  %v5017_v17 = vld [vmem:[#allocation2] sm:$0x1] }
 0xb7e   :  { %v4294_v31 = vpop.f32.mrf.mxu3 }
 0xb7f   :  { %v4370_v42 = vpop.f32.mrf.mxu1 }
 0xb80   :  { %v4238_v58 = vpop.f32.mrf.mxu0  ;;  %v4374_v38 = vadd.f32 %v4370_v42, %v4318_v36  ;;  %v4755_v42 = vunpack.c.h.bf16 %v4617_v46  ;;  %v4731_v36 = vunpack.c.h.bf16 %v4605_v13  ;;  %v7376_v13 = vld [vmem:[%s11406_s23 + $0x1] sm:$0x1] }
 0xb81   :  { %v4261_v53 = vadd.f32 %v4238_v58, %v4205_v10  ;;  %v4735_v58 = vunpack.c.h.bf16 %v10027_v62  ;;  %v4717_v62 = vunpack.c.h.bf16 %v10057_v54  ;;  %v4701_v54 = vunpack.c.h.bf16 %v9987_v22 }
 0xb82   :  { %v4743_v10 = vunpack.c.h.bf16 %v4611_v2  ;;  %v4683_v22 = vunpack.c.h.bf16 %v10021_v63  ;;  %v4653_v63 = vunpack.c.h.bf16 %v10064_v59 }
 0xb83   :  { %v4317_v19 = vadd.f32 %v4294_v31, %v4261_v53  ;;  %v4713_v31 = vunpack.c.h.bf16 %v9971_v4  ;;  %v4695_v4 = vunpack.c.h.bf16 %v9999_v48  ;;  %v4725_v53 = vunpack.c.h.bf16 %v4602_v25 }
 0xb84   :  { %v4426_v35 = vpop.f32.mrf.mxu2  ;;  %v4671_v48 = vunpack.c.h.bf16 %v10043_v5  ;;  %v4635_v5 = vunpack.c.h.bf16 %v10077_v14 }
 0xb85   :  { %v4430_v18 = vadd.f32 %v4426_v35, %v4374_v38  ;;  %v4749_v35 = vunpack.c.h.bf16 %v4614_v7  ;;  %v4677_v38 = vunpack.c.h.bf16 %v10033_v40  ;;  %v4647_v40 = vunpack.c.h.bf16 %v10068_v11 }
 0xb88   :  { %v4350_v0 = vpop.f32.mrf.mxu0 }
 0xb89   :  { %v4373_v20 = vadd.f32 %v4350_v0, %v4317_v19  ;;  %v4689_v0 = vunpack.c.h.bf16 %v10010_v26  ;;  %v4719_v19 = vunpack.c.h.bf16 %v4599_v57  ;;  %v4659_v26 = vunpack.c.h.bf16 %v10060_v45 }
 0xb8d   :  { %v4406_v37 = vpop.f32.mrf.mxu3  ;;  %v4538_v51 = vpop.f32.mrf.mxu2 }
 0xb8e   :  { %v4482_v49 = vpop.f32.mrf.mxu1  ;;  %v4429_v3 = vadd.f32 %v4406_v37, %v4373_v20  ;;  %v4641_v37 = vunpack.c.h.bf16 %v10072_v27 }
 0xb8f   :  { %v4486_v61 = vadd.f32 %v4482_v49, %v4430_v18  ;;  %v4665_v18 = vunpack.c.h.bf16 %v10053_v28  ;;  %v4629_v28 = vunpack.c.h.bf16 %v10082_v50  ;;  %v4623_v49 = vunpack.c.h.bf16 %v10086_v29 }
 0xb91   :  { %v4542_v16 = vadd.f32 %v4538_v51, %v4486_v61  ;;  %v4462_v52 = vpop.f32.mrf.mxu0 }
 0xb92   :  { %v4485_v33 = vadd.f32 %v4462_v52, %v4429_v3 }
 0xb93   :  { %vm4544_vm3 = vcmp.ge.f32.partialorder %v4542_v16, 0.0  ;;  %v4546_v60 = vmul.f32 0.01, %v4542_v16 }
 0xb95   :  { %v10090_v15 = vsel %vm4544_vm3, %v4542_v16, %v4546_v60  ;;  %v5018_v60 = vld [vmem:[%s11406_s23] sm:$0x1]  ;;  %vm11411_vm3 = vmmov %vm11408_vm2 }
 0xb96   :  { %v4518_v43 = vpop.f32.mrf.mxu3  ;;  %7355 = vmatmul.msk.f32.vlgmr.msra.gmra.mxu1 %vm11398_vm5, %v10090_v15  ;;  %7357 = vmatmul.msk.f32.vlgmr.msrb.gmra.mxu2 %vm11399_vm10, %v10090_v15  ;;  %vm11415_vm5 = vmmov %vm11408_vm2 }
 0xb97   :  { %v4541_v55 = vadd.f32 %v4518_v43, %v4485_v33  ;;  %7360 = vmatpush.msk.msrb.mxu2 %vm1843_vm9, %v4753_v12  ;;  %7362 = vmatpush.msk.msra.mxu1 %vm1843_vm9, %v4754_v23  ;;  %vm11416_vm10 = vmmov %vm11408_vm2 }
 0xb99   :  { %vm4543_vm11 = vcmp.ge.f32.partialorder %v4541_v55, 0.0  ;;  %v4545_v9 = vmul.f32 0.01, %v4541_v55  ;;  %4927 = vmatpush.msrb.mxu2 %v4747_v1  ;;  %4967 = vmatpush.msra.mxu1 %v4748_v8 }
 0xb9b   :  { %v10101_v24 = vsel %vm4543_vm11, %v4541_v55, %v4545_v9  ;;  %4928 = vmatpush.msrb.mxu2 %v4741_v47  ;;  %4968 = vmatpush.msra.mxu1 %v4742_v21  ;;  %vm11417_vm11 = vmmov %vm11408_vm2 }
 0xb9c   :  { %4793 = vmatmul.f32.vlgmr.msrb.gmra.mxu0 %v10101_v24  ;;  %4833 = vmatmul.f32.vlgmr.msrb.gmra.mxu3 %v10101_v24 }
 0xb9d   :  { %4929 = vmatpush.msrb.mxu2 %v4735_v58  ;;  %4969 = vmatpush.msra.mxu1 %v4736_v30 }
 0xb9e   :  { %4873 = vmatmul.f32.vlgmr.msrb.gmra.mxu1 %v10101_v24  ;;  %7359 = vmatmul.msk.f32.vlgmr.msra.gmra.mxu2 %vm11400_vm12, %v10090_v15  ;;  %vm11418_vm12 = vmmov %vm11408_vm2 }
 0xb9f   :  { %4930 = vmatpush.msrb.mxu2 %v4729_v34  ;;  %4970 = vmatpush.msra.mxu1 %v4730_v39  ;;  %v7387_v34 = vld [vmem:[%s11406_s23 + $0x2] sm:$0x1] }
 0xba1   :  { %4931 = vmatpush.msrb.mxu2 %v4723_v32  ;;  %4971 = vmatpush.msra.mxu1 %v4724_v6 }
 0xba3   :  { %4932 = vmatpush.msrb.mxu2 %v4717_v62  ;;  %4972 = vmatpush.msra.mxu1 %v4718_v56 }
 0xba4   :  { %4913 = vmatmul.f32.vlgmr.msra.gmra.mxu0 %v10101_v24  ;;  %4953 = vmatmul.f32.vlgmr.msra.gmra.mxu3 %v10101_v24 }
 0xba5   :  { %4977 = vmatpush.msra.mxu2 %v4713_v31  ;;  %7364 = vmatpush.msk.msrb.mxu1 %vm1843_vm9, %v4755_v42 }
 0xba6   :  { %7361 = vmatmul.msk.f32.vlgmr.msrb.gmra.mxu2 %vm11401_vm13, %v10090_v15  ;;  %7363 = vmatmul.msk.f32.vlgmr.msra.gmra.mxu1 %vm11402_vm14, %v10090_v15  ;;  %vm11419_vm13 = vmmov %vm11408_vm2 }
 0xba7   :  { %4978 = vmatpush.msra.mxu2 %v4707_v44  ;;  %5007 = vmatpush.msrb.mxu1 %v4749_v35  ;;  %vm11420_vm14 = vmmov %vm11408_vm2 }
 0xba9   :  { %4979 = vmatpush.msra.mxu2 %v4701_v54  ;;  %5008 = vmatpush.msrb.mxu1 %v4743_v10 }
 0xbab   :  { %4980 = vmatpush.msra.mxu2 %v4695_v4  ;;  %5009 = vmatpush.msrb.mxu1 %v4737_v41 }
 0xbad   :  { %4981 = vmatpush.msra.mxu2 %v4689_v0  ;;  %5010 = vmatpush.msrb.mxu1 %v4731_v36  ;;  %v7398_v36 = vld [vmem:[%s11406_s23 + $0x3] sm:$0x1] }
 0xbaf   :  { %4982 = vmatpush.msra.mxu2 %v4683_v22  ;;  %5011 = vmatpush.msrb.mxu1 %v4725_v53 }
 0xbb1   :  { %4983 = vmatpush.msra.mxu2 %v4677_v38  ;;  %5012 = vmatpush.msrb.mxu1 %v4719_v19 }
 0xbb2   :  { %7365 = vmatmul.msk.f32.vlgmr.msrb.gmra.mxu1 %vm11403_vm6, %v10090_v15  ;;  %vm11421_vm6 = vcmask 900096  }
 0xbb3   :  { %4984 = vmatpush.msra.mxu2 %v4671_v48 }
 0xbb5   :  { %4985 = vmatpush.msra.mxu2 %v4665_v18 }
 0xbb7   :  { %4986 = vmatpush.msra.mxu2 %v4659_v26 }
 0xbb9   :  { %4987 = vmatpush.msra.mxu2 %v4653_v63 }
 0xbbb   :  { %4988 = vmatpush.msra.mxu2 %v4647_v40 }
 0xbbd   :  { %4989 = vmatpush.msra.mxu2 %v4641_v37 }
 0xbbf   :  { %4990 = vmatpush.msra.mxu2 %v4635_v5  ;;  %v7409_v5 = vld [vmem:[%s11406_s23 + $0x4] sm:$0x1] }
 0xbc1   :  { %4991 = vmatpush.msra.mxu2 %v4629_v28 }
 0xbc3   :  { %4992 = vmatpush.msra.mxu2 %v4623_v49 }
 0xbc4   :  { %4993 = vmatmul.f32.vlgmr.msra.gmra.mxu2 %v10101_v24 }
 0xc13   :  { %v4814_v45 = vpop.f32.mrf.mxu1 }
 0xc19   :  { %v4794_v59 = vpop.f32.mrf.mxu0  ;;  %v4854_v51 = vpop.f32.mrf.mxu2 }
 0xc1a   :  { %v4815_v11 = vadd.f32 %v4814_v45, %v4794_v59  ;;  %v7420_v59 = vld [vmem:[%s11406_s23 + $0x5] sm:$0x1] }
 0xc1b   :  { %v4874_v27 = vpop.f32.mrf.mxu1 }
 0xc1c   :  { %5418 = vrot.lane.b32.xlu1 %v4815_v11, %s11404_s4  ;;  %5150 = vrot.lane.b32.xlu0 %v4815_v11, %s7736_s10 }
 0xc1d   :  { %7366 = vmatpush.msk.msrb.mxu0 %vm1843_vm9, %v4815_v11 }
 0xc1e   :  { %7367 = vmatmul.msk.f32.vlgmr.msrb.gmra.mxu0 %vm11408_vm2, %v5018_v60 }
 0xc1f   :  { %v4834_v14 = vpop.f32.mrf.mxu3 }
 0xc20   :  { %v4855_v50 = vadd.f32 %v4854_v51, %v4834_v14 }
 0xc21   :  { %v4894_v20 = vpop.f32.mrf.mxu2  ;;  %v4914_v16 = vpop.f32.mrf.mxu0 }
 0xc22   :  { %v4895_v61 = vadd.f32 %v4894_v20, %v4874_v27  ;;  %5420 = vrot.lane.b32.xlu2 %v4855_v50, %s11404_s4  ;;  %7368 = vmatpush.msk.msrb.mxu3 %vm1843_vm9, %v4855_v50 }
 0xc23   :  { %v4974_v29 = vpop.f32.mrf.mxu1  ;;  %7369 = vmatmul.msk.f32.vlgmr.msrb.gmra.mxu3 %vm11407_vm15, %v5018_v60  ;;  %vm11422_vm15 = vmmov %vm11408_vm2 }
 0xc24   :  { %5152 = vrot.lane.b32.xlu1 %v4855_v50, %s7736_s10  ;;  %5284 = vrot.lane.b32.xlu0 %v4815_v11, %s7740_s27 }
 0xc25   :  { %7370 = vmatpush.msk.msra.mxu0 %vm1843_vm9, %v4895_v61 }
 0xc26   :  { %7371 = vmatmul.msk.f32.vlgmr.msra.gmra.mxu0 %vm11411_vm3, %v5018_v60 }
 0xc27   :  { %v4954_v46 = vpop.f32.mrf.mxu3 }
 0xc28   :  { %v4975_v3 = vadd.f32 %v4974_v29, %v4954_v46 }
 0xc29   :  { %v4934_v52 = vpop.f32.mrf.mxu2 }
 0xc2a   :  { %v4935_v7 = vadd.f32 %v4934_v52, %v4914_v16  ;;  %5154 = vrot.lane.b32.xlu2 %v4895_v61, %s7736_s10  ;;  %7374 = vmatpush.msk.msra.mxu3 %vm1843_vm9, %v4975_v3 }
 0xc2b   :  { %7375 = vmatmul.msk.f32.vlgmr.msra.gmra.mxu3 %vm11410_vm8, %v5018_v60  ;;  %vm11427_vm8 = vcmask 891904  }
 0xc2c   :  { %5286 = vrot.lane.b32.xlu1 %v4855_v50, %s7740_s27  ;;  %5422 = vrot.lane.b32.xlu0 %v4895_v61, %s11404_s4 }
 0xc2d   :  { %7372 = vmatpush.msk.msra.mxu1 %vm1843_vm9, %v4935_v7 }
 0xc2e   :  { %7373 = vmatmul.msk.f32.vlgmr.msra.gmra.mxu1 %vm11409_vm7, %v5018_v60 }
 0xc2f   :  { %v5014_v23 = vpop.f32.mrf.mxu1 }
 0xc32   :  { %5288 = vrot.lane.b32.xlu2 %v4895_v61, %s7740_s27 }
 0xc34   :  { %5292 = vrot.lane.b32.xlu1 %v4975_v3, %s7740_s27  ;;  %5426 = vrot.lane.b32.xlu0 %v4975_v3, %s11404_s4 }
 0xc3a   :  { %5158 = vrot.lane.b32.xlu2 %v4975_v3, %s7736_s10 }
 0xc3c   :  { %5156 = vrot.lane.b32.xlu1 %v4935_v7, %s7736_s10  ;;  %5290 = vrot.lane.b32.xlu0 %v4935_v7, %s7740_s27  ;;  %s11412_s10 = smov 92   ;;  %s11413_s27 = smov 91  }
 0xc42   :  { %5554 = vrot.lane.b32.xlu2 %v4855_v50, %s11405_s19 }
 0xc44   :  { %5552 = vrot.lane.b32.xlu1 %v4815_v11, %s11405_s19  ;;  %5556 = vrot.lane.b32.xlu0 %v4895_v61, %s11405_s19 }
 0xc47   :  { %v4994_v12 = vpop.f32.mrf.mxu2 }
 0xc48   :  { %v5015_v2 = vadd.f32 %v5014_v23, %v4994_v12  ;;  %v7431_v12 = vld [vmem:[%s11406_s23 + $0x6] sm:$0x1] }
 0xc4a   :  { %5560 = vrot.lane.b32.xlu2 %v4975_v3, %s11405_s19 }
 0xc4c   :  { %5690 = vrot.lane.b32.xlu1 %v4895_v61, %s7739_s18  ;;  %5688 = vrot.lane.b32.xlu0 %v4855_v50, %s7739_s18 }
 0xc52   :  { %5686 = vrot.lane.b32.xlu2 %v4815_v11, %s7739_s18 }
 0xc54   :  { %5694 = vrot.lane.b32.xlu1 %v4975_v3, %s7739_s18  ;;  %5823 = vrot.lane.b32.xlu0 %v4855_v50, %s11412_s10 }
 0xc5a   :  { %5424 = vrot.lane.b32.xlu2 %v4935_v7, %s11404_s4 }
 0xc5c   :  { %5558 = vrot.lane.b32.xlu1 %v4935_v7, %s11405_s19  ;;  %5692 = vrot.lane.b32.xlu0 %v4935_v7, %s7739_s18  ;;  %s11414_s18 = smov 90  }
 0xc62   :  { %5821 = vrot.lane.b32.xlu2 %v4815_v11, %s11412_s10 }
 0xc64   :  { %5825 = vrot.lane.b32.xlu1 %v4895_v61, %s11412_s10  ;;  %5829 = vrot.lane.b32.xlu0 %v4975_v3, %s11412_s10 }
 0xc6a   :  { %5960 = vrot.lane.b32.xlu2 %v4855_v50, %s11413_s27 }
 0xc6c   :  { %5958 = vrot.lane.b32.xlu1 %v4815_v11, %s11413_s27  ;;  %5962 = vrot.lane.b32.xlu0 %v4895_v61, %s11413_s27 }
 0xc72   :  { %5827 = vrot.lane.b32.xlu2 %v4935_v7, %s11412_s10 }
 0xc74   :  { %5831 = vrot.lane.b32.xlu1 %v5015_v2, %s11412_s10  ;;  %5966 = vrot.lane.b32.xlu0 %v4975_v3, %s11413_s27 }
 0xc7a   :  { %5964 = vrot.lane.b32.xlu2 %v4935_v7, %s11413_s27 }
 0xc7c   :  { %v5421_v33 = vpop.permute.xlu2 %5420  ;;  %6095 = vrot.lane.b32.xlu1 %v4815_v11, %s11414_s18  ;;  %5968 = vrot.lane.b32.xlu0 %v5015_v2, %s11413_s27 }
 0xc82   :  { %6097 = vrot.lane.b32.xlu2 %v4855_v50, %s11414_s18 }
 0xc84   :  { %v5155_v15 = vpop.permute.xlu2 %5154  ;;  %6099 = vrot.lane.b32.xlu1 %v4895_v61, %s11414_s18  ;;  %6103 = vrot.lane.b32.xlu0 %v4975_v3, %s11414_s18 }
 0xc8a   :  { %6101 = vrot.lane.b32.xlu2 %v4935_v7, %s11414_s18 }
 0xc8c   :  { %v5289_v1 = vpop.permute.xlu2 %5288  ;;  %6105 = vrot.lane.b32.xlu1 %v5015_v2, %s11414_s18 }
 0xc8e   :  { %v5419_v8 = vpop.permute.xlu1 %5418  ;;  %v5151_v43 = vpop.permute.xlu0 %5150 }
 0xc8f   :  { %v5428_v4 = vsel %vm11421_vm6, %v5419_v8, %v5421_v33 }
 0xc92   :  { %5139 = vperm.xlu2 %7582, %v5017_v17  }
 0xc94   :  { %v5159_v55 = vpop.permute.xlu2 %5158 }
 0xc96   :  { %v5153_v47 = vpop.permute.xlu1 %5152  ;;  %v5285_v21 = vpop.permute.xlu0 %5284 }
 0xc97   :  { %v5160_v9 = vsel %vm1268_vm0, %v5151_v43, %v5153_v47  ;;  %v5161_v58 = vsel %vm1268_vm0, %v5153_v47, %v5155_v15  ;;  %v7442_v43 = vld [vmem:[%s11406_s23 + $0x7] sm:$0x1] }
 0xc98   :  { %7377 = vmatpush.msk.msrb.mxu0 %vm1843_vm9, %v5160_v9  ;;  %7379 = vmatpush.msk.msrb.mxu2 %vm1843_vm9, %v5161_v58 }
 0xc99   :  { %7378 = vmatmul.msk.f32.vlgmr.msrb.gmra.mxu0 %vm11415_vm5, %v7376_v13  ;;  %7380 = vmatmul.msk.f32.vlgmr.msrb.gmra.mxu2 %vm11416_vm10, %v7376_v13  ;;  %vm11429_vm5 = vmmov %vm11427_vm8 }
 0xc9a   :  { %7385 = vmatpush.msk.msra.mxu0 %vm1843_vm9, %v5159_v55 }
 0xc9c   :  { %v5555_v30 = vpop.permute.xlu2 %5554 }
 0xc9e   :  { %v5287_v25 = vpop.permute.xlu1 %5286  ;;  %v5423_v24 = vpop.permute.xlu0 %5422 }
 0xc9f   :  { %v5294_v39 = vsel %vm1310_vm1, %v5285_v21, %v5287_v25  ;;  %v5295_v10 = vsel %vm1310_vm1, %v5287_v25, %v5289_v1 }
 0xca0   :  { %7388 = vmatpush.msk.msra.mxu2 %vm1843_vm9, %v5294_v39 }
 0xca1   :  { %7386 = vmatmul.msk.f32.vlgmr.msra.gmra.mxu0 %vm11417_vm11, %v7376_v13  ;;  %7389 = vmatmul.msk.f32.vlgmr.msra.gmra.mxu2 %vm11418_vm12, %v7387_v34 }
 0xca4   :  { %v10210_v57 = vpop.permute.xlu2 %5560 }
 0xca6   :  { %v5293_v32 = vpop.permute.xlu1 %5292  ;;  %v5427_v6 = vpop.permute.xlu0 %5426 }
 0xca7   :  { %7396 = vmatpush.msk.msrb.mxu2 %vm1843_vm9, %v5293_v32 }
 0xca9   :  { %7397 = vmatmul.msk.f32.vlgmr.msrb.gmra.mxu2 %vm11419_vm13, %v7387_v34 }
 0xcac   :  { %v5687_v62 = vpop.permute.xlu2 %5686 }
 0xcae   :  { %v5157_v56 = vpop.permute.xlu1 %5156  ;;  %v5291_v31 = vpop.permute.xlu0 %5290 }
 0xcaf   :  { %v5162_v42 = vsel %vm1268_vm0, %v5155_v15, %v5157_v56  ;;  %v5163_v44 = vsel %vm1268_vm0, %v5157_v56, %v5159_v55  ;;  %v5297_v35 = vsel %vm1310_vm1, %v5291_v31, %v5293_v32  ;;  %v5296_v54 = vsel %vm1310_vm1, %v5289_v1, %v5291_v31  ;;  %vm11423_vm0 = vmmov %vm11421_vm6 }
 0xcb0   :  { %7381 = vmatpush.msk.msrb.mxu1 %vm1843_vm9, %v5162_v42  ;;  %7383 = vmatpush.msk.msrb.mxu3 %vm1843_vm9, %v5163_v44  ;;  %v5429_v41 = vsel %vm11423_vm0, %v5421_v33, %v5423_v24  ;;  %vm11424_vm1 = vmmov %vm11408_vm2  ;;  %v10336_v42 = vpop.f32.mrf.mxu0 }
 0xcb1   :  { %7394 = vmatpush.msk.msrb.mxu0 %vm1843_vm9, %v5297_v35  ;;  %7382 = vmatmul.msk.f32.vlgmr.msrb.gmra.mxu1 %vm11420_vm14, %v7376_v13  ;;  %vm11425_vm2 = vmmov %vm11423_vm0  ;;  %v10340_v35 = vld [vmem:[#allocation8 + $0x1f0] sm:$0xff] }
 0xcb2   :  { %7384 = vmatmul.msk.f32.vlgmr.msrb.gmra.mxu3 %vm11422_vm15, %v7376_v13  ;;  %7390 = vmatpush.msk.msra.mxu1 %vm1843_vm9, %v5295_v10  ;;  %vm11426_vm7 = vmmov %vm11423_vm0  ;;  %v6523_v10 = vunpack.c.l.bf16 %v10340_v35 }
 0xcb3   :  { %7392 = vmatpush.msk.msra.mxu3 %vm1843_vm9, %v5296_v54  ;;  %7395 = vmatmul.msk.f32.vlgmr.msrb.gmra.mxu0 %vm11424_vm1, %v7387_v34  ;;  %vm11428_vm3 = vmmov %vm11424_vm1  ;;  %v10342_v54 = vld [vmem:[#allocation8 + $0x3f0] sm:$0xff] }
 0xcb4   :  { %7399 = vmatpush.msk.msrb.mxu1 %vm1843_vm9, %v5428_v4  ;;  %v5425_v0 = vpop.permute.xlu2 %5424  ;;  %vm11430_vm10 = vmmov %vm11424_vm1  ;;  %11476 = vst [vmem:[#allocation25_spill] sm:$0xff] %v10342_v54  ;;  %v6651_v4 = vunpack.c.l.bf16 %v10342_v54 }
 0xcb5   :  { %7401 = vmatpush.msk.msrb.mxu3 %vm1843_vm9, %v5429_v41  ;;  %v5430_v22 = vsel %vm11425_vm2, %v5423_v24, %v5425_v0  ;;  %v5431_v53 = vsel %vm11426_vm7, %v5425_v0, %v5427_v6  ;;  %vm11431_vm11 = vmmov %vm11424_vm1  ;;  %v7453_v24 = vld [vmem:[%s11406_s23 + $0x8] sm:$0x1]  ;;  %v10346_v41 = vld [vmem:[#allocation8 + $0x1e0] sm:$0xff] }
 0xcb6   :  { %v5553_v38 = vpop.permute.xlu1 %5552  ;;  %7405 = vmatpush.msk.msra.mxu2 %vm1843_vm9, %v5431_v53  ;;  %v5557_v19 = vpop.permute.xlu0 %5556  ;;  %7403 = vmatpush.msk.msra.mxu0 %vm1843_vm9, %v5430_v22  ;;  %vm11432_vm12 = vmmov %vm11424_vm1  ;;  %v10348_v0 = vld [vmem:[#allocation8 + $0x3e0] sm:$0xff]  ;;  %v6519_v22 = vunpack.c.l.bf16 %v10346_v41 }
 0xcb7   :  { %v5563_v48 = vsel %vm11427_vm8, %v5555_v30, %v5557_v19  ;;  %7406 = vmatmul.msk.f32.vlgmr.msra.gmra.mxu2 %vm11428_vm3, %v7398_v36  ;;  %v5562_v18 = vsel %vm11429_vm5, %v5553_v38, %v5555_v30  ;;  %vm11433_vm13 = vmmov %vm11424_vm1  ;;  %11477 = vst [vmem:[#allocation26_spill] sm:$0xff] %v10348_v0  ;;  %v6647_v53 = vunpack.c.l.bf16 %v10348_v0  ;;  %v10354_v38 = vld [vmem:[#allocation8 + $0xf0] sm:$0xff] }
 0xcb8   :  { %7412 = vmatpush.msk.msrb.mxu0 %vm1843_vm9, %v5563_v48  ;;  %vm11434_vm14 = vmmov %vm11424_vm1  ;;  %v10338_v44 = vpop.f32.mrf.mxu0  ;;  %v10358_v48 = vld [vmem:[#allocation8 + $0x3d0] sm:$0xff] }
 0xcb9   :  { %7391 = vmatmul.msk.f32.vlgmr.msra.gmra.mxu1 %vm11430_vm10, %v7387_v34  ;;  %vm11435_vm6 = vmmov %vm11424_vm1  ;;  %vm11444_vm10 = vcmask 752640   ;;  %11478 = vst [vmem:[#allocation27_spill] sm:$0xff] %v10358_v48 }
 0xcba   :  { %7393 = vmatmul.msk.f32.vlgmr.msra.gmra.mxu3 %vm11431_vm11, %v7387_v34  ;;  %7407 = vmatpush.msk.msra.mxu1 %vm1843_vm9, %v5427_v6  ;;  %vm11436_vm15 = vmmov %vm11424_vm1 }
 0xcbb   :  { %7410 = vmatpush.msk.msra.mxu3 %vm1843_vm9, %v5562_v18  ;;  %7404 = vmatmul.msk.f32.vlgmr.msra.gmra.mxu0 %vm11432_vm12, %v7398_v36  ;;  %vm11437_vm0 = vmmov %vm11424_vm1  ;;  %v6459_v18 = vunpack.c.l.bf16 %v10354_v38 }
 0xcbc   :  { %v5822_v40 = vpop.permute.xlu2 %5821  ;;  %vm11438_vm1 = vmmov %vm11437_vm0 }
 0xcbd   :  { %vm11439_vm2 = vmmov %vm11429_vm5 }
 0xcbe   :  { %v5691_v26 = vpop.permute.xlu1 %5690  ;;  %v5689_v63 = vpop.permute.xlu0 %5688  ;;  %vm11440_vm7 = vmmov %vm11439_vm2 }
 0xcbf   :  { %v5696_v37 = vsel %vm1436_vm4, %v5687_v62, %v5689_v63  ;;  %vm11441_vm8 = vmmov %vm11437_vm0  ;;  %v5697_v61 = vsel %vm1436_vm4, %v5689_v63, %v5691_v26  ;;  %v6643_v63 = vunpack.c.l.bf16 %v10358_v48  ;;  %v10525_v48 = vld [vmem:[#allocation8 + $0x310] sm:$0xff] }
 0xcc0   :  { %7421 = vmatpush.msk.msra.mxu0 %vm1843_vm9, %v5696_v37  ;;  %vm11442_vm3 = vmmov %vm11437_vm0  ;;  %v10365_v37 = vld [vmem:[#allocation8 + $0xe0] sm:$0xff]  ;;  %11497 = vst [vmem:[#allocation34_spill] sm:$0xff] %v10525_v48 }
 0xcc1   :  { %7400 = vmatmul.msk.f32.vlgmr.msrb.gmra.mxu1 %vm11433_vm13, %v7398_v36  ;;  %vm11443_vm5 = vmmov %vm11437_vm0 }
 0xcc2   :  { %7402 = vmatmul.msk.f32.vlgmr.msrb.gmra.mxu3 %vm11434_vm14, %v7398_v36  ;;  %vm11445_vm11 = vmmov %vm11437_vm0 }
 0xcc3   :  { %7418 = vmatpush.msk.msrb.mxu3 %vm1843_vm9, %v10210_v57  ;;  %7413 = vmatmul.msk.f32.vlgmr.msrb.gmra.mxu0 %vm11435_vm6, %v7409_v5  ;;  %vm11446_vm12 = vmmov %vm11444_vm10 }
 0xcc4   :  { %v5961_v45 = vpop.permute.xlu2 %5960  ;;  %vm11449_vm14 = vmmov %vm11437_vm0 }
 0xcc5   :  { %vm11450_vm6 = vmmov %vm11437_vm0 }
 0xcc6   :  { %v5695_v28 = vpop.permute.xlu1 %5694  ;;  %v5824_v49 = vpop.permute.xlu0 %5823 }
 0xcc7   :  { %7429 = vmatpush.msk.msrb.mxu0 %vm1843_vm9, %v5695_v28  ;;  %v5833_v29 = vsel %vm11444_vm10, %v5822_v40, %v5824_v49  ;;  %v10363_v40 = vpop.f32.mrf.mxu3 }
 0xcc9   :  { %7408 = vmatmul.msk.f32.vlgmr.msra.gmra.mxu1 %vm11436_vm15, %v7398_v36  ;;  %vm11451_vm15 = vmmov %vm11437_vm0 }
 0xcca   :  { %7411 = vmatmul.msk.f32.vlgmr.msra.gmra.mxu3 %vm11437_vm0, %v7409_v5 }
 0xccb   :  { %7422 = vmatmul.msk.f32.vlgmr.msra.gmra.mxu0 %vm11438_vm1, %v7420_v59  ;;  %vm11452_vm1 = vcmask 744448  }
 0xccc   :  { %v5828_v46 = vpop.permute.xlu2 %5827 }
 0xcce   :  { %v5559_v51 = vpop.permute.xlu1 %5558  ;;  %v5693_v11 = vpop.permute.xlu0 %5692 }
 0xccf   :  { %v5564_v27 = vsel %vm11439_vm2, %v5557_v19, %v5559_v51  ;;  %v5565_v14 = vsel %vm11440_vm7, %v5559_v51, %v10210_v57  ;;  %v5699_v50 = vsel %vm1436_vm4, %v5693_v11, %v5695_v28  ;;  %v5698_v20 = vsel %vm1436_vm4, %v5691_v26, %v5693_v11  ;;  %vm11447_vm4 = vmmov %vm11444_vm10  ;;  %v10356_v19 = vld [vmem:[#allocation8 + $0x1d0] sm:$0xff]  ;;  %v10374_v51 = vld [vmem:[#allocation8 + $0x3c0] sm:$0xff] }
 0xcd0   :  { %7414 = vmatpush.msk.msrb.mxu2 %vm1843_vm9, %v5564_v27  ;;  %7416 = vmatpush.msk.msrb.mxu1 %vm1843_vm9, %v5565_v14  ;;  %vm11448_vm13 = vmmov %vm11447_vm4  ;;  %v6515_v26 = vunpack.c.l.bf16 %v10356_v19  ;;  %v10369_v28 = vld [vmem:[#allocation8 + $0x2f0] sm:$0xff]  ;;  %11479 = vst [vmem:[#allocation28_spill] sm:$0xff] %v10374_v51  ;;  %v6639_v11 = vunpack.c.l.bf16 %v10374_v51 }
 0xcd1   :  { %7427 = vmatpush.msk.msra.mxu3 %vm1843_vm9, %v5699_v50  ;;  %7415 = vmatmul.msk.f32.vlgmr.msrb.gmra.mxu2 %vm11441_vm8, %v7409_v5  ;;  %vm11453_vm2 = vmmov %vm11452_vm1  ;;  %v10377_v27 = vld [vmem:[#allocation8 + $0xd0] sm:$0xff]  ;;  %v10381_v50 = vld [vmem:[#allocation8 + $0x2e0] sm:$0xff] }
 0xcd2   :  { %7417 = vmatmul.msk.f32.vlgmr.msrb.gmra.mxu1 %vm11442_vm3, %v7409_v5  ;;  %7419 = vmatmul.msk.f32.vlgmr.msrb.gmra.mxu3 %vm11443_vm5, %v7409_v5  ;;  %vm11454_vm7 = vmmov %vm11452_vm1  ;;  %v10367_v5 = vld [vmem:[#allocation8 + $0x1c0] sm:$0xff]  ;;  %v10379_v14 = vld [vmem:[#allocation8 + $0x1b0] sm:$0xff] }
 0xcd3   :  { %7423 = vmatpush.msk.msra.mxu2 %vm1843_vm9, %v5697_v61  ;;  %7425 = vmatpush.msk.msra.mxu1 %vm1843_vm9, %v5698_v20  ;;  %vm11455_vm8 = vmmov %vm11437_vm0  ;;  %v10383_v61 = vpop.f32.mrf.mxu1 }
 0xcd4   :  { %7430 = vmatmul.msk.f32.vlgmr.msrb.gmra.mxu0 %vm11445_vm11, %v7420_v59  ;;  %v5965_v23 = vpop.permute.xlu2 %5964  ;;  %vm11456_vm3 = vmmov %vm11437_vm0 }
 0xcd5   :  { %7432 = vmatpush.msk.msrb.mxu2 %vm1843_vm9, %v5833_v29  ;;  %vm11457_vm5 = vmmov %vm11437_vm0  ;;  %v6451_v29 = vunpack.c.l.bf16 %v10377_v27 }
 0xcd6   :  { %v5826_v3 = vpop.permute.xlu1 %5825  ;;  %v5830_v16 = vpop.permute.xlu0 %5829  ;;  %vm11458_vm10 = vmmov %vm11437_vm0 }
 0xcd7   :  { %v5834_v52 = vsel %vm11446_vm12, %v5824_v49, %v5826_v3  ;;  %v5835_v7 = vsel %vm11447_vm4, %v5826_v3, %v5828_v46  ;;  %v5836_v60 = vsel %vm11448_vm13, %v5828_v46, %v5830_v16  ;;  %vm11459_vm11 = vmmov %vm11447_vm4  ;;  %v6455_v49 = vunpack.c.l.bf16 %v10365_v37 }
 0xcd8   :  { %7434 = vmatpush.msk.msrb.mxu1 %vm1843_vm9, %v5834_v52  ;;  %7436 = vmatpush.msk.msrb.mxu3 %vm1843_vm9, %v5835_v7  ;;  %vm11460_vm12 = vmmov %vm11452_vm1  ;;  %v6507_v46 = vunpack.c.l.bf16 %v10379_v14  ;;  %v6583_v3 = vunpack.c.l.bf16 %v10381_v50  ;;  %v10391_v7 = vld [vmem:[#allocation8 + $0xc0] sm:$0xff] }
 0xcd9   :  { %7438 = vmatpush.msk.msra.mxu0 %vm1843_vm9, %v5836_v60  ;;  %7424 = vmatmul.msk.f32.vlgmr.msra.gmra.mxu2 %vm11449_vm14, %v7420_v59  ;;  %vm11461_vm4 = vmmov %vm11437_vm0  ;;  %v10393_v60 = vld [vmem:[#allocation8 + $0x1a0] sm:$0xff] }
 0xcda   :  { %7426 = vmatmul.msk.f32.vlgmr.msra.gmra.mxu1 %vm11450_vm6, %v7420_v59  ;;  %7428 = vmatmul.msk.f32.vlgmr.msra.gmra.mxu3 %vm11451_vm15, %v7420_v59  ;;  %vm11462_vm13 = vmmov %vm11437_vm0  ;;  %vm11464_vm6 = vcmask 736256   ;;  %v6587_v59 = vunpack.c.l.bf16 %v10369_v28 }
 0xcdb   :  { %vm11463_vm14 = vmmov %vm11437_vm0 }
 0xcdc   :  { %7439 = vmatmul.msk.f32.vlgmr.msra.gmra.mxu0 %vm11437_vm0, %v7431_v12  ;;  %v6098_v13 = vpop.permute.xlu2 %6097  ;;  %vm11465_vm15 = vmmov %vm11452_vm1 }
 0xcde   :  { %v5959_v2 = vpop.permute.xlu1 %5958  ;;  %v5963_v33 = vpop.permute.xlu0 %5962 }
 0xcdf   :  { %v5970_v15 = vsel %vm11452_vm1, %v5959_v2, %v5961_v45  ;;  %v5971_v1 = vsel %vm11453_vm2, %v5961_v45, %v5963_v33  ;;  %v5972_v8 = vsel %vm11454_vm7, %v5963_v33, %v5965_v23  ;;  %vm11466_vm1 = vmmov %vm11437_vm0  ;;  %v6511_v45 = vunpack.c.l.bf16 %v10367_v5 }
 0xce0   :  { %7443 = vmatpush.msk.msra.mxu1 %vm1843_vm9, %v5970_v15  ;;  %7445 = vmatpush.msk.msra.mxu3 %vm1843_vm9, %v5971_v1  ;;  %vm11467_vm2 = vmmov %vm11437_vm0  ;;  %v6503_v2 = vunpack.c.l.bf16 %v10393_v60  ;;  %v10400_v15 = vld [vmem:[#allocation8 + $0x3a0] sm:$0xff]  ;;  %v10402_v1 = vld [vmem:[#allocation8 + $0xb0] sm:$0xff] }
 0xce1   :  { %7447 = vmatpush.msk.msrb.mxu0 %vm1843_vm9, %v5972_v8  ;;  %7433 = vmatmul.msk.f32.vlgmr.msrb.gmra.mxu2 %vm11455_vm8, %v7431_v12  ;;  %vm11468_vm7 = vmmov %vm11464_vm6  ;;  %11481 = vst [vmem:[#allocation30_spill] sm:$0xff] %v10400_v15  ;;  %v10404_v8 = vld [vmem:[#allocation8 + $0x190] sm:$0xff] }
 0xce2   :  { %7435 = vmatmul.msk.f32.vlgmr.msrb.gmra.mxu1 %vm11456_vm3, %v7431_v12  ;;  %7437 = vmatmul.msk.f32.vlgmr.msrb.gmra.mxu3 %vm11457_vm5, %v7431_v12  ;;  %vm11469_vm8 = vmmov %vm11464_vm6 }
 0xce3   :  { %vm11470_vm3 = vmmov %vm11464_vm6 }
 0xce4   :  { %7448 = vmatmul.msk.f32.vlgmr.msrb.gmra.mxu0 %vm11458_vm10, %v7442_v43  ;;  %v6102_v34 = vpop.permute.xlu2 %6101  ;;  %vm11471_vm5 = vmmov %vm11437_vm0 }
 0xce5   :  { %vm11472_vm10 = vmmov %vm11437_vm0 }
 0xce6   :  { %v5832_v17 = vpop.permute.xlu1 %5831  ;;  %v5967_v55 = vpop.permute.xlu0 %5966 }
 0xce7   :  { %v5837_v47 = vsel %vm11459_vm11, %v5830_v16, %v5832_v17  ;;  %v5973_v21 = vsel %vm11460_vm12, %v5965_v23, %v5967_v55  ;;  %vm11473_vm11 = vmmov %vm11437_vm0  ;;  %v10388_v16 = vld [vmem:[#allocation8 + $0x3b0] sm:$0xff]  ;;  %v6447_v23 = vunpack.c.l.bf16 %v10391_v7  ;;  %v6631_v17 = vunpack.c.l.bf16 %v10400_v15 }
 0xce8   :  { %7440 = vmatpush.msk.msra.mxu2 %vm1843_vm9, %v5837_v47  ;;  %vm11474_vm12 = vmmov %vm11470_vm3  ;;  %11480 = vst [vmem:[#allocation29_spill] sm:$0xff] %v10388_v16  ;;  %v6635_v52 = vunpack.c.l.bf16 %v10388_v16  ;;  %v6499_v47 = vunpack.c.l.bf16 %v10404_v8  ;;  %v10514_v16 = vld [vmem:[#allocation8 + $0x320] sm:$0xff] }
 0xce9   :  { %7441 = vmatmul.msk.f32.vlgmr.msra.gmra.mxu2 %vm11461_vm4, %v7431_v12  ;;  %vm11475_vm4 = vmmov %vm11437_vm0  ;;  %v10395_v12 = vld [vmem:[#allocation8 + $0x2d0] sm:$0xff]  ;;  %11496 = vst [vmem:[#allocation33_spill] sm:$0xff] %v10514_v16 }
 0xcea   :  { %7444 = vmatmul.msk.f32.vlgmr.msra.gmra.mxu1 %vm11462_vm13, %v7442_v43  ;;  %7446 = vmatmul.msk.f32.vlgmr.msra.gmra.mxu3 %vm11463_vm14, %v7442_v43  ;;  %v6579_v33 = vunpack.c.l.bf16 %v10395_v12 }
 0xceb   :  { %7449 = vmatpush.msk.msrb.mxu2 %vm1843_vm9, %v5973_v21  ;;  %v10411_v21 = vld [vmem:[#allocation8 + $0x2c0] sm:$0xff] }
 0xcec   :  { %v5140_v20 = vpop.permute.xlu2 %5139 }
 0xcee   :  { %v6096_v9 = vpop.permute.xlu1 %6095  ;;  %v5969_v58 = vpop.permute.xlu0 %5968 }
 0xcef   :  { %v6107_v30 = vsel %vm11464_vm6, %v6096_v9, %v6098_v13  ;;  %v5974_v25 = vsel %vm11465_vm15, %v5967_v55, %v5969_v58  ;;  %v6443_v55 = vunpack.c.l.bf16 %v10402_v1  ;;  %v6575_v58 = vunpack.c.l.bf16 %v10411_v21 }
 0xcf0   :  { %7451 = vmatpush.msk.msrb.mxu1 %vm1843_vm9, %v5974_v25  ;;  %7454 = vmatpush.msk.msrb.mxu3 %vm1843_vm9, %v6107_v30  ;;  %v10419_v25 = vld [vmem:[#allocation8 + $0xa0] sm:$0xff] }
 0xcf1   :  { %7450 = vmatmul.msk.f32.vlgmr.msrb.gmra.mxu2 %vm11437_vm0, %v7442_v43 }
 0xcf2   :  { %7452 = vmatmul.msk.f32.vlgmr.msrb.gmra.mxu1 %vm11466_vm1, %v7442_v43  ;;  %7455 = vmatmul.msk.f32.vlgmr.msrb.gmra.mxu3 %vm11467_vm2, %v7453_v24  ;;  %v10406_v43 = vperm.slane %v5140_v20, 0  ;;  %v10453_v20 = vld [vmem:[#allocation8 + $0x290] sm:$0xff]  ;;  %vm11525_vm1 = vcmask 801792  }
 0xcf3   :  { %vm11538_vm2 = vmmov %vm11525_vm1 }
 0xcf6   :  { %v6100_v39 = vpop.permute.xlu1 %6099  ;;  %v6104_v57 = vpop.permute.xlu0 %6103 }
 0xcf7   :  { %v6108_v32 = vsel %vm11468_vm7, %v6098_v13, %v6100_v39  ;;  %v6109_v6 = vsel %vm11469_vm8, %v6100_v39, %v6102_v34  ;;  %v6110_v62 = vsel %vm11470_vm3, %v6102_v34, %v6104_v57  ;;  %v10413_v13 = vld [vmem:[#allocation8 + $0x390] sm:$0xff]  ;;  %v6439_v39 = vunpack.c.l.bf16 %v10419_v25  ;;  %vm11550_vm7 = vmmov %vm11525_vm1 }
 0xcf8   :  { %7456 = vmatpush.msk.msra.mxu0 %vm1843_vm9, %v6108_v32  ;;  %7458 = vmatpush.msk.msra.mxu2 %vm1843_vm9, %v6109_v6  ;;  %11482 = vst [vmem:[#allocation31_spill] sm:$0xff] %v10413_v13  ;;  %v6627_v30 = vunpack.c.l.bf16 %v10413_v13  ;;  %v10423_v34 = vld [vmem:[#allocation8 + $0x2b0] sm:$0xff]  ;;  %v10428_v6 = vld [vmem:[#allocation8 + $0x380] sm:$0xff]  ;;  %vm11567_vm8 = vmmov %vm11525_vm1  ;;  %vm7129_vm3 = vcmask 1040384  }
 0xcf9   :  { %7460 = vmatpush.msk.msra.mxu1 %vm1843_vm9, %v6110_v62  ;;  %7457 = vmatmul.msk.f32.vlgmr.msra.gmra.mxu0 %vm11471_vm5, %v7453_v24  ;;  %v6571_v32 = vunpack.c.l.bf16 %v10423_v34  ;;  %11484 = vst [vmem:[#allocation16_spill] sm:$0xff] %v10428_v6  ;;  %v10430_v62 = vpop.f32.mrf.mxu3  ;;  %v10509_v13 = vld [vmem:[#allocation8 + $0x250] sm:$0xff]  ;;  %vm7131_vm5 = vcmask 1042434  }
 0xcfa   :  { %7459 = vmatmul.msk.f32.vlgmr.msra.gmra.mxu2 %vm11472_vm10, %v7453_v24  ;;  %7461 = vmatmul.msk.f32.vlgmr.msra.gmra.mxu1 %vm11473_vm11, %v7453_v24  ;;  %11485 = vst [vmem:[#allocation17_spill] sm:$0xff] %v10430_v62  ;;  %v6547_v15 = vunpack.c.l.bf16 %v10509_v13 }
 0xcfb   :  { %6742 = vmatpush.msrb.mxu2 %v6523_v10  ;;  %6722 = vmatpush.msrb.mxu0 %v6459_v18  ;;  %v10435_v10 = vld [vmem:[#allocation8 + $0x90] sm:$0xff] }
 0xcfc   :  { %6762 = vmatpush.msrb.mxu1 %v6587_v59  ;;  %v6435_v18 = vunpack.c.l.bf16 %v10435_v10  ;;  %v10449_v59 = vld [vmem:[#allocation8 + $0x80] sm:$0xff] }
 0xcfd   :  { %6743 = vmatpush.msrb.mxu2 %v6519_v22  ;;  %6723 = vmatpush.msrb.mxu0 %v6455_v49  ;;  %v10439_v22 = vld [vmem:[#allocation8 + $0x2a0] sm:$0xff] }
 0xcfe   :  { %v6106_v56 = vpop.permute.xlu1 %6105  ;;  %6763 = vmatpush.msrb.mxu1 %v6583_v3 }
 0xcff   :  { %v6111_v31 = vsel %vm11474_vm12, %v6104_v57, %v6106_v56  ;;  %6744 = vmatpush.msrb.mxu2 %v6515_v26  ;;  %6724 = vmatpush.msrb.mxu0 %v6451_v29  ;;  %v5145_v56 = vadd.f32 %v10406_v43, %v10338_v44  ;;  %v10444_v44 = vld [vmem:[#allocation8 + $0x370] sm:$0xff] }
 0xd00   :  { %7462 = vmatpush.msk.msra.mxu3 %vm1843_vm9, %v6111_v31  ;;  %6764 = vmatpush.msrb.mxu1 %v6579_v33  ;;  %v6623_v31 = vunpack.c.l.bf16 %v10428_v6  ;;  %11486 = vst [vmem:[#allocation13_spill] sm:$0xff] %v10444_v44  ;;  %v10464_v33 = vld [vmem:[#allocation8 + $0x150] sm:$0xff]  ;;  %v10507_v6 = vld [vmem:[#allocation8 + $0x120] sm:$0xff] }
 0xd01   :  { %7463 = vmatmul.msk.f32.vlgmr.msra.gmra.mxu3 %vm11475_vm4, %v7453_v24  ;;  %6745 = vmatpush.msrb.mxu2 %v6511_v45  ;;  %v10421_v24 = vld [vmem:[#allocation8 + $0x180] sm:$0xff]  ;;  %v6619_v45 = vunpack.c.l.bf16 %v10444_v44 }
 0xd02   :  { %6782 = vmatpush.msrb.mxu3 %v6651_v4  ;;  %6725 = vmatpush.msrb.mxu0 %v6447_v23  ;;  %v6495_v57 = vunpack.c.l.bf16 %v10421_v24  ;;  %v10437_v4 = vld [vmem:[#allocation8 + $0x170] sm:$0xff]  ;;  %v10460_v23 = vld [vmem:[#allocation8 + $0x360] sm:$0xff] }
 0xd03   :  { %6746 = vmatpush.msrb.mxu2 %v6507_v46  ;;  %6765 = vmatpush.msrb.mxu1 %v6575_v58  ;;  %v6491_v26 = vunpack.c.l.bf16 %v10437_v4  ;;  %v6431_v46 = vunpack.c.l.bf16 %v10449_v59  ;;  %11489 = vst [vmem:[#allocation21_spill] sm:$0xff] %v10460_v23  ;;  %v10469_v58 = vld [vmem:[#allocation8 + $0x280] sm:$0xff] }
 0xd04   :  { %6783 = vmatpush.msrb.mxu3 %v6647_v53  ;;  %6726 = vmatpush.msrb.mxu0 %v6443_v55 }
 0xd05   :  { %6747 = vmatpush.msrb.mxu2 %v6503_v2  ;;  %6766 = vmatpush.msrb.mxu1 %v6571_v32  ;;  %v10462_v2 = vld [vmem:[#allocation8 + $0x70] sm:$0xff] }
 0xd06   :  { %6784 = vmatpush.msrb.mxu3 %v6643_v63  ;;  %6727 = vmatpush.msrb.mxu0 %v6439_v39  ;;  %v6567_v63 = vunpack.c.l.bf16 %v10439_v22  ;;  %v6427_v55 = vunpack.c.l.bf16 %v10462_v2 }
 0xd07   :  { %6748 = vmatpush.msrb.mxu2 %v6499_v47  ;;  %v6483_v47 = vunpack.c.l.bf16 %v10464_v33 }
 0xd08   :  { %6785 = vmatpush.msrb.mxu3 %v6639_v11  ;;  %v10451_v11 = vld [vmem:[#allocation8 + $0x160] sm:$0xff]  ;;  %6728 = vmatpush.msrb.mxu0 %v6435_v18 }
 0xd09   :  { %6749 = vmatpush.msrb.mxu2 %v6495_v57  ;;  %v6487_v3 = vunpack.c.l.bf16 %v10451_v11  ;;  %6767 = vmatpush.msrb.mxu1 %v6567_v63  ;;  %v6559_v57 = vunpack.c.l.bf16 %v10469_v58 }
 0xd0a   :  { %6786 = vmatpush.msrb.mxu3 %v6635_v52  ;;  %v6563_v52 = vunpack.c.l.bf16 %v10453_v20  ;;  %6729 = vmatpush.msrb.mxu0 %v6431_v46 }
 0xd0b   :  { %6750 = vmatpush.msrb.mxu2 %v6491_v26 }
 0xd0c   :  { %6787 = vmatpush.msrb.mxu3 %v6631_v17  ;;  %v6615_v17 = vunpack.c.l.bf16 %v10460_v23  ;;  %6768 = vmatpush.msrb.mxu1 %v6563_v52  ;;  %v10491_v52 = vld [vmem:[#allocation8 + $0x50] sm:$0xff] }
 0xd0d   :  { %6751 = vmatpush.msrb.mxu2 %v6487_v3  ;;  %6730 = vmatpush.msrb.mxu0 %v6427_v55  ;;  %v10495_v55 = vld [vmem:[#allocation8 + $0x260] sm:$0xff] }
 0xd0e   :  { %6788 = vmatpush.msrb.mxu3 %v6627_v30  ;;  %v10471_v30 = vld [vmem:[#allocation8 + $0x350] sm:$0xff]  ;;  %6769 = vmatpush.msrb.mxu1 %v6559_v57  ;;  %v6551_v44 = vunpack.c.l.bf16 %v10495_v55 }
 0xd0f   :  { %11490 = vst [vmem:[#allocation20_spill] sm:$0xff] %v10471_v30  ;;  %v6611_v32 = vunpack.c.l.bf16 %v10471_v30  ;;  %6752 = vmatpush.msrb.mxu2 %v6483_v47  ;;  %v6419_v30 = vunpack.c.l.bf16 %v10491_v52  ;;  %v10502_v57 = vld [vmem:[#allocation8 + $0x330] sm:$0xff] }
 0xd10   :  { %6789 = vmatpush.msrb.mxu3 %v6623_v31  ;;  %v10479_v31 = vld [vmem:[#allocation8 + $0x140] sm:$0xff]  ;;  %11495 = vst [vmem:[#allocation32_spill] sm:$0xff] %v10502_v57 }
 0xd11   :  { %v6479_v26 = vunpack.c.l.bf16 %v10479_v31 }
 0xd12   :  { %6790 = vmatpush.msrb.mxu3 %v6619_v45  ;;  %v10486_v45 = vld [vmem:[#allocation8 + $0x340] sm:$0xff] }
 0xd13   :  { %11492 = vst [vmem:[#allocation22_spill] sm:$0xff] %v10486_v45  ;;  %v6607_v3 = vunpack.c.l.bf16 %v10486_v45  ;;  %6753 = vmatpush.msrb.mxu2 %v6479_v26  ;;  %v10505_v45 = vld [vmem:[#allocation8 + $0x40] sm:$0xff]  ;;  %v6471_v26 = vunpack.c.l.bf16 %v10507_v6 }
 0xd14   :  { %6791 = vmatpush.msrb.mxu3 %v6615_v17  ;;  %v10493_v17 = vld [vmem:[#allocation8 + $0x130] sm:$0xff] }
 0xd15   :  { %v6475_v23 = vunpack.c.l.bf16 %v10493_v17 }
 0xd16   :  { %v10350_v36 = vpop.f32.mrf.mxu0  ;;  %6792 = vmatpush.msrb.mxu3 %v6611_v32  ;;  %v6603_v32 = vunpack.c.l.bf16 %v10502_v57  ;;  %v6599_v57 = vunpack.c.l.bf16 %v10514_v16  ;;  %v10535_v16 = vld [vmem:[#allocation8 + $0x230] sm:$0xff] }
 0xd17   :  { %6754 = vmatpush.msrb.mxu2 %v6475_v23 }
 0xd18   :  { %6793 = vmatpush.msrb.mxu3 %v6607_v3  ;;  %v10518_v3 = vld [vmem:[#allocation8 + $0x110] sm:$0xff] }
 0xd19   :  { %v6467_v23 = vunpack.c.l.bf16 %v10518_v3  ;;  %6755 = vmatpush.msrb.mxu2 %v6471_v26  ;;  %v6539_v26 = vunpack.c.l.bf16 %v10535_v16 }
 0xd1a   :  { %6794 = vmatpush.msrb.mxu3 %v6603_v32  ;;  %v10533_v32 = vld [vmem:[#allocation8 + $0x100] sm:$0xff] }
 0xd1b   :  { %6756 = vmatpush.msrb.mxu2 %v6467_v23  ;;  %v10551_v23 = vld [vmem:[#allocation8 + $0x220] sm:$0xff] }
 0xd1c   :  { %v10455_v29 = vpop.f32.mrf.mxu2  ;;  %6795 = vmatpush.msrb.mxu3 %v6599_v57 }
 0xd1d   :  { %11488 = vst [vmem:[#allocation24_spill] sm:$0xff] %v10455_v29  ;;  %v6576_v29 = vunpack.c.h.bf16 %v10411_v21 }
 0xd1e   :  { %v10415_v9 = vpop.f32.mrf.mxu0 }
 0xd1f   :  { %11483 = vst [vmem:[#allocation19_spill] sm:$0xff] %v10415_v9  ;;  %v6595_v9 = vunpack.c.l.bf16 %v10525_v48  ;;  %v6460_v48 = vunpack.c.h.bf16 %v10354_v38  ;;  %v6584_v38 = vunpack.c.h.bf16 %v10381_v50  ;;  %v6580_v50 = vunpack.c.h.bf16 %v10395_v12  ;;  %v10582_v12 = vld [vmem:[#allocation8 + $0x4a0] sm:$0xff] }
 0xd21   :  { %6796 = vmatpush.msrb.mxu3 %v6595_v9  ;;  %v10559_v9 = vld [vmem:[#allocation8] sm:$0xff] }
 0xd24   :  { %v10527_v0 = vpop.f32.mrf.mxu2 }
 0xd25   :  { %11498 = vst [vmem:[#allocation35_spill] sm:$0xff] %v10527_v0 }
 0xd2e   :  { %v5234_v53 = vpop.f32.mrf.mxu1 }
 0xd2f   :  { %v10446_v49 = vadd.f32 %v5234_v53, %v5145_v56  ;;  %v10477_v56 = vld [vmem:[#allocation8 + $0x60] sm:$0xff]  ;;  %v10481_v53 = vld [vmem:[#allocation8 + $0x270] sm:$0xff] }
 0xd30   :  { %v10473_v39 = vpop.f32.mrf.mxu0  ;;  %v6423_v18 = vunpack.c.l.bf16 %v10477_v56  ;;  %v6555_v63 = vunpack.c.l.bf16 %v10481_v53 }
 0xd31   :  { %11487 = vst [vmem:[#allocation18_spill] sm:$0xff] %v10446_v49 }
 0xd32   :  { %11491 = vst [vmem:[#allocation15_spill] sm:$0xff] %v10473_v39  ;;  %6731 = vmatpush.msrb.mxu0 %v6423_v18  ;;  %6770 = vmatpush.msrb.mxu1 %v6555_v63  ;;  %v6415_v18 = vunpack.c.l.bf16 %v10505_v45  ;;  %v10516_v63 = vld [vmem:[#allocation8 + $0x30] sm:$0xff]  ;;  %v10542_v39 = vld [vmem:[#allocation8 + $0x300] sm:$0xff] }
 0xd33   :  { %v6411_v51 = vunpack.c.l.bf16 %v10516_v63  ;;  %11500 = vst [vmem:[#allocation37_spill] sm:$0xff] %v10542_v39  ;;  %v6591_v57 = vunpack.c.l.bf16 %v10542_v39  ;;  %v6399_v39 = vunpack.c.l.bf16 %v10559_v9 }
 0xd34   :  { %6732 = vmatpush.msrb.mxu0 %v6419_v30  ;;  %6771 = vmatpush.msrb.mxu1 %v6551_v44  ;;  %v10523_v30 = vld [vmem:[#allocation8 + $0x240] sm:$0xff] }
 0xd35   :  { %v10488_v46 = vpop.f32.mrf.mxu3  ;;  %v6543_v54 = vunpack.c.l.bf16 %v10523_v30  ;;  %v10531_v44 = vld [vmem:[#allocation8 + $0x20] sm:$0xff]  ;;  %6797 = vmatpush.msrb.mxu3 %v6591_v57  ;;  %v10570_v57 = vld [vmem:[#allocation8 + $0x4b0] sm:$0xff] }
 0xd36   :  { %11493 = vst [vmem:[#allocation14_spill] sm:$0xff] %v10488_v46  ;;  %v10497_v47 = vpop.f32.mrf.mxu1  ;;  %6733 = vmatpush.msrb.mxu0 %v6415_v18  ;;  %6772 = vmatpush.msrb.mxu1 %v6547_v15  ;;  %v6407_v49 = vunpack.c.l.bf16 %v10531_v44  ;;  %v6463_v18 = vunpack.c.l.bf16 %v10533_v32  ;;  %v6448_v46 = vunpack.c.h.bf16 %v10391_v7  ;;  %v6444_v7 = vunpack.c.h.bf16 %v10402_v1 }
 0xd37   :  { %11494 = vst [vmem:[#allocation23_spill] sm:$0xff] %v10497_v47  ;;  %v6516_v1 = vunpack.c.h.bf16 %v10356_v19 }
 0xd38   :  { %v10537_v62 = vpop.f32.mrf.mxu0  ;;  %6734 = vmatpush.msrb.mxu0 %v6411_v51  ;;  %6773 = vmatpush.msrb.mxu1 %v6543_v54  ;;  %v10549_v51 = vld [vmem:[#allocation8 + $0x10] sm:$0xff]  ;;  %v6456_v54 = vunpack.c.h.bf16 %v10365_v37 }
 0xd39   :  { %11499 = vst [vmem:[#allocation36_spill] sm:$0xff] %v10537_v62  ;;  %v6588_v62 = vunpack.c.h.bf16 %v10369_v28  ;;  %6757 = vmatpush.msrb.mxu2 %v6463_v18  ;;  %v6403_v0 = vunpack.c.l.bf16 %v10549_v51  ;;  %v10561_v28 = vld [vmem:[#allocation8 + $0x210] sm:$0xff]  ;;  %v10565_v18 = vld [vmem:[#allocation8 + $0x4c0] sm:$0x11] }
 0xd3a   :  { %6735 = vmatpush.msrb.mxu0 %v6407_v49  ;;  %6774 = vmatpush.msrb.mxu1 %v6539_v26  ;;  %v6531_v49 = vunpack.c.l.bf16 %v10561_v28  ;;  %v10568_v26 = vld [vmem:[#allocation8 + $0x200] sm:$0xff]  ;;  %v6703_v37 = vunpack.c.l.bf16 %v10565_v18 }
 0xd3b   :  { %6822 = vmatpush.msra.mxu2 %v6460_v48  ;;  %6862 = vmatpush.msra.mxu3 %v6588_v62  ;;  %v6527_v48 = vunpack.c.l.bf16 %v10568_v26  ;;  %v6699_v62 = vunpack.c.l.bf16 %v10570_v57 }
 0xd3c   :  { %6736 = vmatpush.msrb.mxu0 %v6403_v0  ;;  %v10579_v0 = vpop.f32.mrf.mxu2 }
 0xd3d   :  { %v10544_v15 = vpop.f32.mrf.mxu3  ;;  %6823 = vmatpush.msra.mxu2 %v6456_v54  ;;  %6863 = vmatpush.msra.mxu3 %v6584_v38  ;;  %v6695_v54 = vunpack.c.l.bf16 %v10582_v12 }
 0xd3e   :  { %11501 = vst [vmem:[#allocation38_spill] sm:$0xff] %v10544_v15  ;;  %v10553_v47 = vpop.f32.mrf.mxu1  ;;  %v6535_v15 = vunpack.c.l.bf16 %v10551_v23  ;;  %6737 = vmatpush.msrb.mxu0 %v6399_v39  ;;  %v6520_v39 = vunpack.c.h.bf16 %v10346_v41  ;;  %v6568_v41 = vunpack.c.h.bf16 %v10439_v22  ;;  %v6432_v22 = vunpack.c.h.bf16 %v10449_v59 }
 0xd3f   :  { %11502 = vst [vmem:[#allocation39_spill] sm:$0xff] %v10553_v47  ;;  %v6452_v47 = vunpack.c.h.bf16 %v10377_v27  ;;  %v6524_v27 = vunpack.c.h.bf16 %v10340_v35  ;;  %6864 = vmatpush.msra.mxu3 %v6580_v50  ;;  %v6572_v35 = vunpack.c.h.bf16 %v10423_v34  ;;  %v10600_v34 = vld [vmem:[#allocation8 + $0x480] sm:$0xff]  ;;  %v6436_v50 = vunpack.c.h.bf16 %v10435_v10 }
 0xd40   :  { %6775 = vmatpush.msrb.mxu1 %v6535_v15  ;;  %7464 = vmatpush.msk.msra.mxu0 %vm1843_vm9, %v6703_v37  ;;  %v10592_v38 = vpop.f32.mrf.mxu0  ;;  %v6440_v37 = vunpack.c.h.bf16 %v10419_v25  ;;  %v6564_v25 = vunpack.c.h.bf16 %v10453_v20  ;;  %v6508_v10 = vunpack.c.h.bf16 %v10379_v14  ;;  %v6428_v59 = vunpack.c.h.bf16 %v10462_v2 }
 0xd41   :  { %6824 = vmatpush.msra.mxu2 %v6452_v47  ;;  %v10594_v47 = vld [vmem:[#allocation8 + $0x490] sm:$0xff]  ;;  %6865 = vmatpush.msra.mxu3 %v6576_v29  ;;  %v6687_v29 = vunpack.c.l.bf16 %v10600_v34  ;;  %v6556_v14 = vunpack.c.h.bf16 %v10481_v53  ;;  %v6552_v2 = vunpack.c.h.bf16 %v10495_v55  ;;  %v6420_v53 = vunpack.c.h.bf16 %v10491_v52 }
 0xd42   :  { %6776 = vmatpush.msrb.mxu1 %v6531_v49  ;;  %6806 = vmatpush.msra.mxu0 %v6699_v62  ;;  %v6691_v49 = vunpack.c.l.bf16 %v10594_v47  ;;  %v6560_v62 = vunpack.c.h.bf16 %v10469_v58  ;;  %v10622_v58 = vld [vmem:[#allocation8 + $0x450] sm:$0xff]  ;;  %v6492_v52 = vunpack.c.h.bf16 %v10437_v4  ;;  %v6540_v4 = vunpack.c.h.bf16 %v10535_v16 }
 0xd43   :  { %6825 = vmatpush.msra.mxu2 %v6448_v46  ;;  %6866 = vmatpush.msra.mxu3 %v6572_v35  ;;  %v6512_v46 = vunpack.c.h.bf16 %v10367_v5  ;;  %v6675_v35 = vunpack.c.l.bf16 %v10622_v58 }
 0xd44   :  { %6777 = vmatpush.msrb.mxu1 %v6527_v48  ;;  %6807 = vmatpush.msra.mxu0 %v6695_v54  ;;  %v10603_v48 = vld [vmem:[#allocation8 + $0x470] sm:$0xff]  ;;  %v10614_v54 = vld [vmem:[#allocation8 + $0x460] sm:$0xff] }
 0xd45   :  { %v10584_v15 = vpop.f32.mrf.mxu3  ;;  %6826 = vmatpush.msra.mxu2 %v6444_v7  ;;  %v6683_v19 = vunpack.c.l.bf16 %v10603_v48  ;;  %6867 = vmatpush.msra.mxu3 %v6568_v41  ;;  %v6679_v20 = vunpack.c.l.bf16 %v10614_v54  ;;  %v6504_v7 = vunpack.c.h.bf16 %v10393_v60  ;;  %v10632_v60 = vld [vmem:[#allocation8 + $0x440] sm:$0xff]  ;;  %v10635_v41 = vld [vmem:[#allocation8 + $0x430] sm:$0xff] }
 0xd46   :  { %v10590_v21 = vpop.f32.mrf.mxu1  ;;  %6842 = vmatpush.msra.mxu1 %v6524_v27  ;;  %6808 = vmatpush.msra.mxu0 %v6691_v49  ;;  %v10612_v27 = vpop.f32.mrf.mxu2  ;;  %v6424_v49 = vunpack.c.h.bf16 %v10477_v56  ;;  %v6496_v56 = vunpack.c.h.bf16 %v10421_v24  ;;  %v6667_v55 = vunpack.c.l.bf16 %v10635_v41 }
 0xd47   :  { %6827 = vmatpush.msra.mxu2 %v6440_v37  ;;  %6868 = vmatpush.msra.mxu3 %v6564_v25  ;;  %v6500_v37 = vunpack.c.h.bf16 %v10404_v8  ;;  %v6548_v8 = vunpack.c.h.bf16 %v10509_v13 }
 0xd48   :  { %6843 = vmatpush.msra.mxu1 %v6520_v39  ;;  %6809 = vmatpush.msra.mxu0 %v6687_v29  ;;  %v6416_v29 = vunpack.c.h.bf16 %v10505_v45  ;;  %v6412_v45 = vunpack.c.h.bf16 %v10516_v63  ;;  %v6536_v63 = vunpack.c.h.bf16 %v10551_v23  ;;  %v6528_v23 = vunpack.c.h.bf16 %v10568_v26 }
 0xd49   :  { %6828 = vmatpush.msra.mxu2 %v6436_v50  ;;  %6869 = vmatpush.msra.mxu3 %v6560_v62  ;;  %v6671_v50 = vunpack.c.l.bf16 %v10632_v60  ;;  %v5146_v26 = vadd.f32 %v10406_v43, %v10383_v61  ;;  %v11507_v61 = vld [vmem:[#allocation39_spill] sm:$0xff] }
 0xd4a   :  { %6844 = vmatpush.msra.mxu1 %v6516_v1  ;;  %6810 = vmatpush.msra.mxu0 %v6683_v19  ;;  %v10630_v1 = vpop.f32.mrf.mxu0  ;;  %v10646_v19 = vld [vmem:[#allocation8 + $0x420] sm:$0xff] }
 0xd4b   :  { %6829 = vmatpush.msra.mxu2 %v6432_v22  ;;  %6870 = vmatpush.msra.mxu3 %v6556_v14  ;;  %v6663_v13 = vunpack.c.l.bf16 %v10646_v19  ;;  %v6488_v22 = vunpack.c.h.bf16 %v10451_v11  ;;  %v10662_v11 = vld [vmem:[#allocation8 + $0x400] sm:$0xff]  ;;  %v6480_v14 = vunpack.c.h.bf16 %v10479_v31  ;;  %v6472_v31 = vunpack.c.h.bf16 %v10507_v6 }
 0xd4c   :  { %6845 = vmatpush.msra.mxu1 %v6512_v46  ;;  %6811 = vmatpush.msra.mxu0 %v6679_v20  ;;  %v6544_v46 = vunpack.c.h.bf16 %v10523_v30  ;;  %v10654_v30 = vld [vmem:[#allocation8 + $0x410] sm:$0xff]  ;;  %v6408_v20 = vunpack.c.h.bf16 %v10531_v44  ;;  %v6655_v16 = vunpack.c.l.bf16 %v10662_v11  ;;  %v6476_v44 = vunpack.c.h.bf16 %v10493_v17 }
 0xd4d   :  { %v10616_v5 = vpop.f32.mrf.mxu3  ;;  %6830 = vmatpush.msra.mxu2 %v6428_v59  ;;  %6871 = vmatpush.msra.mxu3 %v6552_v2  ;;  %v6659_v62 = vunpack.c.l.bf16 %v10654_v30  ;;  %v6484_v59 = vunpack.c.h.bf16 %v10464_v33  ;;  %v6400_v33 = vunpack.c.h.bf16 %v10559_v9  ;;  %v6468_v2 = vunpack.c.h.bf16 %v10518_v3  ;;  %v11504_v3 = vld [vmem:[#allocation14_spill] sm:$0xff] }
 0xd4e   :  { %6846 = vmatpush.msra.mxu1 %v6508_v10  ;;  %6812 = vmatpush.msra.mxu0 %v6675_v35  ;;  %v6532_v35 = vunpack.c.h.bf16 %v10561_v28  ;;  %v6464_v9 = vunpack.c.h.bf16 %v10533_v32  ;;  %v5143_v17 = vadd.f32 %v10406_v43, %v10336_v42  ;;  %v11505_v32 = vld [vmem:[#allocation35_spill] sm:$0xff] }
 0xd4f   :  { %v10624_v39 = vpop.f32.mrf.mxu1  ;;  %6831 = vmatpush.msra.mxu2 %v6424_v49  ;;  %6872 = vmatpush.msra.mxu3 %v6548_v8  ;;  %v11503_v8 = vld [vmem:[#allocation24_spill] sm:$0xff]  ;;  %v11506_v42 = vld [vmem:[#allocation23_spill] sm:$0xff] }
 0xd50   :  { %6847 = vmatpush.msra.mxu1 %v6504_v7  ;;  %6813 = vmatpush.msra.mxu0 %v6671_v50  ;;  %v6404_v7 = vunpack.c.h.bf16 %v10549_v51  ;;  %v5277_v6 = vadd.f32 %v10350_v36, %v5143_v17 }
 0xd51   :  { %6832 = vmatpush.msra.mxu2 %v6420_v53  ;;  %6873 = vmatpush.msra.mxu3 %v6544_v46  ;;  %v5144_v53 = vadd.f32 %v10406_v43, %v10363_v40 }
 0xd52   :  { %6848 = vmatpush.msra.mxu1 %v6500_v37  ;;  %6814 = vmatpush.msra.mxu0 %v6667_v55  ;;  %v10668_v49 = vpop.f32.mrf.mxu0  ;;  %v5411_v46 = vadd.f32 %v11505_v32, %v5277_v6 }
 0xd53   :  { %6833 = vmatpush.msra.mxu2 %v6416_v29  ;;  %6874 = vmatpush.msra.mxu3 %v6540_v4  ;;  %v5278_v55 = vadd.f32 %v11503_v8, %v5144_v53  ;;  %v5280_v29 = vadd.f32 %v11504_v3, %v5146_v26  ;;  %v11508_v4 = vld [vmem:[#allocation15_spill] sm:$0xff] }
 0xd54   :  { %v10644_v25 = vpop.f32.mrf.mxu2  ;;  %6849 = vmatpush.msra.mxu1 %v6496_v56  ;;  %6815 = vmatpush.msra.mxu0 %v6663_v13  ;;  %v11513_v53 = vld [vmem:[#allocation19_spill] sm:$0xff] }
 0xd55   :  { %v10648_v24 = vpop.f32.mrf.mxu3  ;;  %6834 = vmatpush.msra.mxu2 %v6412_v45  ;;  %6875 = vmatpush.msra.mxu3 %v6536_v63  ;;  %v5412_v13 = vadd.f32 %v11506_v42, %v5278_v55  ;;  %v5414_v40 = vadd.f32 %v11508_v4, %v5280_v29  ;;  %v11510_v63 = vld [vmem:[#allocation38_spill] sm:$0xff] }
 0xd56   :  { %6850 = vmatpush.msra.mxu1 %v6492_v52  ;;  %6816 = vmatpush.msra.mxu0 %v6659_v62  ;;  %v11515_v4 = vld [vmem:[#allocation26_spill] sm:$0xff] }
 0xd57   :  { %v10656_v10 = vpop.f32.mrf.mxu1  ;;  %6835 = vmatpush.msra.mxu2 %v6408_v20  ;;  %6876 = vmatpush.msra.mxu3 %v6532_v35  ;;  %v5546_v62 = vadd.f32 %v10584_v15, %v5412_v13  ;;  %v5548_v20 = vadd.f32 %v10612_v27, %v5414_v40  ;;  %v11512_v27 = vld [vmem:[#allocation36_spill] sm:$0xff]  ;;  %v6648_v40 = vunpack.c.h.bf16 %v11515_v4 }
 0xd58   :  { %6851 = vmatpush.msra.mxu1 %v6488_v22  ;;  %6817 = vmatpush.msra.mxu0 %v6655_v16  ;;  %v5545_v22 = vadd.f32 %v11507_v61, %v5411_v46 }
 0xd59   :  { %6836 = vmatpush.msra.mxu2 %v6404_v7  ;;  %6877 = vmatpush.msra.mxu3 %v6528_v23  ;;  %v5682_v35 = vadd.f32 %v10624_v39, %v5548_v20 }
 0xd5a   :  { %6852 = vmatpush.msra.mxu1 %v6484_v59  ;;  %v5928_v50 = vpop.f32.mrf.mxu0  ;;  %v5679_v36 = vadd.f32 %v10616_v5, %v5545_v22  ;;  %v11509_v59 = vld [vmem:[#allocation18_spill] sm:$0xff] }
 0xd5b   :  { %6837 = vmatpush.msra.mxu2 %v6400_v33  ;;  %v5413_v16 = vadd.f32 %v11510_v63, %v11509_v59  ;;  %v10724_v63 = vld [vmem:[#allocation8 + $0x1d8] sm:$0xff] }
 0xd5c   :  { %v5750_v37 = vpop.f32.mrf.mxu2  ;;  %6853 = vmatpush.msra.mxu1 %v6480_v14  ;;  %v5680_v14 = vadd.f32 %v10592_v38, %v5546_v62  ;;  %v10715_v62 = vld [vmem:[#allocation8 + $0x1e8] sm:$0xff] }
 0xd5d   :  { %v5790_v51 = vpop.f32.mrf.mxu3  ;;  %v5547_v17 = vadd.f32 %v11512_v27, %v5413_v16  ;;  %v6517_v27 = vunpack.c.l.bf16 %v10724_v63 }
 0xd5e   :  { %6854 = vmatpush.msra.mxu1 %v6476_v44  ;;  %v5813_v44 = vadd.f32 %v10630_v1, %v5679_v36  ;;  %v5816_v5 = vadd.f32 %v5790_v51, %v5682_v35 }
 0xd5f   :  { %v5888_v28 = vpop.f32.mrf.mxu1  ;;  %v5681_v38 = vadd.f32 %v10644_v25, %v5547_v17  ;;  %v11514_v25 = vld [vmem:[#allocation25_spill] sm:$0xff]  ;;  %v10739_v17 = vld [vmem:[#allocation8 + $0x1c8] sm:$0xff] }
 0xd60   :  { %6855 = vmatpush.msra.mxu1 %v6472_v31  ;;  %v11511_v31 = vld [vmem:[#allocation17_spill] sm:$0xff]  ;;  %v5954_v55 = vadd.f32 %v5928_v50, %v5816_v5  ;;  %v6652_v22 = vunpack.c.h.bf16 %v11514_v25  ;;  %v10768_v25 = vld [vmem:[#allocation8 + $0x198] sm:$0xff] }
 0xd61   :  { %v5147_v15 = vadd.f32 %v10406_v43, %v11511_v31  ;;  %v5815_v32 = vadd.f32 %v10656_v10, %v5681_v38  ;;  %v6704_v10 = vunpack.c.h.bf16 %v10565_v18  ;;  %v11517_v18 = vld [vmem:[#allocation27_spill] sm:$0xff] }
 0xd62   :  { %6856 = vmatpush.msra.mxu1 %v6468_v2  ;;  %v6045_v23 = vpop.f32.mrf.mxu0  ;;  %v5814_v2 = vadd.f32 %v5750_v37, %v5680_v14  ;;  %v6644_v35 = vunpack.c.h.bf16 %v11517_v18 }
 0xd63   :  { %v5281_v6 = vadd.f32 %v11513_v53, %v5147_v15  ;;  %v10735_v15 = vld [vmem:[#allocation8 + $0xf8] sm:$0xff] }
 0xd64   :  { %v5868_v56 = vpop.f32.mrf.mxu2  ;;  %6857 = vmatpush.msra.mxu1 %v6464_v9  ;;  %v5952_v8 = vadd.f32 %v5888_v28, %v5814_v2  ;;  %v11518_v2 = vld [vmem:[#allocation28_spill] sm:$0xff]  ;;  %v6461_v38 = vunpack.c.l.bf16 %v10735_v15 }
 0xd65   :  { %v5908_v52 = vpop.f32.mrf.mxu3  ;;  %v5951_v26 = vadd.f32 %v5868_v56, %v5813_v44  ;;  %v5415_v39 = vadd.f32 %v10579_v0, %v5281_v6  ;;  %v10711_v0 = vld [vmem:[#allocation8 + $0x1f8] sm:$0xff]  ;;  %v6640_v5 = vunpack.c.h.bf16 %v11518_v2  ;;  %v10797_v2 = vld [vmem:[#allocation8 + $0x168] sm:$0xff] }
 0xd66   :  { %v5953_v28 = vadd.f32 %v5908_v52, %v5815_v32  ;;  %v6525_v20 = vunpack.c.l.bf16 %v10711_v0  ;;  %v6700_v52 = vunpack.c.h.bf16 %v10570_v57  ;;  %v6696_v57 = vunpack.c.h.bf16 %v10582_v12  ;;  %v11519_v12 = vld [vmem:[#allocation29_spill] sm:$0xff]  ;;  %11526 = vst [vmem:[#allocation14_spill] sm:$0xff] %v10797_v2 }
 0xd67   :  { %v6005_v45 = vpop.f32.mrf.mxu1  ;;  %v5549_v29 = vadd.f32 %v10590_v21, %v5415_v39  ;;  %v6636_v6 = vunpack.c.h.bf16 %v11519_v12  ;;  %v10745_v39 = vld [vmem:[#allocation8 + $0xe8] sm:$0xff] }
 0xd68   :  { %v6088_v1 = vadd.f32 %v6005_v45, %v5951_v26  ;;  %v6090_v16 = vadd.f32 %v6045_v23, %v5953_v28  ;;  %v6692_v26 = vunpack.c.h.bf16 %v10594_v47  ;;  %v11520_v47 = vld [vmem:[#allocation30_spill] sm:$0xff]  ;;  %v11522_v28 = vld [vmem:[#allocation16_spill] sm:$0xff] }
 0xd69   :  { %v5683_v56 = vadd.f32 %v10648_v24, %v5549_v29 }
 0xd6b   :  { %v5817_v44 = vadd.f32 %v10668_v49, %v5683_v56 }
 0xd6c   :  { %v10694_v7 = vpop.f32.mrf.mxu2 }
 0xd6d   :  { %v6025_v33 = vpop.f32.mrf.mxu3  ;;  %v5955_v49 = vadd.f32 %v10694_v7, %v5817_v44  ;;  %v6632_v7 = vunpack.c.h.bf16 %v11520_v47  ;;  %v11524_v44 = vld [vmem:[#allocation21_spill] sm:$0xff]  ;;  %v10810_v47 = vld [vmem:[#allocation8 + $0x78] sm:$0xff] }
 0xd6e   :  { %v6089_v43 = vadd.f32 %v6025_v33, %v5952_v8  ;;  %v6521_v33 = vunpack.c.l.bf16 %v10715_v62  ;;  %v6513_v8 = vunpack.c.l.bf16 %v10739_v17 }
 0xd6f   :  { %v10701_v9 = vpop.f32.mrf.mxu1 }
 0xd70   :  { %v6092_v29 = vadd.f32 %v10701_v9, %v5955_v49 }
 0xd74   :  { %v6065_v3 = vpop.f32.mrf.mxu2 }
 0xd75   :  { %v6091_v37 = vadd.f32 %v6065_v3, %v5954_v55  ;;  %v6142_v51 = vpop.f32.mrf.mxu3  ;;  %v10748_v55 = vld [vmem:[#allocation8 + $0x1b8] sm:$0xff] }
 0xd76   :  { %v6225_v46 = vadd.f32 %v6142_v51, %v6088_v1  ;;  %v6162_v42 = vpop.f32.mrf.mxu0  ;;  %v10753_v3 = vld [vmem:[#allocation8 + $0xd8] sm:$0xff]  ;;  %v10759_v51 = vld [vmem:[#allocation8 + $0x1a8] sm:$0xff] }
 0xd77   :  { %v6226_v13 = vadd.f32 %v6162_v42, %v6089_v43  ;;  %v6202_v61 = vpop.f32.mrf.mxu1  ;;  %v6688_v43 = vunpack.c.h.bf16 %v10600_v34  ;;  %v11521_v42 = vld [vmem:[#allocation31_spill] sm:$0xff]  ;;  %v6453_v34 = vunpack.c.l.bf16 %v10753_v3 }
 0xd78   :  { %vm6230_vm13 = vcmp.ge.f32.partialorder %v6225_v46, 0.0  ;;  %v6235_v50 = vmul.f32 0.01, %v6225_v46  ;;  %v6228_v45 = vadd.f32 %v6202_v61, %v6091_v37  ;;  %v6457_v37 = vunpack.c.l.bf16 %v10745_v39 }
 0xd79   :  { %vm6231_vm14 = vcmp.ge.f32.partialorder %v6226_v13, 0.0  ;;  %v6236_v21 = vmul.f32 0.01, %v6226_v13  ;;  %v6628_v56 = vunpack.c.h.bf16 %v11521_v42  ;;  %v6684_v61 = vunpack.c.h.bf16 %v10603_v48  ;;  %v10775_v48 = vld [vmem:[#allocation8 + $0xb8] sm:$0xff] }
 0xd7a   :  { %v10717_v36 = vsel %vm6230_vm13, %v6225_v46, %v6235_v50  ;;  %vm6233_vm6 = vcmp.ge.f32.partialorder %v6228_v45, 0.0  ;;  %v6238_v24 = vmul.f32 0.01, %v6228_v45  ;;  %v6509_v46 = vunpack.c.l.bf16 %v10748_v55 }
 0xd7b   :  { %v10720_v59 = vsel %vm6231_vm14, %v6226_v13, %v6236_v21  ;;  %6738 = vmatmul.f32.vlgmr.msrb.gmra.mxu0 %v10717_v36  ;;  %v10763_v13 = vld [vmem:[#allocation8 + $0xc8] sm:$0xff]  ;;  %v6624_v50 = vunpack.c.h.bf16 %v11522_v28  ;;  %v6680_v21 = vunpack.c.h.bf16 %v10614_v54  ;;  %v6676_v54 = vunpack.c.h.bf16 %v10622_v58 }
 0xd7c   :  { %11516 = vst [vmem:[#allocation24_spill] sm:$0xff] %v10720_v59  ;;  %v10726_v14 = vsel %vm6233_vm6, %v6228_v45, %v6238_v24  ;;  %6882 = vmatpush.msrb.mxu0 %v6652_v22  ;;  %6758 = vmatmul.f32.vlgmr.msrb.gmra.mxu2 %v10720_v59  ;;  %v6505_v22 = vunpack.c.l.bf16 %v10759_v51  ;;  %v6449_v4 = vunpack.c.l.bf16 %v10763_v13  ;;  %v6445_v18 = vunpack.c.l.bf16 %v10775_v48 }
 0xd7d   :  { %v6182_v31 = vpop.f32.mrf.mxu2  ;;  %6798 = vmatmul.f32.vlgmr.msrb.gmra.mxu3 %v10726_v14  ;;  %7466 = vmatpush.msk.msrb.mxu2 %vm1843_vm9, %v6704_v10  ;;  %v10778_v10 = vld [vmem:[#allocation8 + $0x188] sm:$0xff]  ;;  %v6660_v42 = vunpack.c.h.bf16 %v10654_v30  ;;  %v6656_v28 = vunpack.c.h.bf16 %v10662_v11  ;;  %v10841_v11 = vld [vmem:[#allocation8 + $0x118] sm:$0xff] }
 0xd7e   :  { %v6227_v23 = vadd.f32 %v6182_v31, %v6090_v16  ;;  %6883 = vmatpush.msrb.mxu0 %v6648_v40  ;;  %6942 = vmatpush.msrb.mxu3 %v6525_v20  ;;  %v6501_v40 = vunpack.c.l.bf16 %v10768_v25  ;;  %v11523_v20 = vld [vmem:[#allocation13_spill] sm:$0xff]  ;;  %v10783_v16 = vld [vmem:[#allocation8 + $0xa8] sm:$0xff]  ;;  %v6616_v31 = vunpack.c.h.bf16 %v11524_v44  ;;  %11536 = vst [vmem:[#allocation18_spill] sm:$0xff] %v10841_v11  ;;  %v10845_v44 = vld [vmem:[#allocation8 + $0x3d8] sm:$0xff] }
 0xd7f   :  { %6906 = vmatpush.msrb.mxu2 %v6700_v52  ;;  %v6620_v52 = vunpack.c.h.bf16 %v11523_v20  ;;  %v6441_v58 = vunpack.c.l.bf16 %v10783_v16  ;;  %v10832_v30 = vld [vmem:[#allocation8 + $0x128] sm:$0xff]  ;;  %v11535_v20 = vld [vmem:[#allocation34_spill] sm:$0xff] }
 0xd80   :  { %vm6232_vm15 = vcmp.ge.f32.partialorder %v6227_v23, 0.0  ;;  %v6237_v53 = vmul.f32 0.01, %v6227_v23  ;;  %6884 = vmatpush.msrb.mxu0 %v6644_v35  ;;  %6943 = vmatpush.msrb.mxu3 %v6521_v33  ;;  %v10787_v35 = vld [vmem:[#allocation8 + $0x178] sm:$0xff]  ;;  %v6497_v33 = vunpack.c.l.bf16 %v10778_v10  ;;  %11534 = vst [vmem:[#allocation15_spill] sm:$0xff] %v10832_v30 }
 0xd81   :  { %6907 = vmatpush.msrb.mxu2 %v6696_v57  ;;  %v10791_v57 = vld [vmem:[#allocation8 + $0x98] sm:$0xff] }
 0xd82   :  { %v10750_v1 = vsel %vm6232_vm15, %v6227_v23, %v6237_v53  ;;  %6885 = vmatpush.msrb.mxu0 %v6640_v5  ;;  %6944 = vmatpush.msrb.mxu3 %v6517_v27  ;;  %v6672_v23 = vunpack.c.h.bf16 %v10632_v60  ;;  %v6493_v5 = vunpack.c.l.bf16 %v10787_v35  ;;  %v11527_v27 = vld [vmem:[#allocation20_spill] sm:$0xff]  ;;  %v6668_v53 = vunpack.c.h.bf16 %v10635_v41  ;;  %v10806_v60 = vld [vmem:[#allocation8 + $0x158] sm:$0xff] }
 0xd83   :  { %6778 = vmatmul.f32.vlgmr.msrb.gmra.mxu1 %v10750_v1  ;;  %6908 = vmatpush.msrb.mxu2 %v6692_v26  ;;  %v6612_v49 = vunpack.c.h.bf16 %v11527_v27  ;;  %v10802_v26 = vld [vmem:[#allocation8 + $0x88] sm:$0xff]  ;;  %v6437_v12 = vunpack.c.l.bf16 %v10791_v57  ;;  %11528 = vst [vmem:[#allocation35_spill] sm:$0xff] %v10806_v60  ;;  %v6485_v41 = vunpack.c.l.bf16 %v10806_v60  ;;  %v10851_v27 = vld [vmem:[#allocation8 + $0x38] sm:$0xff] }
 0xd84   :  { %6886 = vmatpush.msrb.mxu0 %v6636_v6  ;;  %6922 = vmatpush.msrb.mxu1 %v6461_v38  ;;  %v6222_v32 = vpop.f32.mrf.mxu3  ;;  %v6489_v6 = vunpack.c.l.bf16 %v10797_v2  ;;  %v11529_v38 = vld [vmem:[#allocation22_spill] sm:$0xff] }
 0xd85   :  { %6945 = vmatpush.msrb.mxu3 %v6513_v8  ;;  %v6229_v9 = vadd.f32 %v6222_v32, %v6092_v29  ;;  %6838 = vmatmul.f32.vlgmr.msra.gmra.mxu2 %v10717_v36  ;;  %v6608_v8 = vunpack.c.h.bf16 %v11529_v38  ;;  %v6433_v29 = vunpack.c.l.bf16 %v10802_v26  ;;  %v6645_v38 = vunpack.c.l.bf16 %v10845_v44  ;;  %v10948_v60 = vld [vmem:[#allocation8 + $0x478] sm:$0xff] }
 0xd86   :  { %6878 = vmatmul.f32.vlgmr.msra.gmra.mxu3 %v10750_v1  ;;  %6887 = vmatpush.msrb.mxu0 %v6632_v7  ;;  %v6664_v7 = vunpack.c.h.bf16 %v10646_v19  ;;  %v10968_v2 = vld [vmem:[#allocation8 + $0x458] sm:$0xff] }
 0xd87   :  { %vm6234_vm0 = vcmp.ge.f32.partialorder %v6229_v9, 0.0  ;;  %v6239_v45 = vmul.f32 0.01, %v6229_v9  ;;  %6909 = vmatpush.msrb.mxu2 %v6688_v43  ;;  %6923 = vmatpush.msrb.mxu1 %v6457_v37  ;;  %v10814_v43 = vld [vmem:[#allocation8 + $0x148] sm:$0xff] }
 0xd88   :  { %6946 = vmatpush.msrb.mxu3 %v6509_v46  ;;  %6888 = vmatpush.msrb.mxu0 %v6628_v56  ;;  %11530 = vst [vmem:[#allocation23_spill] sm:$0xff] %v10814_v43  ;;  %v11531_v37 = vld [vmem:[#allocation32_spill] sm:$0xff]  ;;  %v6429_v56 = vunpack.c.l.bf16 %v10810_v47  ;;  %v6481_v19 = vunpack.c.l.bf16 %v10814_v43 }
 0xd89   :  { %v10780_v24 = vsel %vm6234_vm0, %v6229_v9, %v6239_v45  ;;  %6910 = vmatpush.msrb.mxu2 %v6684_v61  ;;  %6924 = vmatpush.msrb.mxu1 %v6453_v34  ;;  %v6604_v32 = vunpack.c.h.bf16 %v11531_v37  ;;  %v10818_v46 = vld [vmem:[#allocation8 + $0x68] sm:$0xff]  ;;  %v10822_v9 = vld [vmem:[#allocation8 + $0x138] sm:$0xff]  ;;  %v11533_v61 = vld [vmem:[#allocation33_spill] sm:$0xff] }
 0xd8a   :  { %6947 = vmatpush.msrb.mxu3 %v6505_v22  ;;  %6889 = vmatpush.msrb.mxu0 %v6624_v50  ;;  %11532 = vst [vmem:[#allocation39_spill] sm:$0xff] %v10822_v9  ;;  %v6600_v34 = vunpack.c.h.bf16 %v11533_v61  ;;  %v10826_v22 = vld [vmem:[#allocation8 + $0x3f8] sm:$0xff]  ;;  %v6425_v50 = vunpack.c.l.bf16 %v10818_v46  ;;  %v10942_v43 = vld [vmem:[#allocation8 + $0x268] sm:$0xff] }
 0xd8b   :  { %6911 = vmatpush.msrb.mxu2 %v6680_v21  ;;  %6925 = vmatpush.msrb.mxu1 %v6449_v4  ;;  %v10830_v45 = vld [vmem:[#allocation8 + $0x58] sm:$0xff]  ;;  %v6477_v21 = vunpack.c.l.bf16 %v10822_v9  ;;  %v10835_v4 = vld [vmem:[#allocation8 + $0x3e8] sm:$0xff] }
 0xd8c   :  { %6948 = vmatpush.msrb.mxu3 %v6501_v40  ;;  %7465 = vmatmul.msk.f32.vlgmr.msra.gmra.mxu0 %vm11525_vm1, %v10780_v24  ;;  %v6653_v40 = vunpack.c.l.bf16 %v10826_v22  ;;  %v10875_v61 = vld [vmem:[#allocation8 + $0x18] sm:$0xff]  ;;  %v10938_v9 = vld [vmem:[#allocation8 + $0x488] sm:$0xff] }
 0xd8d   :  { %6858 = vmatmul.f32.vlgmr.msra.gmra.mxu1 %v10720_v59  ;;  %6890 = vmatpush.msrb.mxu0 %v6620_v52  ;;  %v6596_v52 = vunpack.c.h.bf16 %v11535_v20 }
 0xd8e   :  { %6912 = vmatpush.msrb.mxu2 %v6676_v54  ;;  %6926 = vmatpush.msrb.mxu1 %v6445_v18  ;;  %v10839_v54 = vld [vmem:[#allocation8 + $0x48] sm:$0xff]  ;;  %v6421_v18 = vunpack.c.l.bf16 %v10830_v45 }
 0xd8f   :  { %6949 = vmatpush.msrb.mxu3 %v6497_v33  ;;  %6891 = vmatpush.msrb.mxu0 %v6616_v31  ;;  %v6473_v33 = vunpack.c.l.bf16 %v10832_v30  ;;  %v6649_v31 = vunpack.c.l.bf16 %v10835_v4  ;;  %v10936_v30 = vld [vmem:[#allocation8 + $0x358] sm:$0xff] }
 0xd90   :  { %6913 = vmatpush.msrb.mxu2 %v6672_v23  ;;  %6927 = vmatpush.msrb.mxu1 %v6441_v58  ;;  %v11537_v23 = vld [vmem:[#allocation37_spill] sm:$0xff]  ;;  %11543 = vst [vmem:[#allocation25_spill] sm:$0xff] %v10936_v30 }
 0xd91   :  { %6950 = vmatpush.msrb.mxu3 %v6493_v5  ;;  %6892 = vmatpush.msrb.mxu0 %v6612_v49  ;;  %v6592_v58 = vunpack.c.h.bf16 %v11537_v23  ;;  %v10849_v5 = vld [vmem:[#allocation8 + $0x2f8] sm:$0xff]  ;;  %v6417_v49 = vunpack.c.l.bf16 %v10839_v54 }
 0xd92   :  { %6914 = vmatpush.msrb.mxu2 %v6668_v53  ;;  %6928 = vmatpush.msrb.mxu1 %v6437_v12  ;;  %v6469_v53 = vunpack.c.l.bf16 %v10841_v11  ;;  %v10857_v12 = vld [vmem:[#allocation8 + $0x108] sm:$0xff]  ;;  %v10932_v11 = vld [vmem:[#allocation8 + $0x278] sm:$0xff] }
 0xd93   :  { %6951 = vmatpush.msrb.mxu3 %v6489_v6  ;;  %6893 = vmatpush.msrb.mxu0 %v6608_v8  ;;  %11539 = vst [vmem:[#allocation38_spill] sm:$0xff] %v10857_v12  ;;  %v10859_v6 = vld [vmem:[#allocation8 + $0x3c8] sm:$0xff]  ;;  %v6465_v37 = vunpack.c.l.bf16 %v10857_v12  ;;  %v10927_v12 = vld [vmem:[#allocation8 + $0x498] sm:$0xff] }
 0xd94   :  { %6915 = vmatpush.msrb.mxu2 %v6664_v7  ;;  %6929 = vmatpush.msrb.mxu1 %v6433_v29  ;;  %v10862_v8 = vld [vmem:[#allocation8 + $0x2e8] sm:$0xff]  ;;  %v6589_v7 = vunpack.c.l.bf16 %v10849_v5  ;;  %v6413_v29 = vunpack.c.l.bf16 %v10851_v27 }
 0xd95   :  { %6952 = vmatpush.msrb.mxu3 %v6485_v41  ;;  %6894 = vmatpush.msrb.mxu0 %v6604_v32  ;;  %v10866_v41 = vld [vmem:[#allocation8 + $0x28] sm:$0xff]  ;;  %v6641_v32 = vunpack.c.l.bf16 %v10859_v6 }
 0xd96   :  { %6916 = vmatpush.msrb.mxu2 %v6660_v42  ;;  %6930 = vmatpush.msrb.mxu1 %v6429_v56  ;;  %v10870_v42 = vld [vmem:[#allocation8 + $0x2d8] sm:$0xff] }
 0xd97   :  { %6953 = vmatpush.msrb.mxu3 %v6481_v19  ;;  %6895 = vmatpush.msrb.mxu0 %v6600_v34  ;;  %v10872_v56 = vld [vmem:[#allocation8 + $0x3b8] sm:$0xff]  ;;  %v6585_v19 = vunpack.c.l.bf16 %v10862_v8  ;;  %v6462_v34 = vunpack.c.h.bf16 %v10735_v15  ;;  %v6405_v15 = vunpack.c.l.bf16 %v10875_v61 }
 0xd98   :  { %6917 = vmatpush.msrb.mxu2 %v6656_v28  ;;  %6931 = vmatpush.msrb.mxu1 %v6425_v50  ;;  %v6409_v28 = vunpack.c.l.bf16 %v10866_v41  ;;  %v10880_v50 = vld [vmem:[#allocation8 + $0x2c8] sm:$0xff]  ;;  %v6637_v20 = vunpack.c.l.bf16 %v10872_v56 }
 0xd99   :  { %6954 = vmatpush.msrb.mxu3 %v6477_v21  ;;  %7467 = vmatmul.msk.f32.vlgmr.msrb.gmra.mxu2 %vm11538_vm2, %v10780_v24  ;;  %v10882_v21 = vld [vmem:[#allocation8 + $0x3a8] sm:$0xff] }
 0xd9a   :  { %6982 = vmatpush.msra.mxu2 %v6653_v40  ;;  %6896 = vmatpush.msrb.mxu0 %v6596_v52  ;;  %v6581_v40 = vunpack.c.l.bf16 %v10870_v42  ;;  %v10886_v52 = vld [vmem:[#allocation8 + $0x8] sm:$0xff]  ;;  %v6633_v23 = vunpack.c.l.bf16 %v10882_v21 }
 0xd9b   :  { %6932 = vmatpush.msrb.mxu1 %v6421_v18  ;;  %6955 = vmatpush.msrb.mxu3 %v6473_v33  ;;  %v6458_v18 = vunpack.c.h.bf16 %v10745_v39  ;;  %v10890_v33 = vld [vmem:[#allocation8 + $0x2b8] sm:$0xff]  ;;  %v6401_v39 = vunpack.c.l.bf16 %v10886_v52 }
 0xd9c   :  { %6983 = vmatpush.msra.mxu2 %v6649_v31  ;;  %6897 = vmatpush.msrb.mxu0 %v6592_v58  ;;  %v6577_v31 = vunpack.c.l.bf16 %v10880_v50  ;;  %v10895_v58 = vld [vmem:[#allocation8 + $0x398] sm:$0xff] }
 0xd9d   :  { %6933 = vmatpush.msrb.mxu1 %v6417_v49  ;;  %6956 = vmatpush.msrb.mxu3 %v6469_v53  ;;  %v10897_v49 = vld [vmem:[#allocation8 + $0x4c8] sm:$0x11]  ;;  %v6454_v53 = vunpack.c.h.bf16 %v10753_v3  ;;  %v6450_v3 = vunpack.c.h.bf16 %v10763_v13 }
 0xd9e   :  { %6898 = vmatmul.f32.vlgmr.msrb.gmra.mxu0 %v10726_v14  ;;  %6984 = vmatpush.msra.mxu2 %v6645_v38  ;;  %v10901_v38 = vld [vmem:[#allocation8 + $0x2a8] sm:$0xff] }
 0xd9f   :  { %6962 = vmatpush.msra.mxu0 %v6589_v7  ;;  %6934 = vmatpush.msrb.mxu1 %v6413_v29  ;;  %v6573_v7 = vunpack.c.l.bf16 %v10890_v33  ;;  %v10904_v29 = vld [vmem:[#allocation8 + $0x388] sm:$0xff] }
 0xda0   :  { %6957 = vmatpush.msrb.mxu3 %v6465_v37  ;;  %6985 = vmatpush.msra.mxu2 %v6641_v32  ;;  %11540 = vst [vmem:[#allocation17_spill] sm:$0xff] %v10904_v29  ;;  %v10906_v37 = vld [vmem:[#allocation8 + $0x4b8] sm:$0xff]  ;;  %v6629_v32 = vunpack.c.l.bf16 %v10895_v58 }
 0xda1   :  { %6958 = vmatmul.f32.vlgmr.msrb.gmra.mxu3 %v10720_v59  ;;  %6963 = vmatpush.msra.mxu0 %v6585_v19  ;;  %v6705_v19 = vunpack.c.l.bf16 %v10897_v49  ;;  %v10920_v59 = vld [vmem:[#allocation8 + $0x288] sm:$0xff] }
 0xda2   :  { %7022 = vmatpush.msra.mxu3 %v6462_v34  ;;  %6935 = vmatpush.msrb.mxu1 %v6409_v28  ;;  %v10910_v34 = vld [vmem:[#allocation8 + $0x298] sm:$0xff]  ;;  %v6569_v28 = vunpack.c.l.bf16 %v10901_v38 }
 0xda3   :  { %6964 = vmatpush.msra.mxu0 %v6581_v40  ;;  %6986 = vmatpush.msra.mxu2 %v6637_v20  ;;  %v10914_v40 = vld [vmem:[#allocation8 + $0x378] sm:$0xff]  ;;  %v10916_v20 = vld [vmem:[#allocation8 + $0x4a8] sm:$0xff]  ;;  %v6565_v13 = vunpack.c.l.bf16 %v10910_v34 }
 0xda4   :  { %7023 = vmatpush.msra.mxu3 %v6458_v18  ;;  %6936 = vmatpush.msrb.mxu1 %v6405_v15  ;;  %11541 = vst [vmem:[#allocation36_spill] sm:$0xff] %v10914_v40  ;;  %v6625_v18 = vunpack.c.l.bf16 %v10904_v29  ;;  %v6701_v15 = vunpack.c.l.bf16 %v10906_v37  ;;  %v10978_v29 = vld [vmem:[#allocation8 + $0x448] sm:$0xff] }
 0xda5   :  { %6965 = vmatpush.msra.mxu0 %v6577_v31  ;;  %6987 = vmatpush.msra.mxu2 %v6633_v23  ;;  %v6446_v31 = vunpack.c.h.bf16 %v10775_v48  ;;  %v10925_v23 = vld [vmem:[#allocation8 + $0x368] sm:$0xff]  ;;  %v6561_v48 = vunpack.c.l.bf16 %v10920_v59 }
 0xda6   :  { %7024 = vmatpush.msra.mxu3 %v6454_v53  ;;  %6937 = vmatpush.msrb.mxu1 %v6401_v39  ;;  %11542 = vst [vmem:[#allocation19_spill] sm:$0xff] %v10925_v23  ;;  %v6621_v53 = vunpack.c.l.bf16 %v10914_v40  ;;  %v6697_v39 = vunpack.c.l.bf16 %v10916_v20  ;;  %v10958_v40 = vld [vmem:[#allocation8 + $0x468] sm:$0xff] }
 0xda7   :  { %6938 = vmatmul.f32.vlgmr.msrb.gmra.mxu1 %v10717_v36  ;;  %6966 = vmatpush.msra.mxu0 %v6573_v7  ;;  %v6442_v7 = vunpack.c.h.bf16 %v10783_v16  ;;  %v6557_v16 = vunpack.c.l.bf16 %v10932_v11 }
 0xda8   :  { %6988 = vmatpush.msra.mxu2 %v6629_v32  ;;  %7468 = vmatpush.msk.msra.mxu1 %vm1843_vm9, %v6705_v19  ;;  %v6617_v32 = vunpack.c.l.bf16 %v10925_v23  ;;  %v6693_v19 = vunpack.c.l.bf16 %v10927_v12  ;;  %v10952_v23 = vld [vmem:[#allocation8 + $0x258] sm:$0xff] }
 0xda9   :  { %7025 = vmatpush.msra.mxu3 %v6450_v3  ;;  %6967 = vmatpush.msra.mxu0 %v6569_v28  ;;  %v6438_v3 = vunpack.c.h.bf16 %v10791_v57  ;;  %v10946_v28 = vld [vmem:[#allocation8 + $0x348] sm:$0xff]  ;;  %v6553_v57 = vunpack.c.l.bf16 %v10942_v43 }
 0xdaa   :  { %6989 = vmatpush.msra.mxu2 %v6625_v18  ;;  %7006 = vmatpush.msra.mxu1 %v6701_v15  ;;  %11544 = vst [vmem:[#allocation26_spill] sm:$0xff] %v10946_v28  ;;  %v6613_v18 = vunpack.c.l.bf16 %v10936_v30  ;;  %v6689_v15 = vunpack.c.l.bf16 %v10938_v9  ;;  %v10962_v30 = vld [vmem:[#allocation8 + $0x248] sm:$0xff] }
 0xdab   :  { %7026 = vmatpush.msra.mxu3 %v6446_v31  ;;  %6968 = vmatpush.msra.mxu0 %v6565_v13  ;;  %v6434_v31 = vunpack.c.h.bf16 %v10802_v26  ;;  %v10956_v13 = vld [vmem:[#allocation8 + $0x338] sm:$0xff]  ;;  %11546 = vst [vmem:[#allocation28_spill] sm:$0xff] %v10962_v30  ;;  %v6549_v26 = vunpack.c.l.bf16 %v10952_v23 }
 0xdac   :  { %6990 = vmatpush.msra.mxu2 %v6621_v53  ;;  %7007 = vmatpush.msra.mxu1 %v6697_v39  ;;  %11545 = vst [vmem:[#allocation27_spill] sm:$0xff] %v10956_v13  ;;  %v6609_v53 = vunpack.c.l.bf16 %v10946_v28  ;;  %v6685_v39 = vunpack.c.l.bf16 %v10948_v60  ;;  %v10972_v28 = vld [vmem:[#allocation8 + $0x238] sm:$0xff] }
 0xdad   :  { %7027 = vmatpush.msra.mxu3 %v6442_v7  ;;  %6969 = vmatpush.msra.mxu0 %v6561_v48  ;;  %v6430_v7 = vunpack.c.h.bf16 %v10810_v47  ;;  %v10966_v48 = vld [vmem:[#allocation8 + $0x328] sm:$0xff]  ;;  %11548 = vst [vmem:[#allocation30_spill] sm:$0xff] %v10972_v28  ;;  %v6545_v47 = vunpack.c.l.bf16 %v10962_v30  ;;  %v10988_v30 = vld [vmem:[#allocation8 + $0x438] sm:$0xff] }
 0xdae   :  { %6991 = vmatpush.msra.mxu2 %v6617_v32  ;;  %7008 = vmatpush.msra.mxu1 %v6693_v19  ;;  %11547 = vst [vmem:[#allocation29_spill] sm:$0xff] %v10966_v48  ;;  %v6605_v32 = vunpack.c.l.bf16 %v10956_v13  ;;  %v6681_v19 = vunpack.c.l.bf16 %v10958_v40  ;;  %v10982_v13 = vld [vmem:[#allocation8 + $0x228] sm:$0xff] }
 0xdaf   :  { %7028 = vmatpush.msra.mxu3 %v6438_v3  ;;  %6970 = vmatpush.msra.mxu0 %v6557_v16  ;;  %v6426_v3 = vunpack.c.h.bf16 %v10818_v46  ;;  %v10976_v16 = vld [vmem:[#allocation8 + $0x318] sm:$0xff]  ;;  %v6541_v46 = vunpack.c.l.bf16 %v10972_v28  ;;  %v6669_v28 = vunpack.c.l.bf16 %v10988_v30 }
 0xdb0   :  { %6992 = vmatpush.msra.mxu2 %v6613_v18  ;;  %7009 = vmatpush.msra.mxu1 %v6689_v15  ;;  %v6601_v18 = vunpack.c.l.bf16 %v10966_v48  ;;  %v6677_v15 = vunpack.c.l.bf16 %v10968_v2  ;;  %v6418_v48 = vunpack.c.h.bf16 %v10839_v54  ;;  %v6590_v54 = vunpack.c.h.bf16 %v10849_v5 }
 0xdb1   :  { %7029 = vmatpush.msra.mxu3 %v6434_v31  ;;  %6971 = vmatpush.msra.mxu0 %v6553_v57  ;;  %v6422_v31 = vunpack.c.h.bf16 %v10830_v45  ;;  %v10986_v57 = vld [vmem:[#allocation8 + $0x308] sm:$0xff] }
 0xdb2   :  { %6993 = vmatpush.msra.mxu2 %v6609_v53  ;;  %7010 = vmatpush.msra.mxu1 %v6685_v39  ;;  %11549 = vst [vmem:[#allocation31_spill] sm:$0xff] %v10986_v57  ;;  %v6597_v53 = vunpack.c.l.bf16 %v10976_v16  ;;  %v6673_v39 = vunpack.c.l.bf16 %v10978_v29  ;;  %v6593_v45 = vunpack.c.l.bf16 %v10986_v57  ;;  %v6410_v57 = vunpack.c.h.bf16 %v10866_v41 }
 0xdb3   :  { %7030 = vmatpush.msra.mxu3 %v6430_v7  ;;  %6972 = vmatpush.msra.mxu0 %v6549_v26  ;;  %v6537_v7 = vunpack.c.l.bf16 %v10982_v13  ;;  %v10994_v26 = vld [vmem:[#allocation8 + $0x218] sm:$0xff]  ;;  %v6526_v41 = vunpack.c.h.bf16 %v10711_v0  ;;  %v6706_v0 = vunpack.c.h.bf16 %v10897_v49  ;;  %v6570_v49 = vunpack.c.h.bf16 %v10901_v38 }
 0xdb4   :  { %6994 = vmatpush.msra.mxu2 %v6605_v32  ;;  %7011 = vmatpush.msra.mxu1 %v6681_v19  ;;  %v10998_v32 = vld [vmem:[#allocation8 + $0x428] sm:$0xff]  ;;  %v6414_v19 = vunpack.c.h.bf16 %v10851_v27  ;;  %v6586_v27 = vunpack.c.h.bf16 %v10862_v8  ;;  %v6506_v38 = vunpack.c.h.bf16 %v10759_v51  ;;  %v6686_v51 = vunpack.c.h.bf16 %v10948_v60 }
 0xdb5   :  { %7031 = vmatpush.msra.mxu3 %v6426_v3  ;;  %6973 = vmatpush.msra.mxu0 %v6545_v47  ;;  %v11001_v3 = vld [vmem:[#allocation8 + $0x208] sm:$0xff]  ;;  %v6533_v47 = vunpack.c.l.bf16 %v10994_v26 }
 0xdb6   :  { %6995 = vmatpush.msra.mxu2 %v6601_v18  ;;  %7012 = vmatpush.msra.mxu1 %v6677_v15  ;;  %v11005_v18 = vld [vmem:[#allocation8 + $0x418] sm:$0xff]  ;;  %v6665_v15 = vunpack.c.l.bf16 %v10998_v32 }
 0xdb7   :  { %7032 = vmatpush.msra.mxu3 %v6422_v31  ;;  %6974 = vmatpush.msra.mxu0 %v6541_v46  ;;  %v6529_v31 = vunpack.c.l.bf16 %v11001_v3  ;;  %v11011_v46 = vld [vmem:[#allocation8 + $0x408] sm:$0xff]  ;;  %v6661_v5 = vunpack.c.l.bf16 %v11005_v18 }
 0xdb8   :  { %6996 = vmatpush.msra.mxu2 %v6597_v53  ;;  %7013 = vmatpush.msra.mxu1 %v6673_v39  ;;  %v6582_v53 = vunpack.c.h.bf16 %v10870_v42  ;;  %v6657_v8 = vunpack.c.l.bf16 %v11011_v46  ;;  %v6522_v39 = vunpack.c.h.bf16 %v10715_v62  ;;  %v6654_v42 = vunpack.c.h.bf16 %v10826_v22 }
 0xdb9   :  { %7033 = vmatpush.msra.mxu3 %v6418_v48  ;;  %6975 = vmatpush.msra.mxu0 %v6537_v7  ;;  %v6406_v48 = vunpack.c.h.bf16 %v10875_v61  ;;  %v6578_v61 = vunpack.c.h.bf16 %v10880_v50  ;;  %v6650_v62 = vunpack.c.h.bf16 %v10835_v4  ;;  %v6702_v50 = vunpack.c.h.bf16 %v10906_v37  ;;  %v11551_v7 = vld [vmem:[#allocation17_spill] sm:$0xff] }
 0xdba   :  { %6997 = vmatpush.msra.mxu2 %v6593_v45  ;;  %7014 = vmatpush.msra.mxu1 %v6669_v28  ;;  %v6402_v28 = vunpack.c.h.bf16 %v10886_v52  ;;  %v6574_v52 = vunpack.c.h.bf16 %v10890_v33  ;;  %v6514_v22 = vunpack.c.h.bf16 %v10739_v17  ;;  %v6698_v33 = vunpack.c.h.bf16 %v10916_v20  ;;  %v11552_v45 = vld [vmem:[#allocation14_spill] sm:$0xff] }
 0xdbb   :  { %7034 = vmatpush.msra.mxu3 %v6414_v19  ;;  %6998 = vmatmul.f32.vlgmr.msra.gmra.mxu2 %v10726_v14  ;;  %v6510_v4 = vunpack.c.h.bf16 %v10748_v55  ;;  %v6642_v37 = vunpack.c.h.bf16 %v10859_v6  ;;  %v6694_v17 = vunpack.c.h.bf16 %v10927_v12  ;;  %v6638_v20 = vunpack.c.h.bf16 %v10872_v56 }
 0xdbc   :  { %7062 = vmatpush.msrb.mxu2 %v6590_v54  ;;  %6976 = vmatpush.msra.mxu0 %v6533_v47  ;;  %v6690_v55 = vunpack.c.h.bf16 %v10938_v9  ;;  %v6558_v6 = vunpack.c.h.bf16 %v10932_v11  ;;  %v6634_v12 = vunpack.c.h.bf16 %v10882_v21  ;;  %v6554_v56 = vunpack.c.h.bf16 %v10942_v43  ;;  %v11554_v54 = vld [vmem:[#allocation36_spill] sm:$0xff]  ;;  %v11555_v47 = vld [vmem:[#allocation35_spill] sm:$0xff] }
 0xdbd   :  { %7015 = vmatpush.msra.mxu1 %v6665_v15  ;;  %7035 = vmatpush.msra.mxu3 %v6410_v57  ;;  %v6518_v57 = vunpack.c.h.bf16 %v10724_v63  ;;  %v6646_v63 = vunpack.c.h.bf16 %v10845_v44  ;;  %v6562_v44 = vunpack.c.h.bf16 %v10920_v59  ;;  %v6498_v59 = vunpack.c.h.bf16 %v10778_v10  ;;  %v11556_v15 = vld [vmem:[#allocation30_spill] sm:$0xff] }
 0xdbe   :  { %7063 = vmatpush.msrb.mxu2 %v6586_v27  ;;  %6977 = vmatpush.msra.mxu0 %v6529_v31  ;;  %v6630_v9 = vunpack.c.h.bf16 %v10895_v58  ;;  %v6494_v11 = vunpack.c.h.bf16 %v10787_v35  ;;  %v6550_v21 = vunpack.c.h.bf16 %v10952_v23  ;;  %v6626_v60 = vunpack.c.h.bf16 %v11551_v7  ;;  %v11553_v58 = vld [vmem:[#allocation28_spill] sm:$0xff]  ;;  %v11557_v31 = vld [vmem:[#allocation19_spill] sm:$0xff] }
 0xdbf   :  { %7016 = vmatpush.msra.mxu1 %v6661_v5  ;;  %7036 = vmatpush.msra.mxu3 %v6406_v48  ;;  %v6678_v10 = vunpack.c.h.bf16 %v10968_v2  ;;  %v6490_v43 = vunpack.c.h.bf16 %v11552_v45  ;;  %v6546_v19 = vunpack.c.h.bf16 %v11553_v58  ;;  %v6674_v35 = vunpack.c.h.bf16 %v10978_v29  ;;  %v11558_v48 = vld [vmem:[#allocation23_spill] sm:$0xff] }
 0xdc0   :  { %6978 = vmatmul.f32.vlgmr.msra.gmra.mxu0 %v10750_v1  ;;  %7064 = vmatpush.msrb.mxu2 %v6582_v53  ;;  %v6486_v23 = vunpack.c.h.bf16 %v11555_v47  ;;  %v6542_v27 = vunpack.c.h.bf16 %v11556_v15  ;;  %v6618_v2 = vunpack.c.h.bf16 %v11557_v31  ;;  %v6670_v5 = vunpack.c.h.bf16 %v10988_v30 }
 0xdc1   :  { %7042 = vmatpush.msrb.mxu0 %v6526_v41  ;;  %7017 = vmatpush.msra.mxu1 %v6657_v8  ;;  %v6482_v53 = vunpack.c.h.bf16 %v11558_v48  ;;  %v6538_v41 = vunpack.c.h.bf16 %v10982_v13  ;;  %v11559_v8 = vld [vmem:[#allocation25_spill] sm:$0xff]  ;;  %v7135_v31 = vlaneseq }
 0xdc2   :  { %7037 = vmatpush.msra.mxu3 %v6402_v28  ;;  %7469 = vmatmul.msk.f32.vlgmr.msra.gmra.mxu1 %vm11550_vm7, %v10780_v24  ;;  %v6614_v29 = vunpack.c.h.bf16 %v11559_v8  ;;  %v6666_v28 = vunpack.c.h.bf16 %v10998_v32 }
 0xdc3   :  { %7038 = vmatmul.f32.vlgmr.msra.gmra.mxu3 %v10717_v36  ;;  %7043 = vmatpush.msrb.mxu0 %v6522_v39  ;;  %v6566_v36 = vunpack.c.h.bf16 %v10910_v34  ;;  %v6502_v34 = vunpack.c.h.bf16 %v10768_v25  ;;  %v6682_v25 = vunpack.c.h.bf16 %v10958_v40  ;;  %v6622_v40 = vunpack.c.h.bf16 %v11554_v54  ;;  %v11560_v39 = vld [vmem:[#allocation39_spill] sm:$0xff] }
 0xdc4   :  { %7065 = vmatpush.msrb.mxu2 %v6578_v61  ;;  %7082 = vmatpush.msrb.mxu1 %v6654_v42  ;;  %v6478_v61 = vunpack.c.h.bf16 %v11560_v39  ;;  %v6534_v42 = vunpack.c.h.bf16 %v10994_v26  ;;  %v11564_v26 = vld [vmem:[#allocation18_spill] sm:$0xff]  ;;  %vm7137_vm10 = vcmp.lt.s32.totalorder %v7135_v31, 512 }
 0xdc5   :  { %7470 = vmatpush.msk.msrb.mxu3 %vm1843_vm9, %v6706_v0  ;;  %7044 = vmatpush.msrb.mxu0 %v6518_v57  ;;  %v11561_v0 = vld [vmem:[#allocation26_spill] sm:$0xff]  ;;  %v6662_v57 = vunpack.c.h.bf16 %v11005_v18 }
 0xdc6   :  { %7066 = vmatpush.msrb.mxu2 %v6574_v52  ;;  %7083 = vmatpush.msrb.mxu1 %v6650_v62  ;;  %v6610_v30 = vunpack.c.h.bf16 %v11561_v0  ;;  %v11562_v52 = vld [vmem:[#allocation15_spill] sm:$0xff]  ;;  %v6530_v62 = vunpack.c.h.bf16 %v11001_v3  ;;  %v6598_v3 = vunpack.c.h.bf16 %v10976_v16 }
 0xdc7   :  { %7106 = vmatpush.msrb.mxu3 %v6702_v50  ;;  %7045 = vmatpush.msrb.mxu0 %v6514_v22  ;;  %v6474_v13 = vunpack.c.h.bf16 %v11562_v52  ;;  %v11563_v50 = vld [vmem:[#allocation27_spill] sm:$0xff]  ;;  %v6658_v22 = vunpack.c.h.bf16 %v11011_v46 }
 0xdc8   :  { %7067 = vmatpush.msrb.mxu2 %v6570_v49  ;;  %7084 = vmatpush.msrb.mxu1 %v6646_v63  ;;  %v6606_v32 = vunpack.c.h.bf16 %v11563_v50  ;;  %v6470_v49 = vunpack.c.h.bf16 %v11564_v26  ;;  %v11565_v63 = vld [vmem:[#allocation29_spill] sm:$0xff]  ;;  %v11568_v46 = vld [vmem:[#allocation31_spill] sm:$0xff] }
 0xdc9   :  { %7107 = vmatpush.msrb.mxu3 %v6698_v33  ;;  %7046 = vmatpush.msrb.mxu0 %v6510_v4  ;;  %v6602_v18 = vunpack.c.h.bf16 %v11565_v63  ;;  %v11566_v33 = vld [vmem:[#allocation38_spill] sm:$0xff] }
 0xdca   :  { %7068 = vmatpush.msrb.mxu2 %v6566_v36  ;;  %7085 = vmatpush.msrb.mxu1 %v6642_v37  ;;  %v6466_v4 = vunpack.c.h.bf16 %v11566_v33  ;;  %v6594_v36 = vunpack.c.h.bf16 %v11568_v46  ;;  %v11569_v37 = vld [vmem:[#allocation24_spill] sm:$0xff] }
 0xdcb   :  { %7108 = vmatpush.msrb.mxu3 %v6694_v17  ;;  %7047 = vmatpush.msrb.mxu0 %v6506_v38 }
 0xdcc   :  { %7069 = vmatpush.msrb.mxu2 %v6562_v44  ;;  %7086 = vmatpush.msrb.mxu1 %v6638_v20 }
 0xdcd   :  { %7109 = vmatpush.msrb.mxu3 %v6690_v55  ;;  %7048 = vmatpush.msrb.mxu0 %v6502_v34 }
 0xdce   :  { %7070 = vmatpush.msrb.mxu2 %v6558_v6  ;;  %7087 = vmatpush.msrb.mxu1 %v6634_v12 }
 0xdcf   :  { %7110 = vmatpush.msrb.mxu3 %v6686_v51  ;;  %7049 = vmatpush.msrb.mxu0 %v6498_v59 }
 0xdd0   :  { %7071 = vmatpush.msrb.mxu2 %v6554_v56  ;;  %7088 = vmatpush.msrb.mxu1 %v6630_v9 }
 0xdd1   :  { %7111 = vmatpush.msrb.mxu3 %v6682_v25  ;;  %7050 = vmatpush.msrb.mxu0 %v6494_v11 }
 0xdd2   :  { %7072 = vmatpush.msrb.mxu2 %v6550_v21  ;;  %7089 = vmatpush.msrb.mxu1 %v6626_v60 }
 0xdd3   :  { %7112 = vmatpush.msrb.mxu3 %v6678_v10  ;;  %7051 = vmatpush.msrb.mxu0 %v6490_v43 }
 0xdd4   :  { %7073 = vmatpush.msrb.mxu2 %v6546_v19  ;;  %7090 = vmatpush.msrb.mxu1 %v6622_v40 }
 0xdd5   :  { %7113 = vmatpush.msrb.mxu3 %v6674_v35  ;;  %7052 = vmatpush.msrb.mxu0 %v6486_v23 }
 0xdd6   :  { %7074 = vmatpush.msrb.mxu2 %v6542_v27  ;;  %7091 = vmatpush.msrb.mxu1 %v6618_v2 }
 0xdd7   :  { %7114 = vmatpush.msrb.mxu3 %v6670_v5  ;;  %7053 = vmatpush.msrb.mxu0 %v6482_v53 }
 0xdd8   :  { %7075 = vmatpush.msrb.mxu2 %v6538_v41  ;;  %7092 = vmatpush.msrb.mxu1 %v6614_v29 }
 0xdd9   :  { %7115 = vmatpush.msrb.mxu3 %v6666_v28  ;;  %7054 = vmatpush.msrb.mxu0 %v6478_v61 }
 0xdda   :  { %7076 = vmatpush.msrb.mxu2 %v6534_v42  ;;  %7093 = vmatpush.msrb.mxu1 %v6610_v30 }
 0xddb   :  { %7116 = vmatpush.msrb.mxu3 %v6662_v57  ;;  %7055 = vmatpush.msrb.mxu0 %v6474_v13 }
 0xddc   :  { %7077 = vmatpush.msrb.mxu2 %v6530_v62  ;;  %7094 = vmatpush.msrb.mxu1 %v6606_v32 }
 0xddd   :  { %7117 = vmatpush.msrb.mxu3 %v6658_v22  ;;  %7078 = vmatmul.f32.vlgmr.msrb.gmra.mxu2 %v10750_v1 }
 0xdde   :  { %7471 = vmatmul.msk.f32.vlgmr.msrb.gmra.mxu3 %vm11567_vm8, %v10780_v24  ;;  %7056 = vmatpush.msrb.mxu0 %v6470_v49 }
 0xddf   :  { %7095 = vmatpush.msrb.mxu1 %v6602_v18 }
 0xde0   :  { %7057 = vmatpush.msrb.mxu0 %v6466_v4 }
 0xde1   :  { %7096 = vmatpush.msrb.mxu1 %v6598_v3  ;;  %7058 = vmatmul.f32.vlgmr.msrb.gmra.mxu0 %v11569_v37 }
 0xde3   :  { %7097 = vmatpush.msrb.mxu1 %v6594_v36 }
 0xde4   :  { %7098 = vmatmul.f32.vlgmr.msrb.gmra.mxu1 %v10726_v14 }
 0xdf8   :  { %v6739_v17 = vpop.f32.mrf.mxu0 }
 0xdff   :  { %v6759_v38 = vpop.f32.mrf.mxu2 }
 0xe00   :  { %v6779_v44 = vpop.f32.mrf.mxu1  ;;  %v6799_v1 = vpop.f32.mrf.mxu3  ;;  %v6760_v60 = vadd.f32 %v6759_v38, %v6739_v17 }
 0xe02   :  { %v6780_v54 = vadd.f32 %v6779_v44, %v6760_v60 }
 0xe04   :  { %v6800_v2 = vadd.f32 %v6799_v1, %v6780_v54 }
 0xe08   :  { %v6839_v16 = vpop.f32.mrf.mxu2 }
 0xe09   :  { %v6819_v20 = vpop.f32.mrf.mxu0  ;;  %v6879_v34 = vpop.f32.mrf.mxu3 }
 0xe0a   :  { %v6859_v55 = vpop.f32.mrf.mxu1  ;;  %v6820_v53 = vadd.f32 %v6819_v20, %v6800_v2 }
 0xe0b   :  { %v6860_v56 = vadd.f32 %v6859_v55, %v6839_v16 }
 0xe0d   :  { %v6880_v21 = vadd.f32 %v6879_v34, %v6860_v56 }
 0xe1b   :  { %v6899_v24 = vpop.f32.mrf.mxu0 }
 0xe1c   :  { %v6919_v6 = vpop.f32.mrf.mxu2  ;;  %v6900_v10 = vadd.f32 %v6899_v24, %v6880_v21 }
 0xe1e   :  { %v6920_v40 = vadd.f32 %v6919_v6, %v6900_v10 }
 0xe20   :  { %v7126_v5 = vrot.slane %v6920_v40, 7 }
 0xe22   :  { %v7130_v29 = vsel %vm7129_vm3, %v6820_v53, %v7126_v5 }
 0xe24   :  { %v6939_v12 = vpop.f32.mrf.mxu1  ;;  %v6959_v51 = vpop.f32.mrf.mxu3 }
 0xe25   :  { %v6960_v25 = vadd.f32 %v6959_v51, %v6939_v12 }
 0xe3d   :  { %v6979_v59 = vpop.f32.mrf.mxu0 }
 0xe3e   :  { %v6999_v9 = vpop.f32.mrf.mxu2  ;;  %v6980_v7 = vadd.f32 %v6979_v59, %v6960_v25 }
 0xe3f   :  { %v7019_v11 = vpop.f32.mrf.mxu1 }
 0xe40   :  { %v7000_v43 = vadd.f32 %v6999_v9, %v6980_v7 }
 0xe42   :  { %v7020_v23 = vadd.f32 %v7019_v11, %v7000_v43 }
 0xe44   :  { %v7127_v41 = vrot.slane %v7020_v23, 6 }
 0xe46   :  { %v7039_v14 = vpop.f32.mrf.mxu3 }
 0xe5e   :  { %v7059_v45 = vpop.f32.mrf.mxu0 }
 0xe5f   :  { %v7060_v58 = vadd.f32 %v7059_v45, %v7039_v14 }
 0xe60   :  { %v7079_v19 = vpop.f32.mrf.mxu2 }
 0xe61   :  { %v7080_v35 = vadd.f32 %v7079_v19, %v7060_v58  ;;  %v7099_v47 = vpop.f32.mrf.mxu1  ;;  %v7119_v27 = vpop.f32.mrf.mxu3 }
 0xe63   :  { %v7100_v15 = vadd.f32 %v7099_v47, %v7080_v35 }
 0xe65   :  { %v7120_v48 = vadd.f32 %v7119_v27, %v7100_v15 }
 0xe67   :  { %v7128_v8 = vrot.slane %v7120_v48, 5 }
 0xe69   :  { %v7132_v28 = vsel %vm7131_vm5, %v7127_v41, %v7128_v8 }
 0xe6a   :  { %v7133_v39 = vsel %vm1843_vm9, %v7130_v29, %v7132_v28 }
 0xe6b   :  { %7139 = vst.msk [vmem:[%s11117_s26] sm:$0xf] %vm7137_vm10, %v7133_v39 }
 0xe6c   :  { %7144 = vsyncpa [#allocation4], 1 }
 0xe6d   :  { %7145 = vsyncpa [#allocation6], 1 }
 0xe6e   :  { %7146 = vsyncpa [#allocation9], 1 }

</bundles_post_ra>
